<compile_context>
chip_gen: v6e
topology: v6e:2x2x1
jax: 0.10.0
libtpu: 0.0.40
codegen_flags: <defaults>
</compile_context>

<pallas_src>
import functools
import numpy as np

import jax
import jax.numpy as jnp
from jax import lax
from jax.experimental import pallas as pl
from jax.experimental.pallas import tpu as pltpu
from jax.scipy.linalg import expm


# --------------------------------------------------------------------------
# Pallas kernels (all single-invocation, whole-array blocks)
# --------------------------------------------------------------------------
def _fused_matmul_kernel(z_ref, sym_ref, ztile_ref, a_ref, b_ref,
                         d_ref, w_ref, bias_ref,
                         diff_ref, tl_ref, prob_ref):
    # diff[b, n*D+d] = z[b,d] - (z @ expm(G_n))[b,d]   (lane-dense (B, NE*D))
    diff_ref[...] = ztile_ref[...] - jnp.dot(
        z_ref[...], sym_ref[...], preferred_element_type=jnp.float32)
    # top-left corner of the commutator basis product: (n_blocks*D, n_blocks*D)
    tl_ref[...] = jnp.dot(a_ref[...], b_ref[...],
                          preferred_element_type=jnp.float32)
    # linear head: prob = difference @ W.T + b
    prob_ref[...] = jnp.dot(d_ref[...], w_ref[...],
                            preferred_element_type=jnp.float32) + bias_ref[...]


def fused_matmuls(z, sym_stack, z_tiled, a_c, b_c, diff_in, w_t, b_row):
    batch = z.shape[0]
    ned = sym_stack.shape[1]
    rows, cols = a_c.shape[0], b_c.shape[1]
    half, out_dim = diff_in.shape[0], w_t.shape[1]
    return pl.pallas_call(
        _fused_matmul_kernel,
        out_shape=(jax.ShapeDtypeStruct((batch, ned), jnp.float32),
                   jax.ShapeDtypeStruct((rows, cols), jnp.float32),
                   jax.ShapeDtypeStruct((half, out_dim), jnp.float32)),
    )(z, sym_stack, z_tiled, a_c, b_c, diff_in, w_t, b_row)


def _indep_loss_kernel(dpar_ref, sel_ref, mask_ref, par_ref, orth_ref):
    # Fused gram + normalization + log + mean reductions; Gram matrices stay
    # in VMEM, only two scalars leave the kernel (written to SMEM).
    sec, sb, _ = dpar_ref.shape
    total = jnp.float32(0.0)
    for s in range(sec):                                   # static loop
        x = dpar_ref[s]                                    # (SB, D)
        nrm = jnp.sqrt(jnp.sum(x * x, axis=-1, keepdims=True))
        xn = x / nrm                                       # row-normalized
        cos = lax.dot_general(xn, xn, (((1,), (1,)), ((), ())),
                              preferred_element_type=jnp.float32)
        total = total + jnp.sum(-jnp.log(cos * cos + 1e-9))
    par_ref[0] = total / jnp.float32(sec * sb * sb)

    sel = sel_ref[...]                                     # (M, D)
    snrm = jnp.sqrt(jnp.sum(sel * sel, axis=-1, keepdims=True))
    sn = sel / snrm
    sg = lax.dot_general(sn, sn, (((1,), (1,)), ((), ())),
                         preferred_element_type=jnp.float32)
    m = sel_ref.shape[0]
    orth_ref[0] = jnp.sum((sg * sg) * mask_ref[...]) / jnp.float32(m * m)


def indep_losses(diff_par, selected, orth_mask):
    return pl.pallas_call(
        _indep_loss_kernel,
        out_shape=(jax.ShapeDtypeStruct((1,), jnp.float32),
                   jax.ShapeDtypeStruct((1,), jnp.float32)),
        out_specs=(pl.BlockSpec(memory_space=pltpu.MemorySpace.SMEM),
                   pl.BlockSpec(memory_space=pltpu.MemorySpace.SMEM)),
    )(diff_par, selected, orth_mask)


def _weighted_sum_kernel(w_ref, g_ref, sym_ref, sub_ref):
    # symmetries  = weight @ G_flat                  (one MXU pass, K = NE)
    # sub_flat[:, s*DD:(s+1)*DD] = weight_sector_s @ G_flat_sector_s
    w = w_ref[...]                                   # (half, NE)
    g = g_ref[...]                                   # (NE, DD)
    dd = g_ref.shape[1]
    ne = g_ref.shape[0]
    sec = sub_ref.shape[1] // dd
    sub_sec = ne // sec
    sym_ref[...] = jnp.dot(w, g, preferred_element_type=jnp.float32)
    for s in range(sec):                             # static loop
        sub_ref[:, s * dd:(s + 1) * dd] = jnp.dot(
            w[:, s * sub_sec:(s + 1) * sub_sec],
            g[s * sub_sec:(s + 1) * sub_sec, :],
            preferred_element_type=jnp.float32)


def weighted_sums(weight, g_flat, *, sec):
    half = weight.shape[0]
    dd = g_flat.shape[1]
    return pl.pallas_call(
        _weighted_sum_kernel,
        out_shape=(jax.ShapeDtypeStruct((half, dd), jnp.float32),
                   jax.ShapeDtypeStruct((half, sec * dd), jnp.float32)),
    )(weight, g_flat)


def _bmv_kernel(z_ref, a_ref, o_ref):
    # out[b] = z[b] @ A[b]; both actions handled in one call (batch = 2*half).
    z = z_ref[...]                                   # (2H, D)
    a = a_ref[...]                                   # (2H, D, D)
    o_ref[...] = jnp.sum(z[:, :, None] * a, axis=1)


def batched_vec_mat(z, a):
    batch, dim = z.shape
    return pl.pallas_call(
        _bmv_kernel,
        out_shape=jax.ShapeDtypeStruct((batch, dim), jnp.float32),
    )(z, a)


# --------------------------------------------------------------------------
# Forward pass (Pallas kernels + JAX glue)
# --------------------------------------------------------------------------
_expm_b = jax.vmap(expm)   # torch.matrix_exp equivalent (batched)


def group_elements_forward(params, mean, logvar, latent_z, key, *, th, sec, sub_sec):
    dim = sec
    num_elements = sec * sub_sec
    dd = dim * dim
    G = params["group_elements"]                     # (NE, D, D)
    W = params["linear_w"]                           # (out, 4D)
    b = params["linear_b"]                           # (out,)
    idx = params["orth_idx"]                         # (sec,) int32
    orth_mask = params["orth_mask"]                  # (sec*B, sec*B)
    commut_w = params["commut_w"]                    # (n_blocks, n_blocks)

    batch = latent_z.shape[0]
    half = batch // 2
    mean_1, mean_2 = mean[:half], mean[half:]
    std_1 = jnp.exp(0.5 * logvar[:half])
    std_2 = jnp.exp(0.5 * mean[half:])   # reproduces the original code (uses mean, not logvar)
    z1, z2 = latent_z[:half], latent_z[half:]

    # ------- big matmuls: one fused Pallas call -------
    syms_full = _expm_b(G)                                        # (NE, D, D)
    sym_stack = syms_full.transpose(1, 0, 2).reshape(dim, num_elements * dim)
    z_tiled = jnp.tile(latent_z, (1, num_elements))               # (B, NE*D)

    n_blocks = num_elements // dim
    a_c = G[:n_blocks].reshape(n_blocks * dim, dim)               # (n_blocks*D, D)
    b_c = G.reshape(dim, dim * num_elements)[:, :n_blocks * dim]  # (D, n_blocks*D)

    difference = jnp.concatenate([mean_1, std_1, mean_2, std_2], axis=-1)  # (half, 4D)

    diff_flat, tl, prob = fused_matmuls(latent_z, sym_stack, z_tiled,
                                        a_c, b_c, difference, W.T, b[None, :])

    diff = diff_flat.reshape(batch, num_elements, dim).transpose(1, 0, 2)  # (NE, B, D)

    # ------- sparse loss -------
    diff_sq = diff.reshape(-1, dim) ** 2
    sum_sq = diff_sq.sum(-1)
    target = diff_sq.max(-1)
    sparse_loss = jnp.mean((sum_sq - target) ** 2)

    # ------- parallel / orthogonal losses (fused gram kernel) -------
    diff_par = diff.reshape(sec, sub_sec * batch, dim)            # (sec, SB, D)
    diff4 = diff.reshape(sec, sub_sec, batch, dim)
    selected = diff4[jnp.arange(sec), idx].reshape(sec * batch, dim)
    # NOTE: matches the reference numerics including the 0/0 behaviour when a
    # difference row is exactly zero (never happens for generic inputs).
    par_out, orth_out = indep_losses(diff_par, selected, orth_mask)
    parallel_loss = par_out[0]
    orthogonal_loss = orth_out[0]

    # ------- commutative loss (closed form of the sequential block-swap loop) -------
    blk = tl.reshape(n_blocks, dim, n_blocks, dim).transpose(0, 2, 1, 3)
    S = jnp.sum((blk - jnp.swapaxes(blk, 0, 1)) ** 2, axis=(-1, -2))
    denom = float((num_elements * dim) * (dim * num_elements))
    commut_loss = jnp.sum(commut_w * 2.0 * S) / denom

    # ------- extract_group_action -------
    z_diff = z1 - z2
    sector_target = (jnp.abs(z_diff) > th).astype(jnp.int32).reshape(-1)

    sector_prob = prob[:, :2 * sec].reshape(-1, sec, 2).reshape(-1, 2)
    # The reference applies F.cross_entropy on top of an explicit softmax
    # (apparent double-softmax); reproduced faithfully.
    p_soft = jax.nn.softmax(sector_prob, axis=-1)
    ce = jax.nn.logsumexp(p_soft, axis=-1) - jnp.take_along_axis(
        p_soft, sector_target[:, None], axis=-1)[:, 0]
    sector_loss = jnp.sum(ce) / half

    factor_logits = prob[:, 2 * sec:]
    gumbel = jax.random.gumbel(key, sector_prob.shape, dtype=jnp.float32)
    sector_attn = jax.nn.softmax((sector_prob + gumbel) / 1e-4, axis=-1)
    switch = jnp.zeros((sector_prob.shape[0],), dtype=jnp.float32)
    switch = jnp.where(sector_attn[:, 0] >= 0.5, sector_attn[:, 1], switch)
    switch = jnp.where(sector_attn[:, 1] > 0.5, sector_attn[:, 1], switch)
    switch = switch.reshape(half, sec)

    factor_prob = jax.nn.softmax(
        factor_logits.reshape(-1, sec, sub_sec), axis=-1).reshape(-1, num_elements)
    sector_weight = jnp.repeat(switch, sub_sec, axis=-1)           # (half, NE)
    weight = sector_weight * factor_prob                           # (half, NE)

    g_flat = G.reshape(num_elements, dd)
    sym_flat, sub_flat = weighted_sums(weight, g_flat, sec=sec)    # [Pallas]
    sub_symmetries = sub_flat.reshape(half, sec, dim, dim)
    symmetries = sym_flat.reshape(half, dim, dim)

    group_action = _expm_b(symmetries)
    inverse_action = _expm_b(-symmetries)
    attn = jnp.concatenate([switch, factor_prob], axis=-1)

    actions = jnp.concatenate([group_action, inverse_action], axis=0)   # (2*half, D, D)
    t_cat = batched_vec_mat(latent_z, actions)                          # [Pallas]
    t_z1, t_z2 = t_cat[:half], t_cat[half:]
    equivariant = jnp.mean((t_z2 - z1) ** 2) + jnp.mean((t_z1 - z2) ** 2)

    return (t_z1, t_z2, group_action, equivariant, attn,
            orthogonal_loss, parallel_loss, commut_loss, sparse_loss,
            sector_loss, sub_symmetries)


def make_commut_weights(n):
    # weight of pair (i, j) = number of loop iterations its swap contributes to
    Wm = np.zeros((n, n), dtype=np.float32)
    total = n * (n - 1) // 2
    k = 0
    for i in range(n):
        for j in range(i + 1, n):
            Wm[i, j] = total - k
            k += 1
    return Wm


# --------------------------------------------------------------------------
if __name__ == "__main__":
    latent_dim = 8            # config.latent_dim
    sec = latent_dim
    sub_sec = 16
    num_elements = latent_dim * sub_sec
    th = 0.1                  # config.th
    batch = 8

    key = jax.random.PRNGKey(0)
    k_g, k_w, k_mean, k_logvar, k_z, k_gumbel = jax.random.split(key, 6)

    # deterministic xavier-uniform-like init of the parameters
    bound_g = float(np.sqrt(6.0 / (latent_dim * latent_dim + num_elements * latent_dim)))
    group_elements = jax.random.uniform(
        k_g, (num_elements, latent_dim, latent_dim),
        minval=-bound_g, maxval=bound_g, dtype=jnp.float32)

    in_f, out_f = 4 * latent_dim, (sub_sec + 2) * sec
    bound_w = float(np.sqrt(6.0 / (in_f + out_f)))
    linear_w = jax.random.uniform(k_w, (out_f, in_f),
                                  minval=-bound_w, maxval=bound_w, dtype=jnp.float32)
    linear_b = jnp.zeros((out_f,), dtype=jnp.float32)

    # deterministic replacement for np.random.choice inside indepdent_loss
    rng = np.random.RandomState(0)
    orth_idx = jnp.asarray(rng.choice(sec, sec, replace=True), dtype=jnp.int32)
    orth_mask = jnp.asarray(
        1.0 - np.kron(np.eye(sec), np.ones((batch, batch))), dtype=jnp.float32)
    commut_w = jnp.asarray(make_commut_weights(num_elements // latent_dim),
                           dtype=jnp.float32)

    params = dict(group_elements=group_elements, linear_w=linear_w, linear_b=linear_b,
                  orth_idx=orth_idx, orth_mask=orth_mask, commut_w=commut_w)

    mean = jax.random.normal(k_mean, (batch, latent_dim), dtype=jnp.float32)
    logvar = 0.1 * jax.random.normal(k_logvar, (batch, latent_dim), dtype=jnp.float32)
    latent_z = jax.random.normal(k_z, (batch, latent_dim), dtype=jnp.float32)

    fwd = jax.jit(functools.partial(group_elements_forward,
                                    th=th, sec=sec, sub_sec=sub_sec))
    out = fwd(params, mean, logvar, latent_z, k_gumbel)
    jax.block_until_ready(out)
    print("KERNEL_OK")
</pallas_src>

<mosaic_0001>
module attributes {stable_mosaic.version = 11 : i64} {
  func.func @_fused_matmul_kernel(%arg0: memref<8x8xf32, #tpu.memory_space<vmem>>, %arg1: memref<8x1024xf32, #tpu.memory_space<vmem>>, %arg2: memref<8x1024xf32, #tpu.memory_space<vmem>>, %arg3: memref<128x8xf32, #tpu.memory_space<vmem>>, %arg4: memref<8x128xf32, #tpu.memory_space<vmem>>, %arg5: memref<4x32xf32, #tpu.memory_space<vmem>>, %arg6: memref<32x144xf32, #tpu.memory_space<vmem>>, %arg7: memref<1x144xf32, #tpu.memory_space<vmem>>, %arg8: memref<8x1024xf32, #tpu.memory_space<vmem>>, %arg9: memref<128x128xf32, #tpu.memory_space<vmem>>, %arg10: memref<4x144xf32, #tpu.memory_space<vmem>>) attributes {dimension_semantics = [], scalar_prefetch = 0 : i64, scratch_operands = 0 : i64, tpu.core_type = #tpu.core_type<tc>} {
    %c0 = arith.constant 0 : index
    %c0_0 = arith.constant 0 : index
    %0 = vector.load %arg2[%c0, %c0_0] : memref<8x1024xf32, #tpu.memory_space<vmem>>, vector<8x1024xf32>
    %c0_1 = arith.constant 0 : index
    %c0_2 = arith.constant 0 : index
    %1 = vector.load %arg0[%c0_1, %c0_2] : memref<8x8xf32, #tpu.memory_space<vmem>>, vector<8x8xf32>
    %c0_3 = arith.constant 0 : index
    %c0_4 = arith.constant 0 : index
    %2 = vector.load %arg1[%c0_3, %c0_4] : memref<8x1024xf32, #tpu.memory_space<vmem>>, vector<8x1024xf32>
    %cst = arith.constant dense<0.000000e+00> : vector<8x1024xf32>
    %3 = tpu.matmul %1, %2, %cst {dimension_numbers = #tpu.dot_dimension_numbers<[1], [0], [0], [1], [0, 0, 1, 1], [], []>} : vector<8x8xf32>, vector<8x1024xf32>, vector<8x1024xf32> -> vector<8x1024xf32>
    %4 = arith.subf %0, %3 : vector<8x1024xf32>
    %c0_5 = arith.constant 0 : index
    %c0_6 = arith.constant 0 : index
    %5 = vector.load %arg8[%c0_5, %c0_6] : memref<8x1024xf32, #tpu.memory_space<vmem>>, vector<8x1024xf32>
    tpu.vector_store %arg8[%c0_5, %c0_6], %4 {strides = array<i32>} : memref<8x1024xf32, #tpu.memory_space<vmem>>, vector<8x1024xf32>,
    %c0_7 = arith.constant 0 : index
    %c0_8 = arith.constant 0 : index
    %6 = vector.load %arg3[%c0_7, %c0_8] : memref<128x8xf32, #tpu.memory_space<vmem>>, vector<128x8xf32>
    %c0_9 = arith.constant 0 : index
    %c0_10 = arith.constant 0 : index
    %7 = vector.load %arg4[%c0_9, %c0_10] : memref<8x128xf32, #tpu.memory_space<vmem>>, vector<8x128xf32>
    %cst_11 = arith.constant dense<0.000000e+00> : vector<128x128xf32>
    %8 = tpu.matmul %6, %7, %cst_11 {dimension_numbers = #tpu.dot_dimension_numbers<[1], [0], [0], [1], [0, 0, 1, 1], [], []>} : vector<128x8xf32>, vector<8x128xf32>, vector<128x128xf32> -> vector<128x128xf32>
    %c0_12 = arith.constant 0 : index
    %c0_13 = arith.constant 0 : index
    %9 = vector.load %arg9[%c0_12, %c0_13] : memref<128x128xf32, #tpu.memory_space<vmem>>, vector<128x128xf32>
    tpu.vector_store %arg9[%c0_12, %c0_13], %8 {strides = array<i32>} : memref<128x128xf32, #tpu.memory_space<vmem>>, vector<128x128xf32>,
    %c0_14 = arith.constant 0 : index
    %c0_15 = arith.constant 0 : index
    %10 = vector.load %arg5[%c0_14, %c0_15] : memref<4x32xf32, #tpu.memory_space<vmem>>, vector<4x32xf32>
    %c0_16 = arith.constant 0 : index
    %c0_17 = arith.constant 0 : index
    %11 = vector.load %arg6[%c0_16, %c0_17] : memref<32x144xf32, #tpu.memory_space<vmem>>, vector<32x144xf32>
    %cst_18 = arith.constant dense<0.000000e+00> : vector<4x144xf32>
    %12 = tpu.matmul %10, %11, %cst_18 {dimension_numbers = #tpu.dot_dimension_numbers<[1], [0], [0], [1], [0, 0, 1, 1], [], []>} : vector<4x32xf32>, vector<32x144xf32>, vector<4x144xf32> -> vector<4x144xf32>
    %c0_19 = arith.constant 0 : index
    %c0_20 = arith.constant 0 : index
    %13 = vector.load %arg7[%c0_19, %c0_20] : memref<1x144xf32, #tpu.memory_space<vmem>>, vector<1x144xf32>
    %14 = vector.broadcast %13 : vector<1x144xf32> to vector<4x144xf32>
    %15 = arith.addf %12, %14 : vector<4x144xf32>
    %c0_21 = arith.constant 0 : index
    %c0_22 = arith.constant 0 : index
    %16 = vector.load %arg10[%c0_21, %c0_22] : memref<4x144xf32, #tpu.memory_space<vmem>>, vector<4x144xf32>
    tpu.vector_store %arg10[%c0_21, %c0_22], %15 {strides = array<i32>} : memref<4x144xf32, #tpu.memory_space<vmem>>, vector<4x144xf32>,
    return
  }
}

module attributes {stable_mosaic.version = 11 : i64} {
  func.func @_indep_loss_kernel(%arg0: memref<8x128x8xf32, #tpu.memory_space<vmem>>, %arg1: memref<64x8xf32, #tpu.memory_space<vmem>>, %arg2: memref<64x64xf32, #tpu.memory_space<vmem>>, %arg3: memref<1xf32, #tpu.memory_space<smem>>, %arg4: memref<1xf32, #tpu.memory_space<smem>>) attributes {dimension_semantics = [], scalar_prefetch = 0 : i64, scratch_operands = 0 : i64, tpu.core_type = #tpu.core_type<tc>} {
    %c0 = arith.constant 0 : index
    %c0_0 = arith.constant 0 : index
    %c0_1 = arith.constant 0 : index
    %0 = vector.load %arg0[%c0, %c0_0, %c0_1] : memref<8x128x8xf32, #tpu.memory_space<vmem>>, vector<1x128x8xf32>
    %1 = vector.shape_cast %0 : vector<1x128x8xf32> to vector<128x8xf32>
    %2 = arith.mulf %1, %1 : vector<128x8xf32>
    %cst = arith.constant dense<0.000000e+00> : vector<128xf32>
    %3 = vector.multi_reduction <add>, %2, %cst [1] : vector<128x8xf32> to vector<128xf32>
    %4 = vector.shape_cast %3 : vector<128xf32> to vector<128x1xf32>
    %5 = math.sqrt %4 : vector<128x1xf32>
    %6 = vector.broadcast %5 : vector<128x1xf32> to vector<128x8xf32>
    %7 = arith.divf %1, %6 : vector<128x8xf32>
    %cst_2 = arith.constant dense<0.000000e+00> : vector<128x128xf32>
    %8 = tpu.matmul %7, %7, %cst_2 {dimension_numbers = #tpu.dot_dimension_numbers<[1], [1], [0], [0], [0, 0, 1, 0], [], []>} : vector<128x8xf32>, vector<128x8xf32>, vector<128x128xf32> -> vector<128x128xf32>
    %9 = arith.mulf %8, %8 : vector<128x128xf32>
    %cst_3 = arith.constant 9.99999971E-10 : f32
    %10 = vector.broadcast %cst_3 : f32 to vector<128x128xf32>
    %11 = arith.addf %9, %10 : vector<128x128xf32>
    %12 = math.log %11 : vector<128x128xf32>
    %cst_4 = arith.constant 0.000000e+00 : f32
    %13 = vector.broadcast %cst_4 : f32 to vector<128x128xf32>
    %14 = arith.subf %13, %12 : vector<128x128xf32>
    %15 = vector.shape_cast %14 : vector<128x128xf32> to vector<1x128x128xf32>
    %cst_5 = arith.constant dense<0.000000e+00> : vector<1xf32>
    %16 = vector.multi_reduction <add>, %15, %cst_5 [1, 2] : vector<1x128x128xf32> to vector<1xf32>
    %17 = vector.shape_cast %16 : vector<1xf32> to vector<1x1x1xf32>
    %18 = vector.extract %17[0, 0, 0] : f32 from vector<1x1x1xf32>
    %cst_6 = arith.constant 0.000000e+00 : f32
    %19 = arith.addf %cst_6, %18 : f32
    %c1 = arith.constant 1 : index
    %c0_7 = arith.constant 0 : index
    %c0_8 = arith.constant 0 : index
    %20 = vector.load %arg0[%c1, %c0_7, %c0_8] : memref<8x128x8xf32, #tpu.memory_space<vmem>>, vector<1x128x8xf32>
    %21 = vector.shape_cast %20 : vector<1x128x8xf32> to vector<128x8xf32>
    %22 = arith.mulf %21, %21 : vector<128x8xf32>
    %cst_9 = arith.constant dense<0.000000e+00> : vector<128xf32>
    %23 = vector.multi_reduction <add>, %22, %cst_9 [1] : vector<128x8xf32> to vector<128xf32>
    %24 = vector.shape_cast %23 : vector<128xf32> to vector<128x1xf32>
    %25 = math.sqrt %24 : vector<128x1xf32>
    %26 = vector.broadcast %25 : vector<128x1xf32> to vector<128x8xf32>
    %27 = arith.divf %21, %26 : vector<128x8xf32>
    %cst_10 = arith.constant dense<0.000000e+00> : vector<128x128xf32>
    %28 = tpu.matmul %27, %27, %cst_10 {dimension_numbers = #tpu.dot_dimension_numbers<[1], [1], [0], [0], [0, 0, 1, 0], [], []>} : vector<128x8xf32>, vector<128x8xf32>, vector<128x128xf32> -> vector<128x128xf32>
    %29 = arith.mulf %28, %28 : vector<128x128xf32>
    %cst_11 = arith.constant 9.99999971E-10 : f32
    %30 = vector.broadcast %cst_11 : f32 to vector<128x128xf32>
    %31 = arith.addf %29, %30 : vector<128x128xf32>
    %32 = math.log %31 : vector<128x128xf32>
    %cst_12 = arith.constant 0.000000e+00 : f32
    %33 = vector.broadcast %cst_12 : f32 to vector<128x128xf32>
    %34 = arith.subf %33, %32 : vector<128x128xf32>
    %35 = vector.shape_cast %34 : vector<128x128xf32> to vector<1x128x128xf32>
    %cst_13 = arith.constant dense<0.000000e+00> : vector<1xf32>
    %36 = vector.multi_reduction <add>, %35, %cst_13 [1, 2] : vector<1x128x128xf32> to vector<1xf32>
    %37 = vector.shape_cast %36 : vector<1xf32> to vector<1x1x1xf32>
    %38 = vector.extract %37[0, 0, 0] : f32 from vector<1x1x1xf32>
    %39 = arith.addf %19, %38 : f32
    %c2 = arith.constant 2 : index
    %c0_14 = arith.constant 0 : index
    %c0_15 = arith.constant 0 : index
    %40 = vector.load %arg0[%c2, %c0_14, %c0_15] : memref<8x128x8xf32, #tpu.memory_space<vmem>>, vector<1x128x8xf32>
    %41 = vector.shape_cast %40 : vector<1x128x8xf32> to vector<128x8xf32>
    %42 = arith.mulf %41, %41 : vector<128x8xf32>
    %cst_16 = arith.constant dense<0.000000e+00> : vector<128xf32>
    %43 = vector.multi_reduction <add>, %42, %cst_16 [1] : vector<128x8xf32> to vector<128xf32>
    %44 = vector.shape_cast %43 : vector<128xf32> to vector<128x1xf32>
    %45 = math.sqrt %44 : vector<128x1xf32>
    %46 = vector.broadcast %45 : vector<128x1xf32> to vector<128x8xf32>
    %47 = arith.divf %41, %46 : vector<128x8xf32>
    %cst_17 = arith.constant dense<0.000000e+00> : vector<128x128xf32>
    %48 = tpu.matmul %47, %47, %cst_17 {dimension_numbers = #tpu.dot_dimension_numbers<[1], [1], [0], [0], [0, 0, 1, 0], [], []>} : vector<128x8xf32>, vector<128x8xf32>, vector<128x128xf32> -> vector<128x128xf32>
    %49 = arith.mulf %48, %48 : vector<128x128xf32>
    %cst_18 = arith.constant 9.99999971E-10 : f32
    %50 = vector.broadcast %cst_18 : f32 to vector<128x128xf32>
    %51 = arith.addf %49, %50 : vector<128x128xf32>
    %52 = math.log %51 : vector<128x128xf32>
    %cst_19 = arith.constant 0.000000e+00 : f32
    %53 = vector.broadcast %cst_19 : f32 to vector<128x128xf32>
    %54 = arith.subf %53, %52 : vector<128x128xf32>
    %55 = vector.shape_cast %54 : vector<128x128xf32> to vector<1x128x128xf32>
    %cst_20 = arith.constant dense<0.000000e+00> : vector<1xf32>
    %56 = vector.multi_reduction <add>, %55, %cst_20 [1, 2] : vector<1x128x128xf32> to vector<1xf32>
    %57 = vector.shape_cast %56 : vector<1xf32> to vector<1x1x1xf32>
    %58 = vector.extract %57[0, 0, 0] : f32 from vector<1x1x1xf32>
    %59 = arith.addf %39, %58 : f32
    %c3 = arith.constant 3 : index
    %c0_21 = arith.constant 0 : index
    %c0_22 = arith.constant 0 : index
    %60 = vector.load %arg0[%c3, %c0_21, %c0_22] : memref<8x128x8xf32, #tpu.memory_space<vmem>>, vector<1x128x8xf32>
    %61 = vector.shape_cast %60 : vector<1x128x8xf32> to vector<128x8xf32>
    %62 = arith.mulf %61, %61 : vector<128x8xf32>
    %cst_23 = arith.constant dense<0.000000e+00> : vector<128xf32>
    %63 = vector.multi_reduction <add>, %62, %cst_23 [1] : vector<128x8xf32> to vector<128xf32>
    %64 = vector.shape_cast %63 : vector<128xf32> to vector<128x1xf32>
    %65 = math.sqrt %64 : vector<128x1xf32>
    %66 = vector.broadcast %65 : vector<128x1xf32> to vector<128x8xf32>
    %67 = arith.divf %61, %66 : vector<128x8xf32>
    %cst_24 = arith.constant dense<0.000000e+00> : vector<128x128xf32>
    %68 = tpu.matmul %67, %67, %cst_24 {dimension_numbers = #tpu.dot_dimension_numbers<[1], [1], [0], [0], [0, 0, 1, 0], [], []>} : vector<128x8xf32>, vector<128x8xf32>, vector<128x128xf32> -> vector<128x128xf32>
    %69 = arith.mulf %68, %68 : vector<128x128xf32>
    %cst_25 = arith.constant 9.99999971E-10 : f32
    %70 = vector.broadcast %cst_25 : f32 to vector<128x128xf32>
    %71 = arith.addf %69, %70 : vector<128x128xf32>
    %72 = math.log %71 : vector<128x128xf32>
    %cst_26 = arith.constant 0.000000e+00 : f32
    %73 = vector.broadcast %cst_26 : f32 to vector<128x128xf32>
    %74 = arith.subf %73, %72 : vector<128x128xf32>
    %75 = vector.shape_cast %74 : vector<128x128xf32> to vector<1x128x128xf32>
    %cst_27 = arith.constant dense<0.000000e+00> : vector<1xf32>
    %76 = vector.multi_reduction <add>, %75, %cst_27 [1, 2] : vector<1x128x128xf32> to vector<1xf32>
    %77 = vector.shape_cast %76 : vector<1xf32> to vector<1x1x1xf32>
    %78 = vector.extract %77[0, 0, 0] : f32 from vector<1x1x1xf32>
    %79 = arith.addf %59, %78 : f32
    %c4 = arith.constant 4 : index
    %c0_28 = arith.constant 0 : index
    %c0_29 = arith.constant 0 : index
    %80 = vector.load %arg0[%c4, %c0_28, %c0_29] : memref<8x128x8xf32, #tpu.memory_space<vmem>>, vector<1x128x8xf32>
    %81 = vector.shape_cast %80 : vector<1x128x8xf32> to vector<128x8xf32>
    %82 = arith.mulf %81, %81 : vector<128x8xf32>
    %cst_30 = arith.constant dense<0.000000e+00> : vector<128xf32>
    %83 = vector.multi_reduction <add>, %82, %cst_30 [1] : vector<128x8xf32> to vector<128xf32>
    %84 = vector.shape_cast %83 : vector<128xf32> to vector<128x1xf32>
    %85 = math.sqrt %84 : vector<128x1xf32>
    %86 = vector.broadcast %85 : vector<128x1xf32> to vector<128x8xf32>
    %87 = arith.divf %81, %86 : vector<128x8xf32>
    %cst_31 = arith.constant dense<0.000000e+00> : vector<128x128xf32>
    %88 = tpu.matmul %87, %87, %cst_31 {dimension_numbers = #tpu.dot_dimension_numbers<[1], [1], [0], [0], [0, 0, 1, 0], [], []>} : vector<128x8xf32>, vector<128x8xf32>, vector<128x128xf32> -> vector<128x128xf32>
    %89 = arith.mulf %88, %88 : vector<128x128xf32>
    %cst_32 = arith.constant 9.99999971E-10 : f32
    %90 = vector.broadcast %cst_32 : f32 to vector<128x128xf32>
    %91 = arith.addf %89, %90 : vector<128x128xf32>
    %92 = math.log %91 : vector<128x128xf32>
    %cst_33 = arith.constant 0.000000e+00 : f32
    %93 = vector.broadcast %cst_33 : f32 to vector<128x128xf32>
    %94 = arith.subf %93, %92 : vector<128x128xf32>
    %95 = vector.shape_cast %94 : vector<128x128xf32> to vector<1x128x128xf32>
    %cst_34 = arith.constant dense<0.000000e+00> : vector<1xf32>
    %96 = vector.multi_reduction <add>, %95, %cst_34 [1, 2] : vector<1x128x128xf32> to vector<1xf32>
    %97 = vector.shape_cast %96 : vector<1xf32> to vector<1x1x1xf32>
    %98 = vector.extract %97[0, 0, 0] : f32 from vector<1x1x1xf32>
    %99 = arith.addf %79, %98 : f32
    %c5 = arith.constant 5 : index
    %c0_35 = arith.constant 0 : index
    %c0_36 = arith.constant 0 : index
    %100 = vector.load %arg0[%c5, %c0_35, %c0_36] : memref<8x128x8xf32, #tpu.memory_space<vmem>>, vector<1x128x8xf32>
    %101 = vector.shape_cast %100 : vector<1x128x8xf32> to vector<128x8xf32>
    %102 = arith.mulf %101, %101 : vector<128x8xf32>
    %cst_37 = arith.constant dense<0.000000e+00> : vector<128xf32>
    %103 = vector.multi_reduction <add>, %102, %cst_37 [1] : vector<128x8xf32> to vector<128xf32>
    %104 = vector.shape_cast %103 : vector<128xf32> to vector<128x1xf32>
    %105 = math.sqrt %104 : vector<128x1xf32>
    %106 = vector.broadcast %105 : vector<128x1xf32> to vector<128x8xf32>
    %107 = arith.divf %101, %106 : vector<128x8xf32>
    %cst_38 = arith.constant dense<0.000000e+00> : vector<128x128xf32>
    %108 = tpu.matmul %107, %107, %cst_38 {dimension_numbers = #tpu.dot_dimension_numbers<[1], [1], [0], [0], [0, 0, 1, 0], [], []>} : vector<128x8xf32>, vector<128x8xf32>, vector<128x128xf32> -> vector<128x128xf32>
    %109 = arith.mulf %108, %108 : vector<128x128xf32>
    %cst_39 = arith.constant 9.99999971E-10 : f32
    %110 = vector.broadcast %cst_39 : f32 to vector<128x128xf32>
    %111 = arith.addf %109, %110 : vector<128x128xf32>
    %112 = math.log %111 : vector<128x128xf32>
    %cst_40 = arith.constant 0.000000e+00 : f32
    %113 = vector.broadcast %cst_40 : f32 to vector<128x128xf32>
    %114 = arith.subf %113, %112 : vector<128x128xf32>
    %115 = vector.shape_cast %114 : vector<128x128xf32> to vector<1x128x128xf32>
    %cst_41 = arith.constant dense<0.000000e+00> : vector<1xf32>
    %116 = vector.multi_reduction <add>, %115, %cst_41 [1, 2] : vector<1x128x128xf32> to vector<1xf32>
    %117 = vector.shape_cast %116 : vector<1xf32> to vector<1x1x1xf32>
    %118 = vector.extract %117[0, 0, 0] : f32 from vector<1x1x1xf32>
    %119 = arith.addf %99, %118 : f32
    %c6 = arith.constant 6 : index
    %c0_42 = arith.constant 0 : index
    %c0_43 = arith.constant 0 : index
    %120 = vector.load %arg0[%c6, %c0_42, %c0_43] : memref<8x128x8xf32, #tpu.memory_space<vmem>>, vector<1x128x8xf32>
    %121 = vector.shape_cast %120 : vector<1x128x8xf32> to vector<128x8xf32>
    %122 = arith.mulf %121, %121 : vector<128x8xf32>
    %cst_44 = arith.constant dense<0.000000e+00> : vector<128xf32>
    %123 = vector.multi_reduction <add>, %122, %cst_44 [1] : vector<128x8xf32> to vector<128xf32>
    %124 = vector.shape_cast %123 : vector<128xf32> to vector<128x1xf32>
    %125 = math.sqrt %124 : vector<128x1xf32>
    %126 = vector.broadcast %125 : vector<128x1xf32> to vector<128x8xf32>
    %127 = arith.divf %121, %126 : vector<128x8xf32>
    %cst_45 = arith.constant dense<0.000000e+00> : vector<128x128xf32>
    %128 = tpu.matmul %127, %127, %cst_45 {dimension_numbers = #tpu.dot_dimension_numbers<[1], [1], [0], [0], [0, 0, 1, 0], [], []>} : vector<128x8xf32>, vector<128x8xf32>, vector<128x128xf32> -> vector<128x128xf32>
    %129 = arith.mulf %128, %128 : vector<128x128xf32>
    %cst_46 = arith.constant 9.99999971E-10 : f32
    %130 = vector.broadcast %cst_46 : f32 to vector<128x128xf32>
    %131 = arith.addf %129, %130 : vector<128x128xf32>
    %132 = math.log %131 : vector<128x128xf32>
    %cst_47 = arith.constant 0.000000e+00 : f32
    %133 = vector.broadcast %cst_47 : f32 to vector<128x128xf32>
    %134 = arith.subf %133, %132 : vector<128x128xf32>
    %135 = vector.shape_cast %134 : vector<128x128xf32> to vector<1x128x128xf32>
    %cst_48 = arith.constant dense<0.000000e+00> : vector<1xf32>
    %136 = vector.multi_reduction <add>, %135, %cst_48 [1, 2] : vector<1x128x128xf32> to vector<1xf32>
    %137 = vector.shape_cast %136 : vector<1xf32> to vector<1x1x1xf32>
    %138 = vector.extract %137[0, 0, 0] : f32 from vector<1x1x1xf32>
    %139 = arith.addf %119, %138 : f32
    %c7 = arith.constant 7 : index
    %c0_49 = arith.constant 0 : index
    %c0_50 = arith.constant 0 : index
    %140 = vector.load %arg0[%c7, %c0_49, %c0_50] : memref<8x128x8xf32, #tpu.memory_space<vmem>>, vector<1x128x8xf32>
    %141 = vector.shape_cast %140 : vector<1x128x8xf32> to vector<128x8xf32>
    %142 = arith.mulf %141, %141 : vector<128x8xf32>
    %cst_51 = arith.constant dense<0.000000e+00> : vector<128xf32>
    %143 = vector.multi_reduction <add>, %142, %cst_51 [1] : vector<128x8xf32> to vector<128xf32>
    %144 = vector.shape_cast %143 : vector<128xf32> to vector<128x1xf32>
    %145 = math.sqrt %144 : vector<128x1xf32>
    %146 = vector.broadcast %145 : vector<128x1xf32> to vector<128x8xf32>
    %147 = arith.divf %141, %146 : vector<128x8xf32>
    %cst_52 = arith.constant dense<0.000000e+00> : vector<128x128xf32>
    %148 = tpu.matmul %147, %147, %cst_52 {dimension_numbers = #tpu.dot_dimension_numbers<[1], [1], [0], [0], [0, 0, 1, 0], [], []>} : vector<128x8xf32>, vector<128x8xf32>, vector<128x128xf32> -> vector<128x128xf32>
    %149 = arith.mulf %148, %148 : vector<128x128xf32>
    %cst_53 = arith.constant 9.99999971E-10 : f32
    %150 = vector.broadcast %cst_53 : f32 to vector<128x128xf32>
    %151 = arith.addf %149, %150 : vector<128x128xf32>
    %152 = math.log %151 : vector<128x128xf32>
    %cst_54 = arith.constant 0.000000e+00 : f32
    %153 = vector.broadcast %cst_54 : f32 to vector<128x128xf32>
    %154 = arith.subf %153, %152 : vector<128x128xf32>
    %155 = vector.shape_cast %154 : vector<128x128xf32> to vector<1x128x128xf32>
    %cst_55 = arith.constant dense<0.000000e+00> : vector<1xf32>
    %156 = vector.multi_reduction <add>, %155, %cst_55 [1, 2] : vector<1x128x128xf32> to vector<1xf32>
    %157 = vector.shape_cast %156 : vector<1xf32> to vector<1x1x1xf32>
    %158 = vector.extract %157[0, 0, 0] : f32 from vector<1x1x1xf32>
    %159 = arith.addf %139, %158 : f32
    %cst_56 = arith.constant 1.310720e+05 : f32
    %160 = arith.divf %159, %cst_56 : f32
    %c0_57 = arith.constant 0 : index
    %161 = memref.load %arg3[%c0_57] : memref<1xf32, #tpu.memory_space<smem>>
    memref.store %160, %arg3[%c0_57] : memref<1xf32, #tpu.memory_space<smem>>
    %c0_58 = arith.constant 0 : index
    %c0_59 = arith.constant 0 : index
    %162 = vector.load %arg1[%c0_58, %c0_59] : memref<64x8xf32, #tpu.memory_space<vmem>>, vector<64x8xf32>
    %163 = arith.mulf %162, %162 : vector<64x8xf32>
    %cst_60 = arith.constant dense<0.000000e+00> : vector<64xf32>
    %164 = vector.multi_reduction <add>, %163, %cst_60 [1] : vector<64x8xf32> to vector<64xf32>
    %165 = vector.shape_cast %164 : vector<64xf32> to vector<64x1xf32>
    %166 = math.sqrt %165 : vector<64x1xf32>
    %167 = vector.broadcast %166 : vector<64x1xf32> to vector<64x8xf32>
    %168 = arith.divf %162, %167 : vector<64x8xf32>
    %cst_61 = arith.constant dense<0.000000e+00> : vector<64x64xf32>
    %169 = tpu.matmul %168, %168, %cst_61 {dimension_numbers = #tpu.dot_dimension_numbers<[1], [1], [0], [0], [0, 0, 1, 0], [], []>} : vector<64x8xf32>, vector<64x8xf32>, vector<64x64xf32> -> vector<64x64xf32>
    %170 = arith.mulf %169, %169 : vector<64x64xf32>
    %c0_62 = arith.constant 0 : index
    %c0_63 = arith.constant 0 : index
    %171 = vector.load %arg2[%c0_62, %c0_63] : memref<64x64xf32, #tpu.memory_space<vmem>>, vector<64x64xf32>
    %172 = arith.mulf %170, %171 : vector<64x64xf32>
    %173 = vector.shape_cast %172 : vector<64x64xf32> to vector<1x64x64xf32>
    %cst_64 = arith.constant dense<0.000000e+00> : vector<1xf32>
    %174 = vector.multi_reduction <add>, %173, %cst_64 [1, 2] : vector<1x64x64xf32> to vector<1xf32>
    %175 = vector.shape_cast %174 : vector<1xf32> to vector<1x1x1xf32>
    %176 = vector.extract %175[0, 0, 0] : f32 from vector<1x1x1xf32>
    %cst_65 = arith.constant 4.096000e+03 : f32
    %177 = arith.divf %176, %cst_65 : f32
    %c0_66 = arith.constant 0 : index
    %178 = memref.load %arg4[%c0_66] : memref<1xf32, #tpu.memory_space<smem>>
    memref.store %177, %arg4[%c0_66] : memref<1xf32, #tpu.memory_space<smem>>
    return
  }
}

module attributes {stable_mosaic.version = 11 : i64} {
  func.func @_weighted_sum_kernel(%arg0: memref<4x128xf32, #tpu.memory_space<vmem>>, %arg1: memref<128x64xf32, #tpu.memory_space<vmem>>, %arg2: memref<4x64xf32, #tpu.memory_space<vmem>>, %arg3: memref<4x512xf32, #tpu.memory_space<vmem>>) attributes {dimension_semantics = [], scalar_prefetch = 0 : i64, scratch_operands = 0 : i64, tpu.core_type = #tpu.core_type<tc>} {
    %c0 = arith.constant 0 : index
    %c0_0 = arith.constant 0 : index
    %0 = vector.load %arg0[%c0, %c0_0] : memref<4x128xf32, #tpu.memory_space<vmem>>, vector<4x128xf32>
    %c0_1 = arith.constant 0 : index
    %c0_2 = arith.constant 0 : index
    %1 = vector.load %arg1[%c0_1, %c0_2] : memref<128x64xf32, #tpu.memory_space<vmem>>, vector<128x64xf32>
    %cst = arith.constant dense<0.000000e+00> : vector<4x64xf32>
    %2 = tpu.matmul %0, %1, %cst {dimension_numbers = #tpu.dot_dimension_numbers<[1], [0], [0], [1], [0, 0, 1, 1], [], []>} : vector<4x128xf32>, vector<128x64xf32>, vector<4x64xf32> -> vector<4x64xf32>
    %c0_3 = arith.constant 0 : index
    %c0_4 = arith.constant 0 : index
    %3 = vector.load %arg2[%c0_3, %c0_4] : memref<4x64xf32, #tpu.memory_space<vmem>>, vector<4x64xf32>
    tpu.vector_store %arg2[%c0_3, %c0_4], %2 {strides = array<i32>} : memref<4x64xf32, #tpu.memory_space<vmem>>, vector<4x64xf32>,
    %4 = vector.extract_strided_slice %0 {offsets = [0, 0], sizes = [4, 16], strides = [1, 1]} : vector<4x128xf32> to vector<4x16xf32>
    %5 = vector.extract_strided_slice %1 {offsets = [0, 0], sizes = [16, 64], strides = [1, 1]} : vector<128x64xf32> to vector<16x64xf32>
    %cst_5 = arith.constant dense<0.000000e+00> : vector<4x64xf32>
    %6 = tpu.matmul %4, %5, %cst_5 {dimension_numbers = #tpu.dot_dimension_numbers<[1], [0], [0], [1], [0, 0, 1, 1], [], []>} : vector<4x16xf32>, vector<16x64xf32>, vector<4x64xf32> -> vector<4x64xf32>
    %c0_6 = arith.constant 0 : index
    %c0_7 = arith.constant 0 : index
    %7 = vector.load %arg3[%c0_6, %c0_7] : memref<4x512xf32, #tpu.memory_space<vmem>>, vector<4x64xf32>
    tpu.vector_store %arg3[%c0_6, %c0_7], %6 {strides = array<i32>} : memref<4x512xf32, #tpu.memory_space<vmem>>, vector<4x64xf32>,
    %8 = vector.extract_strided_slice %0 {offsets = [0, 16], sizes = [4, 16], strides = [1, 1]} : vector<4x128xf32> to vector<4x16xf32>
    %9 = vector.extract_strided_slice %1 {offsets = [16, 0], sizes = [16, 64], strides = [1, 1]} : vector<128x64xf32> to vector<16x64xf32>
    %cst_8 = arith.constant dense<0.000000e+00> : vector<4x64xf32>
    %10 = tpu.matmul %8, %9, %cst_8 {dimension_numbers = #tpu.dot_dimension_numbers<[1], [0], [0], [1], [0, 0, 1, 1], [], []>} : vector<4x16xf32>, vector<16x64xf32>, vector<4x64xf32> -> vector<4x64xf32>
    %c0_9 = arith.constant 0 : index
    %c64 = arith.constant 64 : index
    %11 = vector.load %arg3[%c0_9, %c64] : memref<4x512xf32, #tpu.memory_space<vmem>>, vector<4x64xf32>
    tpu.vector_store %arg3[%c0_9, %c64], %10 {strides = array<i32>} : memref<4x512xf32, #tpu.memory_space<vmem>>, vector<4x64xf32>,
    %12 = vector.extract_strided_slice %0 {offsets = [0, 32], sizes = [4, 16], strides = [1, 1]} : vector<4x128xf32> to vector<4x16xf32>
    %13 = vector.extract_strided_slice %1 {offsets = [32, 0], sizes = [16, 64], strides = [1, 1]} : vector<128x64xf32> to vector<16x64xf32>
    %cst_10 = arith.constant dense<0.000000e+00> : vector<4x64xf32>
    %14 = tpu.matmul %12, %13, %cst_10 {dimension_numbers = #tpu.dot_dimension_numbers<[1], [0], [0], [1], [0, 0, 1, 1], [], []>} : vector<4x16xf32>, vector<16x64xf32>, vector<4x64xf32> -> vector<4x64xf32>
    %c0_11 = arith.constant 0 : index
    %c128 = arith.constant 128 : index
    %15 = vector.load %arg3[%c0_11, %c128] : memref<4x512xf32, #tpu.memory_space<vmem>>, vector<4x64xf32>
    tpu.vector_store %arg3[%c0_11, %c128], %14 {strides = array<i32>} : memref<4x512xf32, #tpu.memory_space<vmem>>, vector<4x64xf32>,
    %16 = vector.extract_strided_slice %0 {offsets = [0, 48], sizes = [4, 16], strides = [1, 1]} : vector<4x128xf32> to vector<4x16xf32>
    %17 = vector.extract_strided_slice %1 {offsets = [48, 0], sizes = [16, 64], strides = [1, 1]} : vector<128x64xf32> to vector<16x64xf32>
    %cst_12 = arith.constant dense<0.000000e+00> : vector<4x64xf32>
    %18 = tpu.matmul %16, %17, %cst_12 {dimension_numbers = #tpu.dot_dimension_numbers<[1], [0], [0], [1], [0, 0, 1, 1], [], []>} : vector<4x16xf32>, vector<16x64xf32>, vector<4x64xf32> -> vector<4x64xf32>
    %c0_13 = arith.constant 0 : index
    %c192 = arith.constant 192 : index
    %19 = vector.load %arg3[%c0_13, %c192] : memref<4x512xf32, #tpu.memory_space<vmem>>, vector<4x64xf32>
    tpu.vector_store %arg3[%c0_13, %c192], %18 {strides = array<i32>} : memref<4x512xf32, #tpu.memory_space<vmem>>, vector<4x64xf32>,
    %20 = vector.extract_strided_slice %0 {offsets = [0, 64], sizes = [4, 16], strides = [1, 1]} : vector<4x128xf32> to vector<4x16xf32>
    %21 = vector.extract_strided_slice %1 {offsets = [64, 0], sizes = [16, 64], strides = [1, 1]} : vector<128x64xf32> to vector<16x64xf32>
    %cst_14 = arith.constant dense<0.000000e+00> : vector<4x64xf32>
    %22 = tpu.matmul %20, %21, %cst_14 {dimension_numbers = #tpu.dot_dimension_numbers<[1], [0], [0], [1], [0, 0, 1, 1], [], []>} : vector<4x16xf32>, vector<16x64xf32>, vector<4x64xf32> -> vector<4x64xf32>
    %c0_15 = arith.constant 0 : index
    %c256 = arith.constant 256 : index
    %23 = vector.load %arg3[%c0_15, %c256] : memref<4x512xf32, #tpu.memory_space<vmem>>, vector<4x64xf32>
    tpu.vector_store %arg3[%c0_15, %c256], %22 {strides = array<i32>} : memref<4x512xf32, #tpu.memory_space<vmem>>, vector<4x64xf32>,
    %24 = vector.extract_strided_slice %0 {offsets = [0, 80], sizes = [4, 16], strides = [1, 1]} : vector<4x128xf32> to vector<4x16xf32>
    %25 = vector.extract_strided_slice %1 {offsets = [80, 0], sizes = [16, 64], strides = [1, 1]} : vector<128x64xf32> to vector<16x64xf32>
    %cst_16 = arith.constant dense<0.000000e+00> : vector<4x64xf32>
    %26 = tpu.matmul %24, %25, %cst_16 {dimension_numbers = #tpu.dot_dimension_numbers<[1], [0], [0], [1], [0, 0, 1, 1], [], []>} : vector<4x16xf32>, vector<16x64xf32>, vector<4x64xf32> -> vector<4x64xf32>
    %c0_17 = arith.constant 0 : index
    %c320 = arith.constant 320 : index
    %27 = vector.load %arg3[%c0_17, %c320] : memref<4x512xf32, #tpu.memory_space<vmem>>, vector<4x64xf32>
    tpu.vector_store %arg3[%c0_17, %c320], %26 {strides = array<i32>} : memref<4x512xf32, #tpu.memory_space<vmem>>, vector<4x64xf32>,
    %28 = vector.extract_strided_slice %0 {offsets = [0, 96], sizes = [4, 16], strides = [1, 1]} : vector<4x128xf32> to vector<4x16xf32>
    %29 = vector.extract_strided_slice %1 {offsets = [96, 0], sizes = [16, 64], strides = [1, 1]} : vector<128x64xf32> to vector<16x64xf32>
    %cst_18 = arith.constant dense<0.000000e+00> : vector<4x64xf32>
    %30 = tpu.matmul %28, %29, %cst_18 {dimension_numbers = #tpu.dot_dimension_numbers<[1], [0], [0], [1], [0, 0, 1, 1], [], []>} : vector<4x16xf32>, vector<16x64xf32>, vector<4x64xf32> -> vector<4x64xf32>
    %c0_19 = arith.constant 0 : index
    %c384 = arith.constant 384 : index
    %31 = vector.load %arg3[%c0_19, %c384] : memref<4x512xf32, #tpu.memory_space<vmem>>, vector<4x64xf32>
    tpu.vector_store %arg3[%c0_19, %c384], %30 {strides = array<i32>} : memref<4x512xf32, #tpu.memory_space<vmem>>, vector<4x64xf32>,
    %32 = vector.extract_strided_slice %0 {offsets = [0, 112], sizes = [4, 16], strides = [1, 1]} : vector<4x128xf32> to vector<4x16xf32>
    %33 = vector.extract_strided_slice %1 {offsets = [112, 0], sizes = [16, 64], strides = [1, 1]} : vector<128x64xf32> to vector<16x64xf32>
    %cst_20 = arith.constant dense<0.000000e+00> : vector<4x64xf32>
    %34 = tpu.matmul %32, %33, %cst_20 {dimension_numbers = #tpu.dot_dimension_numbers<[1], [0], [0], [1], [0, 0, 1, 1], [], []>} : vector<4x16xf32>, vector<16x64xf32>, vector<4x64xf32> -> vector<4x64xf32>
    %c0_21 = arith.constant 0 : index
    %c448 = arith.constant 448 : index
    %35 = vector.load %arg3[%c0_21, %c448] : memref<4x512xf32, #tpu.memory_space<vmem>>, vector<4x64xf32>
    tpu.vector_store %arg3[%c0_21, %c448], %34 {strides = array<i32>} : memref<4x512xf32, #tpu.memory_space<vmem>>, vector<4x64xf32>,
    return
  }
}

module attributes {stable_mosaic.version = 11 : i64} {
  func.func @_bmv_kernel(%arg0: memref<8x8xf32, #tpu.memory_space<vmem>>, %arg1: memref<8x8x8xf32, #tpu.memory_space<vmem>>, %arg2: memref<8x8xf32, #tpu.memory_space<vmem>>) attributes {dimension_semantics = [], scalar_prefetch = 0 : i64, scratch_operands = 0 : i64, tpu.core_type = #tpu.core_type<tc>} {
    %c0 = arith.constant 0 : index
    %c0_0 = arith.constant 0 : index
    %0 = vector.load %arg0[%c0, %c0_0] : memref<8x8xf32, #tpu.memory_space<vmem>>, vector<8x8xf32>
    %c0_1 = arith.constant 0 : index
    %c0_2 = arith.constant 0 : index
    %c0_3 = arith.constant 0 : index
    %1 = vector.load %arg1[%c0_1, %c0_2, %c0_3] : memref<8x8x8xf32, #tpu.memory_space<vmem>>, vector<8x8x8xf32>
    %2 = vector.shape_cast %0 : vector<8x8xf32> to vector<8x8x1xf32>
    %3 = vector.broadcast %2 : vector<8x8x1xf32> to vector<8x8x8xf32>
    %4 = arith.mulf %3, %1 : vector<8x8x8xf32>
    %cst = arith.constant dense<0.000000e+00> : vector<8x8xf32>
    %5 = vector.multi_reduction <add>, %4, %cst [1] : vector<8x8x8xf32> to vector<8x8xf32>
    %c0_4 = arith.constant 0 : index
    %c0_5 = arith.constant 0 : index
    %6 = vector.load %arg2[%c0_4, %c0_5] : memref<8x8xf32, #tpu.memory_space<vmem>>, vector<8x8xf32>
    tpu.vector_store %arg2[%c0_4, %c0_5], %5 {strides = array<i32>} : memref<8x8xf32, #tpu.memory_space<vmem>>, vector<8x8xf32>,
    return
  }
}

</mosaic_0001>

<bundles_post_ra>
// kernel: custom-call.29
= control target key start
LH: loop header
LB: loop body
LE: loop exit
PB: predicated region body
PF: predicated region fallthrough
CT: control target
= control target key end

     0   :  { %s6_s0 = inlined_call_operand.vmem [shape: u32[128], index: 0, kind: output, shape index: {}]  }

// kernel: custom-call.22
= control target key start
LH: loop header
LB: loop body
LE: loop exit
PB: predicated region body
PF: predicated region fallthrough
CT: control target
= control target key end

     0   :  { %5 = vsyncpa [#allocation3], 0  ;;  %s868_s0 = inlined_call_operand.vmem [shape: f32[128,8,8], index: 0, kind: input, shape index: {}]   ;;  %s869_s1 = inlined_call_operand.vmem [shape: f32[128,8,8], index: 1, kind: output, shape index: {0}]   ;;  %s870_s2 = inlined_call_operand.hbm [shape: s32[128,8], index: 2, kind: output, shape index: {1}]   ;;  %s871_s3 = inlined_call_operand.vmem [shape: s32[128,8], index: 3, kind: output, shape index: {2}]  }
   0x1   :  { %7 = vsyncpa [#allocation3 + $0x1], 0  ;;  %s697_s12 = smov 0   ;;  %s699_s13 = smov 0  }
   0x2   :  { %s701_s14 = smov 0   ;;  %s703_s15 = smov 0  }
   0x3 LB: > { %s718_s16 = sadd.s32 4294967295, %s669_s15   ;;  %s534_s17 = sadd.s32 4294967294, %s669_s15   ;;  %s669_s15 = sphi %s703_s15, %s877_s15   ;;  %s665_s14 = sphi %s701_s14, %s876_s14   ;;  %s661_s13 = sphi %s699_s13, %s875_s13   ;;  %s657_s12 = sphi %s697_s12, %s874_s12  }
   0x4   : > { %s722_s18 = sadd.s32 1, %s669_s15   ;;  %s17_s19 = sshrl.u32 %s669_s15, 3 }
   0x5   : > { %s18_s20 = sshrl.u32 %s722_s18, 3  ;;  %s22_s21 = sadd.s32 1, %s665_s14 }
   0x6   : > { %s19_s22 = ssub.s32 %s17_s19, %s18_s20  ;;  %p32_p0 = scmp.ne.s32.totalorder %s665_s14, %s661_s13 }
   0x7   : > { %p20_p1 = scmp.eq.s32.totalorder %s19_s22, 0  ;;  %p33_p2 = scmp.eq.s32.totalorder %s718_s16, 127 }
   0x8   : > { %p38_p3 = scmp.ne.s32.totalorder %s661_s13, %s657_s12  ;;  %p39_p4 = scmp.eq.s32.totalorder %s534_s17, 127 }
   0x9   : > { %s733_s23 = scalar_select %p20_p1, %s665_s14, %s22_s21  }
   0xa   : > { %p735_p5 = por %p33_p2, %p32_p0  ;;  %p739_p6 = por %p39_p4, %p38_p3 }
   0xb   : > { %p536_p7 = scmp.ge.s32.totalorder %s669_s15, 128 }
   0xc   : > { %s85_s26 = sand.u32 (!%p536_p7), 1, %s669_s15   ;;  %s538_s27 = sshll.u32 (!%p536_p7), %s669_s15, 3 }
   0xd   : > { %83 = sbr.rel (%p536_p7) target bundleno = 20 (0x14), region = 16  ;;  %s537_s28 = sshll.u32 (!%p536_p7), %s85_s26, 3 }
   0xe   : > { %s89_s4 = scalar_lea.vmem (!%p536_p7), %s868_s0, %s538_s27  ;;  %s87_s5 = scalar_lea.vmem (!%p536_p7), [#allocation0], %s537_s28 }
  0x12   : > { %v118_v0 = vld [vmem:[%s89_s4] sm:$0xff] }
  0x13   : > { %119 = vst [vmem:[%s87_s5] sm:$0xff] %v118_v0 }
  0x14 PF: > { %p539_p8 = scmp.ge.s32.totalorder %s669_s15, 1  ;;  %p124_p9 = scmp.lt.s32.totalorder %s669_s15, 129 }
  0x16   : > { %p125_p10 = pnand %p539_p8, %p124_p9 }
  0x18   : > { %128 = sbr.rel (%p125_p10) target bundleno = 430 (0x1ae), region = 54 }
  0x1d   : > { %s131_s6 = sand.u32 1, %s718_s16   ;;  %s146_s7 = sand.u32 1, %s661_s13   ;;  %v164_v1 = vlaneseq  ;;  %v675_v4 = vmov 0  }
  0x1e   : > { %s540_s8 = sshll.u32 %s131_s6, 3  ;;  %s755_s9 = sshll.u32 %s146_s7, 3 }
  0x1f   : > { %v758_v2 = vshrl.u32 %v164_v1, 7  ;;  %s133_s10 = scalar_lea.vmem [#allocation0], %s540_s8  ;;  %s760_s11 = scalar_lea.vmem [#allocation1], %s540_s8 }
  0x20   : > { %v157_v3 = vld [vmem:[%s133_s10] sm:$0xff]  ;;  %s159_s17 = sand.u32 7, %s718_s16   ;;  %s148_s19 = scalar_lea.vmem [#allocation2], %s755_s9 }
  0x21   : > { %158 = vst [vmem:[%s760_s11] sm:$0xff] %v157_v3  ;;  %168 = vst [vmem:[#allocation5] sm:$0xff] %v758_v2  ;;  %s768_s20 = scalar_lea.vmem %s148_s19, %s159_s17 [#allocation2]  ;;  %s154_s21 = scalar_lea.vmem [#allocation4], %s755_s9 }
  0x22   : > { %s773_s22 = scalar_lea.vmem %s154_s21, %s159_s17 [#allocation4]  ;;  %163 = vst [vmem:[%s768_s20] sm:$0x1] %v675_v4  ;;  %s776_s26 = smov 0  }
  0x23 LB: >> { %v783_v7 = vstv %s673_s26  ;;  %s225_s27 = ssub.s32 128, %s673_s26  ;;  %v231_v37 = vand.u32 127, %v164_v1  ;;  %s237_s28 = scalar_lea.vmem %s760_s11, %s673_s26 [#allocation1]  ;;  %s673_s26 = sphi %s776_s26, %s174_s26  }
  0x24   : >> { %vm183_vm0 = vcmp.ge.s32.totalorder %v758_v2, %v783_v7  ;;  %s243_s30 = scalar_lea.vmem [#allocation5], %s673_s26  ;;  %vm263_vm13 = vcmp.gt.s32.totalorder %v758_v2, %v783_v7  ;;  %s174_s26 = sadd.s32 1, %s673_s26  }
  0x25   : >> { %vm255_vm10 = vcmp.gt.s32.totalorder %v231_v37, %v783_v7  ;;  %vm232_vm11 = vcmp.eq.s32.totalorder %v231_v37, %v783_v7  ;;  %p171_p11 = scmp.ge.s32.totalorder %s174_s26, 8  }
  0x26   : >> { %vm267_vm15 = vmand %vm263_vm13, %vm232_vm11  ;;  %s548_s6 = sshll.u32 (%p171_p11), %s718_s16, 3 }
  0x27   : > { %s337_s17 = scalar_lea.vmem (%p171_p11), %s869_s1, %s548_s6 }
  0x28   : >> { %v179_v5 = vld [vmem:[%s760_s11] sm:$0xff]  ;;  %v239_v40 = vld [vmem:[%s237_s28] ss:$0 sm:$0xff] }
  0x29   : >> { %v180_v6 = vand.u32 2147483647, %v179_v5  ;;  %v234_v39 = vld [vmem:[%s768_s20] ss:$0 sm:$0xff] }
  0x2a   : >> { %v245_v41 = vld [vmem:[%s243_s30] ss:$0 sm:$0xff] }
  0x2b   : >> { %vm544_vm1 = vcmp.gt.f32.partialorder %v180_v6, -inf }
  0x2c   : >> { %vm187_vm2 = vmand %vm183_vm0, %vm544_vm1 }
  0x2d   : >> { %v188_v8 = vsel %vm187_vm2, %v758_v2, %v783_v7  ;;  %v189_v9 = vsel %vm187_vm2, %v180_v6, -inf }
  0x2e   : >> { %v190_v10 = vrot.slane %v189_v9, 1  ;;  %v191_v11 = vrot.slane %v188_v8, 1 }
  0x30   : >> { %vm192_vm3 = vcmp.ge.f32.partialorder %v190_v10, %v189_v9  ;;  %v195_v12 = vrot.slane %v190_v10, 1  ;;  %v196_v13 = vrot.slane %v191_v11, 1 }
  0x31   : >> { %v193_v14 = vsel %vm192_vm3, %v190_v10, %v189_v9  ;;  %v194_v15 = vsel %vm192_vm3, %v191_v11, %v188_v8 }
  0x32   : >> { %vm197_vm4 = vcmp.ge.f32.partialorder %v195_v12, %v193_v14  ;;  %v200_v16 = vrot.slane %v195_v12, 1  ;;  %v201_v17 = vrot.slane %v196_v13, 1 }
  0x33   : >> { %v198_v18 = vsel %vm197_vm4, %v195_v12, %v193_v14  ;;  %v199_v19 = vsel %vm197_vm4, %v196_v13, %v194_v15 }
  0x34   : >> { %vm202_vm5 = vcmp.ge.f32.partialorder %v200_v16, %v198_v18  ;;  %v205_v20 = vrot.slane %v200_v16, 1  ;;  %v206_v21 = vrot.slane %v201_v17, 1 }
  0x35   : >> { %v203_v22 = vsel %vm202_vm5, %v200_v16, %v198_v18  ;;  %v204_v23 = vsel %vm202_vm5, %v201_v17, %v199_v19 }
  0x36   : >> { %vm207_vm6 = vcmp.ge.f32.partialorder %v205_v20, %v203_v22  ;;  %v210_v24 = vrot.slane %v205_v20, 1  ;;  %v211_v25 = vrot.slane %v206_v21, 1 }
  0x37   : >> { %v208_v26 = vsel %vm207_vm6, %v205_v20, %v203_v22  ;;  %v209_v27 = vsel %vm207_vm6, %v206_v21, %v204_v23 }
  0x38   : >> { %vm212_vm7 = vcmp.ge.f32.partialorder %v210_v24, %v208_v26  ;;  %v215_v28 = vrot.slane %v210_v24, 1  ;;  %v216_v29 = vrot.slane %v211_v25, 1 }
  0x39   : >> { %v213_v30 = vsel %vm212_vm7, %v210_v24, %v208_v26  ;;  %v214_v31 = vsel %vm212_vm7, %v211_v25, %v209_v27 }
  0x3a   : >> { %vm217_vm8 = vcmp.ge.f32.partialorder %v215_v28, %v213_v30  ;;  %v220_v32 = vrot.slane %v215_v28, 1  ;;  %v221_v33 = vrot.slane %v216_v29, 1 }
  0x3b   : >> { %v218_v34 = vsel %vm217_vm8, %v215_v28, %v213_v30  ;;  %v219_v35 = vsel %vm217_vm8, %v216_v29, %v214_v31 }
  0x3c   : >> { %vm222_vm9 = vcmp.ge.f32.partialorder %v220_v32, %v218_v34 }
  0x3d   : >> { %v224_v36 = vsel %vm222_vm9, %v221_v33, %v219_v35 }
  0x3e   : >> { %226 = vrot.lane.b32.xlu0 %v224_v36, %s225_s27  ;;  %s374_s27 = sshrl.u32 (%p171_p11), %s718_s16, 3 }
  0x3f   : > { %s549_s26 = sshll.u32 (%p171_p11), %s374_s27, 7 }
  0xb0   : >> { %v227_v38 = vpop.permute.xlu0 %226 }
  0xb1   : >> { %553 = vpush %v227_v38 }
  0xe2   : >> { %s554_s29 = spop %553 }
  0xe3   : >> { %v233_v42 = vstv %s554_s29  ;;  %s238_s4 = scalar_lea.vmem %s760_s11, %s554_s29 [#allocation1]  ;;  %s244_s5 = scalar_lea.vmem [#allocation5], %s554_s29 }
  0xe4   : >> { %v240_v43 = vld [vmem:[%s238_s4] ss:$0 sm:$0xff]  ;;  %v235_v45 = vsel %vm232_vm11, %v233_v42, %v234_v39 }
  0xe5   : >> { %v246_v44 = vld [vmem:[%s244_s5] ss:$0 sm:$0xff]  ;;  %241 = vst [vmem:[%s238_s4] sm:$0x1] %v239_v40  ;;  %vm249_vm12 = vcmp.ne.f32.partialorder %v240_v43, 0.0  ;;  %236 = vst [vmem:[%s768_s20] sm:$0x1] %v235_v45  ;;  %v256_v52 = vsel %vm255_vm10, %v240_v43, 0.0 }
  0xe6   : >> { %247 = vst [vmem:[%s244_s5] sm:$0x1] %v245_v41  ;;  %242 = vst [vmem:[%s237_s28] sm:$0x1] %v240_v43  ;;  %s381_s20 = sshll.u32 (%p171_p11), %s148_s19, 4  ;;  %s328_s4 = scalar_lea.sflag (%p171_p11), [#allocation3], %s146_s7  ;;  %s382_s20 = int_to_ptr.vmem [resolvable:$true] %s381_s20 }
  0xe7   : >> { %248 = vst [vmem:[%s243_s30] sm:$0x1] %v246_v44  ;;  %vm250_vm14 = vmand %vm232_vm11, %vm249_vm12  ;;  %s379_s30 = scalar_lea.hbm (%p171_p11), %s870_s2, %s549_s26  ;;  %s605_s5 = scalar_lea.vmem (%p171_p11), %s382_s20, 128 }
  0xe8   : >> { %v251_v46 = vsel %vm250_vm14, %v240_v43, 1.0  ;;  %p606_p12 = scmp.ne.s32.totalorder (%p171_p11), %s382_s20, %s605_s5 }
  0xe9   : >> { %v264_v47 = vsel %vm263_vm13, %v251_v46, 1.0 }
  0xea   : >> { %603 = vrcp.f32 %v264_v47  ;;  %p607_p13 = pnand (%p171_p11), %p606_p12, %p735_p5 }
  0xec   : > { %p608_p0 = pneg (%p171_p11), %p607_p13 }
  0xed   : >> { %v260_v49 = vld [vmem:[%s760_s11] sm:$0xff] }
  0xee   : > { %v274_v56 = vld [vmem:[#allocation5] sm:$0xff] (%p171_p11) }
  0xf7   : >> { %v604_v48 = vpop.eup %603 }
  0xf8   : >> { %v266_v50 = vmul.f32 %v604_v48, %v260_v49 }
  0xfa   : >> { %v268_v51 = vsel %vm267_vm15, %v266_v50, 0.0 }
  0xfb   : >> { %269 = vadd.xlane.f32.xlu0 %v268_v51 }
 0x128   : > { %290 = vxpose.xlu0.b32.start.end [1/1] (short) (narrow) (%p171_p11), %v274_v56, 8 }
 0x184   : >> { %v270_v53 = vpop.xlane.xlu0 %269 }
 0x185   : >> { %v271_v54 = vmul.f32 %v270_v53, %v256_v52  ;;  %173 = sbr.rel (!%p171_p11) target bundleno = 35 (0x23), region = 214 }
 0x187   : >> { %v272_v55 = vsub.f32 %v266_v50, %v271_v54 }
 0x189   : >> { %273 = vst [vmem:[%s760_s11] sm:$0xff] %v272_v55 }
 0x190   : > { %v366_v57 = vld [vmem:[%s760_s11] sm:$0xff]  ;;  %s676_s11 = smov [#allocation2]  }
 0x191   : > { %367 = vst [vmem:[%s337_s17] sm:$0xff] %v366_v57  ;;  %s609_s6 = sshll.u32 %s676_s11, 4  ;;  %s610_s6 = int_to_ptr.vmem [resolvable:$false] %s609_s6 }
 0x192   : > { %s611_s8 = scalar_lea.vmem %s610_s6, 256  ;;  %p612_p1 = scmp.lt.s32.totalorder %s382_s20, %s610_s6 }
 0x193   : > { %p613_p2 = scmp.lt.s32.totalorder %s611_s8, %s605_s5 }
 0x195   : > { %p614_p3 = por %p613_p2, %p612_p1 }
 0x197   : > { %p615_p4 = pnand %p614_p3, %p608_p0 }
 0x199   : > { %618 = shalt.err (!%p615_p4)
}
 0x19a   : > { %s619_s19 = scalar_lea.hbm %s379_s30, 128  ;;  %s623_s17 = scalar_lea.hbm %s870_s2, 2048 }
 0x19b   : > { %p620_p7 = scmp.ne.s32.totalorder %s379_s30, %s619_s19  ;;  %p624_p10 = scmp.lt.s32.totalorder %s379_s30, %s870_s2 }
 0x19c   : > { %p625_p11 = scmp.lt.s32.totalorder %s623_s17, %s619_s19 }
 0x19d   : > { %p621_p8 = pnand %p620_p7, %p735_p5 }
 0x19e   : > { %p626_p12 = por %p625_p11, %p624_p10 }
 0x19f   : > { %p622_p9 = pneg %p621_p8 }
 0x1a1   : > { %p627_p13 = pnand %p626_p12, %p622_p9 }
 0x1a3   : > { %630 = shalt.err (!%p627_p13)
}
 0x1a4   : > { %555 = dma.vmem_to_hbm [thread:$0]  (%p735_p5), %s382_s20, 128, %s379_s30, %s328_s4   ;;  %v306_v58 = vpop.trf.xlu0 }
 0x1a5   : > { %322 = vst [vmem:[%s773_s22] sm:$0x1] %v306_v58  ;;  %387 = sbr.rel (!%p735_p5) target bundleno = 430 (0x1ae), region = 104  ;;  %s550_s29 = sshll.u32 (%p735_p5), %s374_s27, 3 }
 0x1a6   : > { %s390_s6 = scalar_lea.vmem (%p735_p5), %s871_s3, %s550_s29 }
 0x1ac   : > { %v419_v59 = vld [vmem:[%s154_s21] sm:$0xff] }
 0x1ad   : > { %420 = vst [vmem:[%s390_s6] sm:$0xff] %v419_v59 }
 0x1ae PF: > { %p561_p0 = scmp.ge.s32.totalorder %s669_s15, 2  ;;  %s436_s22 = sand.u32 1, %s657_s12  }
 0x1af   : > { %s437_s16 = scalar_lea.sflag [#allocation3], %s436_s22 }
 0x1b0   : > { %p558_p5 = pnand %p561_p0, %p739_p6 }
 0x1b2   : > { %p559_p1 = pneg %p558_p5 }
 0x1b4   : > { %652 = dma.done.wait (%p559_p1), %s437_s16, 128  }
 0x1b5   : > { %654 = vsyncadd (%p559_p1), %s437_s16, 4294967168  ;;  %p10_p2 = scmp.ge.s32.totalorder %s722_s18, 130   ;;  %s874_s12 = smov %s661_s13 }
 0x1b6   : > { %s875_s13 = smov %s665_s14  ;;  %s876_s14 = smov %s733_s23 }
 0x1b7   : > { %s877_s15 = smov %s722_s18  ;;  %12 = sbr.rel (!%p10_p2) target bundleno = 3 (0x3), region = 225 }
 0x1bc   :  { %449 = vsyncpa [#allocation3], 1 }
 0x1bd   :  { %451 = vsyncpa [#allocation3 + $0x1], 1 }

// kernel: custom-call.24
= control target key start
LH: loop header
LB: loop body
LE: loop exit
PB: predicated region body
PF: predicated region fallthrough
CT: control target
= control target key end

     0   :  { %s453_s22 = smov 0   ;;  %s559_s0 = inlined_call_operand.vmem [shape: f32[128,1,8,8], index: 0, kind: input, shape index: {}]   ;;  %s560_s1 = inlined_call_operand.vmem [shape: f32[128,1,8,8], index: 1, kind: output, shape index: {}]  }
   0x1   :  { %v44_v0 = vld [vmem:[%s559_s0] sm:$0xff]  ;;  %v46_v1 = vld [vmem:[%s559_s0 + $0x8] sm:$0xff]  ;;  %v48_v2 = vld [vmem:[%s559_s0 + $0x10] sm:$0xff] }
   0x2   :  { %45 = vst [vmem:[#allocation0] sm:$0xff] %v44_v0  ;;  %47 = vst [vmem:[#allocation0 + $0x8] sm:$0xff] %v46_v1  ;;  %v50_v3 = vld [vmem:[%s559_s0 + $0x18] sm:$0xff]  ;;  %v52_v4 = vld [vmem:[%s559_s0 + $0x20] sm:$0xff] }
   0x3   :  { %49 = vst [vmem:[#allocation0 + $0x10] sm:$0xff] %v48_v2  ;;  %v54_v5 = vld [vmem:[%s559_s0 + $0x28] sm:$0xff]  ;;  %51 = vst [vmem:[#allocation0 + $0x18] sm:$0xff] %v50_v3  ;;  %v56_v6 = vld [vmem:[%s559_s0 + $0x30] sm:$0xff] }
   0x4   :  { %53 = vst [vmem:[#allocation0 + $0x20] sm:$0xff] %v52_v4  ;;  %55 = vst [vmem:[#allocation0 + $0x28] sm:$0xff] %v54_v5  ;;  %v58_v7 = vld [vmem:[%s559_s0 + $0x38] sm:$0xff] }
   0x5   :  { %57 = vst [vmem:[#allocation0 + $0x30] sm:$0xff] %v56_v6  ;;  %59 = vst [vmem:[#allocation0 + $0x38] sm:$0xff] %v58_v7 }
   0x6 LB: > { %s380_s23 = sshll.u32 %s455_s22, 3  ;;  %s73_s26 = scalar_lea.vmem [#allocation3], %s455_s22  ;;  %v79_v9 = vlaneseq  ;;  %v82_v11 = vstv %s455_s22  ;;  %s455_s22 = sphi %s453_s22, %s68_s22  }
   0x7   : > { %s70_s24 = sadd.s32 %s455_s22, %s380_s23  ;;  %s76_s27 = scalar_lea.vmem [#allocation0], %s380_s23 }
   0x8   : > { %s71_s25 = scalar_lea.vmem [#allocation0], %s70_s24  ;;  %v80_v10 = vshrl.u32 %v79_v9, 7  ;;  %s77_s0 = scalar_lea.vmem [#allocation2], %s380_s23 }
   0x9   : > { %s68_s22 = sadd.s32 1, %s455_s22  }
   0xa   : > { %vm83_vm0 = vcmp.ge.s32.totalorder %v82_v11, %v80_v10  ;;  %p65_p0 = scmp.ge.s32.totalorder %s68_s22, 8  }
   0xb   :  { %s457_s28 = smov (%p65_p0), 0  }
   0xc   : > { %v72_v8 = vld [vmem:[%s71_s25] ss:$0 sm:$0xff] }
   0xd   : > { %74 = vst [vmem:[%s73_s26] sm:$0x1] %v72_v8  ;;  %433 = vrcp.f32 %v72_v8  ;;  %v78_v12 = vld [vmem:[%s76_s27] sm:$0xff] }
   0xe   : > { %v86_v13 = vsel %vm83_vm0, %v78_v12, 0.0 }
  0x1a   : > { %v434_v14 = vpop.eup %433 }
  0x1b   : > { %v88_v15 = vmul.f32 %v434_v14, %v86_v13  ;;  %67 = sbr.rel (!%p65_p0) target bundleno = 6 (0x6), region = 145 }
  0x1d   : > { %v89_v16 = vxor.u32 2147483648, %v88_v15 }
  0x1f   : > { %90 = vst [vmem:[%s77_s0] sm:$0xff] %v89_v16 }
  0x20 LB: > { %v97_v17 = vstv %s459_s28  ;;  %s382_s29 = sshll.u32 %s459_s28, 3  ;;  %v469_v18 = vmov 0.0   ;;  %s96_s28 = sadd.s32 1, %s459_s28   ;;  %s459_s28 = sphi %s457_s28, %s96_s28  }
  0x21   : > { %vm101_vm1 = vcmp.eq.s32.totalorder %v97_v17, %v80_v10  ;;  %s103_s30 = scalar_lea.vmem [#allocation1], %s382_s29  ;;  %p93_p1 = scmp.ge.s32.totalorder %s96_s28, 8  }
  0x22   : > { %v104_v19 = vsel %vm101_vm1, -1.0, %v469_v18  ;;  %v470_v20 = vmov (%p93_p1), 1.0   ;;  %s505_s2 = smov (%p93_p1), 1  }
  0x23   : > { %105 = vst [vmem:[%s103_s30] sm:$0xff] %v104_v19  ;;  %95 = sbr.rel (!%p93_p1) target bundleno = 32 (0x20), region = 156 }
  0x24   :  { %106 = vst [vmem:[#allocation1] sm:$0x1] (%p93_p1), %v470_v20 }
  0x28 LB: > { %s383_s3 = sshll.u32 %s463_s2, 3  ;;  %s515_s5 = scalar_lea.vmem [#allocation1], %s463_s2  ;;  %s463_s2 = sphi %s505_s2, %s112_s2  }
  0x29   : > { %s114_s4 = scalar_lea.vmem [#allocation2], %s383_s3  ;;  %s112_s2 = sadd.s32 1, %s463_s2  }
  0x2a   : > { %v511_v22 = vld [vmem:[%s114_s4] sm:$0xff]  ;;  %p109_p2 = scmp.ge.s32.totalorder %s112_s2, 8  }
  0x2b   : > { %v116_v21 = vld [vmem:[#allocation1] sm:$0xff]  ;;  %s465_s6 = smov (%p109_p2), 0  }
  0x2c   : > { %v117_v23 = vmul.f32 %v116_v21, %v511_v22 }
  0x2e   : > { %v119_v24 = vrot.slane %v117_v23, 4 }
  0x30   : > { %v120_v25 = vadd.f32 %v119_v24, %v117_v23 }
  0x32   : > { %v121_v26 = vrot.slane %v120_v25, 2 }
  0x34   : > { %v122_v27 = vadd.f32 %v121_v26, %v120_v25 }
  0x36   : > { %v123_v28 = vrot.slane %v122_v27, 1 }
  0x38   : > { %v124_v29 = vadd.f32 %v123_v28, %v122_v27 }
  0x3a   : > { %125 = vst [vmem:[%s515_s5] sm:$0x1] %v124_v29 }
  0x41   : > { %v130_v30 = vld [vmem:[#allocation1 + $0x8] sm:$0xff] }
  0x42   : > { %v131_v31 = vmul.f32 %v130_v30, %v511_v22 }
  0x44   : > { %v134_v32 = vrot.slane %v131_v31, 4 }
  0x46   : > { %v135_v33 = vadd.f32 %v134_v32, %v131_v31 }
  0x48   : > { %v136_v34 = vrot.slane %v135_v33, 2 }
  0x4a   : > { %v137_v35 = vadd.f32 %v136_v34, %v135_v33 }
  0x4c   : > { %v138_v36 = vrot.slane %v137_v35, 1 }
  0x4e   : > { %v139_v37 = vadd.f32 %v138_v36, %v137_v35 }
  0x50   : > { %385 = vst [vmem:[%s515_s5 + $0x8] sm:$0x1] %v139_v37 }
  0x57   : > { %v145_v38 = vld [vmem:[#allocation1 + $0x10] sm:$0xff] }
  0x58   : > { %v146_v39 = vmul.f32 %v145_v38, %v511_v22 }
  0x5a   : > { %v149_v40 = vrot.slane %v146_v39, 4 }
  0x5c   : > { %v150_v41 = vadd.f32 %v149_v40, %v146_v39 }
  0x5e   : > { %v151_v42 = vrot.slane %v150_v41, 2 }
  0x60   : > { %v152_v43 = vadd.f32 %v151_v42, %v150_v41 }
  0x62   : > { %v153_v44 = vrot.slane %v152_v43, 1 }
  0x64   : > { %v154_v45 = vadd.f32 %v153_v44, %v152_v43 }
  0x66   : > { %387 = vst [vmem:[%s515_s5 + $0x10] sm:$0x1] %v154_v45 }
  0x6d   : > { %v160_v46 = vld [vmem:[#allocation1 + $0x18] sm:$0xff] }
  0x6e   : > { %v161_v47 = vmul.f32 %v160_v46, %v511_v22 }
  0x70   : > { %v164_v48 = vrot.slane %v161_v47, 4 }
  0x72   : > { %v165_v49 = vadd.f32 %v164_v48, %v161_v47 }
  0x74   : > { %v166_v50 = vrot.slane %v165_v49, 2 }
  0x76   : > { %v167_v51 = vadd.f32 %v166_v50, %v165_v49 }
  0x78   : > { %v168_v52 = vrot.slane %v167_v51, 1 }
  0x7a   : > { %v169_v53 = vadd.f32 %v168_v52, %v167_v51 }
  0x7c   : > { %389 = vst [vmem:[%s515_s5 + $0x18] sm:$0x1] %v169_v53 }
  0x83   : > { %v175_v54 = vld [vmem:[#allocation1 + $0x20] sm:$0xff] }
  0x84   : > { %v176_v55 = vmul.f32 %v175_v54, %v511_v22 }
  0x86   : > { %v179_v56 = vrot.slane %v176_v55, 4 }
  0x88   : > { %v180_v57 = vadd.f32 %v179_v56, %v176_v55 }
  0x8a   : > { %v181_v58 = vrot.slane %v180_v57, 2 }
  0x8c   : > { %v182_v59 = vadd.f32 %v181_v58, %v180_v57 }
  0x8e   : > { %v183_v60 = vrot.slane %v182_v59, 1 }
  0x90   : > { %v184_v61 = vadd.f32 %v183_v60, %v182_v59 }
  0x92   : > { %391 = vst [vmem:[%s515_s5 + $0x20] sm:$0x1] %v184_v61 }
  0x99   : > { %v190_v62 = vld [vmem:[#allocation1 + $0x28] sm:$0xff] }
  0x9a   : > { %v191_v63 = vmul.f32 %v190_v62, %v511_v22 }
  0x9c   : > { %v194_v0 = vrot.slane %v191_v63, 4 }
  0x9e   : > { %v195_v1 = vadd.f32 %v194_v0, %v191_v63 }
  0xa0   : > { %v196_v2 = vrot.slane %v195_v1, 2 }
  0xa2   : > { %v197_v3 = vadd.f32 %v196_v2, %v195_v1 }
  0xa4   : > { %v198_v4 = vrot.slane %v197_v3, 1 }
  0xa6   : > { %v199_v5 = vadd.f32 %v198_v4, %v197_v3 }
  0xa8   : > { %393 = vst [vmem:[%s515_s5 + $0x28] sm:$0x1] %v199_v5 }
  0xaf   : > { %v205_v6 = vld [vmem:[#allocation1 + $0x30] sm:$0xff] }
  0xb0   : > { %v206_v7 = vmul.f32 %v205_v6, %v511_v22 }
  0xb2   : > { %v209_v8 = vrot.slane %v206_v7, 4 }
  0xb4   : > { %v210_v9 = vadd.f32 %v209_v8, %v206_v7 }
  0xb6   : > { %v211_v10 = vrot.slane %v210_v9, 2 }
  0xb8   : > { %v212_v11 = vadd.f32 %v211_v10, %v210_v9 }
  0xba   : > { %v213_v12 = vrot.slane %v212_v11, 1 }
  0xbc   : > { %v214_v13 = vadd.f32 %v213_v12, %v212_v11 }
  0xbe   : > { %395 = vst [vmem:[%s515_s5 + $0x30] sm:$0x1] %v214_v13 }
  0xc5   : > { %v220_v14 = vld [vmem:[#allocation1 + $0x38] sm:$0xff] }
  0xc6   : > { %v221_v15 = vmul.f32 %v220_v14, %v511_v22 }
  0xc8   : > { %v224_v16 = vrot.slane %v221_v15, 4 }
  0xca   : > { %v225_v17 = vadd.f32 %v224_v16, %v221_v15 }
  0xcc   : > { %v226_v18 = vrot.slane %v225_v17, 2 }
  0xce   : > { %v227_v19 = vadd.f32 %v226_v18, %v225_v17 }
  0xd0   : > { %v228_v20 = vrot.slane %v227_v19, 1  ;;  %111 = sbr.rel (!%p109_p2) target bundleno = 40 (0x28), region = 167 }
  0xd2   : > { %v229_v21 = vadd.f32 %v228_v20, %v227_v19 }
  0xd4   : > { %397 = vst [vmem:[%s515_s5 + $0x38] sm:$0x1] %v229_v21 }
  0xd5 LB: > { %s237_s7 = scalar_lea.vmem [#allocation3], %s467_s6  ;;  %s398_s8 = sshll.u32 %s467_s6, 3  ;;  %s467_s6 = sphi %s465_s6, %s236_s6  }
  0xd6   : > { %v238_v23 = vld [vmem:[%s237_s7] ss:$0 sm:$0xff]  ;;  %s240_s9 = scalar_lea.vmem [#allocation1], %s398_s8  ;;  %s236_s6 = sadd.s32 1, %s467_s6  }
  0xd7   : > { %435 = vrcp.f32 %v238_v23  ;;  %vm244_vm2 = vweird.f32 %v238_v23  ;;  %p233_p3 = scmp.ge.s32.totalorder %s236_s6, 8  }
  0xdb   : > { %v241_v22 = vld [vmem:[%s240_s9] sm:$0xff] }
  0xe4   : > { %v436_v24 = vpop.eup %435  ;;  %235 = sbr.rel (!%p233_p3) target bundleno = 213 (0xd5), region = 178 }
  0xe5   : > { %v243_v25 = vmul.f32 %v436_v24, %v241_v22 }
  0xe7   : > { %v245_v26 = vsel %vm244_vm2, %v241_v22, %v243_v25 }
  0xe8   : > { %246 = vst [vmem:[%s240_s9] sm:$0xff] %v245_v26 }
  0xef   :  { %v289_v27 = vld [vmem:[#allocation1] sm:$0xff]  ;;  %v291_v28 = vld [vmem:[#allocation1 + $0x8] sm:$0xff]  ;;  %v293_v29 = vld [vmem:[#allocation1 + $0x10] sm:$0xff] }
  0xf0   :  { %290 = vst [vmem:[%s560_s1] sm:$0xff] %v289_v27  ;;  %292 = vst [vmem:[%s560_s1 + $0x8] sm:$0xff] %v291_v28  ;;  %v295_v30 = vld [vmem:[#allocation1 + $0x18] sm:$0xff]  ;;  %v297_v31 = vld [vmem:[#allocation1 + $0x20] sm:$0xff] }
  0xf1   :  { %294 = vst [vmem:[%s560_s1 + $0x10] sm:$0xff] %v293_v29  ;;  %v299_v32 = vld [vmem:[#allocation1 + $0x28] sm:$0xff]  ;;  %296 = vst [vmem:[%s560_s1 + $0x18] sm:$0xff] %v295_v30  ;;  %v301_v33 = vld [vmem:[#allocation1 + $0x30] sm:$0xff] }
  0xf2   :  { %298 = vst [vmem:[%s560_s1 + $0x20] sm:$0xff] %v297_v31  ;;  %300 = vst [vmem:[%s560_s1 + $0x28] sm:$0xff] %v299_v32  ;;  %v303_v34 = vld [vmem:[#allocation1 + $0x38] sm:$0xff] }
  0xf3   :  { %302 = vst [vmem:[%s560_s1 + $0x30] sm:$0xff] %v301_v33  ;;  %304 = vst [vmem:[%s560_s1 + $0x38] sm:$0xff] %v303_v34 }

// kernel: custom-call.23
= control target key start
LH: loop header
LB: loop body
LE: loop exit
PB: predicated region body
PF: predicated region fallthrough
CT: control target
= control target key end

     0   :  { %s455_s22 = smov 0   ;;  %s560_s0 = inlined_call_operand.vmem [shape: f32[128,1,8,8], index: 0, kind: input, shape index: {}]   ;;  %s561_s1 = inlined_call_operand.vmem [shape: f32[128,1,8,8], index: 1, kind: output, shape index: {}]  }
   0x1   :  { %v44_v0 = vld [vmem:[%s560_s0] sm:$0xff]  ;;  %v46_v1 = vld [vmem:[%s560_s0 + $0x8] sm:$0xff]  ;;  %v48_v2 = vld [vmem:[%s560_s0 + $0x10] sm:$0xff] }
   0x2   :  { %45 = vst [vmem:[#allocation0] sm:$0xff] %v44_v0  ;;  %47 = vst [vmem:[#allocation0 + $0x8] sm:$0xff] %v46_v1  ;;  %v50_v3 = vld [vmem:[%s560_s0 + $0x18] sm:$0xff]  ;;  %v52_v4 = vld [vmem:[%s560_s0 + $0x20] sm:$0xff] }
   0x3   :  { %49 = vst [vmem:[#allocation0 + $0x10] sm:$0xff] %v48_v2  ;;  %v54_v5 = vld [vmem:[%s560_s0 + $0x28] sm:$0xff]  ;;  %51 = vst [vmem:[#allocation0 + $0x18] sm:$0xff] %v50_v3  ;;  %v56_v6 = vld [vmem:[%s560_s0 + $0x30] sm:$0xff] }
   0x4   :  { %53 = vst [vmem:[#allocation0 + $0x20] sm:$0xff] %v52_v4  ;;  %55 = vst [vmem:[#allocation0 + $0x28] sm:$0xff] %v54_v5  ;;  %v58_v7 = vld [vmem:[%s560_s0 + $0x38] sm:$0xff] }
   0x5   :  { %57 = vst [vmem:[#allocation0 + $0x30] sm:$0xff] %v56_v6  ;;  %59 = vst [vmem:[#allocation0 + $0x38] sm:$0xff] %v58_v7 }
   0x6 LB: > { %s382_s23 = sshll.u32 %s457_s22, 3  ;;  %s73_s26 = scalar_lea.vmem [#allocation3], %s457_s22  ;;  %v79_v9 = vlaneseq  ;;  %v82_v11 = vstv %s457_s22  ;;  %s457_s22 = sphi %s455_s22, %s68_s22  }
   0x7   : > { %s70_s24 = sadd.s32 %s457_s22, %s382_s23  ;;  %s76_s27 = scalar_lea.vmem [#allocation0], %s382_s23 }
   0x8   : > { %s71_s25 = scalar_lea.vmem [#allocation0], %s70_s24  ;;  %v80_v10 = vshrl.u32 %v79_v9, 7  ;;  %s77_s0 = scalar_lea.vmem [#allocation2], %s382_s23 }
   0x9   : > { %s68_s22 = sadd.s32 1, %s457_s22  }
   0xa   : > { %vm83_vm0 = vcmp.le.s32.totalorder %v82_v11, %v80_v10  ;;  %p65_p0 = scmp.ge.s32.totalorder %s68_s22, 8  }
   0xb   :  { %s459_s28 = smov (%p65_p0), 0  }
   0xc   : > { %v72_v8 = vld [vmem:[%s71_s25] ss:$0 sm:$0xff] }
   0xd   : > { %74 = vst [vmem:[%s73_s26] sm:$0x1] %v72_v8  ;;  %435 = vrcp.f32 %v72_v8  ;;  %v78_v12 = vld [vmem:[%s76_s27] sm:$0xff] }
   0xe   : > { %v86_v13 = vsel %vm83_vm0, %v78_v12, 0.0 }
  0x1a   : > { %v436_v14 = vpop.eup %435 }
  0x1b   : > { %v88_v15 = vmul.f32 %v436_v14, %v86_v13  ;;  %67 = sbr.rel (!%p65_p0) target bundleno = 6 (0x6), region = 146 }
  0x1d   : > { %v89_v16 = vxor.u32 2147483648, %v88_v15 }
  0x1f   : > { %90 = vst [vmem:[%s77_s0] sm:$0xff] %v89_v16 }
  0x20 LB: > { %v97_v17 = vstv %s461_s28  ;;  %s384_s29 = sshll.u32 %s461_s28, 3  ;;  %v471_v18 = vmov 0.0   ;;  %s96_s28 = sadd.s32 1, %s461_s28   ;;  %s461_s28 = sphi %s459_s28, %s96_s28  }
  0x21   : > { %vm101_vm1 = vcmp.eq.s32.totalorder %v97_v17, %v80_v10  ;;  %s103_s30 = scalar_lea.vmem [#allocation1], %s384_s29  ;;  %p93_p1 = scmp.ge.s32.totalorder %s96_s28, 8  }
  0x22   : > { %v104_v19 = vsel %vm101_vm1, -1.0, %v471_v18  ;;  %v472_v20 = vmov (%p93_p1), 1.0   ;;  %s507_s2 = smov (%p93_p1), 1  }
  0x23   : > { %105 = vst [vmem:[%s103_s30] sm:$0xff] %v104_v19  ;;  %95 = sbr.rel (!%p93_p1) target bundleno = 32 (0x20), region = 157 }
  0x24   :  { %107 = vst [vmem:[#allocation1 + $0x3f] sm:$0x1] (%p93_p1), %v472_v20 }
  0x28 LB: > { %s114_s3 = ssub.s32 7, %s465_s2  ;;  %s113_s2 = sadd.s32 1, %s465_s2   ;;  %s465_s2 = sphi %s507_s2, %s113_s2  }
  0x29   : > { %s385_s4 = sshll.u32 %s114_s3, 3  ;;  %s516_s6 = scalar_lea.vmem [#allocation1], %s114_s3 }
  0x2a   : > { %v118_v21 = vld [vmem:[#allocation1] sm:$0xff]  ;;  %s116_s5 = scalar_lea.vmem [#allocation2], %s385_s4  ;;  %p110_p2 = scmp.ge.s32.totalorder %s113_s2, 8  }
  0x2b   : > { %v513_v22 = vld [vmem:[%s116_s5] sm:$0xff]  ;;  %s467_s7 = smov (%p110_p2), 0  }
  0x2c   : > { %v119_v23 = vmul.f32 %v118_v21, %v513_v22 }
  0x2e   : > { %v121_v24 = vrot.slane %v119_v23, 4 }
  0x30   : > { %v122_v25 = vadd.f32 %v121_v24, %v119_v23 }
  0x32   : > { %v123_v26 = vrot.slane %v122_v25, 2 }
  0x34   : > { %v124_v27 = vadd.f32 %v123_v26, %v122_v25 }
  0x36   : > { %v125_v28 = vrot.slane %v124_v27, 1 }
  0x38   : > { %v126_v29 = vadd.f32 %v125_v28, %v124_v27 }
  0x3a   : > { %127 = vst [vmem:[%s516_s6] sm:$0x1] %v126_v29 }
  0x41   : > { %v132_v30 = vld [vmem:[#allocation1 + $0x8] sm:$0xff] }
  0x42   : > { %v133_v31 = vmul.f32 %v132_v30, %v513_v22 }
  0x44   : > { %v136_v32 = vrot.slane %v133_v31, 4 }
  0x46   : > { %v137_v33 = vadd.f32 %v136_v32, %v133_v31 }
  0x48   : > { %v138_v34 = vrot.slane %v137_v33, 2 }
  0x4a   : > { %v139_v35 = vadd.f32 %v138_v34, %v137_v33 }
  0x4c   : > { %v140_v36 = vrot.slane %v139_v35, 1 }
  0x4e   : > { %v141_v37 = vadd.f32 %v140_v36, %v139_v35 }
  0x50   : > { %387 = vst [vmem:[%s516_s6 + $0x8] sm:$0x1] %v141_v37 }
  0x57   : > { %v147_v38 = vld [vmem:[#allocation1 + $0x10] sm:$0xff] }
  0x58   : > { %v148_v39 = vmul.f32 %v147_v38, %v513_v22 }
  0x5a   : > { %v151_v40 = vrot.slane %v148_v39, 4 }
  0x5c   : > { %v152_v41 = vadd.f32 %v151_v40, %v148_v39 }
  0x5e   : > { %v153_v42 = vrot.slane %v152_v41, 2 }
  0x60   : > { %v154_v43 = vadd.f32 %v153_v42, %v152_v41 }
  0x62   : > { %v155_v44 = vrot.slane %v154_v43, 1 }
  0x64   : > { %v156_v45 = vadd.f32 %v155_v44, %v154_v43 }
  0x66   : > { %389 = vst [vmem:[%s516_s6 + $0x10] sm:$0x1] %v156_v45 }
  0x6d   : > { %v162_v46 = vld [vmem:[#allocation1 + $0x18] sm:$0xff] }
  0x6e   : > { %v163_v47 = vmul.f32 %v162_v46, %v513_v22 }
  0x70   : > { %v166_v48 = vrot.slane %v163_v47, 4 }
  0x72   : > { %v167_v49 = vadd.f32 %v166_v48, %v163_v47 }
  0x74   : > { %v168_v50 = vrot.slane %v167_v49, 2 }
  0x76   : > { %v169_v51 = vadd.f32 %v168_v50, %v167_v49 }
  0x78   : > { %v170_v52 = vrot.slane %v169_v51, 1 }
  0x7a   : > { %v171_v53 = vadd.f32 %v170_v52, %v169_v51 }
  0x7c   : > { %391 = vst [vmem:[%s516_s6 + $0x18] sm:$0x1] %v171_v53 }
  0x83   : > { %v177_v54 = vld [vmem:[#allocation1 + $0x20] sm:$0xff] }
  0x84   : > { %v178_v55 = vmul.f32 %v177_v54, %v513_v22 }
  0x86   : > { %v181_v56 = vrot.slane %v178_v55, 4 }
  0x88   : > { %v182_v57 = vadd.f32 %v181_v56, %v178_v55 }
  0x8a   : > { %v183_v58 = vrot.slane %v182_v57, 2 }
  0x8c   : > { %v184_v59 = vadd.f32 %v183_v58, %v182_v57 }
  0x8e   : > { %v185_v60 = vrot.slane %v184_v59, 1 }
  0x90   : > { %v186_v61 = vadd.f32 %v185_v60, %v184_v59 }
  0x92   : > { %393 = vst [vmem:[%s516_s6 + $0x20] sm:$0x1] %v186_v61 }
  0x99   : > { %v192_v62 = vld [vmem:[#allocation1 + $0x28] sm:$0xff] }
  0x9a   : > { %v193_v63 = vmul.f32 %v192_v62, %v513_v22 }
  0x9c   : > { %v196_v0 = vrot.slane %v193_v63, 4 }
  0x9e   : > { %v197_v1 = vadd.f32 %v196_v0, %v193_v63 }
  0xa0   : > { %v198_v2 = vrot.slane %v197_v1, 2 }
  0xa2   : > { %v199_v3 = vadd.f32 %v198_v2, %v197_v1 }
  0xa4   : > { %v200_v4 = vrot.slane %v199_v3, 1 }
  0xa6   : > { %v201_v5 = vadd.f32 %v200_v4, %v199_v3 }
  0xa8   : > { %395 = vst [vmem:[%s516_s6 + $0x28] sm:$0x1] %v201_v5 }
  0xaf   : > { %v207_v6 = vld [vmem:[#allocation1 + $0x30] sm:$0xff] }
  0xb0   : > { %v208_v7 = vmul.f32 %v207_v6, %v513_v22 }
  0xb2   : > { %v211_v8 = vrot.slane %v208_v7, 4 }
  0xb4   : > { %v212_v9 = vadd.f32 %v211_v8, %v208_v7 }
  0xb6   : > { %v213_v10 = vrot.slane %v212_v9, 2 }
  0xb8   : > { %v214_v11 = vadd.f32 %v213_v10, %v212_v9 }
  0xba   : > { %v215_v12 = vrot.slane %v214_v11, 1 }
  0xbc   : > { %v216_v13 = vadd.f32 %v215_v12, %v214_v11 }
  0xbe   : > { %397 = vst [vmem:[%s516_s6 + $0x30] sm:$0x1] %v216_v13 }
  0xc5   : > { %v222_v14 = vld [vmem:[#allocation1 + $0x38] sm:$0xff] }
  0xc6   : > { %v223_v15 = vmul.f32 %v222_v14, %v513_v22 }
  0xc8   : > { %v226_v16 = vrot.slane %v223_v15, 4 }
  0xca   : > { %v227_v17 = vadd.f32 %v226_v16, %v223_v15 }
  0xcc   : > { %v228_v18 = vrot.slane %v227_v17, 2 }
  0xce   : > { %v229_v19 = vadd.f32 %v228_v18, %v227_v17 }
  0xd0   : > { %v230_v20 = vrot.slane %v229_v19, 1  ;;  %112 = sbr.rel (!%p110_p2) target bundleno = 40 (0x28), region = 168 }
  0xd2   : > { %v231_v21 = vadd.f32 %v230_v20, %v229_v19 }
  0xd4   : > { %399 = vst [vmem:[%s516_s6 + $0x38] sm:$0x1] %v231_v21 }
  0xd5 LB: > { %s239_s8 = scalar_lea.vmem [#allocation3], %s469_s7  ;;  %s400_s9 = sshll.u32 %s469_s7, 3  ;;  %s469_s7 = sphi %s467_s7, %s238_s7  }
  0xd6   : > { %v240_v23 = vld [vmem:[%s239_s8] ss:$0 sm:$0xff]  ;;  %s242_s10 = scalar_lea.vmem [#allocation1], %s400_s9  ;;  %s238_s7 = sadd.s32 1, %s469_s7  }
  0xd7   : > { %437 = vrcp.f32 %v240_v23  ;;  %vm246_vm2 = vweird.f32 %v240_v23  ;;  %p235_p3 = scmp.ge.s32.totalorder %s238_s7, 8  }
  0xdb   : > { %v243_v22 = vld [vmem:[%s242_s10] sm:$0xff] }
  0xe4   : > { %v438_v24 = vpop.eup %437  ;;  %237 = sbr.rel (!%p235_p3) target bundleno = 213 (0xd5), region = 179 }
  0xe5   : > { %v245_v25 = vmul.f32 %v438_v24, %v243_v22 }
  0xe7   : > { %v247_v26 = vsel %vm246_vm2, %v243_v22, %v245_v25 }
  0xe8   : > { %248 = vst [vmem:[%s242_s10] sm:$0xff] %v247_v26 }
  0xef   :  { %v291_v27 = vld [vmem:[#allocation1] sm:$0xff]  ;;  %v293_v28 = vld [vmem:[#allocation1 + $0x8] sm:$0xff]  ;;  %v295_v29 = vld [vmem:[#allocation1 + $0x10] sm:$0xff] }
  0xf0   :  { %292 = vst [vmem:[%s561_s1] sm:$0xff] %v291_v27  ;;  %294 = vst [vmem:[%s561_s1 + $0x8] sm:$0xff] %v293_v28  ;;  %v297_v30 = vld [vmem:[#allocation1 + $0x18] sm:$0xff]  ;;  %v299_v31 = vld [vmem:[#allocation1 + $0x20] sm:$0xff] }
  0xf1   :  { %296 = vst [vmem:[%s561_s1 + $0x10] sm:$0xff] %v295_v29  ;;  %v301_v32 = vld [vmem:[#allocation1 + $0x28] sm:$0xff]  ;;  %298 = vst [vmem:[%s561_s1 + $0x18] sm:$0xff] %v297_v30  ;;  %v303_v33 = vld [vmem:[#allocation1 + $0x30] sm:$0xff] }
  0xf2   :  { %300 = vst [vmem:[%s561_s1 + $0x20] sm:$0xff] %v299_v31  ;;  %302 = vst [vmem:[%s561_s1 + $0x28] sm:$0xff] %v301_v32  ;;  %v305_v34 = vld [vmem:[#allocation1 + $0x38] sm:$0xff] }
  0xf3   :  { %304 = vst [vmem:[%s561_s1 + $0x30] sm:$0xff] %v303_v33  ;;  %306 = vst [vmem:[%s561_s1 + $0x38] sm:$0xff] %v305_v34 }

// kernel: group_elements_forward.4
= control target key start
LH: loop header
LB: loop body
LE: loop exit
PB: predicated region body
PF: predicated region fallthrough
CT: control target
= control target key end

     0   :  { %v762_v3 = vmov 0.0   ;;  %vm49_vm0 = vcmask 64512   ;;  %vm600_vm1 = vcmask 261120   ;;  %v590_v60 = vlaneseq  ;;  %s1050_s1 = inlined_call_operand.vmem [shape: f32[8,1024], index: 1, kind: input, shape index: {}]   ;;  %s1051_s0 = inlined_call_operand.vmem [shape: f32[8,8], index: 0, kind: input, shape index: {}]   ;;  %s1052_s4 = inlined_call_operand.vmem [shape: f32[8,128], index: 4, kind: input, shape index: {}]   ;;  %s1053_s3 = inlined_call_operand.vmem [shape: f32[128,8], index: 3, kind: input, shape index: {}]   ;;  %s1054_s6 = inlined_call_operand.vmem [shape: f32[32,144], index: 6, kind: input, shape index: {}]   ;;  %s1055_s5 = inlined_call_operand.vmem [shape: f32[4,32], index: 5, kind: input, shape index: {}]   ;;  %s1056_s2 = inlined_call_operand.vmem [shape: f32[8,1024], index: 2, kind: input, shape index: {}]   ;;  %s1057_s8 = inlined_call_operand.vmem [shape: f32[8,1024], index: 8, kind: output, shape index: {0}]   ;;  %s1058_s9 = inlined_call_operand.vmem [shape: f32[128,128], index: 9, kind: output, shape index: {1}]   ;;  %s1059_s7 = inlined_call_operand.vmem [shape: f32[1,144], index: 7, kind: input, shape index: {}]   ;;  %s1060_s10 = inlined_call_operand.vmem [shape: f32[4,144], index: 10, kind: output, shape index: {2}]  }
   0x1   :  { %v42_v0 = vld [vmem:[%s1050_s1 + $0x8] sm:$0xff]  ;;  %v44_v1 = vld [vmem:[%s1050_s1 + $0x18] sm:$0xff]  ;;  %v41_v2 = vld [vmem:[%s1050_s1] sm:$0xff]  ;;  %117 = vmatprep.mubr.f32.mxu0 %v762_v3  ;;  %188 = vmatprep.mubr.f32.mxu1 %v762_v3  ;;  %vm679_vm2 = vcmask 1043456   ;;  %vm680_vm3 = vcmask 130052  }
   0x2   :  { %83 = vmatprep.subr.mxu0 %v42_v0  ;;  %154 = vmatprep.subr.mxu1 %v44_v1  ;;  %v43_v4 = vld [vmem:[%s1050_s1 + $0x10] sm:$0xff]  ;;  %v40_v5 = vld [vmem:[%s1051_s0] sm:$0xff]  ;;  %v46_v6 = vld [vmem:[%s1050_s1 + $0x28] sm:$0xff]  ;;  %v591_v1 = vshrl.u32 %v590_v60, 7 }
   0x3   :  { %84 = vmatpush1.msra.mxu0 %v41_v2  ;;  %155 = vmatpush1.msra.mxu1 %v43_v4  ;;  %v48_v7 = vld [vmem:[%s1050_s1 + $0x38] sm:$0xff]  ;;  %v45_v8 = vld [vmem:[%s1050_s1 + $0x20] sm:$0xff]  ;;  %v47_v9 = vld [vmem:[%s1050_s1 + $0x30] sm:$0xff] }
   0x4   :  { %695 = vmatmul.mubr.msk.f32.vlgmr.msra.gmra.mxu0 %vm49_vm0, %v40_v5  ;;  %696 = vmatmul.mubr.msk.f32.vlgmr.msra.gmra.mxu1 %vm49_vm0, %v40_v5  ;;  %v369_v10 = vld [vmem:[%s1052_s4] sm:$0xff]  ;;  %v363_v12 = vld [vmem:[%s1053_s3 + $0x50] sm:$0xff]  ;;  %v354_v13 = vld [vmem:[%s1053_s3 + $0x8] sm:$0xff] }
   0x5   :  { %225 = vmatprep.subr.mxu0 %v46_v6  ;;  %296 = vmatprep.subr.mxu1 %v48_v7  ;;  %v353_v11 = vld [vmem:[%s1053_s3] sm:$0xff]  ;;  %v364_v14 = vld [vmem:[%s1053_s3 + $0x58] sm:$0xff]  ;;  %v355_v16 = vld [vmem:[%s1053_s3 + $0x10] sm:$0xff]  ;;  %v592_v6 = vsub.s32 0, %v591_v1  ;;  %v596_v7 = vsub.s32 1, %v591_v1 }
   0x6   :  { %226 = vmatpush1.msra.mxu0 %v45_v8  ;;  %297 = vmatpush1.msra.mxu1 %v47_v9  ;;  %v587_v15 = vld [vmem:[%s1054_s6 + $0x38] sm:$0xff]  ;;  %v586_v17 = vld [vmem:[%s1054_s6 + $0x30] sm:$0xff]  ;;  %v365_v18 = vld [vmem:[%s1053_s3 + $0x60] sm:$0xff] }
   0x7   :  { %259 = vmatprep.mubr.f32.mxu0 %v762_v3  ;;  %330 = vmatprep.mubr.f32.mxu1 %v762_v3  ;;  %v585_v19 = vld [vmem:[%s1054_s6 + $0x28] sm:$0xff]  ;;  %v356_v20 = vld [vmem:[%s1053_s3 + $0x18] sm:$0xff]  ;;  %v584_v22 = vld [vmem:[%s1054_s6 + $0x20] sm:$0xff] }
   0x8   :  { %697 = vmatmul.mubr.msk.f32.vlgmr.msra.gmra.mxu0 %vm49_vm0, %v40_v5  ;;  %698 = vmatmul.mubr.msk.f32.vlgmr.msra.gmra.mxu1 %vm49_vm0, %v40_v5  ;;  %v366_v21 = vld [vmem:[%s1053_s3 + $0x68] sm:$0xff]  ;;  %v357_v23 = vld [vmem:[%s1053_s3 + $0x20] sm:$0xff]  ;;  %v583_v24 = vld [vmem:[%s1054_s6 + $0x18] sm:$0xff] }
   0x9   :  { %733 = vmatprep.subr.mxu0 %v369_v10  ;;  %759 = vmatprep.subr.mxu1 %v369_v10  ;;  %v367_v25 = vld [vmem:[%s1053_s3 + $0x70] sm:$0xff]  ;;  %v358_v27 = vld [vmem:[%s1053_s3 + $0x28] sm:$0xff]  ;;  %v368_v28 = vld [vmem:[%s1053_s3 + $0x78] sm:$0xff] }
   0xa   :  { %734 = vmatpush3.msra.mxu0 %v369_v10  ;;  %760 = vmatpush3.msra.mxu1 %v369_v10  ;;  %v582_v26 = vld [vmem:[%s1054_s6 + $0x10] sm:$0xff]  ;;  %v581_v29 = vld [vmem:[%s1054_s6 + $0x8] sm:$0xff]  ;;  %v580_v31 = vld [vmem:[%s1054_s6] sm:$0xff] }
   0xb   :  { %735 = vmatprep.mubr.msk.f32.mxu0 %vm49_vm0, %v353_v11  ;;  %750 = vmatprep.mubr.msk.f32.mxu1 %vm49_vm0, %v363_v12  ;;  %v359_v30 = vld [vmem:[%s1053_s3 + $0x30] sm:$0xff]  ;;  %v360_v32 = vld [vmem:[%s1053_s3 + $0x38] sm:$0xff]  ;;  %v579_v33 = vld [vmem:[%s1055_s5] sm:$0xf] }
   0xc   :  { %736 = vmatmul.mubr.msk.f32.vlgmr.msra.gmra.mxu0 %vm49_vm0, %v354_v13  ;;  %751 = vmatmul.mubr.msk.f32.vlgmr.msra.gmra.mxu1 %vm49_vm0, %v364_v14  ;;  %v361_v34 = vld [vmem:[%s1053_s3 + $0x40] sm:$0xff]  ;;  %v362_v35 = vld [vmem:[%s1053_s3 + $0x48] sm:$0xff]  ;;  %v34_v37 = vld [vmem:[%s1056_s2 + $0x10] sm:$0xff] }
   0xd   :  { %628 = vmatprep.subr.mxu1 %v587_v15  ;;  %738 = vmatprep.mubr.msk.f32.mxu0 %vm49_vm0, %v355_v16  ;;  %v32_v36 = vld [vmem:[%s1056_s2] sm:$0xff]  ;;  %v33_v40 = vld [vmem:[%s1056_s2 + $0x8] sm:$0xff]  ;;  %v35_v41 = vld [vmem:[%s1056_s2 + $0x18] sm:$0xff] }
   0xe   :  { %629 = vmatpush1.msra.mxu1 %v586_v17  ;;  %753 = vmatprep.mubr.msk.f32.mxu1 %vm49_vm0, %v365_v18  ;;  %v36_v46 = vld [vmem:[%s1056_s2 + $0x20] sm:$0xff]  ;;  %v38_v47 = vld [vmem:[%s1056_s2 + $0x30] sm:$0xff]  ;;  %v37_v52 = vld [vmem:[%s1056_s2 + $0x28] sm:$0xff] }
   0xf   :  { %630 = vmatprep.subr.mxu1 %v585_v19  ;;  %v39_v53 = vld [vmem:[%s1056_s2 + $0x38] sm:$0xff]  ;;  %v588_v10 = vld [vmem:[%s1059_s7] sm:$0x3]  ;;  %vm681_vm4 = vmor %vm680_vm3, %vm679_vm2 }
  0x10   :  { %739 = vmatmul.mubr.msk.f32.gmra.mxu0 %vm49_vm0, %v356_v20  ;;  %754 = vmatmul.mubr.msk.f32.gmra.mxu1 %vm49_vm0, %v366_v21  ;;  %v593_v13 = vrot.slane %v588_v10, %v592_v6  ;;  %v597_v14 = vrot.slane %v588_v10, %v596_v7 }
  0x11   :  { %631 = vmatpush1.msra.mxu1 %v584_v22  ;;  %741 = vmatprep.mubr.msk.f32.mxu0 %vm49_vm0, %v357_v23 }
  0x12   :  { %632 = vmatprep.subr.mxu1 %v583_v24  ;;  %756 = vmatprep.mubr.msk.f32.mxu1 %vm49_vm0, %v367_v25 }
  0x13   :  { %633 = vmatpush1.msra.mxu1 %v582_v26 }
  0x14   :  { %742 = vmatmul.mubr.msk.f32.gmra.mxu0 %vm49_vm0, %v358_v27  ;;  %757 = vmatmul.mubr.msk.f32.gmra.mxu1 %vm49_vm0, %v368_v28 }
  0x15   :  { %634 = vmatprep.subr.mxu1 %v581_v29  ;;  %744 = vmatprep.mubr.msk.f32.mxu0 %vm49_vm0, %v359_v30 }
  0x16   :  { %635 = vmatpush1.msra.mxu1 %v580_v31  ;;  %668 = vmatprep.mubr.f32.mxu1 %v762_v3 }
  0x18   :  { %745 = vmatmul.mubr.msk.f32.gmra.mxu0 %vm49_vm0, %v360_v32  ;;  %715 = vmatmul.mubr.msk.f32.vlgmr.msra.gmra.mxu1 %vm600_vm1, %v579_v33 }
  0x19   :  { %747 = vmatprep.mubr.msk.f32.mxu0 %vm49_vm0, %v361_v34 }
  0x1c   :  { %748 = vmatmul.mubr.msk.f32.gmra.mxu0 %vm49_vm0, %v362_v35 }
  0xc4   :  { %v119_v38 = vpop.f32.mrf.mxu0  ;;  %v190_v39 = vpop.f32.mrf.mxu1 }
  0xc5   :  { %v337_v42 = vsub.f32 %v32_v36, %v119_v38  ;;  %v339_v43 = vsub.f32 %v34_v37, %v190_v39 }
  0xc6   :  { %v121_v44 = vpop.f32.mrf.mxu0  ;;  %v192_v45 = vpop.f32.mrf.mxu1 }
  0xc7   :  { %345 = vst [vmem:[%s1057_s8] sm:$0xff] %v337_v42  ;;  %347 = vst [vmem:[%s1057_s8 + $0x10] sm:$0xff] %v339_v43  ;;  %v338_v48 = vsub.f32 %v33_v40, %v121_v44  ;;  %v340_v49 = vsub.f32 %v35_v41, %v192_v45 }
  0xc8   :  { %v261_v50 = vpop.f32.mrf.mxu0  ;;  %v332_v51 = vpop.f32.mrf.mxu1 }
  0xc9   :  { %346 = vst [vmem:[%s1057_s8 + $0x8] sm:$0xff] %v338_v48  ;;  %348 = vst [vmem:[%s1057_s8 + $0x18] sm:$0xff] %v340_v49  ;;  %v341_v54 = vsub.f32 %v36_v46, %v261_v50  ;;  %v343_v55 = vsub.f32 %v38_v47, %v332_v51 }
  0xca   :  { %v263_v56 = vpop.f32.mrf.mxu0  ;;  %v334_v57 = vpop.f32.mrf.mxu1 }
  0xcb   :  { %349 = vst [vmem:[%s1057_s8 + $0x20] sm:$0xff] %v341_v54  ;;  %351 = vst [vmem:[%s1057_s8 + $0x30] sm:$0xff] %v343_v55  ;;  %v342_v58 = vsub.f32 %v37_v52, %v263_v56  ;;  %v344_v59 = vsub.f32 %v39_v53, %v334_v57 }
  0xcc   :  { %v737_v61 = vpop.f32.mrf.mxu0  ;;  %v752_v62 = vpop.f32.mrf.mxu1 }
  0xcd   :  { %350 = vst [vmem:[%s1057_s8 + $0x28] sm:$0xff] %v342_v58  ;;  %352 = vst [vmem:[%s1057_s8 + $0x38] sm:$0xff] %v344_v59 }
  0xce   :  { %564 = vst [vmem:[%s1058_s9 + $0x8] sm:$0xff] %v737_v61  ;;  %574 = vst [vmem:[%s1058_s9 + $0x58] sm:$0xff] %v752_v62  ;;  %v484_v63 = vpop.f32.mrf.mxu0  ;;  %v534_v0 = vpop.f32.mrf.mxu1 }
  0xcf   :  { %563 = vst [vmem:[%s1058_s9] sm:$0xff] %v484_v63  ;;  %573 = vst [vmem:[%s1058_s9 + $0x50] sm:$0xff] %v534_v0 }
  0xd0   :  { %v740_v2 = vpop.f32.mrf.mxu0  ;;  %v755_v3 = vpop.f32.mrf.mxu1 }
  0xd1   :  { %566 = vst [vmem:[%s1058_s9 + $0x18] sm:$0xff] %v740_v2  ;;  %576 = vst [vmem:[%s1058_s9 + $0x68] sm:$0xff] %v755_v3 }
  0xd2   :  { %v494_v4 = vpop.f32.mrf.mxu0  ;;  %v544_v5 = vpop.f32.mrf.mxu1 }
  0xd3   :  { %565 = vst [vmem:[%s1058_s9 + $0x10] sm:$0xff] %v494_v4  ;;  %575 = vst [vmem:[%s1058_s9 + $0x60] sm:$0xff] %v544_v5 }
  0xd4   :  { %v743_v8 = vpop.f32.mrf.mxu0  ;;  %v758_v9 = vpop.f32.mrf.mxu1 }
  0xd5   :  { %568 = vst [vmem:[%s1058_s9 + $0x28] sm:$0xff] %v743_v8  ;;  %578 = vst [vmem:[%s1058_s9 + $0x78] sm:$0xff] %v758_v9 }
  0xd6   :  { %v504_v11 = vpop.f32.mrf.mxu0  ;;  %v554_v12 = vpop.f32.mrf.mxu1 }
  0xd7   :  { %567 = vst [vmem:[%s1058_s9 + $0x20] sm:$0xff] %v504_v11  ;;  %577 = vst [vmem:[%s1058_s9 + $0x70] sm:$0xff] %v554_v12 }
  0xd8   :  { %v746_v15 = vpop.f32.mrf.mxu0  ;;  %v670_v16 = vpop.f32.mrf.mxu1 }
  0xd9   :  { %570 = vst [vmem:[%s1058_s9 + $0x38] sm:$0xff] %v746_v15  ;;  %v671_v19 = vadd.f32 %v670_v16, %v593_v13 }
  0xda   :  { %v514_v17 = vpop.f32.mrf.mxu0  ;;  %v672_v18 = vpop.f32.mrf.mxu1 }
  0xdb   :  { %569 = vst [vmem:[%s1058_s9 + $0x30] sm:$0xff] %v514_v17  ;;  %v673_v20 = vadd.f32 %v672_v18, %v597_v14 }
  0xdc   :  { %v749_v21 = vpop.f32.mrf.mxu0 }
  0xdd   :  { %v677_v22 = vcombine.low %v671_v19, %v673_v20  ;;  %572 = vst [vmem:[%s1058_s9 + $0x48] sm:$0xff] %v749_v21 }
  0xde   :  { %v524_v23 = vpop.f32.mrf.mxu0 }
  0xdf   :  { %682 = vst.msk [vmem:[%s1060_s10] sm:$0xff] %vm681_vm4, %v677_v22  ;;  %571 = vst [vmem:[%s1058_s9 + $0x40] sm:$0xff] %v524_v23 }

// kernel: group_elements_forward.7
= control target key start
LH: loop header
LB: loop body
LE: loop exit
PB: predicated region body
PF: predicated region fallthrough
CT: control target
= control target key end

     0   :  { %10 = vsyncpa [#allocation3], 0  ;;  %vm50_vm0 = vcmask 64512   ;;  %s10604_s0 = inlined_call_operand.vmem [shape: f32[8,128,8], index: 0, kind: input, shape index: {}]   ;;  %s10605_s1 = inlined_call_operand.vmem [shape: f32[64,8], index: 1, kind: input, shape index: {}]   ;;  %s10606_s2 = inlined_call_operand.vmem [shape: f32[64,64], index: 2, kind: input, shape index: {}]   ;;  %s10607_s3 = inlined_call_operand.hbm [shape: f32[1], index: 3, kind: output, shape index: {0}]   ;;  %s10608_s4 = inlined_call_operand.hbm [shape: f32[1], index: 4, kind: output, shape index: {1}]  }
   0x1   :  { %v33_v0 = vld [vmem:[%s10604_s0 + $0x78] sm:$0xff]  ;;  %v32_v1 = vld [vmem:[%s10604_s0 + $0x70] sm:$0xff]  ;;  %v4572_v8 = vld [vmem:[%s10604_s0 + $0xe8] sm:$0xff] }
   0x2   :  { %v4574_v2 = vld [vmem:[%s10604_s0 + $0xf8] sm:$0xff]  ;;  %v49_v3 = vmul.f32 %v33_v0, %v33_v0  ;;  %v48_v4 = vmul.f32 %v32_v1, %v32_v1  ;;  %v4573_v6 = vld [vmem:[%s10604_s0 + $0xf0] sm:$0xff]  ;;  %v31_v9 = vld [vmem:[%s10604_s0 + $0x68] sm:$0xff]  ;;  %v571_v14 = vmul.f32 %v4572_v8, %v4572_v8 }
   0x3   :  { %v573_v5 = vmul.f32 %v4574_v2, %v4574_v2  ;;  %v572_v7 = vmul.f32 %v4573_v6, %v4573_v6  ;;  %v47_v15 = vmul.f32 %v31_v9, %v31_v9  ;;  %v4571_v16 = vld [vmem:[%s10604_s0 + $0xe0] sm:$0xff]  ;;  %v4570_v22 = vld [vmem:[%s10604_s0 + $0xd8] sm:$0xff]  ;;  %v4569_v28 = vld [vmem:[%s10604_s0 + $0xd0] sm:$0xff] }
   0x4   :  { %v96_v10 = vsel %vm50_vm0, %v49_v3, 0.0  ;;  %v93_v11 = vsel %vm50_vm0, %v48_v4, 0.0  ;;  %v30_v17 = vld [vmem:[%s10604_s0 + $0x60] sm:$0xff]  ;;  %v613_v18 = vsel %vm50_vm0, %v571_v14, 0.0  ;;  %v570_v20 = vmul.f32 %v4571_v16, %v4571_v16  ;;  %v29_v23 = vld [vmem:[%s10604_s0 + $0x58] sm:$0xff]  ;;  %v28_v29 = vld [vmem:[%s10604_s0 + $0x50] sm:$0xff] }
   0x5   :  { %97 = vadd.xlane.f32.xlu0 %v96_v10  ;;  %94 = vadd.xlane.f32.xlu1 %v93_v11  ;;  %v619_v12 = vsel %vm50_vm0, %v573_v5, 0.0  ;;  %v616_v13 = vsel %vm50_vm0, %v572_v7, 0.0  ;;  %v90_v19 = vsel %vm50_vm0, %v47_v15, 0.0  ;;  %v46_v21 = vmul.f32 %v30_v17, %v30_v17  ;;  %v4568_v34 = vld [vmem:[%s10604_s0 + $0xc8] sm:$0xff]  ;;  %v4567_v40 = vld [vmem:[%s10604_s0 + $0xc0] sm:$0xff]  ;;  %v4566_v46 = vld [vmem:[%s10604_s0 + $0xb8] sm:$0xff] }
   0x6   :  { %v610_v24 = vsel %vm50_vm0, %v570_v20, 0.0  ;;  %v569_v26 = vmul.f32 %v4570_v22, %v4570_v22  ;;  %v45_v27 = vmul.f32 %v29_v23, %v29_v23  ;;  %v568_v32 = vmul.f32 %v4569_v28, %v4569_v28  ;;  %v27_v35 = vld [vmem:[%s10604_s0 + $0x48] sm:$0xff]  ;;  %v26_v41 = vld [vmem:[%s10604_s0 + $0x40] sm:$0xff]  ;;  %v25_v47 = vld [vmem:[%s10604_s0 + $0x38] sm:$0xff] }
   0x7   :  { %v87_v25 = vsel %vm50_vm0, %v46_v21, 0.0  ;;  %v44_v33 = vmul.f32 %v28_v29, %v28_v29  ;;  %v567_v38 = vmul.f32 %v4568_v34, %v4568_v34  ;;  %v43_v39 = vmul.f32 %v27_v35, %v27_v35 }
   0x8   :  { %v607_v30 = vsel %vm50_vm0, %v569_v26, 0.0  ;;  %v84_v31 = vsel %vm50_vm0, %v45_v27, 0.0  ;;  %v604_v36 = vsel %vm50_vm0, %v568_v32, 0.0  ;;  %v566_v44 = vmul.f32 %v4567_v40, %v4567_v40 }
   0x9   :  { %620 = vadd.xlane.f32.xlu0 %v619_v12  ;;  %617 = vadd.xlane.f32.xlu1 %v616_v13  ;;  %v81_v37 = vsel %vm50_vm0, %v44_v33, 0.0  ;;  %v601_v42 = vsel %vm50_vm0, %v567_v38, 0.0  ;;  %v78_v43 = vsel %vm50_vm0, %v43_v39, 0.0  ;;  %v42_v45 = vmul.f32 %v26_v41, %v26_v41 }
   0xd   :  { %614 = vadd.xlane.f32.xlu1 %v613_v18  ;;  %91 = vadd.xlane.f32.xlu0 %v90_v19 }
  0x11   :  { %611 = vadd.xlane.f32.xlu1 %v610_v24  ;;  %88 = vadd.xlane.f32.xlu0 %v87_v25 }
  0x15   :  { %608 = vadd.xlane.f32.xlu1 %v607_v30  ;;  %85 = vadd.xlane.f32.xlu0 %v84_v31 }
  0x19   :  { %605 = vadd.xlane.f32.xlu1 %v604_v36  ;;  %82 = vadd.xlane.f32.xlu0 %v81_v37 }
  0x1a   :  { %11 = vsyncpa [#allocation5], 0  ;;  %v598_v48 = vsel %vm50_vm0, %v566_v44, 0.0  ;;  %v75_v49 = vsel %vm50_vm0, %v42_v45, 0.0  ;;  %v565_v50 = vmul.f32 %v4566_v46, %v4566_v46  ;;  %v41_v51 = vmul.f32 %v25_v47, %v25_v47  ;;  %v4565_v52 = vld [vmem:[%s10604_s0 + $0xb0] sm:$0xff]  ;;  %v4564_v58 = vld [vmem:[%s10604_s0 + $0xa8] sm:$0xff] }
  0x1b   :  { %v24_v53 = vld [vmem:[%s10604_s0 + $0x30] sm:$0xff]  ;;  %v564_v56 = vmul.f32 %v4565_v52, %v4565_v52  ;;  %v23_v59 = vld [vmem:[%s10604_s0 + $0x28] sm:$0xff]  ;;  %v563_v62 = vmul.f32 %v4564_v58, %v4564_v58  ;;  %v4563_v0 = vld [vmem:[%s10604_s0 + $0xa0] sm:$0xff]  ;;  %s6651_s16 = smov [#allocation2]   ;;  %s6652_s19 = smov [#allocation4]  }
  0x1c   :  { %v595_v54 = vsel %vm50_vm0, %v565_v50, 0.0  ;;  %v72_v55 = vsel %vm50_vm0, %v41_v51, 0.0  ;;  %v40_v57 = vmul.f32 %v24_v53, %v24_v53  ;;  %v39_v63 = vmul.f32 %v23_v59, %v23_v59  ;;  %v22_v1 = vld [vmem:[%s10604_s0 + $0x20] sm:$0xff]  ;;  %v4562_v6 = vld [vmem:[%s10604_s0 + $0x98] sm:$0xff]  ;;  %v4561_v12 = vld [vmem:[%s10604_s0 + $0x90] sm:$0xff] }
  0x1d   :  { %602 = vadd.xlane.f32.xlu1 %v601_v42  ;;  %79 = vadd.xlane.f32.xlu0 %v78_v43  ;;  %v592_v60 = vsel %vm50_vm0, %v564_v56, 0.0  ;;  %v589_v2 = vsel %vm50_vm0, %v563_v62, 0.0  ;;  %v562_v4 = vmul.f32 %v4563_v0, %v4563_v0  ;;  %v38_v5 = vmul.f32 %v22_v1, %v22_v1  ;;  %v21_v7 = vld [vmem:[%s10604_s0 + $0x18] sm:$0xff]  ;;  %v20_v13 = vld [vmem:[%s10604_s0 + $0x10] sm:$0xff]  ;;  %v4560_v18 = vld [vmem:[%s10604_s0 + $0x88] sm:$0xff] }
  0x1e   :  { %v69_v61 = vsel %vm50_vm0, %v40_v57, 0.0  ;;  %v66_v3 = vsel %vm50_vm0, %v39_v63, 0.0  ;;  %v561_v10 = vmul.f32 %v4562_v6, %v4562_v6  ;;  %v37_v11 = vmul.f32 %v21_v7, %v21_v7  ;;  %v19_v19 = vld [vmem:[%s10604_s0 + $0x8] sm:$0xff]  ;;  %v4559_v24 = vld [vmem:[%s10604_s0 + $0x80] sm:$0xff]  ;;  %v4670_v30 = vld [vmem:[%s10604_s0 + $0x1f8] sm:$0xff] }
  0x1f   :  { %v586_v8 = vsel %vm50_vm0, %v562_v4, 0.0  ;;  %v63_v9 = vsel %vm50_vm0, %v38_v5, 0.0  ;;  %v560_v16 = vmul.f32 %v4561_v12, %v4561_v12  ;;  %v36_v17 = vmul.f32 %v20_v13, %v20_v13  ;;  %v18_v25 = vld [vmem:[%s10604_s0] sm:$0xff]  ;;  %v4622_v31 = vld [vmem:[%s10604_s0 + $0x178] sm:$0xff]  ;;  %v4669_v36 = vld [vmem:[%s10604_s0 + $0x1f0] sm:$0xff] }
  0x20   :  { %v583_v14 = vsel %vm50_vm0, %v561_v10, 0.0  ;;  %v60_v15 = vsel %vm50_vm0, %v37_v11, 0.0  ;;  %v559_v22 = vmul.f32 %v4560_v18, %v4560_v18  ;;  %v35_v23 = vmul.f32 %v19_v19, %v19_v19  ;;  %v4621_v37 = vld [vmem:[%s10604_s0 + $0x170] sm:$0xff]  ;;  %v4668_v42 = vld [vmem:[%s10604_s0 + $0x1e8] sm:$0xff] }
  0x21   :  { %599 = vadd.xlane.f32.xlu1 %v598_v48  ;;  %76 = vadd.xlane.f32.xlu0 %v75_v49  ;;  %v580_v20 = vsel %vm50_vm0, %v560_v16, 0.0  ;;  %v57_v21 = vsel %vm50_vm0, %v36_v17, 0.0  ;;  %v558_v28 = vmul.f32 %v4559_v24, %v4559_v24  ;;  %v34_v29 = vmul.f32 %v18_v25, %v18_v25  ;;  %v4620_v43 = vld [vmem:[%s10604_s0 + $0x168] sm:$0xff]  ;;  %v4667_v48 = vld [vmem:[%s10604_s0 + $0x1e0] sm:$0xff] }
  0x22   :  { %v577_v26 = vsel %vm50_vm0, %v559_v22, 0.0  ;;  %v54_v27 = vsel %vm50_vm0, %v35_v23, 0.0  ;;  %v1619_v34 = vmul.f32 %v4670_v30, %v4670_v30  ;;  %v1096_v35 = vmul.f32 %v4622_v31, %v4622_v31  ;;  %v4619_v49 = vld [vmem:[%s10604_s0 + $0x160] sm:$0xff] }
  0x23   :  { %v574_v32 = vsel %vm50_vm0, %v558_v28, 0.0  ;;  %v51_v33 = vsel %vm50_vm0, %v34_v29, 0.0  ;;  %v1618_v40 = vmul.f32 %v4669_v36, %v4669_v36  ;;  %v1095_v41 = vmul.f32 %v4621_v37, %v4621_v37 }
  0x24   :  { %v1665_v38 = vsel %vm50_vm0, %v1619_v34, 0.0  ;;  %v1142_v39 = vsel %vm50_vm0, %v1096_v35, 0.0  ;;  %v1617_v46 = vmul.f32 %v4668_v42, %v4668_v42  ;;  %v1094_v47 = vmul.f32 %v4620_v43, %v4620_v43 }
  0x25   :  { %596 = vadd.xlane.f32.xlu1 %v595_v54  ;;  %73 = vadd.xlane.f32.xlu0 %v72_v55  ;;  %v1662_v44 = vsel %vm50_vm0, %v1618_v40, 0.0  ;;  %v1139_v45 = vsel %vm50_vm0, %v1095_v41, 0.0  ;;  %v1616_v52 = vmul.f32 %v4667_v48, %v4667_v48  ;;  %v1093_v53 = vmul.f32 %v4619_v49, %v4619_v49  ;;  %v4666_v54 = vld [vmem:[%s10604_s0 + $0x1d8] sm:$0xff] }
  0x26   :  { %v1659_v50 = vsel %vm50_vm0, %v1617_v46, 0.0  ;;  %v1136_v51 = vsel %vm50_vm0, %v1094_v47, 0.0  ;;  %v4618_v55 = vld [vmem:[%s10604_s0 + $0x158] sm:$0xff]  ;;  %v1615_v58 = vmul.f32 %v4666_v54, %v4666_v54 }
  0x27   :  { %v1656_v56 = vsel %vm50_vm0, %v1616_v52, 0.0  ;;  %v1133_v57 = vsel %vm50_vm0, %v1093_v53, 0.0  ;;  %v1092_v59 = vmul.f32 %v4618_v55, %v4618_v55 }
  0x28   :  { %v1653_v62 = vsel %vm50_vm0, %v1615_v58, 0.0 }
  0x29   :  { %593 = vadd.xlane.f32.xlu1 %v592_v60  ;;  %70 = vadd.xlane.f32.xlu0 %v69_v61  ;;  %v4665_v60 = vld [vmem:[%s10604_s0 + $0x1d0] sm:$0xff]  ;;  %v1130_v63 = vsel %vm50_vm0, %v1092_v59, 0.0 }
  0x2a   :  { %v4617_v61 = vld [vmem:[%s10604_s0 + $0x150] sm:$0xff]  ;;  %v1614_v0 = vmul.f32 %v4665_v60, %v4665_v60 }
  0x2b   :  { %v1091_v1 = vmul.f32 %v4617_v61, %v4617_v61 }
  0x2c   :  { %v1650_v4 = vsel %vm50_vm0, %v1614_v0, 0.0 }
  0x2d   :  { %590 = vadd.xlane.f32.xlu1 %v589_v2  ;;  %67 = vadd.xlane.f32.xlu0 %v66_v3  ;;  %v4664_v2 = vld [vmem:[%s10604_s0 + $0x1c8] sm:$0xff]  ;;  %v1127_v5 = vsel %vm50_vm0, %v1091_v1, 0.0 }
  0x2e   :  { %v4616_v3 = vld [vmem:[%s10604_s0 + $0x148] sm:$0xff]  ;;  %v1613_v6 = vmul.f32 %v4664_v2, %v4664_v2 }
  0x2f   :  { %v1090_v7 = vmul.f32 %v4616_v3, %v4616_v3 }
  0x30   :  { %v1647_v10 = vsel %vm50_vm0, %v1613_v6, 0.0  ;;  %v4764_v6 = vld [vmem:[%s10604_s0 + $0x2e8] sm:$0xff] }
  0x31   :  { %587 = vadd.xlane.f32.xlu1 %v586_v8  ;;  %64 = vadd.xlane.f32.xlu0 %v63_v9  ;;  %v4663_v8 = vld [vmem:[%s10604_s0 + $0x1c0] sm:$0xff]  ;;  %v1124_v11 = vsel %vm50_vm0, %v1090_v7, 0.0  ;;  %v4716_v7 = vld [vmem:[%s10604_s0 + $0x268] sm:$0xff] }
  0x32   :  { %v4615_v9 = vld [vmem:[%s10604_s0 + $0x140] sm:$0xff]  ;;  %v1612_v12 = vmul.f32 %v4663_v8, %v4663_v8 }
  0x33   :  { %v1089_v13 = vmul.f32 %v4615_v9, %v4615_v9  ;;  %v4763_v8 = vld [vmem:[%s10604_s0 + $0x2e0] sm:$0xff] }
  0x34   :  { %v1644_v16 = vsel %vm50_vm0, %v1612_v12, 0.0  ;;  %v4715_v9 = vld [vmem:[%s10604_s0 + $0x260] sm:$0xff] }
  0x35   :  { %584 = vadd.xlane.f32.xlu1 %v583_v14  ;;  %61 = vadd.xlane.f32.xlu0 %v60_v15  ;;  %v4662_v14 = vld [vmem:[%s10604_s0 + $0x1b8] sm:$0xff]  ;;  %v1121_v17 = vsel %vm50_vm0, %v1089_v13, 0.0 }
  0x36   :  { %v4614_v15 = vld [vmem:[%s10604_s0 + $0x138] sm:$0xff]  ;;  %v1611_v18 = vmul.f32 %v4662_v14, %v4662_v14 }
  0x37   :  { %v1088_v19 = vmul.f32 %v4614_v15, %v4614_v15  ;;  %v4714_v15 = vld [vmem:[%s10604_s0 + $0x258] sm:$0xff] }
  0x38   :  { %v1641_v22 = vsel %vm50_vm0, %v1611_v18, 0.0  ;;  %v2140_v18 = vmul.f32 %v4716_v7, %v4716_v7 }
  0x39   :  { %581 = vadd.xlane.f32.xlu1 %v580_v20  ;;  %58 = vadd.xlane.f32.xlu0 %v57_v21  ;;  %v4661_v20 = vld [vmem:[%s10604_s0 + $0x1b0] sm:$0xff]  ;;  %v1118_v23 = vsel %vm50_vm0, %v1088_v19, 0.0 }
  0x3a   :  { %v4613_v21 = vld [vmem:[%s10604_s0 + $0x130] sm:$0xff]  ;;  %v1610_v24 = vmul.f32 %v4661_v20, %v4661_v20  ;;  %v2662_v20 = vmul.f32 %v4763_v8, %v4763_v8 }
  0x3b   :  { %v1087_v25 = vmul.f32 %v4613_v21, %v4613_v21  ;;  %v4713_v19 = vld [vmem:[%s10604_s0 + $0x250] sm:$0xff]  ;;  %v2139_v21 = vmul.f32 %v4715_v9, %v4715_v9 }
  0x3c   :  { %v1638_v28 = vsel %vm50_vm0, %v1610_v24, 0.0  ;;  %v2138_v24 = vmul.f32 %v4714_v15, %v4714_v15  ;;  %v4751_v15 = vld [vmem:[%s10604_s0 + $0x280] sm:$0xff] }
  0x3d   :  { %578 = vadd.xlane.f32.xlu1 %v577_v26  ;;  %55 = vadd.xlane.f32.xlu0 %v54_v27  ;;  %v4660_v26 = vld [vmem:[%s10604_s0 + $0x1a8] sm:$0xff]  ;;  %v1115_v29 = vsel %vm50_vm0, %v1087_v25, 0.0 }
  0x3e   :  { %v4612_v27 = vld [vmem:[%s10604_s0 + $0x128] sm:$0xff]  ;;  %v1609_v30 = vmul.f32 %v4660_v26, %v4660_v26 }
  0x3f   :  { %v1086_v31 = vmul.f32 %v4612_v27, %v4612_v27  ;;  %v4712_v26 = vld [vmem:[%s10604_s0 + $0x248] sm:$0xff] }
  0x40   :  { %v1635_v34 = vsel %vm50_vm0, %v1609_v30, 0.0  ;;  %v4759_v30 = vld [vmem:[%s10604_s0 + $0x2c0] sm:$0xff] }
  0x41   :  { %575 = vadd.xlane.f32.xlu1 %v574_v32  ;;  %52 = vadd.xlane.f32.xlu0 %v51_v33  ;;  %v4659_v32 = vld [vmem:[%s10604_s0 + $0x1a0] sm:$0xff]  ;;  %v1112_v35 = vsel %vm50_vm0, %v1086_v31, 0.0 }
  0x42   :  { %v4611_v33 = vld [vmem:[%s10604_s0 + $0x120] sm:$0xff]  ;;  %v1608_v36 = vmul.f32 %v4659_v32, %v4659_v32 }
  0x43   :  { %v1085_v37 = vmul.f32 %v4611_v33, %v4611_v33  ;;  %v4711_v31 = vld [vmem:[%s10604_s0 + $0x240] sm:$0xff]  ;;  %v2182_v33 = vsel %vm50_vm0, %v2140_v18, 0.0 }
  0x44   :  { %v1632_v40 = vsel %vm50_vm0, %v1608_v36, 0.0  ;;  %v4710_v36 = vld [vmem:[%s10604_s0 + $0x238] sm:$0xff] }
  0x45   :  { %1666 = vadd.xlane.f32.xlu1 %v1665_v38  ;;  %1143 = vadd.xlane.f32.xlu0 %v1142_v39  ;;  %v4658_v38 = vld [vmem:[%s10604_s0 + $0x198] sm:$0xff]  ;;  %v1109_v41 = vsel %vm50_vm0, %v1085_v37, 0.0  ;;  %v4757_v37 = vld [vmem:[%s10604_s0 + $0x2b0] sm:$0xff] }
  0x46   :  { %v4610_v39 = vld [vmem:[%s10604_s0 + $0x118] sm:$0xff]  ;;  %v1607_v42 = vmul.f32 %v4658_v38, %v4658_v38  ;;  %v2702_v38 = vsel %vm50_vm0, %v2662_v20, 0.0  ;;  %v4703_v20 = vld [vmem:[%s10604_s0 + $0x200] sm:$0xff] }
  0x47   :  { %v1084_v43 = vmul.f32 %v4610_v39, %v4610_v39  ;;  %v2179_v39 = vsel %vm50_vm0, %v2139_v21, 0.0  ;;  %v4862_v21 = vld [vmem:[%s10604_s0 + $0x3f8] sm:$0xff] }
  0x48   :  { %v1629_v46 = vsel %vm50_vm0, %v1607_v42, 0.0  ;;  %v4709_v42 = vld [vmem:[%s10604_s0 + $0x230] sm:$0xff] }
  0x49   :  { %1663 = vadd.xlane.f32.xlu1 %v1662_v44  ;;  %1140 = vadd.xlane.f32.xlu0 %v1139_v45  ;;  %v4657_v44 = vld [vmem:[%s10604_s0 + $0x190] sm:$0xff]  ;;  %v1106_v47 = vsel %vm50_vm0, %v1084_v43, 0.0  ;;  %v4756_v43 = vld [vmem:[%s10604_s0 + $0x2a8] sm:$0xff] }
  0x4a   :  { %v4609_v45 = vld [vmem:[%s10604_s0 + $0x110] sm:$0xff]  ;;  %v1606_v48 = vmul.f32 %v4657_v44, %v4657_v44  ;;  %v4708_v44 = vld [vmem:[%s10604_s0 + $0x228] sm:$0xff] }
  0x4b   :  { %v1083_v49 = vmul.f32 %v4609_v45, %v4609_v45  ;;  %v7012_v45 = vsel %vm50_vm0, %v2138_v24, 0.0 }
  0x4c   :  { %v1626_v52 = vsel %vm50_vm0, %v1606_v48, 0.0  ;;  %v2135_v48 = vmul.f32 %v4711_v31, %v4711_v31  ;;  %v2650_v31 = vmul.f32 %v4751_v15, %v4751_v15 }
  0x4d   :  { %1660 = vadd.xlane.f32.xlu1 %v1659_v50  ;;  %1137 = vadd.xlane.f32.xlu0 %v1136_v51  ;;  %v4656_v50 = vld [vmem:[%s10604_s0 + $0x188] sm:$0xff]  ;;  %v1103_v53 = vsel %vm50_vm0, %v1083_v49, 0.0  ;;  %v4755_v49 = vld [vmem:[%s10604_s0 + $0x2a0] sm:$0xff] }
  0x4e   :  { %v4608_v51 = vld [vmem:[%s10604_s0 + $0x108] sm:$0xff]  ;;  %v1605_v54 = vmul.f32 %v4656_v50, %v4656_v50  ;;  %v4707_v50 = vld [vmem:[%s10604_s0 + $0x220] sm:$0xff] }
  0x4f   :  { %v1082_v55 = vmul.f32 %v4608_v51, %v4608_v51  ;;  %v4754_v51 = vld [vmem:[%s10604_s0 + $0x298] sm:$0xff] }
  0x50   :  { %v1623_v58 = vsel %vm50_vm0, %v1605_v54, 0.0  ;;  %v2134_v54 = vmul.f32 %v4710_v36, %v4710_v36 }
  0x51   :  { %1657 = vadd.xlane.f32.xlu1 %v1656_v56  ;;  %1134 = vadd.xlane.f32.xlu0 %v1133_v57  ;;  %v4655_v56 = vld [vmem:[%s10604_s0 + $0x180] sm:$0xff]  ;;  %v1100_v59 = vsel %vm50_vm0, %v1082_v55, 0.0  ;;  %v2656_v55 = vmul.f32 %v4757_v37, %v4757_v37 }
  0x52   :  { %v4607_v57 = vld [vmem:[%s10604_s0 + $0x100] sm:$0xff]  ;;  %v1604_v60 = vmul.f32 %v4655_v56, %v4655_v56  ;;  %v4706_v56 = vld [vmem:[%s10604_s0 + $0x218] sm:$0xff] }
  0x53   :  { %v1081_v61 = vmul.f32 %v4607_v57, %v4607_v57  ;;  %v4753_v57 = vld [vmem:[%s10604_s0 + $0x290] sm:$0xff] }
  0x54   :  { %v1620_v0 = vsel %vm50_vm0, %v1604_v60, 0.0  ;;  %v2655_v60 = vmul.f32 %v4756_v43, %v4756_v43  ;;  %v2652_v7 = vmul.f32 %v4753_v57, %v4753_v57 }
  0x55   :  { %1654 = vadd.xlane.f32.xlu1 %v1653_v62  ;;  %1131 = vadd.xlane.f32.xlu0 %v1130_v63  ;;  %v4766_v62 = vld [vmem:[%s10604_s0 + $0x2f8] sm:$0xff]  ;;  %v1097_v1 = vsel %vm50_vm0, %v1081_v61, 0.0  ;;  %v2132_v61 = vmul.f32 %v4708_v44, %v4708_v44 }
  0x56   :  { %v4718_v63 = vld [vmem:[%s10604_s0 + $0x278] sm:$0xff]  ;;  %v2665_v2 = vmul.f32 %v4766_v62, %v4766_v62  ;;  %v4705_v62 = vld [vmem:[%s10604_s0 + $0x210] sm:$0xff] }
  0x57   :  { %v2142_v3 = vmul.f32 %v4718_v63, %v4718_v63  ;;  %v7079_v18 = vsel %vm50_vm0, %v2132_v61, 0.0 }
  0x59   :  { %1651 = vadd.xlane.f32.xlu1 %v1650_v4  ;;  %1128 = vadd.xlane.f32.xlu0 %v1127_v5  ;;  %v4765_v4 = vld [vmem:[%s10604_s0 + $0x2f0] sm:$0xff]  ;;  %v2188_v12 = vsel %vm50_vm0, %v2142_v3, 0.0  ;;  %v4752_v3 = vld [vmem:[%s10604_s0 + $0x288] sm:$0xff] }
  0x5a   :  { %v4717_v5 = vld [vmem:[%s10604_s0 + $0x270] sm:$0xff]  ;;  %v2664_v13 = vmul.f32 %v4765_v4, %v4765_v4 }
  0x5b   :  { %v2141_v14 = vmul.f32 %v4717_v5, %v4717_v5  ;;  %v7051_v5 = vsel %vm50_vm0, %v2135_v48, 0.0 }
  0x5c   :  { %v2708_v27 = vsel %vm50_vm0, %v2664_v13, 0.0  ;;  %v2129_v13 = vmul.f32 %v4705_v62, %v4705_v62 }
  0x5d   :  { %1648 = vadd.xlane.f32.xlu1 %v1647_v10  ;;  %1125 = vadd.xlane.f32.xlu0 %v1124_v11  ;;  %v4762_v10 = vld [vmem:[%s10604_s0 + $0x2d8] sm:$0xff]  ;;  %v2711_v11 = vsel %vm50_vm0, %v2665_v2, 0.0  ;;  %v2653_v2 = vmul.f32 %v4754_v51, %v4754_v51 }
  0x5e   :  { %v7126_v37 = vsel %vm50_vm0, %v2129_v13, 0.0  ;;  %v4808_v13 = vld [vmem:[%s10604_s0 + $0x348] sm:$0xff] }
  0x5f   :  { %v7094_v24 = vsel %vm50_vm0, %v2653_v2, 0.0 }
  0x61   :  { %1645 = vadd.xlane.f32.xlu1 %v1644_v16  ;;  %1122 = vadd.xlane.f32.xlu0 %v1121_v17  ;;  %v4761_v16 = vld [vmem:[%s10604_s0 + $0x2d0] sm:$0xff]  ;;  %v2663_v17 = vmul.f32 %v4764_v6, %v4764_v6  ;;  %v2130_v6 = vmul.f32 %v4706_v56, %v4706_v56  ;;  %v7150_v56 = vsel %vm50_vm0, %v2650_v31, 0.0 }
  0x62   :  { %v2660_v25 = vmul.f32 %v4761_v16, %v4761_v16 }
  0x63   :  { %v2705_v32 = vsel %vm50_vm0, %v2663_v17, 0.0  ;;  %v7076_v17 = vsel %vm50_vm0, %v2655_v60, 0.0 }
  0x65   :  { %1642 = vadd.xlane.f32.xlu1 %v1641_v22  ;;  %1119 = vadd.xlane.f32.xlu0 %v1118_v23  ;;  %v2661_v22 = vmul.f32 %v4762_v10, %v4762_v10  ;;  %v4760_v23 = vld [vmem:[%s10604_s0 + $0x2c8] sm:$0xff] }
  0x69   :  { %1639 = vadd.xlane.f32.xlu1 %v1638_v28  ;;  %1116 = vadd.xlane.f32.xlu0 %v1115_v29  ;;  %v2185_v28 = vsel %vm50_vm0, %v2141_v14, 0.0  ;;  %v2137_v29 = vmul.f32 %v4713_v19, %v4713_v19  ;;  %v4704_v14 = vld [vmem:[%s10604_s0 + $0x208] sm:$0xff]  ;;  %v2651_v19 = vmul.f32 %v4752_v3, %v4752_v3 }
  0x6b   :  { %v7135_v43 = vsel %vm50_vm0, %v2651_v19, 0.0 }
  0x6d   :  { %1636 = vadd.xlane.f32.xlu1 %v1635_v34  ;;  %1113 = vadd.xlane.f32.xlu0 %v1112_v35  ;;  %v2659_v34 = vmul.f32 %v4760_v23, %v4760_v23  ;;  %v4758_v35 = vld [vmem:[%s10604_s0 + $0x2b8] sm:$0xff] }
  0x71   :  { %1633 = vadd.xlane.f32.xlu1 %v1632_v40  ;;  %1110 = vadd.xlane.f32.xlu0 %v1109_v41  ;;  %v7000_v40 = vsel %vm50_vm0, %v2661_v22, 0.0  ;;  %v2136_v41 = vmul.f32 %v4712_v26, %v4712_v26  ;;  %v4861_v26 = vld [vmem:[%s10604_s0 + $0x3f0] sm:$0xff] }
  0x73   :  { %v7042_v63 = vsel %vm50_vm0, %v2136_v41, 0.0  ;;  %v4811_v41 = vld [vmem:[%s10604_s0 + $0x360] sm:$0xff] }
  0x74   :  { %v3185_v57 = vmul.f32 %v4811_v41, %v4811_v41 }
  0x75   :  { %1630 = vadd.xlane.f32.xlu1 %v1629_v46  ;;  %1107 = vadd.xlane.f32.xlu0 %v1106_v47  ;;  %v7015_v46 = vsel %vm50_vm0, %v2660_v25, 0.0  ;;  %v2658_v47 = vmul.f32 %v4759_v30, %v4759_v30  ;;  %v4814_v25 = vld [vmem:[%s10604_s0 + $0x378] sm:$0xff]  ;;  %v2128_v30 = vmul.f32 %v4704_v14, %v4704_v14  ;;  %v4855_v14 = vld [vmem:[%s10604_s0 + $0x3c0] sm:$0xff] }
  0x76   :  { %v3188_v44 = vmul.f32 %v4814_v25, %v4814_v25  ;;  %v4854_v25 = vld [vmem:[%s10604_s0 + $0x3b8] sm:$0xff] }
  0x77   :  { %v7048_v4 = vsel %vm50_vm0, %v2658_v47, 0.0  ;;  %v3710_v47 = vmul.f32 %v4861_v26, %v4861_v26  ;;  %v4806_v26 = vld [vmem:[%s10604_s0 + $0x338] sm:$0xff] }
  0x78   :  { %v7167_v2 = vsel %vm50_vm0, %v3188_v44, 0.0  ;;  %v4804_v44 = vld [vmem:[%s10604_s0 + $0x328] sm:$0xff] }
  0x79   :  { %1627 = vadd.xlane.f32.xlu1 %v1626_v52  ;;  %1104 = vadd.xlane.f32.xlu0 %v1103_v53  ;;  %v7027_v52 = vsel %vm50_vm0, %v2137_v29, 0.0  ;;  %v2657_v53 = vmul.f32 %v4758_v35, %v4758_v35  ;;  %v7109_v29 = vsel %vm50_vm0, %v2652_v7, 0.0  ;;  %v7170_v3 = vsel %vm50_vm0, %v3710_v47, 0.0  ;;  %v4856_v7 = vld [vmem:[%s10604_s0 + $0x3c8] sm:$0xff]  ;;  %v4851_v47 = vld [vmem:[%s10604_s0 + $0x3a0] sm:$0xff] }
  0x7a   :  { %v3705_v41 = vmul.f32 %v4856_v7, %v4856_v7  ;;  %v3178_v7 = vmul.f32 %v4804_v44, %v4804_v44 }
  0x7b   :  { %v7058_v10 = vsel %vm50_vm0, %v2657_v53, 0.0 }
  0x7d   :  { %1624 = vadd.xlane.f32.xlu1 %v1623_v58  ;;  %1101 = vadd.xlane.f32.xlu0 %v1100_v59  ;;  %v7036_v58 = vsel %vm50_vm0, %v2659_v34, 0.0  ;;  %v2133_v59 = vmul.f32 %v4709_v42, %v4709_v42  ;;  %v4859_v34 = vld [vmem:[%s10604_s0 + $0x3e0] sm:$0xff]  ;;  %v4858_v42 = vld [vmem:[%s10604_s0 + $0x3d8] sm:$0xff] }
  0x7f   :  { %v7073_v16 = vsel %vm50_vm0, %v2133_v59, 0.0  ;;  %v3707_v59 = vmul.f32 %v4858_v42, %v4858_v42  ;;  %v3182_v42 = vmul.f32 %v4808_v13, %v4808_v13  ;;  %v3700_v13 = vmul.f32 %v4851_v47, %v4851_v47 }
  0x81   :  { %1621 = vadd.xlane.f32.xlu1 %v1620_v0  ;;  %1098 = vadd.xlane.f32.xlu0 %v1097_v1  ;;  %v2654_v0 = vmul.f32 %v4755_v49, %v4755_v49  ;;  %v2131_v1 = vmul.f32 %v4707_v50, %v4707_v50  ;;  %v4810_v49 = vld [vmem:[%s10604_s0 + $0x358] sm:$0xff]  ;;  %v4857_v50 = vld [vmem:[%s10604_s0 + $0x3d0] sm:$0xff] }
  0x83   :  { %v7088_v22 = vsel %vm50_vm0, %v2654_v0, 0.0  ;;  %v7091_v23 = vsel %vm50_vm0, %v2131_v1, 0.0  ;;  %v4809_v1 = vld [vmem:[%s10604_s0 + $0x350] sm:$0xff] }
  0x84   :  { %v3183_v31 = vmul.f32 %v4809_v1, %v4809_v1 }
  0x85   :  { %2712 = vadd.xlane.f32.xlu1 %v2711_v11  ;;  %2189 = vadd.xlane.f32.xlu0 %v2188_v12  ;;  %v7061_v11 = vsel %vm50_vm0, %v2134_v54, 0.0  ;;  %v7064_v12 = vsel %vm50_vm0, %v2656_v55, 0.0  ;;  %v3708_v54 = vmul.f32 %v4859_v34, %v4859_v34  ;;  %v7147_v55 = vsel %vm50_vm0, %v2128_v30, 0.0 }
  0x86   :  { %v7210_v30 = vsel %vm50_vm0, %v3707_v59, 0.0  ;;  %v7250_v1 = vsel %vm50_vm0, %v3183_v31, 0.0 }
  0x89   :  { %2709 = vadd.xlane.f32.xlu1 %v2708_v27  ;;  %2186 = vadd.xlane.f32.xlu0 %v2185_v28  ;;  %v4813_v27 = vld [vmem:[%s10604_s0 + $0x370] sm:$0xff]  ;;  %v7106_v28 = vsel %vm50_vm0, %v2130_v6, 0.0 }
  0x8a   :  { %v3187_v48 = vmul.f32 %v4813_v27, %v4813_v27  ;;  %v7207_v27 = vsel %vm50_vm0, %v3185_v57, 0.0 }
  0x8c   :  { %v7173_v6 = vsel %vm50_vm0, %v3187_v48, 0.0  ;;  %v4803_v48 = vld [vmem:[%s10604_s0 + $0x320] sm:$0xff] }
  0x8d   :  { %2706 = vadd.xlane.f32.xlu1 %v2705_v32  ;;  %2183 = vadd.xlane.f32.xlu0 %v2182_v33  ;;  %v4860_v32 = vld [vmem:[%s10604_s0 + $0x3e8] sm:$0xff] }
  0x8e   :  { %v7053_v8 = vpop.xlane.xlu0 %97  ;;  %v7055_v9 = vpop.xlane.xlu1 %94  ;;  %v4812_v33 = vld [vmem:[%s10604_s0 + $0x368] sm:$0xff]  ;;  %v3709_v51 = vmul.f32 %v4860_v32, %v4860_v32  ;;  %v4853_v32 = vld [vmem:[%s10604_s0 + $0x3b0] sm:$0xff] }
  0x8f   :  { %5695 = vrsqrt.f32 %v7055_v9  ;;  %v3186_v53 = vmul.f32 %v4812_v33, %v4812_v33  ;;  %v4805_v33 = vld [vmem:[%s10604_s0 + $0x330] sm:$0xff]  ;;  %v3702_v57 = vmul.f32 %v4853_v32, %v4853_v32  ;;  %v7261_v32 = vsel %vm50_vm0, %v3182_v42, 0.0 }
  0x90   :  { %v7186_v15 = vsel %vm50_vm0, %v3709_v51, 0.0  ;;  %v3703_v51 = vmul.f32 %v4854_v25, %v4854_v25  ;;  %v3179_v59 = vmul.f32 %v4805_v33, %v4805_v33  ;;  %v4801_v42 = vld [vmem:[%s10604_s0 + $0x310] sm:$0xff]  ;;  %vm206_vm1 = vcmp.eq.f32.partialorder %v7053_v8, inf }
  0x91   :  { %2703 = vadd.xlane.f32.xlu1 %v2702_v38  ;;  %2180 = vadd.xlane.f32.xlu0 %v2179_v39  ;;  %v2127_v38 = vmul.f32 %v4703_v20, %v4703_v20  ;;  %v3711_v39 = vmul.f32 %v4862_v21, %v4862_v21  ;;  %v7189_v19 = vsel %vm50_vm0, %v3186_v53, 0.0  ;;  %v7192_v20 = vsel %vm50_vm0, %v3708_v54, 0.0  ;;  %v4807_v21 = vld [vmem:[%s10604_s0 + $0x340] sm:$0xff]  ;;  %v4850_v54 = vld [vmem:[%s10604_s0 + $0x398] sm:$0xff] }
  0x92   :  { %v7121_v35 = vpop.xlane.xlu0 %620  ;;  %v7123_v36 = vpop.xlane.xlu1 %617  ;;  %v3180_v53 = vmul.f32 %v4806_v26, %v4806_v26  ;;  %v7258_v26 = vsel %vm50_vm0, %v3705_v41, 0.0  ;;  %v4849_v41 = vld [vmem:[%s10604_s0 + $0x390] sm:$0xff]  ;;  %vm199_vm2 = vcmp.eq.f32.partialorder %v7055_v9, inf  ;;  %vm201_vm3 = vcmp.eq.f32.partialorder %v7055_v9, 0.0 }
  0x93   :  { %5697 = vrsqrt.f32 %v7123_v36  ;;  %v7157_v62 = vsel %vm50_vm0, %v2127_v38, 0.0  ;;  %v7160_v0 = vsel %vm50_vm0, %v3711_v39, 0.0  ;;  %vm722_vm4 = vcmp.eq.f32.partialorder %v7123_v36, inf }
  0x94   :  { %v7280_v47 = vsel %vm50_vm0, %v3180_v53, 0.0  ;;  %v7297_v53 = vsel %vm50_vm0, %v3700_v13, 0.0  ;;  %vm724_vm5 = vcmp.eq.f32.partialorder %v7123_v36, 0.0  ;;  %vm208_vm6 = vcmp.eq.f32.partialorder %v7053_v8, 0.0 }
  0x95   :  { %2700 = vadd.xlane.f32.xlu1 %v7000_v40  ;;  %2177 = vadd.xlane.f32.xlu0 %v7012_v45  ;;  %v3184_v40 = vmul.f32 %v4810_v49, %v4810_v49  ;;  %v3706_v45 = vmul.f32 %v4857_v50, %v4857_v50  ;;  %v3704_v49 = vmul.f32 %v4855_v14, %v4855_v14  ;;  %vm729_vm9 = vcmp.eq.f32.partialorder %v7121_v35, inf }
  0x96   :  { %v7152_v60 = vpop.xlane.xlu1 %614  ;;  %v7154_v61 = vpop.xlane.xlu0 %91  ;;  %v3181_v50 = vmul.f32 %v4807_v21, %v4807_v21  ;;  %v3177_v14 = vmul.f32 %v4803_v48, %v4803_v48  ;;  %v7283_v48 = vsel %vm50_vm0, %v3702_v57, 0.0  ;;  %10622 = vst [vmem:[#allocation12_spill] sm:$0xff] %v7297_v53  ;;  %vm731_vm12 = vcmp.eq.f32.partialorder %v7121_v35, 0.0 }
  0x97   :  { %5699 = vrsqrt.f32 %v7152_v60  ;;  %v7226_v38 = vsel %vm50_vm0, %v3184_v40, 0.0  ;;  %v7229_v39 = vsel %vm50_vm0, %v3706_v45, 0.0  ;;  %v4802_v45 = vld [vmem:[%s10604_s0 + $0x318] sm:$0xff]  ;;  %v7264_v31 = vsel %vm50_vm0, %v3704_v49, 0.0  ;;  %10618 = vst [vmem:[#allocation8_spill] sm:$0xff] %v7283_v48 }
  0x98   :  { %5701 = vrsqrt.f32 %v7154_v61  ;;  %v7267_v33 = vsel %vm50_vm0, %v3181_v50, 0.0  ;;  %v3176_v44 = vmul.f32 %v4802_v45, %v4802_v45  ;;  %v7286_v49 = vsel %vm50_vm0, %v3179_v59, 0.0 }
  0x99   :  { %5703 = vrsqrt.f32 %v7053_v8  ;;  %2697 = vadd.xlane.f32.xlu1 %v7015_v46  ;;  %2174 = vadd.xlane.f32.xlu0 %v7027_v52  ;;  %v4852_v46 = vld [vmem:[%s10604_s0 + $0x3a8] sm:$0xff]  ;;  %10619 = vst [vmem:[#allocation9_spill] sm:$0xff] %v7286_v49  ;;  %v7300_v57 = vsel %vm50_vm0, %v3177_v14, 0.0  ;;  %vm715_vm7 = vcmp.eq.f32.partialorder %v7152_v60, inf  ;;  %vm717_vm8 = vcmp.eq.f32.partialorder %v7152_v60, 0.0 }
  0x9a   :  { %v7221_v52 = vpop.xlane.xlu1 %611  ;;  %v7223_v34 = vpop.xlane.xlu0 %88  ;;  %v3701_v40 = vmul.f32 %v4852_v46, %v4852_v46  ;;  %v7270_v46 = vsel %vm50_vm0, %v3703_v51, 0.0  ;;  %10623 = vst [vmem:[#allocation13_spill] sm:$0xff] %v7300_v57  ;;  %v7314_v13 = vsel %vm50_vm0, %v3176_v44, 0.0  ;;  %v725_v44 = vand.u32 2147483648, %v7123_v36 }
  0x9b   :  { %5705 = vrsqrt.f32 %v7223_v34  ;;  %10625 = vst [vmem:[#allocation15_spill] sm:$0xff] %v7314_v13  ;;  %vm192_vm10 = vcmp.eq.f32.partialorder %v7154_v61, inf  ;;  %vm194_vm11 = vcmp.eq.f32.partialorder %v7154_v61, 0.0  ;;  %vm708_vm13 = vcmp.eq.f32.partialorder %v7221_v52, inf }
  0x9c   :  { %5707 = vrsqrt.f32 %v7121_v35  ;;  %v7291_v51 = vsel %vm50_vm0, %v3701_v40, 0.0  ;;  %v3175_v40 = vmul.f32 %v4801_v42, %v4801_v42  ;;  %vm185_vm14 = vcmp.eq.f32.partialorder %v7223_v34, inf }
  0x9d   :  { %2694 = vadd.xlane.f32.xlu1 %v7036_v58  ;;  %2171 = vadd.xlane.f32.xlu0 %v7042_v63  ;;  %v3699_v58 = vmul.f32 %v4850_v54, %v4850_v54  ;;  %v5696_v63 = vpop.eup %5695  ;;  %5709 = vrsqrt.f32 %v7221_v52  ;;  %10620 = vst [vmem:[#allocation10_spill] sm:$0xff] %v7291_v51  ;;  %v7294_v54 = vsel %vm50_vm0, %v3178_v7, 0.0  ;;  %vm710_vm15 = vcmp.eq.f32.partialorder %v7221_v52, 0.0 }
  0x9e   :  { %v7253_v21 = vpop.xlane.xlu1 %608  ;;  %v7255_v25 = vpop.xlane.xlu0 %85  ;;  %10621 = vst [vmem:[#allocation11_spill] sm:$0xff] %v7294_v54  ;;  %v198_v59 = vmul.f32 %v5696_v63, %v7055_v9  ;;  %v4848_v63 = vld [vmem:[%s10604_s0 + $0x388] sm:$0xff] }
  0x9f   :  { %5711 = vrsqrt.f32 %v7255_v25 }
  0xa0   :  { %v5698_v50 = vpop.eup %5697  ;;  %5713 = vrsqrt.f32 %v7253_v21  ;;  %v200_v13 = vsel %vm199_vm2, %v7055_v9, %v198_v59  ;;  %v3697_v59 = vmul.f32 %v4848_v63, %v4848_v63  ;;  %vm701_vm2 = vcmp.eq.f32.partialorder %v7253_v21, inf }
  0xa1   :  { %2691 = vadd.xlane.f32.xlu1 %v7048_v4  ;;  %2168 = vadd.xlane.f32.xlu0 %v7051_v5  ;;  %v7308_v4 = vsel %vm50_vm0, %v3699_v58, 0.0  ;;  %v3698_v5 = vmul.f32 %v4849_v41, %v4849_v41  ;;  %v721_v54 = vmul.f32 %v5698_v50, %v7123_v36  ;;  %v202_v58 = vand.u32 2147483648, %v7055_v9  ;;  %v4800_v50 = vld [vmem:[%s10604_s0 + $0x308] sm:$0xff] }
  0xa2   :  { %v7303_v45 = vpop.xlane.xlu1 %605  ;;  %v7305_v49 = vpop.xlane.xlu0 %82  ;;  %10624 = vst [vmem:[#allocation14_spill] sm:$0xff] %v7308_v4 }
  0xa3   :  { %v7340_v53 = vsel %vm50_vm0, %v3698_v5, 0.0  ;;  %5715 = vrsqrt.f32 %v7305_v49  ;;  %v3174_v5 = vmul.f32 %v4800_v50, %v4800_v50 }
  0xa4   :  { %v5700_v14 = vpop.eup %5699  ;;  %10626 = vst [vmem:[#allocation16_spill] sm:$0xff] %v7340_v53  ;;  %5717 = vrsqrt.f32 %v7303_v45 }
  0xa5   :  { %v5702_v41 = vpop.eup %5701  ;;  %2688 = vadd.xlane.f32.xlu1 %v7058_v10  ;;  %2165 = vadd.xlane.f32.xlu0 %v7061_v11  ;;  %v714_v4 = vmul.f32 %v5700_v14, %v7152_v60  ;;  %v7343_v10 = vsel %vm50_vm0, %v3175_v40, 0.0  ;;  %v723_v11 = vsel %vm722_vm4, %v7123_v36, %v721_v54  ;;  %v718_v14 = vand.u32 2147483648, %v7152_v60  ;;  %v4847_v54 = vld [vmem:[%s10604_s0 + $0x380] sm:$0xff] }
  0xa6   :  { %v5704_v7 = vpop.eup %5703  ;;  %v7335_v42 = vpop.xlane.xlu1 %602  ;;  %10627 = vst [vmem:[#allocation17_spill] sm:$0xff] %v7343_v10  ;;  %v191_v51 = vmul.f32 %v5702_v41, %v7154_v61  ;;  %v203_v10 = vsel %vm201_vm3, %v202_v58, %v200_v13  ;;  %v726_v9 = vsel %vm724_vm5, %v725_v44, %v723_v11  ;;  %v195_v58 = vand.u32 2147483648, %v7154_v61 }
  0xa7   :  { %v7337_v57 = vpop.xlane.xlu0 %79  ;;  %v205_v40 = vmul.f32 %v5704_v7, %v7053_v8  ;;  %v4799_v7 = vld [vmem:[%s10604_s0 + $0x300] sm:$0xff]  ;;  %v716_v13 = vsel %vm715_vm7, %v7152_v60, %v714_v4  ;;  %v7379_v36 = vsel %vm50_vm0, %v3697_v59, 0.0  ;;  %v7383_v4 = vsel %vm50_vm0, %v3174_v5, 0.0 }
  0xa8   :  { %v5706_v53 = vpop.eup %5705  ;;  %v193_v41 = vsel %vm192_vm10, %v7154_v61, %v191_v51  ;;  %5719 = vrsqrt.f32 %v7337_v57  ;;  %v3696_v44 = vmul.f32 %v4847_v54, %v4847_v54  ;;  %v3173_v11 = vmul.f32 %v4799_v7, %v4799_v7 }
  0xa9   :  { %2685 = vadd.xlane.f32.xlu1 %v7064_v12  ;;  %2162 = vadd.xlane.f32.xlu0 %v7073_v16  ;;  %v5708_v63 = vpop.eup %5707  ;;  %v184_v50 = vmul.f32 %v5706_v53, %v7223_v34  ;;  %5721 = vrcp.f32 %v203_v10  ;;  %v207_v51 = vsel %vm206_vm1, %v7053_v8, %v205_v40  ;;  %v719_v53 = vsel %vm717_vm8, %v718_v14, %v716_v13  ;;  %v4214_v13 = vld [vmem:[%s10605_s1 + $0x38] sm:$0xff] }
  0xaa   :  { %v7371_v12 = vpop.xlane.xlu1 %599  ;;  %v5710_v48 = vpop.eup %5709  ;;  %5723 = vrcp.f32 %v726_v9  ;;  %v728_v10 = vmul.f32 %v5708_v63, %v7121_v35  ;;  %v196_v59 = vsel %vm194_vm11, %v195_v58, %v193_v41  ;;  %v711_v60 = vand.u32 2147483648, %v7221_v52 }
  0xab   :  { %v7373_v16 = vpop.xlane.xlu0 %76  ;;  %5725 = vrsqrt.f32 %v7335_v42  ;;  %v10628_v14 = vand.u32 2147483648, %v7053_v8  ;;  %v707_v7 = vmul.f32 %v5710_v48, %v7221_v52  ;;  %v188_v9 = vand.u32 2147483648, %v7223_v34 }
  0xac   :  { %5727 = vrsqrt.f32 %v7373_v16  ;;  %v5712_v61 = vpop.eup %5711  ;;  %vm187_vm1 = vcmp.eq.f32.partialorder %v7223_v34, 0.0  ;;  %v7422_v8 = vsel %vm50_vm0, %v3696_v44, 0.0  ;;  %v7425_v63 = vsel %vm50_vm0, %v3173_v11, 0.0 }
  0xad   :  { %2682 = vadd.xlane.f32.xlu1 %v7076_v17  ;;  %2159 = vadd.xlane.f32.xlu0 %v7079_v18  ;;  %v186_v17 = vsel %vm185_vm14, %v7223_v34, %v184_v50  ;;  %v4213_v18 = vld [vmem:[%s10605_s1 + $0x30] sm:$0xff]  ;;  %v210_v54 = vsel %vm208_vm6, %v10628_v14, %v207_v51  ;;  %5729 = vrcp.f32 %v719_v53  ;;  %v5714_v58 = vpop.eup %5713  ;;  %v730_v48 = vsel %vm729_vm9, %v7121_v35, %v728_v10 }
  0xae   :  { %v7398_v5 = vpop.xlane.xlu1 %596  ;;  %5731 = vrcp.f32 %v196_v59  ;;  %v189_v41 = vsel %vm187_vm1, %v188_v9, %v186_v17  ;;  %v4222_v44 = vmul.f32 %v4214_v13, %v4214_v13  ;;  %v709_v51 = vsel %vm708_vm13, %v7221_v52, %v707_v7 }
  0xaf   :  { %v7400_v40 = vpop.xlane.xlu0 %73  ;;  %v700_v53 = vmul.f32 %v5714_v58, %v7253_v21  ;;  %vm703_vm3 = vcmp.eq.f32.partialorder %v7253_v21, 0.0  ;;  %v10629_v10 = vand.u32 2147483648, %v7121_v35  ;;  %v704_v17 = vand.u32 2147483648, %v7253_v21 }
  0xb0   :  { %5733 = vrsqrt.f32 %v7400_v40  ;;  %v5716_v11 = vpop.eup %5715  ;;  %vm178_vm4 = vcmp.eq.f32.partialorder %v7255_v25, inf  ;;  %vm180_vm5 = vcmp.eq.f32.partialorder %v7255_v25, 0.0  ;;  %v712_v7 = vsel %vm710_vm15, %v711_v60, %v709_v51 }
  0xb1   :  { %2679 = vadd.xlane.f32.xlu1 %v7088_v22  ;;  %2156 = vadd.xlane.f32.xlu0 %v7091_v23  ;;  %v4221_v22 = vmul.f32 %v4213_v18, %v4213_v18  ;;  %v177_v23 = vmul.f32 %v5712_v61, %v7255_v25  ;;  %5735 = vrcp.f32 %v210_v54  ;;  %v733_v59 = vsel %vm731_vm12, %v10629_v10, %v730_v48  ;;  %v5718_v18 = vpop.eup %5717 }
  0xb2   :  { %v7431_v50 = vpop.xlane.xlu1 %593  ;;  %5737 = vrsqrt.f32 %v7371_v12  ;;  %v181_v61 = vand.u32 2147483648, %v7255_v25  ;;  %v702_v13 = vsel %vm701_vm2, %v7253_v21, %v700_v53  ;;  %vm694_vm6 = vcmp.eq.f32.partialorder %v7303_v45, inf }
  0xb3   :  { %v7433_v34 = vpop.xlane.xlu0 %70  ;;  %5739 = vrcp.f32 %v189_v41  ;;  %v7459_v54 = vsel %vm50_vm0, %v4221_v22, 0.0  ;;  %vm696_vm7 = vcmp.eq.f32.partialorder %v7303_v45, 0.0  ;;  %v693_v52 = vmul.f32 %v5718_v18, %v7303_v45 }
  0xb4   :  { %5741 = vrsqrt.f32 %v7398_v5  ;;  %v697_v60 = vand.u32 2147483648, %v7303_v45  ;;  %vm171_vm8 = vcmp.eq.f32.partialorder %v7305_v49, inf  ;;  %vm173_vm9 = vcmp.eq.f32.partialorder %v7305_v49, 0.0 }
  0xb5   :  { %2676 = vadd.xlane.f32.xlu1 %v7094_v24  ;;  %2153 = vadd.xlane.f32.xlu0 %v7106_v28  ;;  %v179_v24 = vsel %vm178_vm4, %v7255_v25, %v177_v23  ;;  %v170_v28 = vmul.f32 %v5716_v11, %v7305_v49  ;;  %5743 = vrsqrt.f32 %v7433_v34  ;;  %v5720_v9 = vpop.eup %5719  ;;  %v174_v22 = vand.u32 2147483648, %v7305_v49 }
  0xb6   :  { %v7454_v14 = vpop.xlane.xlu1 %590  ;;  %5745 = vrcp.f32 %v733_v59  ;;  %v7471_v58 = vpop.eup %5721  ;;  %v182_v41 = vsel %vm180_vm5, %v181_v61, %v179_v24  ;;  %v163_v53 = vmul.f32 %v5720_v9, %v7337_v57  ;;  %vm687_vm10 = vcmp.eq.f32.partialorder %v7335_v42, inf }
  0xb7   :  { %v7456_v35 = vpop.xlane.xlu0 %67  ;;  %5747 = vrsqrt.f32 %v7431_v50  ;;  %v7479_v48 = vpop.eup %5723  ;;  %v690_v10 = vand.u32 2147483648, %v7335_v42  ;;  %v7498_v59 = vsel %vm50_vm0, %v4222_v44, 0.0  ;;  %v695_v21 = vsel %vm694_vm6, %v7303_v45, %v693_v52 }
  0xb8   :  { %5749 = vrcp.f32 %v712_v7  ;;  %v5726_v51 = vpop.eup %5725  ;;  %vm164_vm11 = vcmp.eq.f32.partialorder %v7337_v57, inf  ;;  %vm166_vm12 = vcmp.eq.f32.partialorder %v7337_v57, 0.0  ;;  %vm689_vm13 = vcmp.eq.f32.partialorder %v7335_v42, 0.0 }
  0xb9   :  { %2673 = vadd.xlane.f32.xlu1 %v7109_v29  ;;  %2150 = vadd.xlane.f32.xlu0 %v7126_v37  ;;  %v705_v29 = vsel %vm703_vm3, %v704_v17, %v702_v13  ;;  %v172_v37 = vsel %vm171_vm8, %v7305_v49, %v170_v28  ;;  %5751 = vrsqrt.f32 %v7454_v14  ;;  %v5728_v25 = vpop.eup %5727  ;;  %v167_v61 = vand.u32 2147483648, %v7337_v57 }
  0xba   :  { %v7485_v23 = vpop.xlane.xlu1 %587  ;;  %5753 = vrsqrt.f32 %v7456_v35  ;;  %v7500_v18 = vpop.eup %5729  ;;  %v175_v44 = vsel %vm173_vm9, %v174_v22, %v172_v37  ;;  %v683_v7 = vand.u32 2147483648, %v7371_v12  ;;  %vm680_vm14 = vcmp.eq.f32.partialorder %v7371_v12, inf  ;;  %v6495_v37 = vld [vmem:[%s10604_s0 + $0x78] sm:$0xff] }
  0xbb   :  { %v7487_v11 = vpop.xlane.xlu0 %64  ;;  %5755 = vrcp.f32 %v182_v41  ;;  %v5732_v17 = vpop.eup %5731  ;;  %vm157_vm15 = vcmp.eq.f32.partialorder %v7373_v16, inf  ;;  %v698_v13 = vsel %vm696_vm7, %v697_v60, %v695_v21  ;;  %v686_v52 = vmul.f32 %v5726_v51, %v7335_v42 }
  0xbc   :  { %5757 = vrcp.f32 %v705_v29  ;;  %vm159_vm1 = vcmp.eq.f32.partialorder %v7373_v16, 0.0  ;;  %v160_v22 = vand.u32 2147483648, %v7373_v16  ;;  %vm682_vm2 = vcmp.eq.f32.partialorder %v7371_v12, 0.0 }
  0xbd   :  { %2670 = vadd.xlane.f32.xlu1 %v7135_v43  ;;  %2147 = vadd.xlane.f32.xlu0 %v7147_v55  ;;  %v5734_v9 = vpop.eup %5733  ;;  %v165_v43 = vsel %vm164_vm11, %v7337_v57, %v163_v53  ;;  %v156_v55 = vmul.f32 %v5728_v25, %v7373_v16  ;;  %5759 = vrsqrt.f32 %v7485_v23  ;;  %vm150_vm3 = vcmp.eq.f32.partialorder %v7400_v40, inf }
  0xbe   :  { %v7514_v24 = vpop.xlane.xlu1 %584  ;;  %v5736_v49 = vpop.eup %5735  ;;  %5761 = vrsqrt.f32 %v7487_v11  ;;  %v168_v60 = vsel %vm166_vm12, %v167_v61, %v165_v43  ;;  %vm152_vm4 = vcmp.eq.f32.partialorder %v7400_v40, 0.0  ;;  %v153_v51 = vand.u32 2147483648, %v7400_v40 }
  0xbf   :  { %v7516_v28 = vpop.xlane.xlu0 %61  ;;  %v5738_v41 = vpop.eup %5737  ;;  %5763 = vrcp.f32 %v175_v44  ;;  %v7533_v53 = vmul.f32 %v6495_v37, %v5736_v49  ;;  %vm673_vm5 = vcmp.eq.f32.partialorder %v7398_v5, inf  ;;  %v149_v57 = vmul.f32 %v5734_v9, %v7400_v40  ;;  %v6496_v44 = vld [vmem:[%s10604_s0 + $0x70] sm:$0xff] }
  0xc0   :  { %v7537_v45 = vpop.eup %5739  ;;  %5765 = vrcp.f32 %v698_v13  ;;  %v7560_v61 = vmul.f32 %v6496_v44, %v7471_v58  ;;  %v688_v49 = vsel %vm687_vm10, %v7335_v42, %v686_v52  ;;  %vm666_vm6 = vcmp.eq.f32.partialorder %v7431_v50, inf  ;;  %v6497_v52 = vld [vmem:[%s10604_s0 + $0x68] sm:$0xff]  ;;  %v6499_v42 = vld [vmem:[%s10604_s0 + $0xf0] sm:$0xff] }
  0xc1   :  { %10630 = vst [vmem:[#allocation18_spill] sm:$0xff] %v7533_v53  ;;  %2667 = vadd.xlane.f32.xlu1 %v7150_v56  ;;  %2144 = vadd.xlane.f32.xlu0 %v7157_v62  ;;  %v5742_v56 = vpop.eup %5741  ;;  %v158_v62 = vsel %vm157_vm15, %v7373_v16, %v156_v55  ;;  %v679_v55 = vmul.f32 %v5738_v41, %v7371_v12  ;;  %5767 = vrsqrt.f32 %v7516_v28  ;;  %vm143_vm7 = vcmp.eq.f32.partialorder %v7433_v34, inf }
  0xc2   :  { %v7545_v25 = vpop.xlane.xlu1 %581  ;;  %5183 = vmatprep.subr.msk.mxu0 %vm50_vm0, %v7533_v53  ;;  %10631 = vst [vmem:[#allocation19_spill] sm:$0xff] %v7560_v61  ;;  %v5744_v43 = vpop.eup %5743  ;;  %5769 = vrcp.f32 %v168_v60  ;;  %v7578_v41 = vmul.f32 %v6497_v52, %v5732_v17  ;;  %v161_v44 = vsel %vm159_vm1, %v160_v22, %v158_v62  ;;  %vm675_vm8 = vcmp.eq.f32.partialorder %v7398_v5, 0.0 }
  0xc3   :  { %v7547_v21 = vpop.xlane.xlu0 %58  ;;  %5184 = vmatpush3.xpose.msk.msra.mxu0 %vm50_vm0, %v7533_v53  ;;  %v5746_v13 = vpop.eup %5745  ;;  %v142_v58 = vmul.f32 %v5744_v43, %v7433_v34  ;;  %vm145_vm9 = vcmp.eq.f32.partialorder %v7433_v34, 0.0  ;;  %v146_v60 = vand.u32 2147483648, %v7433_v34  ;;  %v6498_v43 = vld [vmem:[%s10604_s0 + $0xf8] sm:$0xff]  ;;  %v691_v62 = vsel %vm689_vm13, %v690_v10, %v688_v49 }
  0xc4   :  { %5185 = vmatprep.subr.msk.mxu0 %vm50_vm0, %v7560_v61  ;;  %v5748_v37 = vpop.eup %5747  ;;  %v7588_v9 = vmul.f32 %v6498_v43, %v5746_v13  ;;  %v151_v13 = vsel %vm150_vm3, %v7400_v40, %v149_v57  ;;  %vm668_vm10 = vcmp.eq.f32.partialorder %v7431_v50, 0.0  ;;  %vm659_vm11 = vcmp.eq.f32.partialorder %v7454_v14, inf }
  0xc5   :  { %3758 = vadd.xlane.f32.xlu1 %v7160_v0  ;;  %3235 = vadd.xlane.f32.xlu0 %v7167_v2  ;;  %v7596_v22 = vpop.eup %5749  ;;  %5771 = vrsqrt.f32 %v7514_v24  ;;  %v681_v2 = vsel %vm680_vm14, %v7371_v12, %v679_v55  ;;  %v672_v52 = vmul.f32 %v5742_v56, %v7398_v5  ;;  %vm661_vm12 = vcmp.eq.f32.partialorder %v7454_v14, 0.0  ;;  %v6501_v12 = vld [vmem:[%s10604_s0 + $0xe8] sm:$0xff] }
  0xc6   :  { %10632 = vst [vmem:[#allocation20_spill] sm:$0xff] %v7588_v9  ;;  %v7592_v17 = vpop.xlane.xlu1 %578  ;;  %v5752_v0 = vpop.eup %5751  ;;  %5239 = vmatprep.subr.msk.mxu1 %vm50_vm0, %v7588_v9  ;;  %v7621_v10 = vmul.f32 %v6499_v42, %v7479_v48  ;;  %5773 = vrsqrt.f32 %v7547_v21  ;;  %v665_v56 = vmul.f32 %v5748_v37, %v7431_v50  ;;  %v144_v49 = vsel %vm143_vm7, %v7433_v34, %v142_v58  ;;  %v6500_v48 = vld [vmem:[%s10604_s0 + $0x60] sm:$0xff]  ;;  %v6502_v34 = vld [vmem:[%s10604_s0 + $0x58] sm:$0xff] }
  0xc7   :  { %v7594_v16 = vpop.xlane.xlu0 %55  ;;  %5186 = vmatpush3.xpose.msk.msra.mxu0 %vm50_vm0, %v7560_v61  ;;  %v5754_v57 = vpop.eup %5753  ;;  %5775 = vrcp.f32 %v161_v44  ;;  %5240 = vmatpush3.xpose.msk.msra.mxu1 %vm50_vm0, %v7588_v9  ;;  %v7636_v55 = vmul.f32 %v6500_v48, %v7537_v45  ;;  %v154_v37 = vsel %vm152_vm4, %v153_v51, %v151_v13  ;;  %v658_v58 = vmul.f32 %v5752_v0, %v7454_v14 }
  0xc8   :  { %10633 = vst [vmem:[#allocation21_spill] sm:$0xff] %v7621_v10  ;;  %5187 = vmatprep.subr.msk.mxu0 %vm50_vm0, %v7578_v41  ;;  %v5756_v44 = vpop.eup %5755  ;;  %5777 = vrcp.f32 %v691_v62  ;;  %v662_v43 = vand.u32 2147483648, %v7454_v14  ;;  %5241 = vmatprep.subr.msk.mxu1 %vm50_vm0, %v7621_v10  ;;  %v684_v40 = vsel %vm682_vm2, %v683_v7, %v681_v2  ;;  %v135_v51 = vmul.f32 %v5754_v57, %v7456_v35 }
  0xc9   :  { %3755 = vadd.xlane.f32.xlu1 %v7170_v3  ;;  %v7649_v45 = vpop.eup %5757  ;;  %vm136_vm13 = vcmp.eq.f32.partialorder %v7456_v35, inf  ;;  %5779 = vrsqrt.f32 %v7594_v16  ;;  %3232 = vadd.xlane.f32.xlu0 %v7173_v6  ;;  %v674_v62 = vsel %vm673_vm5, %v7398_v5, %v672_v52  ;;  %v147_v13 = vsel %vm145_vm9, %v146_v60, %v144_v49 }
  0xca   :  { %v7645_v42 = vpop.xlane.xlu1 %575  ;;  %v5760_v3 = vpop.eup %5759  ;;  %v7670_v7 = vmul.f32 %v6501_v12, %v7500_v18  ;;  %5781 = vrsqrt.f32 %v7545_v25  ;;  %v667_v0 = vsel %vm666_vm6, %v7431_v50, %v665_v56  ;;  %vm138_vm14 = vcmp.eq.f32.partialorder %v7456_v35, 0.0 }
  0xcb   :  { %v7647_v29 = vpop.xlane.xlu0 %52  ;;  %5188 = vmatpush3.xpose.msk.msra.mxu0 %vm50_vm0, %v7578_v41  ;;  %v5762_v6 = vpop.eup %5761  ;;  %5783 = vrcp.f32 %v154_v37  ;;  %5242 = vmatpush3.xpose.msk.msra.mxu1 %vm50_vm0, %v7621_v10  ;;  %v7684_v18 = vmul.f32 %v6502_v34, %v5756_v44  ;;  %v660_v2 = vsel %vm659_vm11, %v7454_v14, %v658_v58  ;;  %v139_v52 = vand.u32 2147483648, %v7456_v35 }
  0xcc   :  { %10634 = vst [vmem:[#allocation22_spill] sm:$0xff] %v7670_v7  ;;  %5189 = vmatprep.subr.msk.mxu0 %vm50_vm0, %v7636_v55  ;;  %v5764_v60 = vpop.eup %5763  ;;  %5785 = vrcp.f32 %v684_v40  ;;  %vm652_vm15 = vcmp.eq.f32.partialorder %v7485_v23, inf  ;;  %5243 = vmatprep.subr.msk.mxu1 %vm50_vm0, %v7670_v7  ;;  %v10635_v49 = vand.u32 2147483648, %v7398_v5  ;;  %v137_v44 = vsel %vm136_vm13, %v7456_v35, %v135_v51  ;;  %v6503_v5 = vld [vmem:[%s10604_s0 + $0xe0] sm:$0xff] }
  0xcd   :  { %3752 = vadd.xlane.f32.xlu1 %v7186_v15  ;;  %5787 = vrcp.f32 %v147_v13  ;;  %v128_v37 = vmul.f32 %v5762_v6, %v7487_v11  ;;  %3229 = vadd.xlane.f32.xlu0 %v7189_v19  ;;  %v7707_v58 = vpop.eup %5765  ;;  %v10636_v15 = vand.u32 2147483648, %v7431_v50  ;;  %v651_v12 = vmul.f32 %v5760_v3, %v7485_v23  ;;  %v6504_v50 = vld [vmem:[%s10604_s0 + $0x50] sm:$0xff] }
  0xce   :  { %v7694_v57 = vpop.xlane.xlu1 %1666  ;;  %v677_v48 = vsel %vm675_vm8, %v10635_v49, %v674_v62  ;;  %v7720_v51 = vmul.f32 %v6503_v5, %v7596_v22  ;;  %5789 = vrsqrt.f32 %v7647_v29  ;;  %v5768_v19 = vpop.eup %5767  ;;  %v663_v62 = vsel %vm661_vm12, %v662_v43, %v660_v2  ;;  %v6505_v2 = vld [vmem:[%s10604_s0 + $0xd8] sm:$0xff] }
  0xcf   :  { %v7696_v56 = vpop.xlane.xlu0 %1143  ;;  %v670_v40 = vsel %vm668_vm10, %v10636_v15, %v667_v0  ;;  %5190 = vmatpush3.xpose.msk.msra.mxu0 %vm50_vm0, %v7636_v55  ;;  %vm654_vm1 = vcmp.eq.f32.partialorder %v7485_v23, 0.0  ;;  %5244 = vmatpush3.xpose.msk.msra.mxu1 %vm50_vm0, %v7670_v7  ;;  %v7733_v22 = vmul.f32 %v6504_v50, %v5764_v60  ;;  %5791 = vrsqrt.f32 %v7592_v17  ;;  %v5770_v3 = vpop.eup %5769 }
  0xd0   :  { %5191 = vmatprep.subr.msk.mxu0 %vm50_vm0, %v7684_v18  ;;  %5793 = vrcp.f32 %v677_v48  ;;  %v140_v14 = vsel %vm138_vm14, %v139_v52, %v137_v44  ;;  %vm129_vm2 = vcmp.eq.f32.partialorder %v7487_v11, inf  ;;  %v121_v43 = vmul.f32 %v5768_v19, %v7516_v28  ;;  %5245 = vmatprep.subr.msk.mxu1 %vm50_vm0, %v7720_v51 }
  0xd1   :  { %3749 = vadd.xlane.f32.xlu1 %v7192_v20  ;;  %5795 = vrcp.f32 %v670_v40  ;;  %v655_v0 = vand.u32 2147483648, %v7485_v23  ;;  %v130_v34 = vsel %vm129_vm2, %v7487_v11, %v128_v37  ;;  %vm131_vm3 = vcmp.eq.f32.partialorder %v7487_v11, 0.0  ;;  %3226 = vadd.xlane.f32.xlu0 %v7207_v27  ;;  %v6506_v27 = vld [vmem:[%s10604_s0 + $0x48] sm:$0xff] }
  0xd2   :  { %v7743_v13 = vpop.xlane.xlu1 %1663  ;;  %v5772_v35 = vpop.eup %5771  ;;  %5797 = vrcp.f32 %v663_v62  ;;  %v653_v60 = vsel %vm652_vm15, %v7485_v23, %v651_v12  ;;  %v132_v20 = vand.u32 2147483648, %v7487_v11  ;;  %v7761_v52 = vmul.f32 %v6505_v2, %v7649_v45 }
  0xd3   :  { %v7745_v6 = vpop.xlane.xlu0 %1140  ;;  %5192 = vmatpush3.xpose.msk.msra.mxu0 %vm50_vm0, %v7684_v18  ;;  %v5774_v49 = vpop.eup %5773  ;;  %5799 = vrcp.f32 %v140_v14  ;;  %vm645_vm4 = vcmp.eq.f32.partialorder %v7514_v24, inf  ;;  %vm122_vm5 = vcmp.eq.f32.partialorder %v7516_v28, inf  ;;  %5246 = vmatpush3.xpose.msk.msra.mxu1 %vm50_vm0, %v7720_v51  ;;  %v7772_v48 = vmul.f32 %v6506_v27, %v5770_v3 }
  0xd4   :  { %5193 = vmatprep.subr.msk.mxu0 %vm50_vm0, %v7733_v22  ;;  %v5776_v45 = vpop.eup %5775  ;;  %v133_v44 = vsel %vm131_vm3, %v132_v20, %v130_v34  ;;  %vm647_vm6 = vcmp.eq.f32.partialorder %v7514_v24, 0.0  ;;  %v123_v37 = vsel %vm122_vm5, %v7516_v28, %v121_v43  ;;  %5247 = vmatprep.subr.msk.mxu1 %vm50_vm0, %v7761_v52  ;;  %5801 = vrsqrt.f32 %v7645_v42 }
  0xd5   :  { %3746 = vadd.xlane.f32.xlu1 %v7210_v30  ;;  %v5778_v12 = vpop.eup %5777  ;;  %v656_v11 = vsel %vm654_vm1, %v655_v0, %v653_v60  ;;  %v125_v5 = vand.u32 2147483648, %v7516_v28  ;;  %v114_v19 = vmul.f32 %v5774_v49, %v7547_v21  ;;  %5803 = vrsqrt.f32 %v7696_v56  ;;  %3223 = vadd.xlane.f32.xlu0 %v7226_v38  ;;  %v6507_v30 = vld [vmem:[%s10604_s0 + $0xd0] sm:$0xff] }
  0xd6   :  { %v7782_v15 = vpop.xlane.xlu1 %1660  ;;  %v5780_v62 = vpop.eup %5779  ;;  %v644_v50 = vmul.f32 %v5772_v35, %v7514_v24  ;;  %vm124_vm7 = vcmp.eq.f32.partialorder %v7516_v28, 0.0  ;;  %v7800_v23 = vmul.f32 %v6507_v30, %v7707_v58  ;;  %5805 = vrsqrt.f32 %v7694_v57  ;;  %v6508_v28 = vld [vmem:[%s10604_s0 + $0x40] sm:$0xff] }
  0xd7   :  { %v7784_v40 = vpop.xlane.xlu0 %1137  ;;  %5194 = vmatpush3.xpose.msk.msra.mxu0 %vm50_vm0, %v7733_v22  ;;  %v5782_v3 = vpop.eup %5781  ;;  %5807 = vrcp.f32 %v133_v44  ;;  %v648_v38 = vand.u32 2147483648, %v7514_v24  ;;  %v126_v14 = vsel %vm124_vm7, %v125_v5, %v123_v37  ;;  %5248 = vmatpush3.xpose.msk.msra.mxu1 %vm50_vm0, %v7761_v52  ;;  %v7811_v43 = vmul.f32 %v6508_v28, %v5776_v45  ;;  %v6509_v45 = vld [vmem:[%s10604_s0 + $0xc8] sm:$0xff] }
  0xd8   :  { %5195 = vmatprep.subr.msk.mxu0 %vm50_vm0, %v7772_v48  ;;  %v5784_v58 = vpop.eup %5783  ;;  %5809 = vrcp.f32 %v656_v11  ;;  %vm638_vm8 = vcmp.eq.f32.partialorder %v7545_v25, inf  ;;  %vm115_vm9 = vcmp.eq.f32.partialorder %v7547_v21, inf  ;;  %v107_v0 = vmul.f32 %v5780_v62, %v7594_v16  ;;  %5249 = vmatprep.subr.msk.mxu1 %vm50_vm0, %v7800_v23 }
  0xd9   :  { %3743 = vadd.xlane.f32.xlu1 %v7229_v39  ;;  %v5786_v60 = vpop.eup %5785  ;;  %vm640_vm10 = vcmp.eq.f32.partialorder %v7545_v25, 0.0  ;;  %v116_v20 = vsel %vm115_vm9, %v7547_v21, %v114_v19  ;;  %vm117_vm11 = vcmp.eq.f32.partialorder %v7547_v21, 0.0  ;;  %v118_v2 = vand.u32 2147483648, %v7547_v21  ;;  %3220 = vadd.xlane.f32.xlu0 %v7250_v1  ;;  %v6510_v1 = vld [vmem:[%s10604_s0 + $0x38] sm:$0xff] }
  0xda   :  { %v7819_v34 = vpop.xlane.xlu1 %1657  ;;  %5811 = vrsqrt.f32 %v7745_v6  ;;  %v5788_v49 = vpop.eup %5787  ;;  %v646_v39 = vsel %vm645_vm4, %v7514_v24, %v644_v50  ;;  %v637_v27 = vmul.f32 %v5782_v3, %v7545_v25  ;;  %v7838_v44 = vmul.f32 %v6509_v45, %v5778_v12  ;;  %v6511_v24 = vld [vmem:[%s10604_s0 + $0xc0] sm:$0xff] }
  0xdb   :  { %v7821_v35 = vpop.xlane.xlu0 %1134  ;;  %5813 = vrcp.f32 %v126_v14  ;;  %5196 = vmatpush3.xpose.msk.msra.mxu0 %vm50_vm0, %v7772_v48  ;;  %v5790_v37 = vpop.eup %5789  ;;  %vm108_vm12 = vcmp.eq.f32.partialorder %v7594_v16, inf  ;;  %vm110_vm13 = vcmp.eq.f32.partialorder %v7594_v16, 0.0  ;;  %5250 = vmatpush3.xpose.msk.msra.mxu1 %vm50_vm0, %v7800_v23  ;;  %v7849_v11 = vmul.f32 %v6510_v1, %v5784_v58 }
  0xdc   :  { %5197 = vmatprep.subr.msk.mxu0 %vm50_vm0, %v7811_v43  ;;  %5815 = vrsqrt.f32 %v7743_v13  ;;  %v5792_v12 = vpop.eup %5791  ;;  %v119_v5 = vsel %vm117_vm11, %v118_v2, %v116_v20  ;;  %v109_v19 = vsel %vm108_vm12, %v7594_v16, %v107_v0  ;;  %v100_v62 = vmul.f32 %v5790_v37, %v7647_v29  ;;  %5251 = vmatprep.subr.msk.mxu1 %vm50_vm0, %v7838_v44 }
  0xdd   :  { %5817 = vrsqrt.f32 %v7782_v15  ;;  %3740 = vadd.xlane.f32.xlu1 %v7258_v26  ;;  %v5794_v3 = vpop.eup %5793  ;;  %v649_v21 = vsel %vm647_vm6, %v648_v38, %v646_v39  ;;  %v111_v14 = vand.u32 2147483648, %v7594_v16  ;;  %vm101_vm14 = vcmp.eq.f32.partialorder %v7647_v29, inf  ;;  %3217 = vadd.xlane.f32.xlu0 %v7261_v32  ;;  %v6512_v39 = vld [vmem:[%s10604_s0 + $0x30] sm:$0xff] }
  0xde   :  { %v7860_v50 = vpop.xlane.xlu1 %1654  ;;  %5819 = vrsqrt.f32 %v7784_v40  ;;  %v7870_v28 = vpop.eup %5795  ;;  %v639_v26 = vsel %vm638_vm8, %v7545_v25, %v637_v27  ;;  %v102_v58 = vsel %vm101_vm14, %v7647_v29, %v100_v62  ;;  %v104_v0 = vand.u32 2147483648, %v7647_v29 }
  0xdf   :  { %v7862_v30 = vpop.xlane.xlu0 %1131  ;;  %5198 = vmatpush3.xpose.msk.msra.mxu0 %vm50_vm0, %v7811_v43  ;;  %v7882_v38 = vmul.f32 %v6511_v24, %v5786_v60  ;;  %v7884_v32 = vpop.eup %5797  ;;  %5821 = vrcp.f32 %v119_v5  ;;  %v630_v20 = vmul.f32 %v5792_v12, %v7592_v17  ;;  %v112_v2 = vsel %vm110_vm13, %v111_v14, %v109_v19  ;;  %5252 = vmatpush3.xpose.msk.msra.mxu1 %vm50_vm0, %v7838_v44  ;;  %v6513_v19 = vld [vmem:[%s10604_s0 + $0xb8] sm:$0xff] }
  0xe0   :  { %5199 = vmatprep.subr.msk.mxu0 %vm50_vm0, %v7849_v11  ;;  %v7896_v60 = vmul.f32 %v6512_v39, %v5788_v49  ;;  %v5800_v27 = vpop.eup %5799  ;;  %5823 = vrcp.f32 %v649_v21  ;;  %v641_v45 = vand.u32 2147483648, %v7545_v25  ;;  %vm631_vm15 = vcmp.eq.f32.partialorder %v7592_v17, inf }
  0xe1   :  { %vm103_vm1 = vcmp.eq.f32.partialorder %v7647_v29, 0.0  ;;  %5253 = vmatprep.subr.msk.mxu1 %vm50_vm0, %v7882_v38  ;;  %3737 = vadd.xlane.f32.xlu1 %v7264_v31  ;;  %v5802_v1 = vpop.eup %5801  ;;  %vm633_vm2 = vcmp.eq.f32.partialorder %v7592_v17, 0.0  ;;  %v634_v49 = vand.u32 2147483648, %v7592_v17  ;;  %5825 = vrsqrt.f32 %v7821_v35 }
  0xe2   :  { %v7904_v16 = vpop.xlane.xlu1 %1651  ;;  %v105_v12 = vsel %vm103_vm1, %v104_v0, %v102_v58  ;;  %3214 = vadd.xlane.f32.xlu0 %v7267_v33  ;;  %v5804_v29 = vpop.eup %5803  ;;  %v642_v5 = vsel %vm640_vm10, %v641_v45, %v639_v26  ;;  %5827 = vrcp.f32 %v112_v2  ;;  %v7920_v62 = vmul.f32 %v6513_v19, %v5794_v3  ;;  %v6514_v3 = vld [vmem:[%s10604_s0 + $0x28] sm:$0xff] }
  0xe3   :  { %v7906_v37 = vpop.xlane.xlu0 %1128  ;;  %5200 = vmatpush3.xpose.msk.msra.mxu0 %vm50_vm0, %v7849_v11  ;;  %v5806_v21 = vpop.eup %5805  ;;  %v632_v33 = vsel %vm631_vm15, %v7592_v17, %v630_v20  ;;  %vm624_vm3 = vcmp.eq.f32.partialorder %v7645_v42, inf  ;;  %v1251_v25 = vmul.f32 %v5804_v29, %v7696_v56  ;;  %5254 = vmatpush3.xpose.msk.msra.mxu1 %vm50_vm0, %v7882_v38  ;;  %v7934_v14 = vmul.f32 %v6514_v3, %v5800_v27 }
  0xe4   :  { %5201 = vmatprep.subr.msk.mxu0 %vm50_vm0, %v7896_v60  ;;  %5829 = vrsqrt.f32 %v7819_v34  ;;  %v5808_v26 = vpop.eup %5807  ;;  %vm1775_vm4 = vcmp.eq.f32.partialorder %v7694_v57, inf  ;;  %v1778_v58 = vand.u32 2147483648, %v7694_v57  ;;  %vm1252_vm5 = vcmp.eq.f32.partialorder %v7696_v56, inf  ;;  %5255 = vmatprep.subr.msk.mxu1 %vm50_vm0, %v7920_v62 }
  0xe5   :  { %5831 = vrcp.f32 %v105_v12  ;;  %3734 = vadd.xlane.f32.xlu1 %v7270_v46  ;;  %v7947_v20 = vpop.eup %5809  ;;  %vm1777_vm6 = vcmp.eq.f32.partialorder %v7694_v57, 0.0  ;;  %v1253_v2 = vsel %vm1252_vm5, %v7696_v56, %v1251_v25  ;;  %vm1254_vm7 = vcmp.eq.f32.partialorder %v7696_v56, 0.0  ;;  %v6515_v12 = vld [vmem:[%s10604_s0 + $0xb0] sm:$0xff]  ;;  %v10637_v25 = vld [vmem:[#allocation8_spill] sm:$0xff] }
  0xe6   :  { %v7943_v0 = vpop.xlane.xlu1 %1648  ;;  %v1255_v39 = vand.u32 2147483648, %v7696_v56  ;;  %5833 = vrsqrt.f32 %v7862_v30  ;;  %3211 = vadd.xlane.f32.xlu0 %v7280_v47  ;;  %v635_v46 = vsel %vm633_vm2, %v634_v49, %v632_v33  ;;  %v1774_v45 = vmul.f32 %v5806_v21, %v7694_v57  ;;  %v10640_v47 = vld [vmem:[#allocation11_spill] sm:$0xff] }
  0xe7   :  { %v7945_v24 = vpop.xlane.xlu0 %1125  ;;  %v5812_v27 = vpop.eup %5811  ;;  %5835 = vrcp.f32 %v642_v5  ;;  %5202 = vmatpush3.xpose.msk.msra.mxu0 %vm50_vm0, %v7896_v60  ;;  %v7964_v29 = vmul.f32 %v6515_v12, %v7870_v28  ;;  %vm626_vm8 = vcmp.eq.f32.partialorder %v7645_v42, 0.0  ;;  %vm1768_vm9 = vcmp.eq.f32.partialorder %v7743_v13, inf  ;;  %5256 = vmatpush3.xpose.msk.msra.mxu1 %vm50_vm0, %v7920_v62  ;;  %v6516_v28 = vld [vmem:[%s10604_s0 + $0x20] sm:$0xff] }
  0xe8   :  { %v5814_v19 = vpop.eup %5813  ;;  %v1244_v17 = vmul.f32 %v5812_v27, %v7745_v6  ;;  %5203 = vmatprep.subr.msk.mxu0 %vm50_vm0, %v7934_v14  ;;  %v7977_v49 = vmul.f32 %v6516_v28, %v5808_v26  ;;  %v623_v21 = vmul.f32 %v5802_v1, %v7645_v42  ;;  %v1256_v33 = vsel %vm1254_vm7, %v1255_v39, %v1253_v2  ;;  %v10638_v2 = vld [vmem:[#allocation9_spill] sm:$0xff]  ;;  %v6518_v28 = vld [vmem:[%s10604_s0 + $0x18] sm:$0xff] }
  0xe9   :  { %v5816_v5 = vpop.eup %5815  ;;  %vm1245_vm10 = vcmp.eq.f32.partialorder %v7745_v6, inf  ;;  %5257 = vmatprep.subr.msk.mxu1 %vm50_vm0, %v7964_v29  ;;  %5837 = vrsqrt.f32 %v7860_v50  ;;  %3731 = vadd.xlane.f32.xlu1 %v10637_v25  ;;  %vm1247_vm11 = vcmp.eq.f32.partialorder %v7745_v6, 0.0  ;;  %v1248_v56 = vand.u32 2147483648, %v7745_v6 }
  0xea   :  { %v7987_v3 = vpop.xlane.xlu1 %1645  ;;  %v5818_v26 = vpop.eup %5817  ;;  %5839 = vrcp.f32 %v635_v46  ;;  %v1246_v1 = vsel %vm1245_vm10, %v7745_v6, %v1244_v17  ;;  %3208 = vadd.xlane.f32.xlu0 %v10638_v2  ;;  %v1776_v12 = vsel %vm1775_vm4, %v7694_v57, %v1774_v45  ;;  %vm1770_vm12 = vcmp.eq.f32.partialorder %v7743_v13, 0.0  ;;  %v6517_v46 = vld [vmem:[%s10604_s0 + $0xa8] sm:$0xff]  ;;  %v6520_v57 = vld [vmem:[%s10604_s0 + $0x10] sm:$0xff] }
  0xeb   :  { %v7989_v27 = vpop.xlane.xlu0 %1122  ;;  %v5820_v39 = vpop.eup %5819  ;;  %vm1761_vm13 = vcmp.eq.f32.partialorder %v7782_v15, inf  ;;  %5204 = vmatpush3.xpose.msk.msra.mxu0 %vm50_vm0, %v7934_v14  ;;  %v8006_v6 = vmul.f32 %v6517_v46, %v7884_v32  ;;  %5841 = vrsqrt.f32 %v7906_v37  ;;  %v1249_v17 = vsel %vm1247_vm11, %v1248_v56, %v1246_v1  ;;  %5258 = vmatpush3.xpose.msk.msra.mxu1 %vm50_vm0, %v7964_v29  ;;  %v10639_v56 = vld [vmem:[#allocation10_spill] sm:$0xff] }
  0xec   :  { %5843 = vrcp.f32 %v1256_v33  ;;  %vm1763_vm14 = vcmp.eq.f32.partialorder %v7782_v15, 0.0  ;;  %v1237_v45 = vmul.f32 %v5820_v39, %v7784_v40  ;;  %5205 = vmatprep.subr.msk.mxu0 %vm50_vm0, %v7977_v49  ;;  %v8018_v32 = vmul.f32 %v6518_v28, %v5814_v19  ;;  %v5822_v25 = vpop.eup %5821 }
  0xed   :  { %v625_v33 = vsel %vm624_vm3, %v7645_v42, %v623_v21  ;;  %v1767_v1 = vmul.f32 %v5816_v5, %v7743_v13  ;;  %vm1238_vm15 = vcmp.eq.f32.partialorder %v7784_v40, inf  ;;  %5259 = vmatprep.subr.msk.mxu1 %vm50_vm0, %v8006_v6  ;;  %5845 = vrsqrt.f32 %v7904_v16  ;;  %3728 = vadd.xlane.f32.xlu1 %v10639_v56  ;;  %v5824_v39 = vpop.eup %5823 }
  0xee   :  { %v8029_v2 = vpop.xlane.xlu1 %1642  ;;  %v1760_v46 = vmul.f32 %v5818_v26, %v7782_v15  ;;  %v1764_v21 = vand.u32 2147483648, %v7782_v15  ;;  %v1239_v5 = vsel %vm1238_vm15, %v7784_v40, %v1237_v45  ;;  %v1241_v28 = vand.u32 2147483648, %v7784_v40  ;;  %3205 = vadd.xlane.f32.xlu0 %v10640_v47  ;;  %v5826_v31 = vpop.eup %5825  ;;  %v6519_v26 = vld [vmem:[%s10604_s0 + $0xa0] sm:$0xff] }
  0xef   :  { %v8031_v19 = vpop.xlane.xlu0 %1119  ;;  %v1779_v56 = vsel %vm1777_vm6, %v1778_v58, %v1776_v12  ;;  %5847 = vrcp.f32 %v1249_v17  ;;  %vm1240_vm1 = vcmp.eq.f32.partialorder %v7784_v40, 0.0  ;;  %5206 = vmatpush3.xpose.msk.msra.mxu0 %vm50_vm0, %v7977_v49  ;;  %v8049_v45 = vmul.f32 %v6519_v26, %v7947_v20  ;;  %v5828_v47 = vpop.eup %5827  ;;  %5260 = vmatpush3.xpose.msk.msra.mxu1 %vm50_vm0, %v8006_v6  ;;  %v10642_v17 = vld [vmem:[#allocation12_spill] sm:$0xff] }
  0xf0   :  { %v1242_v9 = vsel %vm1240_vm1, %v1241_v28, %v1239_v5  ;;  %v1230_v10 = vmul.f32 %v5826_v31, %v7821_v35  ;;  %5207 = vmatprep.subr.msk.mxu0 %vm50_vm0, %v8018_v32  ;;  %v8059_v40 = vmul.f32 %v6520_v57, %v5822_v25  ;;  %5849 = vrsqrt.f32 %v7943_v0 }
  0xf1   :  { %v5830_v58 = vpop.eup %5829  ;;  %v10641_v20 = vand.u32 2147483648, %v7645_v42  ;;  %v1769_v12 = vsel %vm1768_vm9, %v7743_v13, %v1767_v1  ;;  %vm1754_vm2 = vcmp.eq.f32.partialorder %v7819_v34, inf  ;;  %5261 = vmatprep.subr.msk.mxu1 %vm50_vm0, %v8049_v45  ;;  %5851 = vrsqrt.f32 %v7945_v24  ;;  %3725 = vadd.xlane.f32.xlu1 %v10642_v17 }
  0xf2   :  { %v8074_v25 = vpop.xlane.xlu1 %1639  ;;  %v5832_v28 = vpop.eup %5831  ;;  %5853 = vrcp.f32 %v1779_v56  ;;  %v1762_v42 = vsel %vm1761_vm13, %v7782_v15, %v1760_v46  ;;  %vm1231_vm3 = vcmp.eq.f32.partialorder %v7821_v35, inf  ;;  %vm1233_vm4 = vcmp.eq.f32.partialorder %v7821_v35, 0.0  ;;  %v6521_v56 = vld [vmem:[%s10604_s0 + $0x98] sm:$0xff] }
  0xf3   :  { %v628_v31 = vsel %vm626_vm8, %v10641_v20, %v625_v33  ;;  %v8076_v5 = vpop.xlane.xlu0 %1116  ;;  %v10643_v33 = vld [vmem:[#allocation13_spill] sm:$0xff]  ;;  %v5834_v1 = vpop.eup %5833  ;;  %5855 = vrcp.f32 %v1242_v9  ;;  %v1232_v26 = vsel %vm1231_vm3, %v7821_v35, %v1230_v10  ;;  %v1234_v57 = vand.u32 2147483648, %v7821_v35  ;;  %5208 = vmatpush3.xpose.msk.msra.mxu0 %vm50_vm0, %v8018_v32  ;;  %5262 = vmatpush3.xpose.msk.msra.mxu1 %vm50_vm0, %v8049_v45  ;;  %v6524_v35 = vld [vmem:[%s10604_s0 + $0x90] sm:$0xff] }
  0xf4   :  { %3202 = vadd.xlane.f32.xlu0 %v10643_v33  ;;  %v8091_v46 = vmul.f32 %v6521_v56, %v5824_v39  ;;  %v5836_v20 = vpop.eup %5835  ;;  %v10644_v17 = vand.u32 2147483648, %v7743_v13  ;;  %v1223_v9 = vmul.f32 %v5834_v1, %v7862_v30  ;;  %5209 = vmatprep.subr.msk.mxu0 %vm50_vm0, %v8059_v40  ;;  %v6522_v10 = vld [vmem:[%s10604_s0 + $0x8] sm:$0xff]  ;;  %5857 = vrsqrt.f32 %v7987_v3  ;;  %v10645_v1 = vld [vmem:[#allocation14_spill] sm:$0xff] }
  0xf5   :  { %v8105_v39 = vmul.f32 %v6522_v10, %v5828_v47  ;;  %v1765_v13 = vsel %vm1763_vm14, %v1764_v21, %v1762_v42  ;;  %vm1224_vm5 = vcmp.eq.f32.partialorder %v7862_v30, inf  ;;  %5859 = vrsqrt.f32 %v7989_v27  ;;  %3722 = vadd.xlane.f32.xlu1 %v10645_v1  ;;  %v10646_v10 = vld [vmem:[#allocation15_spill] sm:$0xff] }
  0xf6   :  { %v1772_v33 = vsel %vm1770_vm12, %v10644_v17, %v1769_v12  ;;  %v1753_v12 = vmul.f32 %v5830_v58, %v7819_v34  ;;  %5263 = vmatprep.subr.msk.mxu1 %vm50_vm0, %v8091_v46  ;;  %v8116_v56 = vpop.xlane.xlu1 %1636  ;;  %v5838_v17 = vpop.eup %5837  ;;  %v1235_v15 = vsel %vm1233_vm4, %v1234_v57, %v1232_v26  ;;  %v1225_v21 = vsel %vm1224_vm5, %v7862_v30, %v1223_v9  ;;  %v6523_v58 = vld [vmem:[%s10604_s0] sm:$0xff] }
  0xf7   :  { %v8118_v47 = vpop.xlane.xlu0 %1113  ;;  %5861 = vrcp.f32 %v628_v31  ;;  %v8126_v42 = vmul.f32 %v6523_v58, %v5832_v28  ;;  %v5840_v1 = vpop.eup %5839  ;;  %vm1756_vm6 = vcmp.eq.f32.partialorder %v7819_v34, 0.0  ;;  %v1227_v7 = vand.u32 2147483648, %v7862_v30  ;;  %5210 = vmatpush3.xpose.msk.msra.mxu0 %vm50_vm0, %v8059_v40  ;;  %5264 = vmatpush3.xpose.msk.msra.mxu1 %vm50_vm0, %v8091_v46 }
  0xf8   :  { %3199 = vadd.xlane.f32.xlu0 %v10646_v10  ;;  %5863 = vrcp.f32 %v1772_v33  ;;  %v8136_v31 = vmul.f32 %v6524_v35, %v5836_v20  ;;  %v5842_v26 = vpop.eup %5841  ;;  %v1757_v28 = vand.u32 2147483648, %v7819_v34  ;;  %vm1747_vm7 = vcmp.eq.f32.partialorder %v7860_v50, inf  ;;  %5211 = vmatprep.subr.msk.mxu0 %vm50_vm0, %v8105_v39 }
  0xf9   :  { %5865 = vrcp.f32 %v1765_v13  ;;  %vm1226_vm8 = vcmp.eq.f32.partialorder %v7862_v30, 0.0  ;;  %v5844_v57 = vpop.eup %5843  ;;  %v1755_v20 = vsel %vm1754_vm2, %v7819_v34, %v1753_v12  ;;  %v1746_v33 = vmul.f32 %v5838_v17, %v7860_v50  ;;  %5215 = vmatprep.mubr.msk.f32.mxu0 %vm50_vm0, %v8126_v42  ;;  %v10648_v12 = vld [vmem:[#allocation17_spill] sm:$0xff] }
  0xfa   :  { %5867 = vrcp.f32 %v1235_v15  ;;  %v1228_v9 = vsel %vm1226_vm8, %v1227_v7, %v1225_v21  ;;  %5265 = vmatprep.subr.msk.mxu1 %vm50_vm0, %v8136_v31  ;;  %v8153_v30 = vpop.xlane.xlu1 %1633  ;;  %v5846_v58 = vpop.eup %5845  ;;  %vm1749_vm9 = vcmp.eq.f32.partialorder %v7860_v50, 0.0  ;;  %v1750_v10 = vand.u32 2147483648, %v7860_v50  ;;  %v10647_v7 = vld [vmem:[#allocation16_spill] sm:$0xff]  ;;  %v6525_v21 = vld [vmem:[%s10604_s0 + $0x88] sm:$0xff] }
  0xfb   :  { %v8155_v13 = vpop.xlane.xlu0 %1110  ;;  %vm1740_vm10 = vcmp.eq.f32.partialorder %v7904_v16, inf  ;;  %5869 = vrsqrt.f32 %v8031_v19  ;;  %3719 = vadd.xlane.f32.xlu1 %v10647_v7  ;;  %vm1742_vm11 = vcmp.eq.f32.partialorder %v7904_v16, 0.0  ;;  %v1216_v15 = vmul.f32 %v5842_v26, %v7906_v37  ;;  %5212 = vmatpush3.xpose.msk.msra.mxu0 %vm50_vm0, %v8105_v39 }
  0xfc   :  { %3196 = vadd.xlane.f32.xlu0 %v10648_v12  ;;  %v8171_v35 = vmul.f32 %v6525_v21, %v5840_v1  ;;  %5871 = vrsqrt.f32 %v8029_v2  ;;  %v5848_v7 = vpop.eup %5847  ;;  %v1758_v12 = vsel %vm1756_vm6, %v1757_v28, %v1755_v20  ;;  %vm1217_vm12 = vcmp.eq.f32.partialorder %v7906_v37, inf  ;;  %5266 = vmatpush3.xpose.msk.msra.mxu1 %vm50_vm0, %v8136_v31  ;;  %v6526_v1 = vld [vmem:[%s10604_s0 + $0x178] sm:$0xff] }
  0xfd   :  { %5873 = vrcp.f32 %v1228_v9  ;;  %5213 = vmatprep.subr.msk.mxu0 %vm50_vm0, %v8126_v42  ;;  %v8184_v26 = vmul.f32 %v6526_v1, %v5844_v57  ;;  %v5850_v21 = vpop.eup %5849  ;;  %v1748_v34 = vsel %vm1747_vm7, %v7860_v50, %v1746_v33  ;;  %v1739_v28 = vmul.f32 %v5846_v58, %v7904_v16 }
  0xfe   :  { %vm1219_vm13 = vcmp.eq.f32.partialorder %v7906_v37, 0.0  ;;  %5267 = vmatprep.subr.msk.mxu1 %vm50_vm0, %v8171_v35  ;;  %5875 = vrsqrt.f32 %v8074_v25  ;;  %v8194_v20 = vpop.xlane.xlu1 %1630  ;;  %v5852_v57 = vpop.eup %5851  ;;  %v1220_v1 = vand.u32 2147483648, %v7906_v37  ;;  %vm1733_vm14 = vcmp.eq.f32.partialorder %v7943_v0, inf }
  0xff   :  { %10649 = vst [vmem:[#allocation8_spill] sm:$0xff] %v8184_v26  ;;  %v8196_v9 = vpop.xlane.xlu0 %1107  ;;  %5877 = vrsqrt.f32 %v8076_v5  ;;  %3716 = vadd.xlane.f32.xlu1 %v7379_v36  ;;  %v5854_v58 = vpop.eup %5853  ;;  %v1218_v17 = vsel %vm1217_vm12, %v7906_v37, %v1216_v15  ;;  %vm1735_vm15 = vcmp.eq.f32.partialorder %v7943_v0, 0.0  ;;  %vm1210_vm1 = vcmp.eq.f32.partialorder %v7945_v24, inf  ;;  %5214 = vmatpush3.xpose.msk.msra.mxu0 %vm50_vm0, %v8126_v42  ;;  %v6527_v15 = vld [vmem:[%s10604_s0 + $0x170] sm:$0xff] }
 0x100   :  { %3193 = vadd.xlane.f32.xlu0 %v7383_v4  ;;  %5879 = vrcp.f32 %v1758_v12  ;;  %vm1212_vm2 = vcmp.eq.f32.partialorder %v7945_v24, 0.0  ;;  %v5856_v33 = vpop.eup %5855  ;;  %v1751_v36 = vsel %vm1749_vm9, %v1750_v10, %v1748_v34  ;;  %v1209_v4 = vmul.f32 %v5852_v57, %v7945_v24  ;;  %5268 = vmatpush3.xpose.msk.msra.mxu1 %vm50_vm0, %v8171_v35 }
 0x101   :  { %5295 = vmatprep.subr.msk.mxu0 %vm50_vm0, %v8184_v26  ;;  %v8222_v12 = vmul.f32 %v6527_v15, %v5848_v7  ;;  %5881 = vrsqrt.f32 %v8116_v56  ;;  %v5858_v42 = vpop.eup %5857  ;;  %v1741_v50 = vsel %vm1740_vm10, %v7904_v16, %v1739_v28  ;;  %v1732_v10 = vmul.f32 %v5850_v21, %v7943_v0 }
 0x102   :  { %v1213_v34 = vand.u32 2147483648, %v7945_v24  ;;  %5883 = vrsqrt.f32 %v8118_v47  ;;  %v8231_v57 = vpop.xlane.xlu1 %1627  ;;  %v5860_v61 = vpop.eup %5859  ;;  %v1221_v7 = vsel %vm1219_vm13, %v1220_v1, %v1218_v17  ;;  %vm1726_vm3 = vcmp.eq.f32.partialorder %v7987_v3, inf  ;;  %5216 = vmatmul.mubr.msk.f32.vlgmr.msra.gmra.mxu0 %vm50_vm0, %v8105_v39  ;;  %v6528_v39 = vld [vmem:[%s10604_s0 + $0x80] sm:$0xff] }
 0x103   :  { %v8233_v53 = vpop.xlane.xlu0 %1104  ;;  %vm1203_vm4 = vcmp.eq.f32.partialorder %v7989_v27, inf  ;;  %3713 = vadd.xlane.f32.xlu1 %v7422_v8  ;;  %5885 = vrcp.f32 %v1751_v36  ;;  %v1202_v28 = vmul.f32 %v5860_v61, %v7989_v27  ;;  %vm1205_vm5 = vcmp.eq.f32.partialorder %v7989_v27, 0.0  ;;  %5218 = vmatprep.mubr.msk.f32.mxu0 %vm50_vm0, %v8059_v40 }
 0x104   :  { %v5862_v21 = vpop.eup %5861  ;;  %v1206_v37 = vand.u32 2147483648, %v7989_v27  ;;  %5296 = vmatpush3.xpose.msk.msra.mxu0 %vm50_vm0, %v8184_v26  ;;  %v10650_v1 = vand.u32 2147483648, %v7904_v16  ;;  %v1211_v61 = vsel %vm1210_vm1, %v7945_v24, %v1209_v4  ;;  %vm1728_vm6 = vcmp.eq.f32.partialorder %v7987_v3, 0.0  ;;  %3190 = vadd.xlane.f32.xlu0 %v7425_v63  ;;  %v6529_v63 = vld [vmem:[%s10604_s0 + $0x1f8] sm:$0xff] }
 0x105   :  { %v5864_v17 = vpop.eup %5863  ;;  %v735_v40 = vmul.f32 %v6528_v39, %v5862_v21  ;;  %5297 = vmatprep.subr.msk.mxu0 %vm50_vm0, %v8222_v12  ;;  %5887 = vrsqrt.f32 %v8153_v30  ;;  %v1734_v36 = vsel %vm1733_vm14, %v7943_v0, %v1732_v10  ;;  %vm1196_vm7 = vcmp.eq.f32.partialorder %v8031_v19, inf }
 0x106   :  { %v1744_v8 = vsel %vm1742_vm11, %v10650_v1, %v1741_v50  ;;  %v8265_v16 = vpop.eup %5865  ;;  %5889 = vrcp.f32 %v1221_v7  ;;  %v8272_v50 = vpop.xlane.xlu1 %1624  ;;  %v1725_v39 = vmul.f32 %v5858_v42, %v7987_v3  ;;  %vm1719_vm8 = vcmp.eq.f32.partialorder %v8029_v2, inf  ;;  %v6530_v7 = vld [vmem:[%s10604_s0 + $0x168] sm:$0xff]  ;;  %5219 = vmatmul.mubr.msk.f32.gmra.mxu0 %vm50_vm0, %v8018_v32 }
 0x107   :  { %v8274_v21 = vpop.xlane.xlu0 %1101  ;;  %v5868_v1 = vpop.eup %5867  ;;  %5271 = vmatprep.mubr.msk.f32.mxu1 %vm50_vm0, %v735_v40  ;;  %vm1198_vm9 = vcmp.eq.f32.partialorder %v8031_v19, 0.0  ;;  %5269 = vmatprep.subr.msk.mxu1 %vm50_vm0, %v735_v40  ;;  %v8284_v10 = vmul.f32 %v6529_v63, %v5854_v58  ;;  %v8289_v4 = vmul.f32 %v6530_v7, %v5856_v33  ;;  %5891 = vrsqrt.f32 %v8155_v13 }
 0x108   :  { %v5870_v42 = vpop.eup %5869  ;;  %5893 = vrcp.f32 %v1744_v8  ;;  %v1214_v15 = vsel %vm1212_vm2, %v1213_v34, %v1211_v61  ;;  %v1204_v26 = vsel %vm1203_vm4, %v7989_v27, %v1202_v28  ;;  %v1199_v58 = vand.u32 2147483648, %v8031_v19  ;;  %5270 = vmatpush3.xpose.msk.msra.mxu1 %vm50_vm0, %v735_v40  ;;  %5221 = vmatprep.mubr.msk.f32.mxu0 %vm50_vm0, %v7977_v49 }
 0x109   :  { %10651 = vst [vmem:[#allocation9_spill] sm:$0xff] %v8284_v10  ;;  %v5872_v33 = vpop.eup %5871  ;;  %v10652_v63 = vand.u32 2147483648, %v7943_v0  ;;  %v1195_v24 = vmul.f32 %v5870_v42, %v8031_v19  ;;  %vm1712_vm10 = vcmp.eq.f32.partialorder %v8074_v25, inf  ;;  %5351 = vmatprep.subr.msk.mxu1 %vm50_vm0, %v8284_v10  ;;  %5895 = vrsqrt.f32 %v8194_v20  ;;  %5298 = vmatpush3.xpose.msk.msra.mxu0 %vm50_vm0, %v8222_v12  ;;  %v6531_v0 = vld [vmem:[%s10604_s0 + $0x1f0] sm:$0xff] }
 0x10a   :  { %v5874_v34 = vpop.eup %5873  ;;  %vm1721_vm11 = vcmp.eq.f32.partialorder %v8029_v2, 0.0  ;;  %v1715_v32 = vand.u32 2147483648, %v8074_v25  ;;  %vm1189_vm12 = vcmp.eq.f32.partialorder %v8076_v5, inf  ;;  %v8320_v28 = vmul.f32 %v6531_v0, %v5864_v17  ;;  %4242 = vadd.xlane.f32.xlu1 %v7459_v54  ;;  %v8324_v49 = vpop.xlane.xlu1 %1621  ;;  %5299 = vmatprep.subr.msk.mxu0 %vm50_vm0, %v8289_v4  ;;  %v6532_v54 = vld [vmem:[%s10604_s0 + $0x160] sm:$0xff] }
 0x10b   :  { %v1737_v8 = vsel %vm1735_vm15, %v10652_v63, %v1734_v36  ;;  %5897 = vrsqrt.f32 %v8196_v9  ;;  %v8326_v61 = vpop.xlane.xlu0 %1098  ;;  %v5876_v40 = vpop.eup %5875  ;;  %v1727_v36 = vsel %vm1726_vm3, %v7987_v3, %v1725_v39  ;;  %v1207_v7 = vsel %vm1205_vm5, %v1206_v37, %v1204_v26  ;;  %5272 = vmatmul.mubr.msk.f32.vlgmr.msra.gmra.mxu1 %vm50_vm0, %v8171_v35  ;;  %5222 = vmatmul.mubr.msk.f32.gmra.mxu0 %vm50_vm0, %v7934_v14 }
 0x10c   :  { %10653 = vst [vmem:[#allocation10_spill] sm:$0xff] %v8320_v28  ;;  %5899 = vrcp.f32 %v1214_v15  ;;  %vm1191_vm13 = vcmp.eq.f32.partialorder %v8076_v5, 0.0  ;;  %v8341_v15 = vmul.f32 %v6532_v54, %v5868_v1  ;;  %v5878_v17 = vpop.eup %5877  ;;  %v1718_v39 = vmul.f32 %v5872_v33, %v8029_v2  ;;  %5274 = vmatprep.mubr.msk.f32.mxu1 %vm50_vm0, %v8136_v31  ;;  %5352 = vmatpush3.xpose.msk.msra.mxu1 %vm50_vm0, %v8284_v10 }
 0x10d   :  { %5901 = vrcp.f32 %v1737_v8  ;;  %vm1714_vm14 = vcmp.eq.f32.partialorder %v8074_v25, 0.0  ;;  %v1192_v27 = vand.u32 2147483648, %v8076_v5  ;;  %vm1705_vm15 = vcmp.eq.f32.partialorder %v8116_v56, inf  ;;  %v5880_v35 = vpop.eup %5879  ;;  %5353 = vmatprep.subr.msk.mxu1 %vm50_vm0, %v8320_v28  ;;  %5224 = vmatprep.mubr.msk.f32.mxu0 %vm50_vm0, %v7896_v60  ;;  %v6534_v60 = vld [vmem:[%s10604_s0 + $0x158] sm:$0xff] }
 0x10e   :  { %v1197_v26 = vsel %vm1196_vm7, %v8031_v19, %v1195_v24  ;;  %v1188_v37 = vmul.f32 %v5878_v17, %v8076_v5  ;;  %vm1707_vm1 = vcmp.eq.f32.partialorder %v8116_v56, 0.0  ;;  %v1708_v1 = vand.u32 2147483648, %v8116_v56  ;;  %v5882_v31 = vpop.eup %5881  ;;  %5300 = vmatpush3.xpose.msk.msra.mxu0 %vm50_vm0, %v8289_v4  ;;  %v8371_v8 = vpop.xlane.xlu1 %2712  ;;  %4245 = vadd.xlane.f32.xlu0 %v7498_v59 }
 0x10f   :  { %v10654_v42 = vand.u32 2147483648, %v7987_v3  ;;  %5903 = vrcp.f32 %v1207_v7  ;;  %v1711_v63 = vmul.f32 %v5876_v40, %v8074_v25  ;;  %vm1182_vm2 = vcmp.eq.f32.partialorder %v8118_v47, inf  ;;  %v8373_v14 = vpop.xlane.xlu0 %2189  ;;  %v5884_v24 = vpop.eup %5883  ;;  %5275 = vmatmul.mubr.msk.f32.gmra.mxu1 %vm50_vm0, %v8091_v46  ;;  %v6533_v3 = vld [vmem:[%s10604_s0 + $0x1e8] sm:$0xff]  ;;  %5301 = vmatprep.subr.msk.mxu0 %vm50_vm0, %v8341_v15 }
 0x110   :  { %v1704_v0 = vmul.f32 %v5882_v31, %v8116_v56  ;;  %v8382_v40 = vmul.f32 %v6533_v3, %v8265_v16  ;;  %5905 = vrsqrt.f32 %v8231_v57  ;;  %v1720_v46 = vsel %vm1719_vm8, %v8029_v2, %v1718_v39  ;;  %5277 = vmatprep.mubr.msk.f32.mxu1 %vm50_vm0, %v8049_v45  ;;  %5354 = vmatpush3.xpose.msk.msra.mxu1 %vm50_vm0, %v8320_v28 }
 0x111   :  { %v1730_v33 = vsel %vm1728_vm6, %v10654_v42, %v1727_v36  ;;  %v8389_v36 = vmul.f32 %v6534_v60, %v5874_v34  ;;  %v1200_v16 = vsel %vm1198_vm9, %v1199_v58, %v1197_v26  ;;  %vm1184_vm3 = vcmp.eq.f32.partialorder %v8118_v47, 0.0  ;;  %v5886_v34 = vpop.eup %5885  ;;  %5225 = vmatmul.mubr.msk.f32.gmra.mxu0 %vm50_vm0, %v7849_v11 }
 0x112   :  { %10655 = vst [vmem:[#allocation11_spill] sm:$0xff] %v8382_v40  ;;  %5907 = vrsqrt.f32 %v8233_v53  ;;  %v1190_v7 = vsel %vm1189_vm12, %v8076_v5, %v1188_v37  ;;  %v1185_v54 = vand.u32 2147483648, %v8118_v47  ;;  %vm1698_vm4 = vcmp.eq.f32.partialorder %v8153_v30, inf  ;;  %5355 = vmatprep.subr.msk.mxu1 %vm50_vm0, %v8382_v40  ;;  %v5888_v19 = vpop.eup %5887  ;;  %5227 = vmatprep.mubr.msk.f32.mxu0 %vm50_vm0, %v7811_v43  ;;  %v8426_v39 = vpop.xlane.xlu1 %2709  ;;  %v6535_v43 = vld [vmem:[%s10604_s0 + $0x1e0] sm:$0xff] }
 0x113   :  { %vm1700_vm5 = vcmp.eq.f32.partialorder %v8153_v30, 0.0  ;;  %5909 = vrcp.f32 %v1730_v33  ;;  %v1713_v45 = vsel %vm1712_vm10, %v8074_v25, %v1711_v63  ;;  %v1706_v58 = vsel %vm1705_vm15, %v8116_v56, %v1704_v0  ;;  %5302 = vmatpush3.xpose.msk.msra.mxu0 %vm50_vm0, %v8341_v15  ;;  %v8428_v11 = vpop.xlane.xlu0 %2186  ;;  %v5890_v26 = vpop.eup %5889  ;;  %5278 = vmatmul.mubr.msk.f32.gmra.mxu1 %vm50_vm0, %v8006_v6  ;;  %v4211_v6 = vld [vmem:[%s10605_s1 + $0x20] sm:$0xff] }
 0x114   :  { %v1181_v17 = vmul.f32 %v5884_v24, %v8118_v47  ;;  %v10656_v37 = vand.u32 2147483648, %v8029_v2  ;;  %5911 = vrcp.f32 %v1200_v16  ;;  %v1697_v42 = vmul.f32 %v5888_v19, %v8153_v30  ;;  %5303 = vmatprep.subr.msk.mxu0 %vm50_vm0, %v8389_v36  ;;  %v5892_v63 = vpop.eup %5891  ;;  %5280 = vmatprep.mubr.msk.f32.mxu1 %vm50_vm0, %v7964_v29  ;;  %v4212_v29 = vld [vmem:[%s10605_s1 + $0x28] sm:$0xff] }
 0x115   :  { %v8440_v33 = vmul.f32 %v6535_v43, %v5880_v35  ;;  %v1193_v2 = vsel %vm1191_vm13, %v1192_v27, %v1190_v7  ;;  %v1701_v24 = vand.u32 2147483648, %v8153_v30  ;;  %vm1175_vm6 = vcmp.eq.f32.partialorder %v8155_v13, inf  ;;  %5356 = vmatpush3.xpose.msk.msra.mxu1 %vm50_vm0, %v8382_v40  ;;  %v5894_v35 = vpop.eup %5893  ;;  %5228 = vmatmul.mubr.msk.f32.gmra.mxu0 %vm50_vm0, %v7772_v48  ;;  %v6536_v48 = vld [vmem:[%s10604_s0 + $0x1d8] sm:$0xff]  ;;  %v6539_v43 = vld [vmem:[%s10604_s0 + $0x148] sm:$0xff] }
 0x116   :  { %v1723_v31 = vsel %vm1721_vm11, %v10656_v37, %v1720_v46  ;;  %5913 = vrsqrt.f32 %v8272_v50  ;;  %v1716_v5 = vsel %vm1714_vm14, %v1715_v32, %v1713_v45  ;;  %v1709_v27 = vsel %vm1707_vm1, %v1708_v1, %v1706_v58  ;;  %v5896_v0 = vpop.eup %5895  ;;  %5230 = vmatprep.mubr.msk.f32.mxu0 %vm50_vm0, %v7733_v22  ;;  %v6537_v32 = vld [vmem:[%s10604_s0 + $0x150] sm:$0xff]  ;;  %v8488_v3 = vpop.xlane.xlu1 %2706 }
 0x117   :  { %vm1177_vm7 = vcmp.eq.f32.partialorder %v8155_v13, 0.0  ;;  %5357 = vmatprep.subr.msk.mxu1 %vm50_vm0, %v8440_v33  ;;  %5915 = vrsqrt.f32 %v8274_v21  ;;  %v1183_v25 = vsel %vm1182_vm2, %v8118_v47, %v1181_v17  ;;  %5304 = vmatpush3.xpose.msk.msra.mxu0 %vm50_vm0, %v8389_v36  ;;  %v8481_v56 = vmul.f32 %v6536_v48, %v5886_v34  ;;  %v8490_v60 = vpop.xlane.xlu0 %2183 }
 0x118   :  { %5917 = vrcp.f32 %v1723_v31  ;;  %v8486_v1 = vmul.f32 %v6537_v32, %v5890_v26  ;;  %v5898_v22 = vpop.eup %5897  ;;  %v1699_v46 = vsel %vm1698_vm4, %v8153_v30, %v1697_v42  ;;  %v1174_v16 = vmul.f32 %v5892_v63, %v8155_v13  ;;  %5281 = vmatmul.mubr.msk.f32.gmra.mxu1 %vm50_vm0, %v7920_v62 }
 0x119   :  { %5919 = vrcp.f32 %v1193_v2  ;;  %v4219_v34 = vmul.f32 %v4211_v6, %v4211_v6  ;;  %v5900_v7 = vpop.eup %5899  ;;  %v1178_v19 = vand.u32 2147483648, %v8155_v13  ;;  %v1167_v45 = vmul.f32 %v5898_v22, %v8196_v9  ;;  %5283 = vmatprep.mubr.msk.f32.mxu1 %vm50_vm0, %v7882_v38  ;;  %5358 = vmatpush3.xpose.msk.msra.mxu1 %vm50_vm0, %v8440_v33 }
 0x11a   :  { %v4220_v58 = vmul.f32 %v4212_v29, %v4212_v29  ;;  %5921 = vrsqrt.f32 %v8324_v49  ;;  %v5902_v17 = vpop.eup %5901  ;;  %v1186_v59 = vsel %vm1184_vm3, %v1185_v54, %v1183_v25  ;;  %vm1691_vm8 = vcmp.eq.f32.partialorder %v8194_v20, inf  ;;  %5359 = vmatprep.subr.msk.mxu1 %vm50_vm0, %v8481_v56  ;;  %5231 = vmatmul.mubr.msk.f32.gmra.mxu0 %vm50_vm0, %v7684_v18  ;;  %v4210_v18 = vld [vmem:[%s10605_s1 + $0x18] sm:$0xff]  ;;  %v8528_v54 = vpop.xlane.xlu1 %2703 }
 0x11b   :  { %5923 = vrcp.f32 %v1716_v5  ;;  %vm1168_vm9 = vcmp.eq.f32.partialorder %v8196_v9, inf  ;;  %v1702_v38 = vsel %vm1700_vm5, %v1701_v24, %v1699_v46  ;;  %v1690_v62 = vmul.f32 %v5896_v0, %v8194_v20  ;;  %5305 = vmatprep.subr.msk.mxu0 %vm50_vm0, %v8486_v1  ;;  %5233 = vmatprep.mubr.msk.f32.mxu0 %vm50_vm0, %v7636_v55  ;;  %v8530_v30 = vpop.xlane.xlu0 %2180  ;;  %v6538_v55 = vld [vmem:[%s10604_s0 + $0x1d0] sm:$0xff] }
 0x11c   :  { %5925 = vrcp.f32 %v1709_v27  ;;  %vm1693_vm10 = vcmp.eq.f32.partialorder %v8194_v20, 0.0  ;;  %v4235_v47 = vsel %vm50_vm0, %v4219_v34, 0.0  ;;  %v5904_v26 = vpop.eup %5903  ;;  %v1176_v37 = vsel %vm1175_vm6, %v8155_v13, %v1174_v16  ;;  %5284 = vmatmul.mubr.msk.f32.gmra.mxu1 %vm50_vm0, %v7838_v44  ;;  %5306 = vmatpush3.xpose.msk.msra.mxu0 %vm50_vm0, %v8486_v1  ;;  %v6541_v34 = vld [vmem:[%s10604_s0 + $0x140] sm:$0xff] }
 0x11d   :  { %v8542_v31 = vmul.f32 %v6538_v55, %v5894_v35  ;;  %v4238_v42 = vsel %vm50_vm0, %v4220_v58, 0.0  ;;  %v8548_v63 = vmul.f32 %v6539_v43, %v5900_v7  ;;  %v5906_v2 = vpop.eup %5905  ;;  %5927 = vrcp.f32 %v1186_v59  ;;  %5286 = vmatprep.mubr.msk.f32.mxu1 %vm50_vm0, %v7800_v23  ;;  %5360 = vmatpush3.xpose.msk.msra.mxu1 %vm50_vm0, %v8481_v56  ;;  %v10658_v59 = vld [vmem:[#allocation18_spill] sm:$0xff] }
 0x11e   :  { %v1694_v44 = vand.u32 2147483648, %v8194_v20  ;;  %v1169_v24 = vsel %vm1168_vm9, %v8196_v9, %v1167_v45  ;;  %vm1170_vm11 = vcmp.eq.f32.partialorder %v8196_v9, 0.0  ;;  %v1171_v35 = vand.u32 2147483648, %v8196_v9  ;;  %4236 = vadd.xlane.f32.xlu1 %v4235_v47  ;;  %5234 = vmatmul.mubr.msk.f32.gmra.mxu0 %vm50_vm0, %v7578_v41  ;;  %v8573_v0 = vpop.xlane.xlu1 %2700  ;;  %v4209_v41 = vld [vmem:[%s10605_s1 + $0x10] sm:$0xff]  ;;  %v10657_v45 = vld [vmem:[#allocation19_spill] sm:$0xff] }
 0x11f   :  { %v5908_v6 = vpop.eup %5907  ;;  %vm1684_vm12 = vcmp.eq.f32.partialorder %v8231_v57, inf  ;;  %5361 = vmatprep.subr.msk.mxu1 %vm50_vm0, %v8542_v31  ;;  %5929 = vrsqrt.f32 %v8326_v61  ;;  %v4218_v5 = vmul.f32 %v4210_v18, %v4210_v18  ;;  %v1179_v27 = vsel %vm1177_vm7, %v1178_v19, %v1176_v37  ;;  %4239 = vadd.xlane.f32.xlu0 %v4238_v42  ;;  %v8575_v25 = vpop.xlane.xlu0 %2177  ;;  %v10659_v42 = vld [vmem:[#allocation22_spill] sm:$0xff] }
 0x120   :  { %5931 = vrcp.f32 %v1702_v38  ;;  %v1692_v23 = vsel %vm1691_vm8, %v8194_v20, %v1690_v62  ;;  %vm1686_vm13 = vcmp.eq.f32.partialorder %v8231_v57, 0.0  ;;  %v1687_v29 = vand.u32 2147483648, %v8231_v57  ;;  %v5910_v48 = vpop.eup %5909  ;;  %5287 = vmatmul.mubr.msk.f32.gmra.mxu1 %vm50_vm0, %v7761_v52  ;;  %5307 = vmatprep.subr.msk.mxu0 %vm50_vm0, %v8548_v63  ;;  %v6540_v52 = vld [vmem:[%s10604_s0 + $0x1c8] sm:$0xff] }
 0x121   :  { %v1172_v13 = vsel %vm1170_vm11, %v1171_v35, %v1169_v24  ;;  %v1683_v32 = vmul.f32 %v5906_v2, %v8231_v57  ;;  %v1160_v22 = vmul.f32 %v5908_v6, %v8233_v53  ;;  %5933 = vrsqrt.f32 %v8371_v8  ;;  %v5912_v46 = vpop.eup %5911  ;;  %5289 = vmatprep.mubr.msk.f32.mxu1 %vm50_vm0, %v7720_v51  ;;  %5362 = vmatpush3.xpose.msk.msra.mxu1 %vm50_vm0, %v8542_v31  ;;  %v10660_v2 = vld [vmem:[#allocation21_spill] sm:$0xff]  ;;  %v6542_v24 = vld [vmem:[%s10604_s0 + $0x1c0] sm:$0xff]  ;;  %v6543_v35 = vld [vmem:[%s10604_s0 + $0x138] sm:$0xff] }
 0x122   :  { %v8596_v9 = vmul.f32 %v6540_v52, %v5902_v17  ;;  %v4232_v16 = vsel %vm50_vm0, %v4218_v5, 0.0  ;;  %v8602_v7 = vmul.f32 %v6541_v34, %v5904_v26  ;;  %5935 = vrsqrt.f32 %v8373_v14  ;;  %5236 = vmatprep.mubr.msk.f32.mxu0 %vm50_vm0, %v10657_v45  ;;  %5308 = vmatpush3.xpose.msk.msra.mxu0 %vm50_vm0, %v8548_v63  ;;  %v8618_v62 = vpop.xlane.xlu1 %2697  ;;  %v6544_v45 = vld [vmem:[%s10604_s0 + $0x1b8] sm:$0xff] }
 0x123   :  { %v5914_v51 = vpop.eup %5913  ;;  %5937 = vrcp.f32 %v1179_v27  ;;  %vm1161_vm14 = vcmp.eq.f32.partialorder %v8233_v53, inf  ;;  %vm1163_vm15 = vcmp.eq.f32.partialorder %v8233_v53, 0.0  ;;  %v1164_v19 = vand.u32 2147483648, %v8233_v53  ;;  %5237 = vmatmul.mubr.msk.f32.gmra.mxu0 %vm50_vm0, %v10658_v59  ;;  %v8620_v47 = vpop.xlane.xlu0 %2174  ;;  %4233 = vadd.xlane.f32.xlu0 %v4232_v16  ;;  %v4208_v27 = vld [vmem:[%s10605_s1 + $0x8] sm:$0xff]  ;;  %v4207_v59 = vld [vmem:[%s10605_s1] sm:$0xff] }
 0x124   :  { %v5916_v58 = vpop.eup %5915  ;;  %5939 = vrcp.f32 %v1172_v13  ;;  %vm1677_vm1 = vcmp.eq.f32.partialorder %v8272_v50, inf  ;;  %v1680_v17 = vand.u32 2147483648, %v8272_v50  ;;  %5363 = vmatprep.subr.msk.mxu1 %vm50_vm0, %v8596_v9  ;;  %v4217_v38 = vmul.f32 %v4209_v41, %v4209_v41  ;;  %5290 = vmatmul.mubr.msk.f32.gmra.mxu1 %vm50_vm0, %v10659_v42 }
 0x125   :  { %v5918_v18 = vpop.eup %5917  ;;  %v1695_v26 = vsel %vm1693_vm10, %v1694_v44, %v1692_v23  ;;  %v1162_v37 = vsel %vm1161_vm14, %v8233_v53, %v1160_v22  ;;  %vm1679_vm2 = vcmp.eq.f32.partialorder %v8272_v50, 0.0  ;;  %v1153_v55 = vmul.f32 %v5916_v58, %v8274_v21  ;;  %5309 = vmatprep.subr.msk.mxu0 %vm50_vm0, %v8602_v7  ;;  %5292 = vmatprep.mubr.msk.f32.mxu1 %vm50_vm0, %v10660_v2 }
 0x126   :  { %5941 = vrsqrt.f32 %v8426_v39  ;;  %v5920_v43 = vpop.eup %5919  ;;  %v1685_v20 = vsel %vm1684_vm12, %v8231_v57, %v1683_v32  ;;  %v4229_v44 = vsel %vm50_vm0, %v4217_v38, 0.0  ;;  %v8643_v6 = vmul.f32 %v6542_v24, %v5910_v48  ;;  %5364 = vmatpush3.xpose.msk.msra.mxu1 %vm50_vm0, %v8596_v9  ;;  %5310 = vmatpush3.xpose.msk.msra.mxu0 %vm50_vm0, %v8602_v7  ;;  %v6545_v57 = vld [vmem:[%s10604_s0 + $0x130] sm:$0xff] }
 0x127   :  { %v8648_v5 = vmul.f32 %v6543_v35, %v5912_v46  ;;  %v5922_v23 = vpop.eup %5921  ;;  %v1676_v13 = vmul.f32 %v5914_v51, %v8272_v50  ;;  %vm1154_vm3 = vcmp.eq.f32.partialorder %v8274_v21, inf  ;;  %vm1156_vm4 = vcmp.eq.f32.partialorder %v8274_v21, 0.0  ;;  %4230 = vadd.xlane.f32.xlu1 %v4229_v44  ;;  %v8668_v46 = vpop.xlane.xlu1 %2694  ;;  %v10661_v51 = vld [vmem:[#allocation20_spill] sm:$0xff] }
 0x128   :  { %5943 = vrsqrt.f32 %v8428_v11  ;;  %v5924_v48 = vpop.eup %5923  ;;  %v1165_v32 = vsel %vm1163_vm15, %v1164_v19, %v1162_v37  ;;  %v1157_v22 = vand.u32 2147483648, %v8274_v21  ;;  %v1669_v41 = vmul.f32 %v5922_v23, %v8324_v49  ;;  %5365 = vmatprep.subr.msk.mxu1 %vm50_vm0, %v8643_v6  ;;  %v8670_v52 = vpop.xlane.xlu0 %2171  ;;  %5293 = vmatmul.mubr.msk.f32.gmra.mxu1 %vm50_vm0, %v10661_v51 }
 0x129   :  { %vm1670_vm5 = vcmp.eq.f32.partialorder %v8324_v49, inf  ;;  %v8672_v16 = vpop.eup %5925  ;;  %5945 = vrcp.f32 %v1695_v26  ;;  %v1688_v53 = vsel %vm1686_vm13, %v1687_v29, %v1685_v20  ;;  %v1155_v34 = vsel %vm1154_vm3, %v8274_v21, %v1153_v55  ;;  %5311 = vmatprep.subr.msk.mxu0 %vm50_vm0, %v8648_v5 }
 0x12a   :  { %v4216_v19 = vmul.f32 %v4208_v27, %v4208_v27  ;;  %vm1672_vm6 = vcmp.eq.f32.partialorder %v8324_v49, 0.0  ;;  %v8689_v58 = vmul.f32 %v6544_v45, %v5918_v18  ;;  %v8694_v29 = vmul.f32 %v6545_v57, %v5920_v43  ;;  %v5928_v38 = vpop.eup %5927  ;;  %5366 = vmatpush3.xpose.msk.msra.mxu1 %vm50_vm0, %v8643_v6  ;;  %5312 = vmatpush3.xpose.msk.msra.mxu0 %vm50_vm0, %v8648_v5 }
 0x12b   :  { %5947 = vrsqrt.f32 %v8488_v3  ;;  %v1678_v26 = vsel %vm1677_vm1, %v8272_v50, %v1676_v13  ;;  %v1673_v18 = vand.u32 2147483648, %v8324_v49  ;;  %v1158_v42 = vsel %vm1156_vm4, %v1157_v22, %v1155_v34  ;;  %v8717_v20 = vpop.xlane.xlu1 %2691  ;;  %v6546_v13 = vld [vmem:[%s10604_s0 + $0x1b0] sm:$0xff]  ;;  %v6547_v22 = vld [vmem:[%s10604_s0 + $0x128] sm:$0xff] }
 0x12c   :  { %5949 = vrcp.f32 %v1165_v32  ;;  %v4226_v37 = vsel %vm50_vm0, %v4216_v19, 0.0  ;;  %v5930_v55 = vpop.eup %5929  ;;  %v1671_v43 = vsel %vm1670_vm5, %v8324_v49, %v1669_v41  ;;  %vm1147_vm7 = vcmp.eq.f32.partialorder %v8326_v61, inf  ;;  %5367 = vmatprep.subr.msk.mxu1 %vm50_vm0, %v8689_v58  ;;  %v8719_v2 = vpop.xlane.xlu0 %2168  ;;  %5313 = vmatprep.subr.msk.mxu0 %vm50_vm0, %v8694_v29 }
 0x12d   :  { %5951 = vrcp.f32 %v1688_v53  ;;  %4227 = vadd.xlane.f32.xlu0 %v4226_v37  ;;  %v8721_v44 = vpop.eup %5931  ;;  %v1146_v24 = vmul.f32 %v5930_v55, %v8326_v61  ;;  %v1150_v21 = vand.u32 2147483648, %v8326_v61  ;;  %v4215_v35 = vmul.f32 %v4207_v59, %v4207_v59  ;;  %v6549_v55 = vld [vmem:[%s10604_s0 + $0x120] sm:$0xff] }
 0x12e   :  { %5953 = vrsqrt.f32 %v8490_v60  ;;  %v5934_v27 = vpop.eup %5933  ;;  %v1681_v23 = vsel %vm1679_vm2, %v1680_v17, %v1678_v26  ;;  %v8735_v32 = vmul.f32 %v6546_v13, %v5924_v48  ;;  %v8740_v41 = vmul.f32 %v6547_v22, %v5928_v38  ;;  %5368 = vmatpush3.xpose.msk.msra.mxu1 %vm50_vm0, %v8689_v58  ;;  %5314 = vmatpush3.xpose.msk.msra.mxu0 %vm50_vm0, %v8694_v29 }
 0x12f   :  { %5955 = vrsqrt.f32 %v8528_v54  ;;  %v5936_v53 = vpop.eup %5935  ;;  %v1674_v50 = vsel %vm1672_vm6, %v1673_v18, %v1671_v43  ;;  %v1148_v17 = vsel %vm1147_vm7, %v8326_v61, %v1146_v24  ;;  %v4223_v48 = vsel %vm50_vm0, %v4215_v35, 0.0  ;;  %v8759_v51 = vpop.xlane.xlu1 %2688  ;;  %v6548_v18 = vld [vmem:[%s10604_s0 + $0x1a8] sm:$0xff] }
 0x130   :  { %5957 = vrcp.f32 %v1158_v42  ;;  %v5938_v34 = vpop.eup %5937  ;;  %vm1149_vm8 = vcmp.eq.f32.partialorder %v8326_v61, 0.0  ;;  %vm2821_vm9 = vcmp.eq.f32.partialorder %v8371_v8, inf  ;;  %v2297_v49 = vmul.f32 %v5936_v53, %v8373_v14  ;;  %4224 = vadd.xlane.f32.xlu1 %v4223_v48  ;;  %5369 = vmatprep.subr.msk.mxu1 %vm50_vm0, %v8735_v32  ;;  %v8761_v19 = vpop.xlane.xlu0 %2165  ;;  %v6550_v53 = vld [vmem:[%s10604_s0 + $0x1a0] sm:$0xff] }
 0x131   :  { %5959 = vrsqrt.f32 %v8530_v30  ;;  %v5940_v45 = vpop.eup %5939  ;;  %v1151_v57 = vsel %vm1149_vm8, %v1150_v21, %v1148_v17  ;;  %v2820_v59 = vmul.f32 %v5934_v27, %v8371_v8  ;;  %vm2298_vm10 = vcmp.eq.f32.partialorder %v8373_v14, inf  ;;  %5315 = vmatprep.subr.msk.mxu0 %vm50_vm0, %v8740_v41 }
 0x132   :  { %5961 = vrcp.f32 %v1681_v23  ;;  %v2299_v38 = vsel %vm2298_vm10, %v8373_v14, %v2297_v49  ;;  %v2301_v26 = vand.u32 2147483648, %v8373_v14  ;;  %v8773_v37 = vmul.f32 %v6548_v18, %v8672_v16  ;;  %5370 = vmatpush3.xpose.msk.msra.mxu1 %vm50_vm0, %v8735_v32  ;;  %5316 = vmatpush3.xpose.msk.msra.mxu0 %vm50_vm0, %v8740_v41 }
 0x133   :  { %v5942_v61 = vpop.eup %5941  ;;  %5963 = vrcp.f32 %v1674_v50  ;;  %vm2823_vm11 = vcmp.eq.f32.partialorder %v8371_v8, 0.0  ;;  %vm2300_vm12 = vcmp.eq.f32.partialorder %v8373_v14, 0.0  ;;  %v8784_v42 = vmul.f32 %v6549_v55, %v5938_v34  ;;  %v8791_v14 = vpop.xlane.xlu1 %2685  ;;  %v6551_v34 = vld [vmem:[%s10604_s0 + $0x118] sm:$0xff] }
 0x134   :  { %5965 = vrsqrt.f32 %v8573_v0  ;;  %v2824_v43 = vand.u32 2147483648, %v8371_v8  ;;  %v2302_v24 = vsel %vm2300_vm12, %v2301_v26, %v2299_v38  ;;  %vm2814_vm13 = vcmp.eq.f32.partialorder %v8426_v39, inf  ;;  %5371 = vmatprep.subr.msk.mxu1 %vm50_vm0, %v8773_v37  ;;  %v8793_v21 = vpop.xlane.xlu0 %2162 }
 0x135   :  { %v5944_v16 = vpop.eup %5943  ;;  %5967 = vrcp.f32 %v1151_v57  ;;  %v2822_v35 = vsel %vm2821_vm9, %v8371_v8, %v2820_v59  ;;  %v2813_v27 = vmul.f32 %v5942_v61, %v8426_v39  ;;  %5317 = vmatprep.subr.msk.mxu0 %vm50_vm0, %v8784_v42  ;;  %vm2816_vm14 = vcmp.eq.f32.partialorder %v8426_v39, 0.0 }
 0x136   :  { %v2290_v23 = vmul.f32 %v5944_v16, %v8428_v11  ;;  %5969 = vrsqrt.f32 %v8575_v25  ;;  %v5946_v13 = vpop.eup %5945  ;;  %v2817_v22 = vand.u32 2147483648, %v8426_v39  ;;  %vm2291_vm15 = vcmp.eq.f32.partialorder %v8428_v11, inf  ;;  %5372 = vmatpush3.xpose.msk.msra.mxu1 %vm50_vm0, %v8773_v37  ;;  %5318 = vmatpush3.xpose.msk.msra.mxu0 %vm50_vm0, %v8784_v42 }
 0x137   :  { %v8810_v50 = vmul.f32 %v6550_v53, %v8721_v44  ;;  %5971 = vrcp.f32 %v2302_v24  ;;  %vm2293_vm1 = vcmp.eq.f32.partialorder %v8428_v11, 0.0  ;;  %v2294_v48 = vand.u32 2147483648, %v8428_v11  ;;  %v8830_v38 = vpop.xlane.xlu1 %2682  ;;  %v6553_v53 = vld [vmem:[%s10604_s0 + $0x110] sm:$0xff] }
 0x138   :  { %v5948_v17 = vpop.eup %5947  ;;  %v8821_v49 = vmul.f32 %v6551_v34, %v5940_v45  ;;  %v2825_v57 = vsel %vm2823_vm11, %v2824_v43, %v2822_v35  ;;  %v2292_v59 = vsel %vm2291_vm15, %v8428_v11, %v2290_v23  ;;  %5973 = vrsqrt.f32 %v8618_v62  ;;  %v8832_v26 = vpop.xlane.xlu0 %2159  ;;  %v6552_v43 = vld [vmem:[%s10604_s0 + $0x198] sm:$0xff] }
 0x139   :  { %v5950_v44 = vpop.eup %5949  ;;  %v2806_v61 = vmul.f32 %v5948_v17, %v8488_v3  ;;  %5373 = vmatprep.subr.msk.mxu1 %vm50_vm0, %v8810_v50  ;;  %v2815_v45 = vsel %vm2814_vm13, %v8426_v39, %v2813_v27  ;;  %vm2807_vm2 = vcmp.eq.f32.partialorder %v8488_v3, inf  ;;  %vm2809_vm3 = vcmp.eq.f32.partialorder %v8488_v3, 0.0 }
 0x13a   :  { %v5952_v18 = vpop.eup %5951  ;;  %v2810_v8 = vand.u32 2147483648, %v8488_v3  ;;  %5319 = vmatprep.subr.msk.mxu0 %vm50_vm0, %v8821_v49  ;;  %vm2284_vm4 = vcmp.eq.f32.partialorder %v8490_v60, inf  ;;  %5975 = vrsqrt.f32 %v8620_v47  ;;  %v8848_v24 = vmul.f32 %v6552_v43, %v5946_v13  ;;  %5374 = vmatpush3.xpose.msk.msra.mxu1 %vm50_vm0, %v8810_v50 }
 0x13b   :  { %v5954_v55 = vpop.eup %5953  ;;  %v2808_v16 = vsel %vm2807_vm2, %v8488_v3, %v2806_v61  ;;  %5977 = vrcp.f32 %v2825_v57  ;;  %v2295_v27 = vsel %vm2293_vm1, %v2294_v48, %v2292_v59  ;;  %5320 = vmatpush3.xpose.msk.msra.mxu0 %vm50_vm0, %v8821_v49  ;;  %v8860_v17 = vmul.f32 %v6553_v53, %v5950_v44  ;;  %v8869_v48 = vpop.xlane.xlu1 %2679 }
 0x13c   :  { %v5956_v35 = vpop.eup %5955  ;;  %v2283_v23 = vmul.f32 %v5954_v55, %v8490_v60  ;;  %v2818_v34 = vsel %vm2816_vm14, %v2817_v22, %v2815_v45  ;;  %vm2286_vm5 = vcmp.eq.f32.partialorder %v8490_v60, 0.0  ;;  %v2287_v11 = vand.u32 2147483648, %v8490_v60  ;;  %5375 = vmatprep.subr.msk.mxu1 %vm50_vm0, %v8848_v24  ;;  %v8871_v57 = vpop.xlane.xlu0 %2156  ;;  %v6554_v55 = vld [vmem:[%s10604_s0 + $0x190] sm:$0xff] }
 0x13d   :  { %v5958_v13 = vpop.eup %5957  ;;  %5979 = vrsqrt.f32 %v8668_v46  ;;  %v2811_v44 = vsel %vm2809_vm3, %v2810_v8, %v2808_v16  ;;  %v2799_v22 = vmul.f32 %v5956_v35, %v8528_v54  ;;  %5321 = vmatprep.subr.msk.mxu0 %vm50_vm0, %v8860_v17  ;;  %vm2800_vm6 = vcmp.eq.f32.partialorder %v8528_v54, inf }
 0x13e   :  { %v5960_v59 = vpop.eup %5959  ;;  %v2285_v39 = vsel %vm2284_vm4, %v8490_v60, %v2283_v23  ;;  %5981 = vrsqrt.f32 %v8670_v52  ;;  %vm2802_vm7 = vcmp.eq.f32.partialorder %v8528_v54, 0.0  ;;  %vm2277_vm8 = vcmp.eq.f32.partialorder %v8530_v30, inf  ;;  %5376 = vmatpush3.xpose.msk.msra.mxu1 %vm50_vm0, %v8848_v24 }
 0x13f   :  { %v5962_v61 = vpop.eup %5961  ;;  %5983 = vrcp.f32 %v2295_v27  ;;  %v2276_v3 = vmul.f32 %v5960_v59, %v8530_v30  ;;  %v2288_v8 = vsel %vm2286_vm5, %v2287_v11, %v2285_v39  ;;  %5322 = vmatpush3.xpose.msk.msra.mxu0 %vm50_vm0, %v8860_v17  ;;  %v8895_v16 = vmul.f32 %v6554_v55, %v5952_v18  ;;  %v6555_v27 = vld [vmem:[%s10604_s0 + $0x108] sm:$0xff]  ;;  %v8904_v53 = vpop.xlane.xlu1 %2676 }
 0x140   :  { %v5964_v45 = vpop.eup %5963  ;;  %5985 = vrcp.f32 %v2818_v34  ;;  %v2280_v60 = vand.u32 2147483648, %v8530_v30  ;;  %v8902_v23 = vmul.f32 %v6555_v27, %v5958_v13  ;;  %v8906_v34 = vpop.xlane.xlu0 %2153  ;;  %v2801_v18 = vsel %vm2800_vm6, %v8528_v54, %v2799_v22 }
 0x141   :  { %v5966_v43 = vpop.eup %5965  ;;  %5987 = vrcp.f32 %v2811_v44  ;;  %v2278_v35 = vsel %vm2277_vm8, %v8530_v30, %v2276_v3  ;;  %v2803_v59 = vand.u32 2147483648, %v8528_v54  ;;  %vm2279_vm9 = vcmp.eq.f32.partialorder %v8530_v30, 0.0  ;;  %5377 = vmatprep.subr.msk.mxu1 %vm50_vm0, %v8895_v16 }
 0x142   :  { %v5968_v11 = vpop.eup %5967  ;;  %5989 = vrsqrt.f32 %v8717_v20  ;;  %v2281_v44 = vsel %vm2279_vm9, %v2280_v60, %v2278_v35  ;;  %vm2793_vm10 = vcmp.eq.f32.partialorder %v8573_v0, inf  ;;  %vm2795_vm11 = vcmp.eq.f32.partialorder %v8573_v0, 0.0  ;;  %5323 = vmatprep.subr.msk.mxu0 %vm50_vm0, %v8902_v23  ;;  %5378 = vmatpush3.xpose.msk.msra.mxu1 %vm50_vm0, %v8895_v16  ;;  %v6558_v60 = vld [vmem:[%s10604_s0 + $0x180] sm:$0xff] }
 0x143   :  { %v5970_v13 = vpop.eup %5969  ;;  %5991 = vrcp.f32 %v2288_v8  ;;  %v2792_v39 = vmul.f32 %v5966_v43, %v8573_v0  ;;  %vm2270_vm12 = vcmp.eq.f32.partialorder %v8575_v25, inf  ;;  %5324 = vmatpush3.xpose.msk.msra.mxu0 %vm50_vm0, %v8902_v23  ;;  %v2804_v3 = vsel %vm2802_vm7, %v2803_v59, %v2801_v18  ;;  %v6556_v8 = vld [vmem:[%s10604_s0 + $0x188] sm:$0xff]  ;;  %v6557_v43 = vld [vmem:[%s10604_s0 + $0x100] sm:$0xff] }
 0x144   :  { %v2269_v22 = vmul.f32 %v5970_v13, %v8575_v25  ;;  %5993 = vrsqrt.f32 %v8719_v2  ;;  %v5972_v30 = vpop.eup %5971  ;;  %v8933_v55 = vmul.f32 %v6556_v8, %v5962_v61  ;;  %v1258_v35 = vmul.f32 %v6557_v43, %v5968_v11  ;;  %v8941_v13 = vpop.xlane.xlu1 %2673 }
 0x145   :  { %v1781_v27 = vmul.f32 %v6558_v60, %v5964_v45  ;;  %v8943_v54 = vpop.xlane.xlu0 %2150  ;;  %v5974_v18 = vpop.eup %5973  ;;  %5995 = vrcp.f32 %v2281_v44  ;;  %v2796_v59 = vand.u32 2147483648, %v8573_v0  ;;  %v2273_v8 = vand.u32 2147483648, %v8575_v25 }
 0x146   :  { %v2271_v61 = vsel %vm2270_vm12, %v8575_v25, %v2269_v22  ;;  %vm2272_vm13 = vcmp.eq.f32.partialorder %v8575_v25, 0.0  ;;  %vm2786_vm14 = vcmp.eq.f32.partialorder %v8618_v62, inf  ;;  %vm2788_vm15 = vcmp.eq.f32.partialorder %v8618_v62, 0.0  ;;  %5379 = vmatprep.subr.msk.mxu1 %vm50_vm0, %v8933_v55  ;;  %5325 = vmatprep.subr.msk.mxu0 %vm50_vm0, %v1258_v35 }
 0x147   :  { %5997 = vrsqrt.f32 %v8759_v51  ;;  %v5976_v45 = vpop.eup %5975  ;;  %v2794_v11 = vsel %vm2793_vm10, %v8573_v0, %v2792_v39  ;;  %v2274_v44 = vsel %vm2272_vm13, %v2273_v8, %v2271_v61  ;;  %v2789_v25 = vand.u32 2147483648, %v8618_v62  ;;  %5327 = vmatprep.mubr.msk.f32.mxu0 %vm50_vm0, %v1258_v35  ;;  %5383 = vmatprep.mubr.msk.f32.mxu1 %vm50_vm0, %v1781_v27  ;;  %v6559_v39 = vld [vmem:[%s10604_s0 + $0x278] sm:$0xff] }
 0x148   :  { %5999 = vrcp.f32 %v2804_v3  ;;  %v5978_v22 = vpop.eup %5977  ;;  %v2785_v43 = vmul.f32 %v5974_v18, %v8618_v62  ;;  %v2262_v60 = vmul.f32 %v5976_v45, %v8620_v47  ;;  %5380 = vmatpush3.xpose.msk.msra.mxu1 %vm50_vm0, %v8933_v55  ;;  %5326 = vmatpush3.xpose.msk.msra.mxu0 %vm50_vm0, %v1258_v35  ;;  %v8972_v3 = vmul.f32 %v6559_v39, %v5972_v30  ;;  %v8974_v61 = vpop.xlane.xlu1 %2670 }
 0x149   :  { %6001 = vrsqrt.f32 %v8761_v19  ;;  %v8976_v8 = vpop.xlane.xlu0 %2147  ;;  %vm2263_vm1 = vcmp.eq.f32.partialorder %v8620_v47, inf  ;;  %vm2265_vm2 = vcmp.eq.f32.partialorder %v8620_v47, 0.0  ;;  %v2266_v45 = vand.u32 2147483648, %v8620_v47  ;;  %5381 = vmatprep.subr.msk.mxu1 %vm50_vm0, %v1781_v27 }
 0x14a   :  { %v5980_v18 = vpop.eup %5979  ;;  %6003 = vrsqrt.f32 %v8791_v14  ;;  %v2797_v30 = vsel %vm2795_vm11, %v2796_v59, %v2794_v11  ;;  %v2264_v39 = vsel %vm2263_vm1, %v8620_v47, %v2262_v60  ;;  %vm2779_vm3 = vcmp.eq.f32.partialorder %v8668_v46, inf  ;;  %5407 = vmatprep.subr.msk.mxu0 %vm50_vm0, %v8972_v3 }
 0x14b   :  { %v5982_v35 = vpop.eup %5981  ;;  %6005 = vrcp.f32 %v2274_v44  ;;  %vm2781_vm4 = vcmp.eq.f32.partialorder %v8668_v46, 0.0  ;;  %v2782_v28 = vand.u32 2147483648, %v8668_v46  ;;  %vm2256_vm5 = vcmp.eq.f32.partialorder %v8670_v52, inf  ;;  %5328 = vmatmul.mubr.msk.f32.vlgmr.msra.gmra.mxu0 %vm50_vm0, %v8902_v23 }
 0x14c   :  { %v5984_v10 = vpop.eup %5983  ;;  %v2255_v40 = vmul.f32 %v5982_v35, %v8670_v52  ;;  %6007 = vrsqrt.f32 %v8793_v21  ;;  %v2787_v59 = vsel %vm2786_vm14, %v8618_v62, %v2785_v43  ;;  %v2267_v11 = vsel %vm2265_vm2, %v2266_v45, %v2264_v39  ;;  %5382 = vmatpush3.xpose.msk.msra.mxu1 %vm50_vm0, %v1781_v27  ;;  %5330 = vmatprep.mubr.msk.f32.mxu0 %vm50_vm0, %v8860_v17  ;;  %v9006_v23 = vpop.xlane.xlu1 %2667  ;;  %v6560_v27 = vld [vmem:[%s10604_s0 + $0x2f8] sm:$0xff] }
 0x14d   :  { %v5986_v0 = vpop.eup %5985  ;;  %vm2258_vm6 = vcmp.eq.f32.partialorder %v8670_v52, 0.0  ;;  %v2259_v44 = vand.u32 2147483648, %v8670_v52  ;;  %v9008_v60 = vpop.xlane.xlu0 %2144  ;;  %6009 = vrcp.f32 %v2797_v30  ;;  %v2778_v43 = vmul.f32 %v5980_v18, %v8668_v46  ;;  %5408 = vmatpush3.xpose.msk.msra.mxu0 %vm50_vm0, %v8972_v3  ;;  %v6561_v18 = vld [vmem:[%s10604_s0 + $0x270] sm:$0xff] }
 0x14e   :  { %v9010_v35 = vpop.eup %5987  ;;  %v2257_v47 = vsel %vm2256_vm5, %v8670_v52, %v2255_v40  ;;  %v9019_v45 = vmul.f32 %v6560_v27, %v5978_v22  ;;  %vm2772_vm7 = vcmp.eq.f32.partialorder %v8717_v20, inf  ;;  %vm2774_vm8 = vcmp.eq.f32.partialorder %v8717_v20, 0.0  ;;  %v6562_v52 = vld [vmem:[%s10604_s0 + $0x2f0] sm:$0xff] }
 0x14f   :  { %v5990_v17 = vpop.eup %5989  ;;  %v9026_v30 = vmul.f32 %v6561_v18, %v5984_v10  ;;  %6011 = vrsqrt.f32 %v8830_v38  ;;  %v2790_v39 = vsel %vm2788_vm15, %v2789_v25, %v2787_v59  ;;  %v2775_v22 = vand.u32 2147483648, %v8717_v20  ;;  %5331 = vmatmul.mubr.msk.f32.gmra.mxu0 %vm50_vm0, %v8821_v49  ;;  %5384 = vmatmul.mubr.msk.f32.vlgmr.msra.gmra.mxu1 %vm50_vm0, %v8933_v55 }
 0x150   :  { %v5992_v40 = vpop.eup %5991  ;;  %6013 = vrcp.f32 %v2267_v11  ;;  %vm2249_vm9 = vcmp.eq.f32.partialorder %v8719_v2, inf  ;;  %5463 = vmatprep.subr.msk.mxu1 %vm50_vm0, %v9019_v45  ;;  %v2260_v10 = vsel %vm2258_vm6, %v2259_v44, %v2257_v47  ;;  %v2771_v18 = vmul.f32 %v5990_v17, %v8717_v20  ;;  %5386 = vmatprep.mubr.msk.f32.mxu1 %vm50_vm0, %v8895_v16  ;;  %v9060_v25 = vpop.xlane.xlu1 %3758  ;;  %v6563_v16 = vld [vmem:[%s10604_s0 + $0x268] sm:$0xff] }
 0x151   :  { %v5994_v27 = vpop.eup %5993  ;;  %vm2251_vm10 = vcmp.eq.f32.partialorder %v8719_v2, 0.0  ;;  %5409 = vmatprep.subr.msk.mxu0 %vm50_vm0, %v9026_v30  ;;  %6015 = vrsqrt.f32 %v8832_v26  ;;  %v2780_v62 = vsel %vm2779_vm3, %v8668_v46, %v2778_v43  ;;  %5464 = vmatpush3.xpose.msk.msra.mxu1 %vm50_vm0, %v9019_v45  ;;  %v9057_v55 = vmul.f32 %v6562_v52, %v5986_v0  ;;  %v9062_v59 = vpop.xlane.xlu0 %3235 }
 0x152   :  { %v2248_v49 = vmul.f32 %v5994_v27, %v8719_v2  ;;  %6017 = vrsqrt.f32 %v8869_v48  ;;  %v5996_v11 = vpop.eup %5995  ;;  %v2252_v44 = vand.u32 2147483648, %v8719_v2  ;;  %vm2765_vm11 = vcmp.eq.f32.partialorder %v8759_v51, inf  ;;  %5333 = vmatprep.mubr.msk.f32.mxu0 %vm50_vm0, %v8784_v42  ;;  %5410 = vmatpush3.xpose.msk.msra.mxu0 %vm50_vm0, %v9026_v30 }
 0x153   :  { %6019 = vrcp.f32 %v2790_v39  ;;  %v9073_v0 = vmul.f32 %v6563_v16, %v5992_v40  ;;  %vm2767_vm12 = vcmp.eq.f32.partialorder %v8759_v51, 0.0  ;;  %v2768_v17 = vand.u32 2147483648, %v8759_v51  ;;  %5465 = vmatprep.subr.msk.mxu1 %vm50_vm0, %v9057_v55  ;;  %5334 = vmatmul.mubr.msk.f32.gmra.mxu0 %vm50_vm0, %v8740_v41 }
 0x154   :  { %v5998_v43 = vpop.eup %5997  ;;  %6021 = vrcp.f32 %v2260_v10  ;;  %v2250_v47 = vsel %vm2249_vm9, %v8719_v2, %v2248_v49  ;;  %vm2242_vm13 = vcmp.eq.f32.partialorder %v8761_v19, inf  ;;  %v2783_v40 = vsel %vm2781_vm4, %v2782_v28, %v2780_v62  ;;  %5387 = vmatmul.mubr.msk.f32.gmra.mxu1 %vm50_vm0, %v8848_v24  ;;  %v6564_v28 = vld [vmem:[%s10604_s0 + $0x2e8] sm:$0xff]  ;;  %v6565_v2 = vld [vmem:[%s10604_s0 + $0x260] sm:$0xff]  ;;  %5336 = vmatprep.mubr.msk.f32.mxu0 %vm50_vm0, %v8694_v29 }
 0x155   :  { %v6000_v42 = vpop.eup %5999  ;;  %v2773_v39 = vsel %vm2772_vm7, %v8717_v20, %v2771_v18  ;;  %v2253_v27 = vsel %vm2251_vm10, %v2252_v44, %v2250_v47  ;;  %5411 = vmatprep.subr.msk.mxu0 %vm50_vm0, %v9073_v0  ;;  %6023 = vrsqrt.f32 %v8871_v57  ;;  %v2764_v10 = vmul.f32 %v5998_v43, %v8759_v51  ;;  %5389 = vmatprep.mubr.msk.f32.mxu1 %vm50_vm0, %v8810_v50  ;;  %v9116_v18 = vpop.xlane.xlu1 %3755 }
 0x156   :  { %v6002_v41 = vpop.eup %6001  ;;  %vm2244_vm14 = vcmp.eq.f32.partialorder %v8761_v19, 0.0  ;;  %5466 = vmatpush3.xpose.msk.msra.mxu1 %vm50_vm0, %v9057_v55  ;;  %v9109_v46 = vmul.f32 %v6564_v28, %v9010_v35  ;;  %v9114_v24 = vmul.f32 %v6565_v2, %v5996_v11  ;;  %v2245_v49 = vand.u32 2147483648, %v8761_v19  ;;  %5412 = vmatpush3.xpose.msk.msra.mxu0 %vm50_vm0, %v9073_v0  ;;  %v9126_v35 = vpop.xlane.xlu0 %3232 }
 0x157   :  { %v6004_v62 = vpop.eup %6003  ;;  %v2241_v50 = vmul.f32 %v6002_v41, %v8761_v19  ;;  %vm2758_vm15 = vcmp.eq.f32.partialorder %v8791_v14, inf  ;;  %6025 = vrsqrt.f32 %v8904_v53  ;;  %v2776_v11 = vsel %vm2774_vm8, %v2775_v22, %v2773_v39  ;;  %5337 = vmatmul.mubr.msk.f32.gmra.mxu0 %vm50_vm0, %v8648_v5 }
 0x158   :  { %v6006_v52 = vpop.eup %6005  ;;  %6027 = vrcp.f32 %v2783_v40  ;;  %vm2760_vm1 = vcmp.eq.f32.partialorder %v8791_v14, 0.0  ;;  %v2761_v44 = vand.u32 2147483648, %v8791_v14  ;;  %5467 = vmatprep.subr.msk.mxu1 %vm50_vm0, %v9109_v46  ;;  %v2757_v43 = vmul.f32 %v6004_v62, %v8791_v14  ;;  %5390 = vmatmul.mubr.msk.f32.gmra.mxu1 %vm50_vm0, %v8773_v37 }
 0x159   :  { %v6008_v29 = vpop.eup %6007  ;;  %6029 = vrcp.f32 %v2253_v27  ;;  %v2243_v16 = vsel %vm2242_vm13, %v8761_v19, %v2241_v50  ;;  %vm2235_vm2 = vcmp.eq.f32.partialorder %v8793_v21, inf  ;;  %5413 = vmatprep.subr.msk.mxu0 %vm50_vm0, %v9114_v24  ;;  %v2766_v5 = vsel %vm2765_vm11, %v8759_v51, %v2764_v10  ;;  %5392 = vmatprep.mubr.msk.f32.mxu1 %vm50_vm0, %v8735_v32  ;;  %v9158_v37 = vpop.xlane.xlu1 %3752  ;;  %v6566_v32 = vld [vmem:[%s10604_s0 + $0x2e0] sm:$0xff] }
 0x15a   :  { %v2246_v20 = vsel %vm2244_vm14, %v2245_v49, %v2243_v16  ;;  %v2234_v22 = vmul.f32 %v6008_v29, %v8793_v21  ;;  %5468 = vmatpush3.xpose.msk.msra.mxu1 %vm50_vm0, %v9109_v46  ;;  %6031 = vrsqrt.f32 %v8906_v34  ;;  %v6010_v47 = vpop.eup %6009  ;;  %vm2237_vm3 = vcmp.eq.f32.partialorder %v8793_v21, 0.0  ;;  %5339 = vmatprep.mubr.msk.f32.mxu0 %vm50_vm0, %v8602_v7  ;;  %v9171_v39 = vpop.xlane.xlu0 %3229  ;;  %v6567_v7 = vld [vmem:[%s10604_s0 + $0x258] sm:$0xff] }
 0x15b   :  { %6033 = vrcp.f32 %v2776_v11  ;;  %v2238_v40 = vand.u32 2147483648, %v8793_v21  ;;  %5414 = vmatpush3.xpose.msk.msra.mxu0 %vm50_vm0, %v9114_v24  ;;  %v9169_v19 = vmul.f32 %v6566_v32, %v6000_v42  ;;  %vm2751_vm4 = vcmp.eq.f32.partialorder %v8830_v38, inf  ;;  %v6568_v29 = vld [vmem:[%s10604_s0 + $0x2d8] sm:$0xff] }
 0x15c   :  { %v6012_v27 = vpop.eup %6011  ;;  %6035 = vrcp.f32 %v2246_v20  ;;  %v2236_v41 = vsel %vm2235_vm2, %v8793_v21, %v2234_v22  ;;  %5340 = vmatmul.mubr.msk.f32.gmra.mxu0 %vm50_vm0, %v8548_v63  ;;  %v9182_v10 = vmul.f32 %v6567_v7, %v6006_v52  ;;  %v2769_v28 = vsel %vm2767_vm12, %v2768_v17, %v2766_v5  ;;  %5393 = vmatmul.mubr.msk.f32.gmra.mxu1 %vm50_vm0, %v8689_v58 }
 0x15d   :  { %v6014_v42 = vpop.eup %6013  ;;  %v2759_v2 = vsel %vm2758_vm15, %v8791_v14, %v2757_v43  ;;  %v2750_v62 = vmul.f32 %v6012_v27, %v8830_v38  ;;  %5469 = vmatprep.subr.msk.mxu1 %vm50_vm0, %v9169_v19  ;;  %6037 = vrsqrt.f32 %v8941_v13  ;;  %v2239_v50 = vsel %vm2237_vm3, %v2238_v40, %v2236_v41  ;;  %5395 = vmatprep.mubr.msk.f32.mxu1 %vm50_vm0, %v8643_v6  ;;  %v9214_v49 = vpop.xlane.xlu1 %3749 }
 0x15e   :  { %v6016_v63 = vpop.eup %6015  ;;  %vm2753_vm5 = vcmp.eq.f32.partialorder %v8830_v38, 0.0  ;;  %v2754_v51 = vand.u32 2147483648, %v8830_v38  ;;  %vm2228_vm6 = vcmp.eq.f32.partialorder %v8832_v26, inf  ;;  %5415 = vmatprep.subr.msk.mxu0 %vm50_vm0, %v9182_v10  ;;  %vm2230_vm7 = vcmp.eq.f32.partialorder %v8832_v26, 0.0  ;;  %5470 = vmatpush3.xpose.msk.msra.mxu1 %vm50_vm0, %v9169_v19  ;;  %v9216_v52 = vpop.xlane.xlu0 %3226 }
 0x15f   :  { %v6018_v17 = vpop.eup %6017  ;;  %v2227_v58 = vmul.f32 %v6016_v63, %v8832_v26  ;;  %v2231_v21 = vand.u32 2147483648, %v8832_v26  ;;  %5342 = vmatprep.mubr.msk.f32.mxu0 %vm50_vm0, %v8486_v1  ;;  %6039 = vrsqrt.f32 %v8943_v54  ;;  %v2762_v11 = vsel %vm2760_vm1, %v2761_v44, %v2759_v2  ;;  %5416 = vmatpush3.xpose.msk.msra.mxu0 %vm50_vm0, %v9182_v10  ;;  %v6569_v1 = vld [vmem:[%s10604_s0 + $0x250] sm:$0xff] }
 0x160   :  { %v6020_v6 = vpop.eup %6019  ;;  %6041 = vrcp.f32 %v2769_v28  ;;  %v9225_v16 = vmul.f32 %v6568_v29, %v6010_v47  ;;  %v9230_v43 = vmul.f32 %v6569_v1, %v6014_v42  ;;  %v2752_v14 = vsel %vm2751_vm4, %v8830_v38, %v2750_v62  ;;  %5343 = vmatmul.mubr.msk.f32.gmra.mxu0 %vm50_vm0, %v8389_v36  ;;  %5396 = vmatmul.mubr.msk.f32.gmra.mxu1 %vm50_vm0, %v8596_v9  ;;  %v6573_v29 = vld [vmem:[%s10604_s0 + $0x240] sm:$0xff] }
 0x161   :  { %v6022_v5 = vpop.eup %6021  ;;  %6043 = vrcp.f32 %v2239_v50  ;;  %v2229_v44 = vsel %vm2228_vm6, %v8832_v26, %v2227_v58  ;;  %vm2744_vm8 = vcmp.eq.f32.partialorder %v8869_v48, inf  ;;  %v2743_v47 = vmul.f32 %v6018_v17, %v8869_v48  ;;  %5398 = vmatprep.mubr.msk.f32.mxu1 %vm50_vm0, %v8542_v31  ;;  %5345 = vmatprep.mubr.msk.f32.mxu0 %vm50_vm0, %v8341_v15  ;;  %v6570_v31 = vld [vmem:[%s10604_s0 + $0x2d0] sm:$0xff]  ;;  %v6571_v15 = vld [vmem:[%s10604_s0 + $0x248] sm:$0xff]  ;;  %v9283_v42 = vpop.xlane.xlu1 %3746 }
 0x162   :  { %v6024_v20 = vpop.eup %6023  ;;  %v2232_v22 = vsel %vm2230_vm7, %v2231_v21, %v2229_v44  ;;  %vm2746_vm9 = vcmp.eq.f32.partialorder %v8869_v48, 0.0  ;;  %5471 = vmatprep.subr.msk.mxu1 %vm50_vm0, %v9225_v16  ;;  %5417 = vmatprep.subr.msk.mxu0 %vm50_vm0, %v9230_v43  ;;  %6045 = vrsqrt.f32 %v8974_v61  ;;  %vm2221_vm10 = vcmp.eq.f32.partialorder %v8871_v57, inf  ;;  %v9285_v28 = vpop.xlane.xlu0 %3223  ;;  %v6572_v21 = vld [vmem:[%s10604_s0 + $0x2c8] sm:$0xff] }
 0x163   :  { %6047 = vrcp.f32 %v2762_v11  ;;  %v2220_v36 = vmul.f32 %v6024_v20, %v8871_v57  ;;  %vm2223_vm11 = vcmp.eq.f32.partialorder %v8871_v57, 0.0  ;;  %5472 = vmatpush3.xpose.msk.msra.mxu1 %vm50_vm0, %v9225_v16  ;;  %v2755_v26 = vsel %vm2753_vm5, %v2754_v51, %v2752_v14  ;;  %5418 = vmatpush3.xpose.msk.msra.mxu0 %vm50_vm0, %v9230_v43  ;;  %v10662_v11 = vld [vmem:[#allocation8_spill] sm:$0xff]  ;;  %v10664_v20 = vld [vmem:[#allocation10_spill] sm:$0xff] }
 0x164   :  { %v6026_v9 = vpop.eup %6025  ;;  %6049 = vrcp.f32 %v2232_v22  ;;  %v2224_v40 = vand.u32 2147483648, %v8871_v57  ;;  %v9269_v32 = vmul.f32 %v6570_v31, %v6020_v6  ;;  %5346 = vmatmul.mubr.msk.f32.gmra.mxu0 %vm50_vm0, %v8289_v4  ;;  %5399 = vmatmul.mubr.msk.f32.gmra.mxu1 %vm50_vm0, %v8481_v56  ;;  %v9281_v7 = vmul.f32 %v6571_v15, %v6022_v5  ;;  %v6574_v31 = vld [vmem:[%s10604_s0 + $0x2c0] sm:$0xff] }
 0x165   :  { %v6028_v27 = vpop.eup %6027  ;;  %v2222_v41 = vsel %vm2221_vm10, %v8871_v57, %v2220_v36  ;;  %v2736_v38 = vmul.f32 %v6026_v9, %v8904_v53  ;;  %6051 = vrsqrt.f32 %v8976_v8  ;;  %v2745_v62 = vsel %vm2744_vm8, %v8869_v48, %v2743_v47  ;;  %5401 = vmatprep.mubr.msk.f32.mxu1 %vm50_vm0, %v8440_v33  ;;  %5348 = vmatprep.mubr.msk.f32.mxu0 %vm50_vm0, %v8222_v12  ;;  %v10663_v12 = vld [vmem:[#allocation11_spill] sm:$0xff] }
 0x166   :  { %v6030_v2 = vpop.eup %6029  ;;  %v2225_v4 = vsel %vm2223_vm11, %v2224_v40, %v2222_v41  ;;  %vm2737_vm12 = vcmp.eq.f32.partialorder %v8904_v53, inf  ;;  %5473 = vmatprep.subr.msk.mxu1 %vm50_vm0, %v9269_v32  ;;  %6053 = vrsqrt.f32 %v9006_v23  ;;  %v2747_v63 = vand.u32 2147483648, %v8869_v48  ;;  %5419 = vmatprep.subr.msk.mxu0 %vm50_vm0, %v9281_v7  ;;  %v9346_v22 = vpop.xlane.xlu0 %3220  ;;  %v10665_v41 = vld [vmem:[#allocation9_spill] sm:$0xff] }
 0x167   :  { %v6032_v56 = vpop.eup %6031  ;;  %6055 = vrcp.f32 %v2755_v26  ;;  %v2738_v50 = vsel %vm2737_vm12, %v8904_v53, %v2736_v38  ;;  %vm2739_vm13 = vcmp.eq.f32.partialorder %v8904_v53, 0.0  ;;  %5474 = vmatpush3.xpose.msk.msra.mxu1 %vm50_vm0, %v9269_v32  ;;  %v2740_v51 = vand.u32 2147483648, %v8904_v53  ;;  %5420 = vmatpush3.xpose.msk.msra.mxu0 %vm50_vm0, %v9281_v7  ;;  %v9344_v53 = vpop.xlane.xlu1 %3743  ;;  %v6575_v38 = vld [vmem:[%s10604_s0 + $0x238] sm:$0xff] }
 0x168   :  { %v6034_v57 = vpop.eup %6033  ;;  %v2213_v33 = vmul.f32 %v6032_v56, %v8906_v34  ;;  %vm2214_vm14 = vcmp.eq.f32.partialorder %v8906_v34, inf  ;;  %6057 = vrsqrt.f32 %v9008_v60  ;;  %v2748_v58 = vsel %vm2746_vm9, %v2747_v63, %v2745_v62  ;;  %5349 = vmatmul.mubr.msk.f32.gmra.mxu0 %vm50_vm0, %v10662_v11  ;;  %5402 = vmatmul.mubr.msk.f32.gmra.mxu1 %vm50_vm0, %v10663_v12  ;;  %v6577_v11 = vld [vmem:[%s10604_s0 + $0x230] sm:$0xff] }
 0x169   :  { %v6036_v17 = vpop.eup %6035  ;;  %6059 = vrcp.f32 %v2225_v4  ;;  %v9318_v6 = vmul.f32 %v6572_v21, %v6028_v27  ;;  %v9327_v1 = vmul.f32 %v6573_v29, %v6030_v2  ;;  %v2741_v5 = vsel %vm2739_vm13, %v2740_v51, %v2738_v50  ;;  %5404 = vmatprep.mubr.msk.f32.mxu1 %vm50_vm0, %v10664_v20 }
 0x16a   :  { %v6038_v48 = vpop.eup %6037  ;;  %v2215_v14 = vsel %vm2214_vm14, %v8906_v34, %v2213_v33  ;;  %v2217_v44 = vand.u32 2147483648, %v8906_v34  ;;  %6061 = vrsqrt.f32 %v9060_v25  ;;  %vm2216_vm15 = vcmp.eq.f32.partialorder %v8906_v34, 0.0 }
 0x16b   :  { %vm2730_vm1 = vcmp.eq.f32.partialorder %v8941_v13, inf  ;;  %vm2732_vm2 = vcmp.eq.f32.partialorder %v8941_v13, 0.0  ;;  %5475 = vmatprep.subr.msk.mxu1 %vm50_vm0, %v9318_v6  ;;  %5421 = vmatprep.subr.msk.mxu0 %vm50_vm0, %v9327_v1  ;;  %6063 = vrsqrt.f32 %v9062_v59  ;;  %v2729_v34 = vmul.f32 %v6038_v48, %v8941_v13  ;;  %v9401_v29 = vpop.xlane.xlu1 %3740  ;;  %v9403_v48 = vpop.xlane.xlu0 %3217 }
 0x16c   :  { %v6040_v47 = vpop.eup %6039  ;;  %6065 = vrcp.f32 %v2748_v58  ;;  %v2218_v36 = vsel %vm2216_vm15, %v2217_v44, %v2215_v14  ;;  %v2733_v9 = vand.u32 2147483648, %v8941_v13  ;;  %5476 = vmatpush3.xpose.msk.msra.mxu1 %vm50_vm0, %v9318_v6  ;;  %5422 = vmatpush3.xpose.msk.msra.mxu0 %vm50_vm0, %v9327_v1  ;;  %v9358_v27 = vmul.f32 %v6574_v31, %v6034_v57  ;;  %v6576_v58 = vld [vmem:[%s10604_s0 + $0x2b8] sm:$0xff] }
 0x16d   :  { %v6042_v26 = vpop.eup %6041  ;;  %6067 = vrcp.f32 %v2741_v5  ;;  %v2206_v40 = vmul.f32 %v6040_v47, %v8943_v54  ;;  %5405 = vmatmul.mubr.msk.f32.gmra.mxu1 %vm50_vm0, %v10665_v41  ;;  %v9365_v15 = vmul.f32 %v6575_v38, %v6036_v17  ;;  %vm2207_vm3 = vcmp.eq.f32.partialorder %v8943_v54, inf  ;;  %v6579_v41 = vld [vmem:[%s10604_s0 + $0x228] sm:$0xff] }
 0x16e   :  { %v6044_v2 = vpop.eup %6043  ;;  %vm2209_vm4 = vcmp.eq.f32.partialorder %v8943_v54, 0.0  ;;  %v2210_v62 = vand.u32 2147483648, %v8943_v54  ;;  %6069 = vrsqrt.f32 %v9116_v18  ;;  %vm2723_vm5 = vcmp.eq.f32.partialorder %v8974_v61, inf  ;;  %5477 = vmatprep.subr.msk.mxu1 %vm50_vm0, %v9358_v27 }
 0x16f   :  { %v6046_v4 = vpop.eup %6045  ;;  %6071 = vrcp.f32 %v2218_v36  ;;  %v2208_v56 = vsel %vm2207_vm3, %v8943_v54, %v2206_v40  ;;  %vm2725_vm6 = vcmp.eq.f32.partialorder %v8974_v61, 0.0  ;;  %5423 = vmatprep.subr.msk.mxu0 %vm50_vm0, %v9365_v15  ;;  %v2731_v50 = vsel %vm2730_vm1, %v8941_v13, %v2729_v34  ;;  %v6578_v40 = vld [vmem:[%s10604_s0 + $0x2b0] sm:$0xff] }
 0x170   :  { %v6048_v63 = vpop.eup %6047  ;;  %v2726_v57 = vand.u32 2147483648, %v8974_v61  ;;  %vm2200_vm7 = vcmp.eq.f32.partialorder %v8976_v8, inf  ;;  %5478 = vmatpush3.xpose.msk.msra.mxu1 %vm50_vm0, %v9358_v27  ;;  %5424 = vmatpush3.xpose.msk.msra.mxu0 %vm50_vm0, %v9365_v15  ;;  %6073 = vrsqrt.f32 %v9126_v35  ;;  %v2211_v33 = vsel %vm2209_vm4, %v2210_v62, %v2208_v56 }
 0x171   :  { %v6050_v51 = vpop.eup %6049  ;;  %v2722_v17 = vmul.f32 %v6046_v4, %v8974_v61  ;;  %v9394_v21 = vmul.f32 %v6576_v58, %v6042_v26  ;;  %v9399_v12 = vmul.f32 %v6577_v11, %v6044_v2  ;;  %vm2202_vm8 = vcmp.eq.f32.partialorder %v8976_v8, 0.0 }
 0x172   :  { %v6052_v54 = vpop.eup %6051  ;;  %v2203_v5 = vand.u32 2147483648, %v8976_v8  ;;  %vm2716_vm9 = vcmp.eq.f32.partialorder %v9006_v23, inf  ;;  %6075 = vrsqrt.f32 %v9158_v37  ;;  %v2734_v44 = vsel %vm2732_vm2, %v2733_v9, %v2731_v50 }
 0x173   :  { %v6054_v14 = vpop.eup %6053  ;;  %v2199_v20 = vmul.f32 %v6052_v54, %v8976_v8  ;;  %vm2718_vm10 = vcmp.eq.f32.partialorder %v9006_v23, 0.0  ;;  %5479 = vmatprep.subr.msk.mxu1 %vm50_vm0, %v9394_v21  ;;  %5425 = vmatprep.subr.msk.mxu0 %vm50_vm0, %v9399_v12  ;;  %6077 = vrsqrt.f32 %v9171_v39  ;;  %v2719_v34 = vand.u32 2147483648, %v9006_v23 }
 0x174   :  { %v6056_v47 = vpop.eup %6055  ;;  %6079 = vrcp.f32 %v2211_v33  ;;  %v2715_v36 = vmul.f32 %v6054_v14, %v9006_v23  ;;  %vm2193_vm11 = vcmp.eq.f32.partialorder %v9008_v60, inf  ;;  %5480 = vmatpush3.xpose.msk.msra.mxu1 %vm50_vm0, %v9394_v21  ;;  %5426 = vmatpush3.xpose.msk.msra.mxu0 %vm50_vm0, %v9399_v12  ;;  %v2724_v9 = vsel %vm2723_vm5, %v8974_v61, %v2722_v17 }
 0x175   :  { %v6058_v13 = vpop.eup %6057  ;;  %v2201_v26 = vsel %vm2200_vm7, %v8976_v8, %v2199_v20  ;;  %v9434_v31 = vmul.f32 %v6578_v40, %v6048_v63  ;;  %v9439_v38 = vmul.f32 %v6579_v41, %v6050_v51  ;;  %6081 = vrcp.f32 %v2734_v44  ;;  %v9455_v8 = vpop.xlane.xlu1 %3737 }
 0x176   :  { %v6060_v2 = vpop.eup %6059  ;;  %v2204_v62 = vsel %vm2202_vm8, %v2203_v5, %v2201_v26  ;;  %v2192_v4 = vmul.f32 %v6058_v13, %v9008_v60  ;;  %vm2195_vm12 = vcmp.eq.f32.partialorder %v9008_v60, 0.0  ;;  %v2717_v63 = vsel %vm2716_vm9, %v9006_v23, %v2715_v36  ;;  %v9457_v51 = vpop.xlane.xlu0 %3214  ;;  %v6580_v13 = vld [vmem:[%s10604_s0 + $0x2a8] sm:$0xff]  ;;  %v6581_v23 = vld [vmem:[%s10604_s0 + $0x220] sm:$0xff] }
 0x177   :  { %v6062_v56 = vpop.eup %6061  ;;  %v2196_v50 = vand.u32 2147483648, %v9008_v60  ;;  %vm3867_vm13 = vcmp.eq.f32.partialorder %v9060_v25, inf  ;;  %5481 = vmatprep.subr.msk.mxu1 %vm50_vm0, %v9434_v31  ;;  %5427 = vmatprep.subr.msk.mxu0 %vm50_vm0, %v9439_v38  ;;  %6083 = vrsqrt.f32 %v9214_v49  ;;  %v2727_v17 = vsel %vm2725_vm6, %v2726_v57, %v2724_v9 }
 0x178   :  { %v6064_v33 = vpop.eup %6063  ;;  %6085 = vrcp.f32 %v2204_v62  ;;  %v2194_v58 = vsel %vm2193_vm11, %v9008_v60, %v2192_v4  ;;  %vm3869_vm14 = vcmp.eq.f32.partialorder %v9060_v25, 0.0  ;;  %5482 = vmatpush3.xpose.msk.msra.mxu1 %vm50_vm0, %v9434_v31  ;;  %5428 = vmatpush3.xpose.msk.msra.mxu0 %vm50_vm0, %v9439_v38  ;;  %v3870_v61 = vand.u32 2147483648, %v9060_v25 }
 0x179   :  { %v6066_v11 = vpop.eup %6065  ;;  %v2197_v54 = vsel %vm2195_vm12, %v2196_v50, %v2194_v58  ;;  %v3343_v57 = vmul.f32 %v6064_v33, %v9062_v59  ;;  %6087 = vrsqrt.f32 %v9216_v52  ;;  %v2720_v14 = vsel %vm2718_vm10, %v2719_v34, %v2717_v63  ;;  %v6582_v33 = vld [vmem:[%s10604_s0 + $0x2a0] sm:$0xff] }
 0x17a   :  { %v9474_v5 = vpop.eup %6067  ;;  %v3866_v44 = vmul.f32 %v6062_v56, %v9060_v25  ;;  %vm3344_vm15 = vcmp.eq.f32.partialorder %v9062_v59, inf  ;;  %v3347_v20 = vand.u32 2147483648, %v9062_v59  ;;  %6089 = vrcp.f32 %v2727_v17 }
 0x17b   :  { %v6070_v36 = vpop.eup %6069  ;;  %v3345_v60 = vsel %vm3344_vm15, %v9062_v59, %v3343_v57  ;;  %v9485_v9 = vmul.f32 %v6580_v13, %v6056_v47  ;;  %v9490_v34 = vmul.f32 %v6581_v23, %v6060_v2  ;;  %6091 = vrcp.f32 %v2197_v54  ;;  %v9501_v2 = vpop.xlane.xlu1 %3734 }
 0x17c   :  { %v6072_v26 = vpop.eup %6071  ;;  %vm3346_vm1 = vcmp.eq.f32.partialorder %v9062_v59, 0.0  ;;  %vm3860_vm2 = vcmp.eq.f32.partialorder %v9116_v18, inf  ;;  %vm3862_vm3 = vcmp.eq.f32.partialorder %v9116_v18, 0.0  ;;  %6093 = vrcp.f32 %v2720_v14  ;;  %v9503_v59 = vpop.xlane.xlu0 %3211  ;;  %v6583_v14 = vld [vmem:[%s10604_s0 + $0x218] sm:$0xff] }
 0x17d   :  { %v6074_v40 = vpop.eup %6073  ;;  %v3348_v41 = vsel %vm3346_vm1, %v3347_v20, %v3345_v60  ;;  %v3859_v47 = vmul.f32 %v6070_v36, %v9116_v18  ;;  %v3863_v62 = vand.u32 2147483648, %v9116_v18  ;;  %5483 = vmatprep.subr.msk.mxu1 %vm50_vm0, %v9485_v9  ;;  %5429 = vmatprep.subr.msk.mxu0 %vm50_vm0, %v9490_v34  ;;  %v3868_v4 = vsel %vm3867_vm13, %v9060_v25, %v3866_v44 }
 0x17e   :  { %v3336_v56 = vmul.f32 %v6074_v40, %v9126_v35  ;;  %vm3337_vm4 = vcmp.eq.f32.partialorder %v9126_v35, inf  ;;  %5484 = vmatpush3.xpose.msk.msra.mxu1 %vm50_vm0, %v9485_v9  ;;  %6095 = vrsqrt.f32 %v9283_v42  ;;  %5430 = vmatpush3.xpose.msk.msra.mxu0 %vm50_vm0, %v9490_v34  ;;  %vm3339_vm5 = vcmp.eq.f32.partialorder %v9126_v35, 0.0 }
 0x17f   :  { %v6076_v63 = vpop.eup %6075  ;;  %v3340_v50 = vand.u32 2147483648, %v9126_v35  ;;  %6097 = vrsqrt.f32 %v9285_v28  ;;  %v9521_v17 = vmul.f32 %v6582_v33, %v6066_v11  ;;  %v9528_v44 = vmul.f32 %v6583_v14, %v6072_v26  ;;  %v9554_v23 = vpop.xlane.xlu1 %3731 }
 0x180   :  { %v6078_v58 = vpop.eup %6077  ;;  %6099 = vrcp.f32 %v3348_v41  ;;  %v3338_v54 = vsel %vm3337_vm4, %v9126_v35, %v3336_v56  ;;  %v3852_v57 = vmul.f32 %v6076_v63, %v9158_v37  ;;  %v3871_v36 = vsel %vm3869_vm14, %v3870_v61, %v3868_v4  ;;  %v9556_v26 = vpop.xlane.xlu0 %3208  ;;  %v6584_v63 = vld [vmem:[%s10604_s0 + $0x298] sm:$0xff] }
 0x181   :  { %v6080_v20 = vpop.eup %6079  ;;  %v3861_v11 = vsel %vm3860_vm2, %v9116_v18, %v3859_v47  ;;  %v3329_v60 = vmul.f32 %v6078_v58, %v9171_v39  ;;  %5485 = vmatprep.subr.msk.mxu1 %vm50_vm0, %v9521_v17  ;;  %6101 = vrsqrt.f32 %v9344_v53  ;;  %v3341_v13 = vsel %vm3339_vm5, %v3340_v50, %v3338_v54  ;;  %5431 = vmatprep.subr.msk.mxu0 %vm50_vm0, %v9528_v44  ;;  %v6585_v18 = vld [vmem:[%s10604_s0 + $0x210] sm:$0xff] }
 0x182   :  { %vm3853_vm6 = vcmp.eq.f32.partialorder %v9158_v37, inf  ;;  %vm3855_vm7 = vcmp.eq.f32.partialorder %v9158_v37, 0.0  ;;  %v3856_v25 = vand.u32 2147483648, %v9158_v37  ;;  %5486 = vmatpush3.xpose.msk.msra.mxu1 %vm50_vm0, %v9521_v17  ;;  %v6082_v61 = vpop.eup %6081  ;;  %vm3330_vm8 = vcmp.eq.f32.partialorder %v9171_v39, inf  ;;  %5432 = vmatpush3.xpose.msk.msra.mxu0 %vm50_vm0, %v9528_v44 }
 0x183   :  { %vm3332_vm9 = vcmp.eq.f32.partialorder %v9171_v39, 0.0  ;;  %v3333_v35 = vand.u32 2147483648, %v9171_v39  ;;  %6103 = vrsqrt.f32 %v9346_v22  ;;  %v3864_v41 = vsel %vm3862_vm3, %v3863_v62, %v3861_v11 }
 0x184   :  { %v6084_v40 = vpop.eup %6083  ;;  %6105 = vrcp.f32 %v3871_v36  ;;  %v3854_v47 = vsel %vm3853_vm6, %v9158_v37, %v3852_v57  ;;  %vm3846_vm10 = vcmp.eq.f32.partialorder %v9214_v49, inf  ;;  %v3331_v56 = vsel %vm3330_vm8, %v9171_v39, %v3329_v60  ;;  %v6586_v39 = vld [vmem:[%s10604_s0 + $0x290] sm:$0xff] }
 0x185   :  { %v6086_v4 = vpop.eup %6085  ;;  %6107 = vrcp.f32 %v3341_v13  ;;  %vm3848_vm11 = vcmp.eq.f32.partialorder %v9214_v49, 0.0  ;;  %v9570_v50 = vmul.f32 %v6584_v63, %v9474_v5  ;;  %v9575_v62 = vmul.f32 %v6585_v18, %v6080_v20  ;;  %v6587_v13 = vld [vmem:[%s10604_s0 + $0x208] sm:$0xff] }
 0x186   :  { %v6088_v33 = vpop.eup %6087  ;;  %v3849_v58 = vand.u32 2147483648, %v9214_v49  ;;  %vm3323_vm12 = vcmp.eq.f32.partialorder %v9216_v52, inf  ;;  %vm3325_vm13 = vcmp.eq.f32.partialorder %v9216_v52, 0.0  ;;  %6109 = vrsqrt.f32 %v9401_v29 }
 0x187   :  { %v3857_v54 = vsel %vm3855_vm7, %v3856_v25, %v3854_v47  ;;  %v3845_v5 = vmul.f32 %v6084_v40, %v9214_v49  ;;  %v3322_v57 = vmul.f32 %v6088_v33, %v9216_v52  ;;  %5487 = vmatprep.subr.msk.mxu1 %vm50_vm0, %v9570_v50  ;;  %5433 = vmatprep.subr.msk.mxu0 %vm50_vm0, %v9575_v62  ;;  %6111 = vrsqrt.f32 %v9403_v48  ;;  %v6090_v14 = vpop.eup %6089  ;;  %v9614_v40 = vpop.xlane.xlu0 %3205  ;;  %v6588_v33 = vld [vmem:[%s10604_s0 + $0x288] sm:$0xff] }
 0x188   :  { %6113 = vrcp.f32 %v3864_v41  ;;  %v3334_v20 = vsel %vm3332_vm9, %v3333_v35, %v3331_v56  ;;  %v3326_v37 = vand.u32 2147483648, %v9216_v52  ;;  %vm3839_vm14 = vcmp.eq.f32.partialorder %v9283_v42, inf  ;;  %5488 = vmatpush3.xpose.msk.msra.mxu1 %vm50_vm0, %v9570_v50  ;;  %5434 = vmatpush3.xpose.msk.msra.mxu0 %vm50_vm0, %v9575_v62  ;;  %v6092_v36 = vpop.eup %6091  ;;  %v9612_v35 = vpop.xlane.xlu1 %3728 }
 0x189   :  { %v3324_v11 = vsel %vm3323_vm12, %v9216_v52, %v3322_v57  ;;  %v9604_v60 = vmul.f32 %v6586_v39, %v6082_v61  ;;  %v9609_v25 = vmul.f32 %v6587_v13, %v6086_v4  ;;  %6115 = vrsqrt.f32 %v9455_v8  ;;  %v6094_v41 = vpop.eup %6093 }
 0x18a   :  { %6117 = vrcp.f32 %v3857_v54  ;;  %v3842_v47 = vand.u32 2147483648, %v9283_v42  ;;  %vm3316_vm15 = vcmp.eq.f32.partialorder %v9285_v28, inf  ;;  %vm3318_vm1 = vcmp.eq.f32.partialorder %v9285_v28, 0.0 }
 0x18b   :  { %v6096_v61 = vpop.eup %6095  ;;  %6119 = vrcp.f32 %v3334_v20  ;;  %v3847_v4 = vsel %vm3846_vm10, %v9214_v49, %v3845_v5  ;;  %vm3841_vm2 = vcmp.eq.f32.partialorder %v9283_v42, 0.0  ;;  %v3319_v56 = vand.u32 2147483648, %v9285_v28  ;;  %5489 = vmatprep.subr.msk.mxu1 %vm50_vm0, %v9604_v60  ;;  %5435 = vmatprep.subr.msk.mxu0 %vm50_vm0, %v9609_v25  ;;  %v6589_v5 = vld [vmem:[%s10604_s0 + $0x200] sm:$0xff] }
 0x18c   :  { %vm3832_vm3 = vcmp.eq.f32.partialorder %v9344_v53, inf  ;;  %v6098_v63 = vpop.eup %6097  ;;  %v3327_v18 = vsel %vm3325_vm13, %v3326_v37, %v3324_v11  ;;  %5490 = vmatpush3.xpose.msk.msra.mxu1 %vm50_vm0, %v9604_v60  ;;  %5436 = vmatpush3.xpose.msk.msra.mxu0 %vm50_vm0, %v9609_v25  ;;  %6121 = vrsqrt.f32 %v9457_v51  ;;  %v9639_v54 = vmul.f32 %v6588_v33, %v6090_v14  ;;  %v6590_v11 = vld [vmem:[%s10604_s0 + $0x280] sm:$0xff] }
 0x18d   :  { %v2304_v52 = vmul.f32 %v6589_v5, %v6092_v36  ;;  %v6100_v57 = vpop.eup %6099  ;;  %v3838_v20 = vmul.f32 %v6096_v61, %v9283_v42  ;;  %v3315_v37 = vmul.f32 %v6098_v63, %v9285_v28  ;;  %vm3834_vm4 = vcmp.eq.f32.partialorder %v9344_v53, 0.0 }
 0x18e   :  { %v2827_v39 = vmul.f32 %v6590_v11, %v6094_v41  ;;  %6123 = vrsqrt.f32 %v9501_v2  ;;  %v6102_v14 = vpop.eup %6101  ;;  %v3850_v13 = vsel %vm3848_vm11, %v3849_v58, %v3847_v4  ;;  %v3835_v36 = vand.u32 2147483648, %v9344_v53  ;;  %5491 = vmatprep.subr.msk.mxu1 %vm50_vm0, %v9639_v54  ;;  %v9667_v58 = vpop.xlane.xlu1 %3725 }
 0x18f   :  { %vm3309_vm5 = vcmp.eq.f32.partialorder %v9346_v22, inf  ;;  %5437 = vmatprep.subr.msk.mxu0 %vm50_vm0, %v2304_v52  ;;  %6125 = vrsqrt.f32 %v9503_v59  ;;  %v3317_v41 = vsel %vm3316_vm15, %v9285_v28, %v3315_v37  ;;  %v3831_v61 = vmul.f32 %v6102_v14, %v9344_v53  ;;  %5439 = vmatprep.mubr.msk.f32.mxu0 %vm50_vm0, %v2304_v52  ;;  %v9669_v4 = vpop.xlane.xlu0 %3202  ;;  %v6591_v28 = vld [vmem:[%s10604_s0 + $0x378] sm:$0xff] }
 0x190   :  { %vm3311_vm6 = vcmp.eq.f32.partialorder %v9346_v22, 0.0  ;;  %v3312_v49 = vand.u32 2147483648, %v9346_v22  ;;  %5495 = vmatprep.mubr.msk.f32.mxu1 %vm50_vm0, %v2827_v39  ;;  %v6104_v63 = vpop.eup %6103  ;;  %6127 = vrcp.f32 %v3327_v18  ;;  %v3320_v33 = vsel %vm3318_vm1, %v3319_v56, %v3317_v41  ;;  %5492 = vmatpush3.xpose.msk.msra.mxu1 %vm50_vm0, %v9639_v54 }
 0x191   :  { %vm3825_vm7 = vcmp.eq.f32.partialorder %v9401_v29, inf  ;;  %v3828_v5 = vand.u32 2147483648, %v9401_v29  ;;  %5438 = vmatpush3.xpose.msk.msra.mxu0 %vm50_vm0, %v2304_v52  ;;  %v6106_v37 = vpop.eup %6105  ;;  %6129 = vrcp.f32 %v3850_v13  ;;  %v3840_v11 = vsel %vm3839_vm14, %v9283_v42, %v3838_v20  ;;  %5493 = vmatprep.subr.msk.mxu1 %vm50_vm0, %v2827_v39  ;;  %v6592_v42 = vld [vmem:[%s10604_s0 + $0x3f8] sm:$0xff] }
 0x192   :  { %v3308_v18 = vmul.f32 %v6104_v63, %v9346_v22  ;;  %v9686_v56 = vmul.f32 %v6591_v28, %v6100_v57  ;;  %v6108_v14 = vpop.eup %6107  ;;  %vm3827_vm8 = vcmp.eq.f32.partialorder %v9401_v29, 0.0  ;;  %vm3302_vm9 = vcmp.eq.f32.partialorder %v9403_v48, inf }
 0x193   :  { %vm3304_vm10 = vcmp.eq.f32.partialorder %v9403_v48, 0.0  ;;  %v3305_v52 = vand.u32 2147483648, %v9403_v48  ;;  %6131 = vrsqrt.f32 %v9554_v23  ;;  %v6110_v20 = vpop.eup %6109  ;;  %v3833_v13 = vsel %vm3832_vm3, %v9344_v53, %v3831_v61 }
 0x194   :  { %6133 = vrcp.f32 %v3320_v33  ;;  %v3310_v57 = vsel %vm3309_vm5, %v9346_v22, %v3308_v18  ;;  %vm3818_vm11 = vcmp.eq.f32.partialorder %v9455_v8, inf  ;;  %5440 = vmatmul.mubr.msk.f32.vlgmr.msra.gmra.mxu0 %vm50_vm0, %v9609_v25  ;;  %5519 = vmatprep.subr.msk.mxu0 %vm50_vm0, %v9686_v56  ;;  %v6112_v41 = vpop.eup %6111  ;;  %v3843_v63 = vsel %vm3841_vm2, %v3842_v47, %v3840_v11 }
 0x195   :  { %v3824_v61 = vmul.f32 %v6110_v20, %v9401_v29  ;;  %v3821_v33 = vand.u32 2147483648, %v9455_v8  ;;  %5494 = vmatpush3.xpose.msk.msra.mxu1 %vm50_vm0, %v2827_v39  ;;  %5442 = vmatprep.mubr.msk.f32.mxu0 %vm50_vm0, %v9575_v62  ;;  %6135 = vrsqrt.f32 %v9556_v26  ;;  %v6114_v25 = vpop.eup %6113  ;;  %v3313_v18 = vsel %vm3311_vm6, %v3312_v49, %v3310_v57  ;;  %v9725_v62 = vpop.xlane.xlu1 %3722  ;;  %v6593_v49 = vld [vmem:[%s10604_s0 + $0x370] sm:$0xff] }
 0x196   :  { %v3301_v28 = vmul.f32 %v6112_v41, %v9403_v48  ;;  %vm3295_vm12 = vcmp.eq.f32.partialorder %v9457_v51, inf  ;;  %5520 = vmatpush3.xpose.msk.msra.mxu0 %vm50_vm0, %v9686_v56  ;;  %v9723_v47 = vmul.f32 %v6592_v42, %v6106_v37  ;;  %v9727_v39 = vpop.xlane.xlu0 %3199  ;;  %v6116_v11 = vpop.eup %6115  ;;  %v3836_v22 = vsel %vm3834_vm4, %v3835_v36, %v3833_v13  ;;  %v6595_v42 = vld [vmem:[%s10604_s0 + $0x368] sm:$0xff] }
 0x197   :  { %vm3820_vm13 = vcmp.eq.f32.partialorder %v9455_v8, 0.0  ;;  %vm3297_vm14 = vcmp.eq.f32.partialorder %v9457_v51, 0.0  ;;  %v9736_v20 = vmul.f32 %v6593_v49, %v6108_v14  ;;  %6137 = vrsqrt.f32 %v9612_v35  ;;  %v9739_v37 = vpop.eup %6117 }
 0x198   :  { %6139 = vrcp.f32 %v3843_v63  ;;  %v3303_v53 = vsel %vm3302_vm9, %v9403_v48, %v3301_v28  ;;  %v3298_v36 = vand.u32 2147483648, %v9457_v51  ;;  %vm3811_vm15 = vcmp.eq.f32.partialorder %v9501_v2, inf  ;;  %5575 = vmatprep.subr.msk.mxu1 %vm50_vm0, %v9723_v47  ;;  %5443 = vmatmul.mubr.msk.f32.gmra.mxu0 %vm50_vm0, %v9528_v44  ;;  %v6120_v14 = vpop.eup %6119 }
 0x199   :  { %6141 = vrcp.f32 %v3313_v18  ;;  %v3826_v13 = vsel %vm3825_vm7, %v9401_v29, %v3824_v61  ;;  %v3306_v57 = vsel %vm3304_vm10, %v3305_v52, %v3303_v53  ;;  %v3817_v41 = vmul.f32 %v6116_v11, %v9455_v8  ;;  %5496 = vmatmul.mubr.msk.f32.vlgmr.msra.gmra.mxu1 %vm50_vm0, %v9639_v54  ;;  %5521 = vmatprep.subr.msk.mxu0 %vm50_vm0, %v9736_v20  ;;  %v6122_v63 = vpop.eup %6121 }
 0x19a   :  { %6143 = vrcp.f32 %v3836_v22  ;;  %v3814_v44 = vand.u32 2147483648, %v9501_v2  ;;  %vm3288_vm1 = vcmp.eq.f32.partialorder %v9503_v59, inf  ;;  %vm3290_vm2 = vcmp.eq.f32.partialorder %v9503_v59, 0.0  ;;  %5498 = vmatprep.mubr.msk.f32.mxu1 %vm50_vm0, %v9604_v60  ;;  %5576 = vmatpush3.xpose.msk.msra.mxu1 %vm50_vm0, %v9723_v47  ;;  %v6594_v60 = vld [vmem:[%s10604_s0 + $0x3f0] sm:$0xff]  ;;  %v9794_v22 = vpop.xlane.xlu0 %3196 }
 0x19b   :  { %v6124_v48 = vpop.eup %6123  ;;  %v3294_v54 = vmul.f32 %v6122_v63, %v9457_v51  ;;  %vm3813_vm3 = vcmp.eq.f32.partialorder %v9501_v2, 0.0  ;;  %v3291_v52 = vand.u32 2147483648, %v9503_v59  ;;  %5445 = vmatprep.mubr.msk.f32.mxu0 %vm50_vm0, %v9490_v34  ;;  %5522 = vmatpush3.xpose.msk.msra.mxu0 %vm50_vm0, %v9736_v20  ;;  %6145 = vrsqrt.f32 %v9614_v40  ;;  %v6596_v63 = vld [vmem:[%s10604_s0 + $0x3e8] sm:$0xff] }
 0x19c   :  { %v9778_v61 = vmul.f32 %v6594_v60, %v6114_v25  ;;  %v6126_v18 = vpop.eup %6125  ;;  %v3829_v28 = vsel %vm3827_vm8, %v3828_v5, %v3826_v13  ;;  %6147 = vrcp.f32 %v3306_v57  ;;  %v3810_v34 = vmul.f32 %v6124_v48, %v9501_v2  ;;  %5446 = vmatmul.mubr.msk.f32.gmra.mxu0 %vm50_vm0, %v9439_v38  ;;  %v9792_v25 = vpop.xlane.xlu1 %3719 }
 0x19d   :  { %v9790_v11 = vmul.f32 %v6595_v42, %v6120_v14  ;;  %v3819_v29 = vsel %vm3818_vm11, %v9455_v8, %v3817_v41  ;;  %v3296_v5 = vsel %vm3295_vm12, %v9457_v51, %v3294_v54  ;;  %v3287_v38 = vmul.f32 %v6126_v18, %v9503_v59  ;;  %5499 = vmatmul.mubr.msk.f32.gmra.mxu1 %vm50_vm0, %v9570_v50  ;;  %v6128_v49 = vpop.eup %6127  ;;  %v6599_v42 = vld [vmem:[%s10604_s0 + $0x358] sm:$0xff] }
 0x19e   :  { %5577 = vmatprep.subr.msk.mxu1 %vm50_vm0, %v9778_v61  ;;  %6149 = vrsqrt.f32 %v9667_v58  ;;  %v3299_v53 = vsel %vm3297_vm14, %v3298_v36, %v3296_v5  ;;  %vm3804_vm4 = vcmp.eq.f32.partialorder %v9554_v23, inf  ;;  %v3807_v14 = vand.u32 2147483648, %v9554_v23  ;;  %5501 = vmatprep.mubr.msk.f32.mxu1 %vm50_vm0, %v9521_v17  ;;  %v6130_v13 = vpop.eup %6129 }
 0x19f   :  { %5523 = vmatprep.subr.msk.mxu0 %vm50_vm0, %v9790_v11  ;;  %6151 = vrsqrt.f32 %v9669_v4  ;;  %v3289_v50 = vsel %vm3288_vm1, %v9503_v59, %v3287_v38  ;;  %vm3806_vm5 = vcmp.eq.f32.partialorder %v9554_v23, 0.0  ;;  %vm3281_vm6 = vcmp.eq.f32.partialorder %v9556_v26, inf  ;;  %5578 = vmatpush3.xpose.msk.msra.mxu1 %vm50_vm0, %v9778_v61 }
 0x1a0   :  { %vm3283_vm7 = vcmp.eq.f32.partialorder %v9556_v26, 0.0  ;;  %v3284_v51 = vand.u32 2147483648, %v9556_v26  ;;  %5448 = vmatprep.mubr.msk.f32.mxu0 %vm50_vm0, %v9399_v12  ;;  %v6132_v17 = vpop.eup %6131  ;;  %6153 = vrcp.f32 %v3829_v28  ;;  %v3822_v36 = vsel %vm3820_vm13, %v3821_v33, %v3819_v29  ;;  %5524 = vmatpush3.xpose.msk.msra.mxu0 %vm50_vm0, %v9790_v11  ;;  %v6597_v33 = vld [vmem:[%s10604_s0 + $0x360] sm:$0xff] }
 0x1a1   :  { %v3812_v57 = vsel %vm3811_vm15, %v9501_v2, %v3810_v34  ;;  %vm3797_vm8 = vcmp.eq.f32.partialorder %v9612_v35, inf  ;;  %v6134_v41 = vpop.eup %6133  ;;  %6155 = vrcp.f32 %v3299_v53  ;;  %v3803_v12 = vmul.f32 %v6132_v17, %v9554_v23  ;;  %5449 = vmatmul.mubr.msk.f32.gmra.mxu0 %vm50_vm0, %v9365_v15  ;;  %5502 = vmatmul.mubr.msk.f32.gmra.mxu1 %vm50_vm0, %v9485_v9  ;;  %v9863_v15 = vpop.xlane.xlu1 %3716 }
 0x1a2   :  { %v9843_v8 = vmul.f32 %v6596_v63, %v9739_v37  ;;  %v9852_v48 = vmul.f32 %v6597_v33, %v6128_v49  ;;  %v6136_v54 = vpop.eup %6135  ;;  %v3292_v60 = vsel %vm3290_vm2, %v3291_v52, %v3289_v50  ;;  %vm3799_vm9 = vcmp.eq.f32.partialorder %v9612_v35, 0.0  ;;  %5504 = vmatprep.mubr.msk.f32.mxu1 %vm50_vm0, %v9434_v31  ;;  %5451 = vmatprep.mubr.msk.f32.mxu0 %vm50_vm0, %v9327_v1  ;;  %v9865_v9 = vpop.xlane.xlu0 %3193  ;;  %v6598_v52 = vld [vmem:[%s10604_s0 + $0x3e0] sm:$0xff] }
 0x1a3   :  { %v3800_v37 = vand.u32 2147483648, %v9612_v35  ;;  %6157 = vrsqrt.f32 %v9725_v62  ;;  %v3280_v18 = vmul.f32 %v6136_v54, %v9556_v26  ;;  %vm3274_vm10 = vcmp.eq.f32.partialorder %v9614_v40, inf }
 0x1a4   :  { %vm3276_vm11 = vcmp.eq.f32.partialorder %v9614_v40, 0.0  ;;  %5579 = vmatprep.subr.msk.mxu1 %vm50_vm0, %v9843_v8  ;;  %5525 = vmatprep.subr.msk.mxu0 %vm50_vm0, %v9852_v48  ;;  %6159 = vrsqrt.f32 %v9727_v39  ;;  %v6138_v31 = vpop.eup %6137  ;;  %v3815_v1 = vsel %vm3813_vm3, %v3814_v44, %v3812_v57  ;;  %v3805_v59 = vsel %vm3804_vm4, %v9554_v23, %v3803_v12 }
 0x1a5   :  { %6161 = vrcp.f32 %v3822_v36  ;;  %5580 = vmatpush3.xpose.msk.msra.mxu1 %vm50_vm0, %v9843_v8  ;;  %5526 = vmatpush3.xpose.msk.msra.mxu0 %vm50_vm0, %v9852_v48  ;;  %v9889_v28 = vmul.f32 %v6598_v52, %v6130_v13  ;;  %v6140_v34 = vpop.eup %6139  ;;  %v3282_v2 = vsel %vm3281_vm6, %v9556_v26, %v3280_v18  ;;  %v3796_v44 = vmul.f32 %v6138_v31, %v9612_v35  ;;  %v9934_v50 = vpop.xlane.xlu1 %3713  ;;  %v6601_v36 = vld [vmem:[%s10604_s0 + $0x350] sm:$0xff]  ;;  %v6603_v18 = vld [vmem:[%s10604_s0 + $0x348] sm:$0xff] }
 0x1a6   :  { %6163 = vrcp.f32 %v3292_v60  ;;  %5452 = vmatmul.mubr.msk.f32.gmra.mxu0 %vm50_vm0, %v9281_v7  ;;  %5505 = vmatmul.mubr.msk.f32.gmra.mxu1 %vm50_vm0, %v9394_v21  ;;  %v9902_v29 = vmul.f32 %v6599_v42, %v6134_v41  ;;  %v6142_v5 = vpop.eup %6141  ;;  %v3285_v38 = vsel %vm3283_vm7, %v3284_v51, %v3282_v2  ;;  %v3277_v49 = vand.u32 2147483648, %v9614_v40 }
 0x1a7   :  { %vm3790_vm12 = vcmp.eq.f32.partialorder %v9667_v58, inf  ;;  %5581 = vmatprep.subr.msk.mxu1 %vm50_vm0, %v9889_v28  ;;  %5507 = vmatprep.mubr.msk.f32.mxu1 %vm50_vm0, %v9358_v27  ;;  %6165 = vrsqrt.f32 %v9792_v25  ;;  %v6144_v7 = vpop.eup %6143  ;;  %v3798_v21 = vsel %vm3797_vm8, %v9612_v35, %v3796_v44  ;;  %vm3792_vm13 = vcmp.eq.f32.partialorder %v9667_v58, 0.0 }
 0x1a8   :  { %6167 = vrcp.f32 %v3815_v1  ;;  %v3793_v26 = vand.u32 2147483648, %v9667_v58  ;;  %vm3267_vm14 = vcmp.eq.f32.partialorder %v9669_v4, inf  ;;  %5527 = vmatprep.subr.msk.mxu0 %vm50_vm0, %v9902_v29  ;;  %5454 = vmatprep.mubr.msk.f32.mxu0 %vm50_vm0, %v9230_v43  ;;  %v6146_v27 = vpop.eup %6145  ;;  %v3808_v53 = vsel %vm3806_vm5, %v3807_v14, %v3805_v59  ;;  %v9936_v43 = vpop.xlane.xlu0 %3190  ;;  %v6600_v14 = vld [vmem:[%s10604_s0 + $0x3d8] sm:$0xff] }
 0x1a9   :  { %vm3269_vm15 = vcmp.eq.f32.partialorder %v9669_v4, 0.0  ;;  %v3270_v13 = vand.u32 2147483648, %v9669_v4  ;;  %5582 = vmatpush3.xpose.msk.msra.mxu1 %vm50_vm0, %v9889_v28  ;;  %5528 = vmatpush3.xpose.msk.msra.mxu0 %vm50_vm0, %v9902_v29  ;;  %6169 = vrsqrt.f32 %v9794_v22  ;;  %v6148_v51 = vpop.eup %6147  ;;  %v3273_v23 = vmul.f32 %v6146_v27, %v9614_v40 }
 0x1aa   :  { %6171 = vrcp.f32 %v3285_v38  ;;  %vm3783_vm1 = vcmp.eq.f32.partialorder %v9725_v62, inf  ;;  %v9943_v17 = vmul.f32 %v6600_v14, %v6140_v34  ;;  %5455 = vmatmul.mubr.msk.f32.gmra.mxu0 %vm50_vm0, %v9182_v10  ;;  %5508 = vmatmul.mubr.msk.f32.gmra.mxu1 %vm50_vm0, %v9318_v6  ;;  %v9952_v57 = vmul.f32 %v6601_v36, %v6142_v5 }
 0x1ab   :  { %v6150_v41 = vpop.eup %6149  ;;  %v3801_v12 = vsel %vm3799_vm9, %v3800_v37, %v3798_v21  ;;  %vm3785_vm2 = vcmp.eq.f32.partialorder %v9725_v62, 0.0  ;;  %v3786_v63 = vand.u32 2147483648, %v9725_v62  ;;  %vm3260_vm3 = vcmp.eq.f32.partialorder %v9727_v39, inf  ;;  %5510 = vmatprep.mubr.msk.f32.mxu1 %vm50_vm0, %v9269_v32  ;;  %5457 = vmatprep.mubr.msk.f32.mxu0 %vm50_vm0, %v9114_v24  ;;  %v6605_v21 = vld [vmem:[%s10604_s0 + $0x340] sm:$0xff] }
 0x1ac   :  { %6173 = vrsqrt.f32 %v9863_v15  ;;  %v6152_v10 = vpop.eup %6151  ;;  %v3275_v6 = vsel %vm3274_vm10, %v9614_v40, %v3273_v23  ;;  %v3789_v35 = vmul.f32 %v6150_v41, %v9667_v58  ;;  %vm3262_vm4 = vcmp.eq.f32.partialorder %v9727_v39, 0.0  ;;  %5583 = vmatprep.subr.msk.mxu1 %vm50_vm0, %v9943_v17  ;;  %5529 = vmatprep.subr.msk.mxu0 %vm50_vm0, %v9952_v57  ;;  %v6602_v40 = vld [vmem:[%s10604_s0 + $0x3d0] sm:$0xff] }
 0x1ad   :  { %6175 = vrsqrt.f32 %v9865_v9  ;;  %v3278_v24 = vsel %vm3276_vm11, %v3277_v49, %v3275_v6  ;;  %v3266_v32 = vmul.f32 %v6152_v10, %v9669_v4  ;;  %v3263_v33 = vand.u32 2147483648, %v9727_v39  ;;  %5584 = vmatpush3.xpose.msk.msra.mxu1 %vm50_vm0, %v9943_v17  ;;  %5530 = vmatpush3.xpose.msk.msra.mxu0 %vm50_vm0, %v9952_v57  ;;  %v6154_v54 = vpop.eup %6153  ;;  %v6607_v10 = vld [vmem:[%s10604_s0 + $0x338] sm:$0xff] }
 0x1ae   :  { %6177 = vrcp.f32 %v3808_v53  ;;  %v3791_v60 = vsel %vm3790_vm12, %v9667_v58, %v3789_v35  ;;  %v9990_v37 = vmul.f32 %v6602_v40, %v6144_v7  ;;  %5458 = vmatmul.mubr.msk.f32.gmra.mxu0 %vm50_vm0, %v9073_v0  ;;  %5511 = vmatmul.mubr.msk.f32.gmra.mxu1 %vm50_vm0, %v9225_v16  ;;  %v9999_v31 = vmul.f32 %v6603_v18, %v6148_v51  ;;  %v6156_v1 = vpop.eup %6155  ;;  %v10011_v0 = vpop.xlane.xlu1 %4242  ;;  %v6604_v58 = vld [vmem:[%s10604_s0 + $0x3c8] sm:$0xff] }
 0x1af   :  { %6179 = vrcp.f32 %v3801_v12  ;;  %v3268_v59 = vsel %vm3267_vm14, %v9669_v4, %v3266_v32  ;;  %vm3776_vm5 = vcmp.eq.f32.partialorder %v9792_v25, inf  ;;  %vm3778_vm6 = vcmp.eq.f32.partialorder %v9792_v25, 0.0  ;;  %5513 = vmatprep.mubr.msk.f32.mxu1 %vm50_vm0, %v9169_v19  ;;  %5460 = vmatprep.mubr.msk.f32.mxu0 %vm50_vm0, %v9026_v30  ;;  %v10013_v16 = vpop.xlane.xlu0 %4245 }
 0x1b0   :  { %6181 = vrsqrt.f32 %v9934_v50  ;;  %v6158_v52 = vpop.eup %6157  ;;  %v3271_v34 = vsel %vm3269_vm15, %v3270_v13, %v3268_v59  ;;  %v3779_v2 = vand.u32 2147483648, %v9792_v25  ;;  %vm3253_vm7 = vcmp.eq.f32.partialorder %v9794_v22, inf  ;;  %5585 = vmatprep.subr.msk.mxu1 %vm50_vm0, %v9990_v37  ;;  %5531 = vmatprep.subr.msk.mxu0 %vm50_vm0, %v9999_v31 }
 0x1b1   :  { %6183 = vrcp.f32 %v3278_v24  ;;  %v6160_v30 = vpop.eup %6159  ;;  %v3794_v19 = vsel %vm3792_vm13, %v3793_v26, %v3791_v60  ;;  %v3782_v4 = vmul.f32 %v6158_v52, %v9725_v62  ;;  %vm3255_vm8 = vcmp.eq.f32.partialorder %v9794_v22, 0.0  ;;  %5586 = vmatpush3.xpose.msk.msra.mxu1 %vm50_vm0, %v9990_v37  ;;  %5532 = vmatpush3.xpose.msk.msra.mxu0 %vm50_vm0, %v9999_v31 }
 0x1b2   :  { %6185 = vrcp.f32 %v3271_v34  ;;  %v6162_v44 = vpop.eup %6161  ;;  %v3259_v42 = vmul.f32 %v6160_v30, %v9727_v39  ;;  %v3256_v5 = vand.u32 2147483648, %v9794_v22  ;;  %v10039_v38 = vmul.f32 %v6604_v58, %v6154_v54  ;;  %5461 = vmatmul.mubr.msk.f32.gmra.mxu0 %vm50_vm0, %v8972_v3  ;;  %5514 = vmatmul.mubr.msk.f32.gmra.mxu1 %vm50_vm0, %v9109_v46  ;;  %v6608_v30 = vld [vmem:[%s10604_s0 + $0x3b8] sm:$0xff] }
 0x1b3   :  { %6187 = vrsqrt.f32 %v9936_v43  ;;  %v6164_v49 = vpop.eup %6163  ;;  %v3784_v7 = vsel %vm3783_vm1, %v9725_v62, %v3782_v4  ;;  %vm3769_vm9 = vcmp.eq.f32.partialorder %v9863_v15, inf  ;;  %v10052_v26 = vmul.f32 %v6605_v21, %v6156_v1  ;;  %5516 = vmatprep.mubr.msk.f32.mxu1 %vm50_vm0, %v9057_v55  ;;  %v10075_v62 = vpop.xlane.xlu1 %4236  ;;  %v6609_v4 = vld [vmem:[%s10604_s0 + $0x330] sm:$0xff] }
 0x1b4   :  { %6189 = vrsqrt.f32 %v10011_v0  ;;  %v6166_v3 = vpop.eup %6165  ;;  %v3787_v46 = vsel %vm3785_vm2, %v3786_v63, %v3784_v7  ;;  %v3261_v27 = vsel %vm3260_vm3, %v9727_v39, %v3259_v42  ;;  %vm3771_vm10 = vcmp.eq.f32.partialorder %v9863_v15, 0.0  ;;  %5587 = vmatprep.subr.msk.mxu1 %vm50_vm0, %v10039_v38  ;;  %v10077_v23 = vpop.xlane.xlu0 %4239  ;;  %v6606_v39 = vld [vmem:[%s10604_s0 + $0x3c0] sm:$0xff] }
 0x1b5   :  { %6191 = vrcp.f32 %v3794_v19  ;;  %v6168_v53 = vpop.eup %6167  ;;  %v3264_v55 = vsel %vm3262_vm4, %v3263_v33, %v3261_v27  ;;  %v3775_v13 = vmul.f32 %v6166_v3, %v9792_v25  ;;  %v3772_v51 = vand.u32 2147483648, %v9863_v15  ;;  %5533 = vmatprep.subr.msk.mxu0 %vm50_vm0, %v10052_v26  ;;  %5588 = vmatpush3.xpose.msk.msra.mxu1 %vm50_vm0, %v10039_v38 }
 0x1b6   :  { %6193 = vrcp.f32 %v3787_v46  ;;  %v6170_v14 = vpop.eup %6169  ;;  %vm3246_vm11 = vcmp.eq.f32.partialorder %v9865_v9, inf  ;;  %vm3248_vm12 = vcmp.eq.f32.partialorder %v9865_v9, 0.0  ;;  %5534 = vmatpush3.xpose.msk.msra.mxu0 %vm50_vm0, %v10052_v26  ;;  %v10086_v36 = vmul.f32 %v6606_v39, %v6162_v44  ;;  %5517 = vmatmul.mubr.msk.f32.gmra.mxu1 %vm50_vm0, %v9019_v45 }
 0x1b7   :  { %6195 = vrcp.f32 %v3264_v55  ;;  %v6172_v41 = vpop.eup %6171  ;;  %v3777_v12 = vsel %vm3776_vm5, %v9792_v25, %v3775_v13  ;;  %v3252_v63 = vmul.f32 %v6170_v14, %v9794_v22  ;;  %v10098_v6 = vmul.f32 %v6607_v10, %v6164_v49  ;;  %v10149_v49 = vpop.xlane.xlu1 %4230 }
 0x1b8   :  { %6197 = vrsqrt.f32 %v10013_v16  ;;  %v3780_v24 = vsel %vm3778_vm6, %v3779_v2, %v3777_v12  ;;  %v3249_v45 = vand.u32 2147483648, %v9865_v9  ;;  %vm3762_vm13 = vcmp.eq.f32.partialorder %v9934_v50, inf  ;;  %5589 = vmatprep.subr.msk.mxu1 %vm50_vm0, %v10086_v36 }
 0x1b9   :  { %v6174_v35 = vpop.eup %6173  ;;  %6199 = vrsqrt.f32 %v10075_v62  ;;  %v3254_v33 = vsel %vm3253_vm7, %v9794_v22, %v3252_v63  ;;  %vm3764_vm14 = vcmp.eq.f32.partialorder %v9934_v50, 0.0  ;;  %5535 = vmatprep.subr.msk.mxu0 %vm50_vm0, %v10098_v6  ;;  %5590 = vmatpush3.xpose.msk.msra.mxu1 %vm50_vm0, %v10086_v36  ;;  %v3765_v18 = vand.u32 2147483648, %v9934_v50  ;;  %v10128_v22 = vpop.xlane.xlu0 %4233 }
 0x1ba   :  { %v6176_v32 = vpop.eup %6175  ;;  %6201 = vrcp.f32 %v3780_v24  ;;  %v3768_v54 = vmul.f32 %v6174_v35, %v9863_v15  ;;  %v3257_v60 = vsel %vm3255_vm8, %v3256_v5, %v3254_v33  ;;  %5536 = vmatpush3.xpose.msk.msra.mxu0 %vm50_vm0, %v10098_v6  ;;  %vm3239_vm15 = vcmp.eq.f32.partialorder %v9936_v43, inf  ;;  %v6612_v35 = vld [vmem:[%s10604_s0 + $0x3a8] sm:$0xff] }
 0x1bb   :  { %v6178_v25 = vpop.eup %6177  ;;  %v3245_v40 = vmul.f32 %v6176_v32, %v9865_v9  ;;  %6203 = vrsqrt.f32 %v10077_v23  ;;  %vm3241_vm1 = vcmp.eq.f32.partialorder %v9936_v43, 0.0  ;;  %v10138_v19 = vmul.f32 %v6608_v30, %v6168_v53 }
 0x1bc   :  { %v6180_v1 = vpop.eup %6179  ;;  %6205 = vrcp.f32 %v3257_v60  ;;  %v3770_v59 = vsel %vm3769_vm9, %v9863_v15, %v3768_v54  ;;  %v10143_v44 = vmul.f32 %v6609_v4, %v6172_v41  ;;  %v3242_v58 = vand.u32 2147483648, %v9936_v43  ;;  %v6613_v54 = vld [vmem:[%s10604_s0 + $0x320] sm:$0xff]  ;;  %v10211_v60 = vpop.xlane.xlu1 %4224  ;;  %v6615_v4 = vld [vmem:[%s10604_s0 + $0x318] sm:$0xff] }
 0x1bd   :  { %v6182_v52 = vpop.eup %6181  ;;  %v3773_v34 = vsel %vm3771_vm10, %v3772_v51, %v3770_v59  ;;  %v3247_v2 = vsel %vm3246_vm11, %v9865_v9, %v3245_v40  ;;  %vm4291_vm2 = vcmp.eq.f32.partialorder %v10011_v0, inf  ;;  %vm4293_vm3 = vcmp.eq.f32.partialorder %v10011_v0, 0.0  ;;  %5591 = vmatprep.subr.msk.mxu1 %vm50_vm0, %v10138_v19  ;;  %v6610_v9 = vld [vmem:[%s10604_s0 + $0x3b0] sm:$0xff]  ;;  %v10172_v53 = vpop.xlane.xlu0 %4227 }
 0x1be   :  { %v6184_v42 = vpop.eup %6183  ;;  %6207 = vrcp.f32 %v3773_v34  ;;  %v3250_v15 = vsel %vm3248_vm12, %v3249_v45, %v3247_v2  ;;  %v3761_v5 = vmul.f32 %v6182_v52, %v9934_v50  ;;  %5537 = vmatprep.subr.msk.mxu0 %vm50_vm0, %v10143_v44  ;;  %v10160_v21 = vmul.f32 %v6610_v9, %v6178_v25  ;;  %5592 = vmatpush3.xpose.msk.msra.mxu1 %vm50_vm0, %v10138_v19  ;;  %v6614_v2 = vld [vmem:[%s10604_s0 + $0x3a0] sm:$0xff] }
 0x1bf   :  { %v6186_v7 = vpop.eup %6185  ;;  %6209 = vrcp.f32 %v3250_v15  ;;  %v4294_v27 = vand.u32 2147483648, %v10011_v0  ;;  %vm4298_vm4 = vcmp.eq.f32.partialorder %v10013_v16, inf  ;;  %5538 = vmatpush3.xpose.msk.msra.mxu0 %vm50_vm0, %v10143_v44  ;;  %vm4300_vm5 = vcmp.eq.f32.partialorder %v10013_v16, 0.0 }
 0x1c0   :  { %v6188_v3 = vpop.eup %6187  ;;  %v3763_v46 = vsel %vm3762_vm13, %v9934_v50, %v3761_v5  ;;  %6211 = vrsqrt.f32 %v10128_v22  ;;  %5593 = vmatprep.subr.msk.mxu1 %vm50_vm0, %v10160_v21  ;;  %v4301_v41 = vand.u32 2147483648, %v10013_v16  ;;  %v6611_v50 = vld [vmem:[%s10604_s0 + $0x328] sm:$0xff]  ;;  %vm4277_vm6 = vcmp.eq.f32.partialorder %v10075_v62, inf }
 0x1c1   :  { %v6190_v55 = vpop.eup %6189  ;;  %v3766_v13 = vsel %vm3764_vm14, %v3765_v18, %v3763_v46  ;;  %v3238_v51 = vmul.f32 %v6188_v3, %v9936_v43  ;;  %6213 = vrsqrt.f32 %v10149_v49  ;;  %v10186_v12 = vmul.f32 %v6611_v50, %v6184_v42 }
 0x1c2   :  { %v6192_v14 = vpop.eup %6191  ;;  %6215 = vrcp.f32 %v3766_v13  ;;  %v4290_v39 = vmul.f32 %v6190_v55, %v10011_v0  ;;  %v10195_v24 = vmul.f32 %v6612_v35, %v6180_v1  ;;  %vm4279_vm7 = vcmp.eq.f32.partialorder %v10075_v62, 0.0  ;;  %5594 = vmatpush3.xpose.msk.msra.mxu1 %vm50_vm0, %v10160_v21  ;;  %v6616_v55 = vld [vmem:[%s10604_s0 + $0x310] sm:$0xff] }
 0x1c3   :  { %v6194_v63 = vpop.eup %6193  ;;  %v3240_v10 = vsel %vm3239_vm15, %v9936_v43, %v3238_v51  ;;  %6217 = vrsqrt.f32 %v10172_v53  ;;  %v4280_v33 = vand.u32 2147483648, %v10075_v62  ;;  %5539 = vmatprep.subr.msk.mxu0 %vm50_vm0, %v10186_v12  ;;  %v10209_v25 = vmul.f32 %v6613_v54, %v6186_v7 }
 0x1c4   :  { %v6196_v45 = vpop.eup %6195  ;;  %v3243_v32 = vsel %vm3241_vm1, %v3242_v58, %v3240_v10  ;;  %v4292_v40 = vsel %vm4291_vm2, %v10011_v0, %v4290_v39  ;;  %vm4284_vm8 = vcmp.eq.f32.partialorder %v10077_v23, inf  ;;  %vm4286_vm9 = vcmp.eq.f32.partialorder %v10077_v23, 0.0  ;;  %5540 = vmatpush3.xpose.msk.msra.mxu0 %vm50_vm0, %v10186_v12  ;;  %5595 = vmatprep.subr.msk.mxu1 %vm50_vm0, %v10195_v24 }
 0x1c5   :  { %v6198_v43 = vpop.eup %6197  ;;  %6219 = vrcp.f32 %v3243_v32  ;;  %v4287_v59 = vand.u32 2147483648, %v10077_v23  ;;  %vm4270_vm10 = vcmp.eq.f32.partialorder %v10128_v22, inf  ;;  %vm4272_vm11 = vcmp.eq.f32.partialorder %v10128_v22, 0.0  ;;  %5541 = vmatprep.subr.msk.mxu0 %vm50_vm0, %v10209_v25 }
 0x1c6   :  { %v6200_v18 = vpop.eup %6199  ;;  %v4297_v1 = vmul.f32 %v6198_v43, %v10013_v16  ;;  %v10232_v30 = vmul.f32 %v6614_v2, %v6192_v14  ;;  %6221 = vrsqrt.f32 %v10211_v60  ;;  %v10238_v42 = vmul.f32 %v6615_v4, %v6196_v45  ;;  %5596 = vmatpush3.xpose.msk.msra.mxu1 %vm50_vm0, %v10195_v24  ;;  %v6619_v4 = vld [vmem:[%s10604_s0 + $0x390] sm:$0xff] }
 0x1c7   :  { %v6202_v52 = vpop.eup %6201  ;;  %v4276_v34 = vmul.f32 %v6200_v18, %v10075_v62  ;;  %v4295_v5 = vsel %vm4293_vm3, %v4294_v27, %v4292_v40  ;;  %v4273_v7 = vand.u32 2147483648, %v10128_v22  ;;  %vm4263_vm12 = vcmp.eq.f32.partialorder %v10149_v49, inf  ;;  %v5217_v27 = vpop.f32.mrf.mxu0  ;;  %v6618_v40 = vld [vmem:[%s10604_s0 + $0x308] sm:$0xff] }
 0x1c8   :  { %v6204_v15 = vpop.eup %6203  ;;  %v4299_v58 = vsel %vm4298_vm4, %v10013_v16, %v4297_v1  ;;  %vm4265_vm13 = vcmp.eq.f32.partialorder %v10149_v49, 0.0  ;;  %5542 = vmatpush3.xpose.msk.msra.mxu0 %vm50_vm0, %v10209_v25  ;;  %5597 = vmatprep.subr.msk.mxu1 %vm50_vm0, %v10232_v30  ;;  %v437_v51 = vmul.f32 %v5217_v27, %v5217_v27  ;;  %vm4256_vm14 = vcmp.eq.f32.partialorder %v10172_v53, inf }
 0x1c9   :  { %v6206_v9 = vpop.eup %6205  ;;  %v4302_v3 = vsel %vm4300_vm5, %v4301_v41, %v4299_v58  ;;  %v4278_v0 = vsel %vm4277_vm6, %v10075_v62, %v4276_v34  ;;  %v4283_v46 = vmul.f32 %v6204_v15, %v10077_v23  ;;  %5543 = vmatprep.subr.msk.mxu0 %vm50_vm0, %v10238_v42  ;;  %v4266_v41 = vand.u32 2147483648, %v10149_v49  ;;  %v6617_v62 = vld [vmem:[%s10604_s0 + $0x398] sm:$0xff]  ;;  %v357_v10 = vpop.f32.mrf.mxu0 }
 0x1ca   :  { %6223 = vrcp.f32 %v4302_v3  ;;  %v4281_v16 = vsel %vm4279_vm7, %v4280_v33, %v4278_v0  ;;  %v10267_v13 = vmul.f32 %v6616_v55, %v6206_v9  ;;  %v10277_v50 = vmul.f32 %v6617_v62, %v6194_v63  ;;  %5598 = vmatpush3.xpose.msk.msra.mxu1 %vm50_vm0, %v10232_v30  ;;  %v6620_v3 = vld [vmem:[%s10604_s0 + $0x380] sm:$0xff] }
 0x1cb   :  { %v6208_v14 = vpop.eup %6207  ;;  %v4285_v39 = vsel %vm4284_vm8, %v10077_v23, %v4283_v46  ;;  %6225 = vrcp.f32 %v4295_v5  ;;  %v453_v32 = vadd.f32 1e-09, %v437_v51  ;;  %v436_v33 = vmul.f32 %v357_v10, %v357_v10  ;;  %v5273_v51 = vpop.f32.mrf.mxu1 }
 0x1cc   :  { %v6210_v35 = vpop.eup %6209  ;;  %v4288_v45 = vsel %vm4286_vm9, %v4287_v59, %v4285_v39  ;;  %6227 = vrcp.f32 %v4281_v16  ;;  %vm4258_vm15 = vcmp.eq.f32.partialorder %v10172_v53, 0.0  ;;  %v4259_v43 = vand.u32 2147483648, %v10172_v53  ;;  %5544 = vmatpush3.xpose.msk.msra.mxu0 %vm50_vm0, %v10238_v42  ;;  %5599 = vmatprep.subr.msk.mxu1 %vm50_vm0, %v10277_v50  ;;  %v5220_v59 = vpop.f32.mrf.mxu0 }
 0x1cd   :  { %v6212_v54 = vpop.eup %6211  ;;  %vm4249_vm1 = vcmp.eq.f32.partialorder %v10211_v60, inf  ;;  %5545 = vmatprep.subr.msk.mxu0 %vm50_vm0, %v10267_v13  ;;  %v10296_v18 = vmul.f32 %v6618_v40, %v6210_v35  ;;  %6229 = vlog2.f32 %v453_v32  ;;  %v452_v1 = vadd.f32 1e-09, %v436_v33  ;;  %v6621_v35 = vld [vmem:[%s10604_s0 + $0x388] sm:$0xff]  ;;  %v880_v32 = vpop.f32.mrf.mxu1 }
 0x1ce   :  { %v6214_v23 = vpop.eup %6213  ;;  %v4269_v63 = vmul.f32 %v6212_v54, %v10128_v22  ;;  %6231 = vrcp.f32 %v4288_v45  ;;  %v10302_v15 = vmul.f32 %v6619_v4, %v6202_v52  ;;  %v439_v5 = vmul.f32 %v5220_v59, %v5220_v59  ;;  %5600 = vmatpush3.xpose.msk.msra.mxu1 %vm50_vm0, %v10277_v50  ;;  %v367_v52 = vpop.f32.mrf.mxu0 }
 0x1cf   :  { %v6216_v34 = vpop.eup %6215  ;;  %v4262_v2 = vmul.f32 %v6214_v23, %v10149_v49  ;;  %vm4251_vm2 = vcmp.eq.f32.partialorder %v10211_v60, 0.0  ;;  %6233 = vlog2.f32 %v452_v1  ;;  %v438_v62 = vmul.f32 %v367_v52, %v367_v52 }
 0x1d0   :  { %v6218_v58 = vpop.eup %6217  ;;  %v4271_v9 = vsel %vm4270_vm10, %v10128_v22, %v4269_v63  ;;  %v10313_v0 = vmul.f32 %v6620_v3, %v6216_v34  ;;  %5546 = vmatpush3.xpose.msk.msra.mxu0 %vm50_vm0, %v10267_v13  ;;  %5601 = vmatprep.subr.msk.mxu1 %vm50_vm0, %v10302_v15  ;;  %v455_v55 = vadd.f32 1e-09, %v439_v5  ;;  %v10337_v45 = vmul.f32 %v6621_v35, %v6208_v14  ;;  %v5223_v33 = vpop.f32.mrf.mxu0 }
 0x1d1   :  { %v4274_v46 = vsel %vm4272_vm11, %v4273_v7, %v4271_v9  ;;  %v4264_v27 = vsel %vm4263_vm12, %v10149_v49, %v4262_v2  ;;  %v4255_v16 = vmul.f32 %v6218_v58, %v10172_v53  ;;  %5547 = vmatprep.subr.msk.mxu0 %vm50_vm0, %v10296_v18  ;;  %v960_v7 = vmul.f32 %v5273_v51, %v5273_v51  ;;  %v6622_v49 = vld [vmem:[%s10604_s0 + $0x300] sm:$0xff] }
 0x1d2   :  { %v6220_v39 = vpop.eup %6219  ;;  %6235 = vrcp.f32 %v4274_v46  ;;  %v4267_v22 = vsel %vm4265_vm13, %v4266_v41, %v4264_v27  ;;  %5607 = vmatprep.mubr.msk.f32.mxu1 %vm50_vm0, %v10313_v0  ;;  %v4252_v63 = vand.u32 2147483648, %v10211_v60  ;;  %5602 = vmatpush3.xpose.msk.msra.mxu1 %vm50_vm0, %v10302_v15  ;;  %v454_v1 = vadd.f32 1e-09, %v438_v62  ;;  %v6623_v27 = vld [vmem:[%s10605_s1 + $0x38] sm:$0xff] }
 0x1d3   :  { %6237 = vrcp.f32 %v4267_v22  ;;  %v4257_v10 = vsel %vm4256_vm14, %v10172_v53, %v4255_v16  ;;  %v3350_v41 = vmul.f32 %v6622_v49, %v6220_v39  ;;  %v6222_v54 = vpop.eup %6221  ;;  %v976_v40 = vadd.f32 1e-09, %v960_v7  ;;  %5603 = vmatprep.subr.msk.mxu1 %vm50_vm0, %v10337_v45  ;;  %v5276_v53 = vpop.f32.mrf.mxu1 }
 0x1d4   :  { %v4260_v23 = vsel %vm4258_vm15, %v4259_v43, %v4257_v10  ;;  %6239 = vlog2.f32 %v455_v55  ;;  %v4248_v14 = vmul.f32 %v6222_v54, %v10211_v60  ;;  %5548 = vmatpush3.xpose.msk.msra.mxu0 %vm50_vm0, %v10296_v18  ;;  %v959_v59 = vmul.f32 %v880_v32, %v880_v32  ;;  %v377_v43 = vpop.f32.mrf.mxu0 }
 0x1d5   :  { %6241 = vrcp.f32 %v4260_v23  ;;  %5549 = vmatprep.subr.msk.mxu0 %vm50_vm0, %v3350_v41  ;;  %5551 = vmatprep.mubr.msk.f32.mxu0 %vm50_vm0, %v3350_v41  ;;  %v441_v34 = vmul.f32 %v5223_v33, %v5223_v33  ;;  %v962_v2 = vmul.f32 %v5276_v53, %v5276_v53  ;;  %v440_v4 = vmul.f32 %v377_v43, %v377_v43  ;;  %v890_v3 = vpop.f32.mrf.mxu1 }
 0x1d6   :  { %6243 = vlog2.f32 %v976_v40  ;;  %v4250_v58 = vsel %vm4249_vm1, %v10211_v60, %v4248_v14  ;;  %v975_v9 = vadd.f32 1e-09, %v959_v59  ;;  %v5226_v52 = vpop.f32.mrf.mxu0  ;;  %5604 = vmatpush3.xpose.msk.msra.mxu1 %vm50_vm0, %v10337_v45  ;;  %v961_v22 = vmul.f32 %v890_v3, %v890_v3  ;;  %v6624_v40 = vld [vmem:[%s10605_s1 + $0x30] sm:$0xff] }
 0x1d7   :  { %v6224_v5 = vpop.eup %6223  ;;  %6245 = vlog2.f32 %v454_v1  ;;  %v4253_v46 = vsel %vm4251_vm2, %v4252_v63, %v4250_v58  ;;  %v457_v55 = vadd.f32 1e-09, %v441_v34  ;;  %v978_v51 = vadd.f32 1e-09, %v962_v2  ;;  %5605 = vmatprep.subr.msk.mxu1 %vm50_vm0, %v10313_v0  ;;  %v5279_v7 = vpop.f32.mrf.mxu1 }
 0x1d8   :  { %v10364_v16 = vmul.f32 %v6623_v27, %v6224_v5  ;;  %v6226_v39 = vpop.eup %6225  ;;  %6247 = vrcp.f32 %v4253_v46  ;;  %5550 = vmatpush3.xpose.msk.msra.mxu0 %vm50_vm0, %v3350_v41  ;;  %v456_v60 = vadd.f32 1e-09, %v440_v4  ;;  %v387_v62 = vpop.f32.mrf.mxu0  ;;  %v443_v35 = vmul.f32 %v5226_v52, %v5226_v52 }
 0x1d9   :  { %v10369_v10 = vpop.eup %6227  ;;  %6249 = vlog2.f32 %v975_v9  ;;  %v964_v49 = vmul.f32 %v5279_v7, %v5279_v7  ;;  %v442_v32 = vmul.f32 %v387_v62, %v387_v62  ;;  %v977_v54 = vadd.f32 1e-09, %v961_v22  ;;  %v900_v41 = vpop.f32.mrf.mxu1 }
 0x1da   :  { %5631 = vmatprep.subr.msk.mxu0 %vm50_vm0, %v10364_v16  ;;  %v6230_v33 = vpop.eup %6229  ;;  %6251 = vlog2.f32 %v457_v55  ;;  %v5229_v23 = vpop.f32.mrf.mxu0  ;;  %5606 = vmatpush3.xpose.msk.msra.mxu1 %vm50_vm0, %v10313_v0  ;;  %v10380_v14 = vmul.f32 %v6624_v40, %v6226_v39  ;;  %v459_v1 = vadd.f32 1e-09, %v443_v35  ;;  %v963_v43 = vmul.f32 %v900_v41, %v900_v41 }
 0x1db   :  { %v6232_v63 = vpop.eup %6231  ;;  %5552 = vmatmul.mubr.msk.f32.vlgmr.msra.gmra.mxu0 %vm50_vm0, %v10296_v18  ;;  %6253 = vlog2.f32 %v978_v51  ;;  %v980_v59 = vadd.f32 1e-09, %v964_v49  ;;  %v458_v18 = vadd.f32 1e-09, %v442_v32  ;;  %v445_v0 = vmul.f32 %v5229_v23, %v5229_v23  ;;  %v5282_v34 = vpop.f32.mrf.mxu1  ;;  %5659 = vmatprep.subr.msk.mxu1 %vm50_vm0, %v10364_v16  ;;  %v6625_v51 = vld [vmem:[%s10605_s1 + $0x28] sm:$0xff] }
 0x1dc   :  { %v6234_v53 = vpop.eup %6233  ;;  %5554 = vmatprep.mubr.msk.f32.mxu0 %vm50_vm0, %v10267_v13  ;;  %5632 = vmatpush3.xpose.msk.msra.mxu0 %vm50_vm0, %v10364_v16  ;;  %6255 = vlog2.f32 %v456_v60  ;;  %v397_v2 = vpop.f32.mrf.mxu0  ;;  %v471_v4 = vmul.f32 0.6931472, %v6230_v33  ;;  %v966_v58 = vmul.f32 %v5282_v34, %v5282_v34  ;;  %v979_v9 = vadd.f32 1e-09, %v963_v43 }
 0x1dd   :  { %v469_v5 = vmul.f32 0.6931472, %v6234_v53  ;;  %5633 = vmatprep.subr.msk.mxu0 %vm50_vm0, %v10380_v14  ;;  %6257 = vlog2.f32 %v977_v54  ;;  %5608 = vmatmul.mubr.msk.f32.vlgmr.msra.gmra.mxu1 %vm50_vm0, %v10337_v45  ;;  %v461_v3 = vadd.f32 1e-09, %v445_v0  ;;  %v444_v52 = vmul.f32 %v397_v2, %v397_v2  ;;  %v910_v46 = vpop.f32.mrf.mxu1 }
 0x1de   :  { %6259 = vlog2.f32 %v459_v1  ;;  %v5232_v27 = vpop.f32.mrf.mxu0  ;;  %5610 = vmatprep.mubr.msk.f32.mxu1 %vm50_vm0, %v10302_v15  ;;  %v10401_v39 = vmul.f32 %v6625_v51, %v6232_v63  ;;  %v982_v45 = vadd.f32 1e-09, %v966_v58  ;;  %5667 = vmatpush3.xpose.msk.msra.mxu1 %vm50_vm0, %v10364_v16  ;;  %v965_v7 = vmul.f32 %v910_v46, %v910_v46  ;;  %v6626_v1 = vld [vmem:[%s10605_s1 + $0x20] sm:$0xff] }
 0x1df   :  { %v6236_v13 = vpop.eup %6235  ;;  %5555 = vmatmul.mubr.msk.f32.gmra.mxu0 %vm50_vm0, %v10238_v42  ;;  %6261 = vlog2.f32 %v980_v59  ;;  %v500_v22 = vsub.f32 0.0, %v469_v5  ;;  %v460_v42 = vadd.f32 1e-09, %v444_v52  ;;  %v5285_v15 = vpop.f32.mrf.mxu1  ;;  %v501_v49 = vsub.f32 0.0, %v471_v4  ;;  %5660 = vmatprep.subr.msk.mxu1 %vm50_vm0, %v10380_v14 }
 0x1e0   :  { %v10392_v55 = vpop.eup %6237  ;;  %5557 = vmatprep.mubr.msk.f32.mxu0 %vm50_vm0, %v10209_v25  ;;  %6263 = vlog2.f32 %v458_v18  ;;  %v407_v62 = vpop.f32.mrf.mxu0  ;;  %5634 = vmatpush3.xpose.msk.msra.mxu0 %vm50_vm0, %v10380_v14  ;;  %v447_v25 = vmul.f32 %v5232_v27, %v5232_v27  ;;  %v981_v54 = vadd.f32 1e-09, %v965_v7  ;;  %v968_v41 = vmul.f32 %v5285_v15, %v5285_v15 }
 0x1e1   :  { %v6240_v60 = vpop.eup %6239  ;;  %6265 = vlog2.f32 %v979_v9  ;;  %5635 = vmatprep.subr.msk.mxu0 %vm50_vm0, %v10401_v39  ;;  %5611 = vmatmul.mubr.msk.f32.gmra.mxu1 %vm50_vm0, %v10277_v50  ;;  %v446_v23 = vmul.f32 %v407_v62, %v407_v62  ;;  %v920_v63 = vpop.f32.mrf.mxu1  ;;  %v10427_v59 = vmul.f32 %v6626_v1, %v10369_v10  ;;  %v6627_v50 = vld [vmem:[%s10605_s1 + $0x18] sm:$0xff] }
 0x1e2   :  { %v10407_v35 = vpop.eup %6241  ;;  %v10409_v32 = vmul.f32 0.6931472, %v6240_v60  ;;  %6267 = vlog2.f32 %v461_v3  ;;  %5613 = vmatprep.mubr.msk.f32.mxu1 %vm50_vm0, %v10232_v30  ;;  %v10432_v53 = vmul.f32 %v6627_v50, %v6236_v13  ;;  %v463_v18 = vadd.f32 1e-09, %v447_v25  ;;  %v5235_v43 = vpop.f32.mrf.mxu0  ;;  %5668 = vmatpush3.xpose.msk.msra.mxu1 %vm50_vm0, %v10380_v14 }
 0x1e3   :  { %v6244_v33 = vpop.eup %6243  ;;  %5558 = vmatmul.mubr.msk.f32.gmra.mxu0 %vm50_vm0, %v10186_v12  ;;  %6269 = vlog2.f32 %v982_v45  ;;  %v516_v12 = vadd.f32 %v501_v49, %v500_v22  ;;  %v462_v30 = vadd.f32 1e-09, %v446_v23  ;;  %v5288_v10 = vpop.f32.mrf.mxu1  ;;  %5661 = vmatprep.subr.msk.mxu1 %vm50_vm0, %v10401_v39  ;;  %v967_v5 = vmul.f32 %v920_v63, %v920_v63 }
 0x1e4   :  { %v6246_v40 = vpop.eup %6245  ;;  %5560 = vmatprep.mubr.msk.f32.mxu0 %vm50_vm0, %v10143_v44  ;;  %6271 = vlog2.f32 %v460_v42  ;;  %v503_v2 = vsub.f32 0.0, %v10409_v32  ;;  %v994_v4 = vmul.f32 0.6931472, %v6244_v33  ;;  %5636 = vmatpush3.xpose.msk.msra.mxu0 %vm50_vm0, %v10401_v39  ;;  %v417_v44 = vpop.f32.mrf.mxu0  ;;  %v984_v9 = vadd.f32 1e-09, %v968_v41 }
 0x1e5   :  { %v473_v0 = vmul.f32 0.6931472, %v6246_v40  ;;  %v10438_v34 = vpop.eup %6247  ;;  %6273 = vlog2.f32 %v981_v54  ;;  %5637 = vmatprep.subr.msk.mxu0 %vm50_vm0, %v10427_v59  ;;  %5614 = vmatmul.mubr.msk.f32.gmra.mxu1 %vm50_vm0, %v10195_v24  ;;  %v449_v3 = vmul.f32 %v5235_v43, %v5235_v43  ;;  %v983_v27 = vadd.f32 1e-09, %v967_v5  ;;  %v930_v60 = vpop.f32.mrf.mxu1  ;;  %v6629_v54 = vld [vmem:[%s10605_s1 + $0x8] sm:$0xff] }
 0x1e6   :  { %v6250_v58 = vpop.eup %6249  ;;  %6275 = vlog2.f32 %v463_v18  ;;  %5616 = vmatprep.mubr.msk.f32.mxu1 %vm50_vm0, %v10160_v21  ;;  %v970_v51 = vmul.f32 %v5288_v10, %v5288_v10  ;;  %v448_v45 = vmul.f32 %v417_v44, %v417_v44  ;;  %5669 = vmatpush3.xpose.msk.msra.mxu1 %vm50_vm0, %v10401_v39  ;;  %v6628_v21 = vld [vmem:[%s10605_s1 + $0x10] sm:$0xff]  ;;  %v1024_v32 = vsub.f32 0.0, %v994_v4 }
 0x1e7   :  { %v502_v13 = vsub.f32 0.0, %v473_v0  ;;  %v6252_v52 = vpop.eup %6251  ;;  %v992_v46 = vmul.f32 0.6931472, %v6250_v58  ;;  %5561 = vmatmul.mubr.msk.f32.gmra.mxu0 %vm50_vm0, %v10098_v6  ;;  %6277 = vlog2.f32 %v462_v30  ;;  %v465_v24 = vadd.f32 1e-09, %v449_v3  ;;  %5662 = vmatprep.subr.msk.mxu1 %vm50_vm0, %v10427_v59 }
 0x1e8   :  { %v6254_v22 = vpop.eup %6253  ;;  %v479_v7 = vmul.f32 0.6931472, %v6252_v52  ;;  %5563 = vmatprep.mubr.msk.f32.mxu0 %vm50_vm0, %v10052_v26  ;;  %5638 = vmatpush3.xpose.msk.msra.mxu0 %vm50_vm0, %v10427_v59  ;;  %v10465_v26 = vmul.f32 %v6628_v21, %v10392_v55  ;;  %6279 = vlog2.f32 %v983_v27  ;;  %v10475_v41 = vmul.f32 %v6629_v54, %v10407_v35  ;;  %v5238_v55 = vpop.f32.mrf.mxu0 }
 0x1e9   :  { %v517_v42 = vadd.f32 %v516_v12, %v502_v13  ;;  %v6256_v15 = vpop.eup %6255  ;;  %v1023_v6 = vsub.f32 0.0, %v992_v46  ;;  %v998_v62 = vmul.f32 0.6931472, %v6254_v22  ;;  %5639 = vmatprep.subr.msk.mxu0 %vm50_vm0, %v10432_v53  ;;  %5617 = vmatmul.mubr.msk.f32.gmra.mxu1 %vm50_vm0, %v10138_v19  ;;  %6281 = vlog2.f32 %v984_v9  ;;  %v5291_v19 = vpop.f32.mrf.mxu1 }
 0x1ea   :  { %v6258_v49 = vpop.eup %6257  ;;  %v477_v25 = vmul.f32 0.6931472, %v6256_v15  ;;  %v505_v63 = vsub.f32 0.0, %v479_v7  ;;  %5619 = vmatprep.mubr.msk.f32.mxu1 %vm50_vm0, %v10086_v36  ;;  %v986_v1 = vadd.f32 1e-09, %v970_v51  ;;  %5670 = vmatpush3.xpose.msk.msra.mxu1 %vm50_vm0, %v10427_v59  ;;  %6283 = vlog2.f32 %v465_v24  ;;  %v6630_v24 = vld [vmem:[%s10605_s1] sm:$0xff] }
 0x1eb   :  { %v518_v33 = vadd.f32 %v517_v42, %v503_v2  ;;  %v6260_v23 = vpop.eup %6259  ;;  %v996_v40 = vmul.f32 0.6931472, %v6258_v49  ;;  %5564 = vmatmul.mubr.msk.f32.gmra.mxu0 %vm50_vm0, %v9999_v31  ;;  %v464_v35 = vadd.f32 1e-09, %v448_v45  ;;  %v969_v43 = vmul.f32 %v930_v60, %v930_v60  ;;  %5663 = vmatprep.subr.msk.mxu1 %vm50_vm0, %v10432_v53  ;;  %v10497_v3 = vpop.f32.mrf.mxu1 }
 0x1ec   :  { %v6262_v50 = vpop.eup %6261  ;;  %v504_v18 = vsub.f32 0.0, %v477_v25  ;;  %5566 = vmatprep.mubr.msk.f32.mxu0 %vm50_vm0, %v9952_v57  ;;  %v1039_v0 = vadd.f32 %v1024_v32, %v1023_v6  ;;  %v1026_v31 = vsub.f32 0.0, %v998_v62  ;;  %5640 = vmatpush3.xpose.msk.msra.mxu0 %vm50_vm0, %v10432_v53  ;;  %v451_v36 = vmul.f32 %v5238_v55, %v5238_v55  ;;  %v427_v60 = vpop.f32.mrf.mxu0 }
 0x1ed   :  { %v6264_v12 = vpop.eup %6263  ;;  %v1025_v30 = vsub.f32 0.0, %v996_v40  ;;  %v483_v57 = vmul.f32 0.6931472, %v6260_v23  ;;  %5641 = vmatprep.subr.msk.mxu0 %vm50_vm0, %v10465_v26  ;;  %5620 = vmatmul.mubr.msk.f32.gmra.mxu1 %vm50_vm0, %v10039_v38  ;;  %6285 = vlog2.f32 %v464_v35  ;;  %v1002_v58 = vmul.f32 0.6931472, %v6262_v50  ;;  %v5294_v25 = vpop.f32.mrf.mxu1 }
 0x1ee   :  { %v6266_v10 = vpop.eup %6265  ;;  %v519_v2 = vadd.f32 %v518_v33, %v504_v18  ;;  %v481_v4 = vmul.f32 0.6931472, %v6264_v12  ;;  %5622 = vmatprep.mubr.msk.f32.mxu1 %vm50_vm0, %v9990_v37  ;;  %v985_v9 = vadd.f32 1e-09, %v969_v43  ;;  %5671 = vmatpush3.xpose.msk.msra.mxu1 %vm50_vm0, %v10432_v53  ;;  %6287 = vlog2.f32 %v986_v1 }
 0x1ef   :  { %v6268_v5 = vpop.eup %6267  ;;  %v1040_v44 = vadd.f32 %v1039_v0, %v1025_v30  ;;  %v1000_v13 = vmul.f32 0.6931472, %v6266_v10  ;;  %5567 = vmatmul.mubr.msk.f32.gmra.mxu0 %vm50_vm0, %v9902_v29  ;;  %5664 = vmatprep.subr.msk.mxu1 %vm50_vm0, %v10465_v26  ;;  %v467_v37 = vadd.f32 1e-09, %v451_v36  ;;  %v507_v42 = vsub.f32 0.0, %v483_v57  ;;  %v950_v43 = vpop.f32.mrf.mxu1 }
 0x1f0   :  { %v6270_v52 = vpop.eup %6269  ;;  %v506_v46 = vsub.f32 0.0, %v481_v4  ;;  %v520_v27 = vadd.f32 %v519_v2, %v505_v63  ;;  %v487_v51 = vmul.f32 0.6931472, %v6268_v5  ;;  %5569 = vmatprep.mubr.msk.f32.mxu0 %vm50_vm0, %v9852_v48  ;;  %5642 = vmatpush3.xpose.msk.msra.mxu0 %vm50_vm0, %v10465_v26  ;;  %6289 = vlog2.f32 %v985_v9 }
 0x1f1   :  { %v6272_v38 = vpop.eup %6271  ;;  %v1027_v45 = vsub.f32 0.0, %v1000_v13  ;;  %v1041_v29 = vadd.f32 %v1040_v44, %v1026_v31  ;;  %5643 = vmatprep.subr.msk.mxu0 %vm50_vm0, %v10475_v41  ;;  %5623 = vmatmul.mubr.msk.f32.gmra.mxu1 %vm50_vm0, %v9943_v17  ;;  %v4304_v15 = vmul.f32 %v6630_v24, %v10438_v34  ;;  %v1028_v62 = vsub.f32 0.0, %v1002_v58 }
 0x1f2   :  { %v6274_v22 = vpop.eup %6273  ;;  %v521_v7 = vadd.f32 %v520_v27, %v506_v46  ;;  %v485_v48 = vmul.f32 0.6931472, %v6272_v38  ;;  %5625 = vmatprep.mubr.msk.f32.mxu1 %vm50_vm0, %v9889_v28  ;;  %v972_v32 = vmul.f32 %v5291_v19, %v5291_v19  ;;  %v1006_v33 = vmul.f32 0.6931472, %v6270_v52  ;;  %5672 = vmatpush3.xpose.msk.msra.mxu1 %vm50_vm0, %v10465_v26 }
 0x1f3   :  { %v6276_v6 = vpop.eup %6275  ;;  %v1042_v21 = vadd.f32 %v1041_v29, %v1027_v45  ;;  %v1004_v49 = vmul.f32 0.6931472, %v6274_v22  ;;  %5570 = vmatmul.mubr.msk.f32.gmra.mxu0 %vm50_vm0, %v9790_v11  ;;  %v450_v34 = vmul.f32 %v427_v60, %v427_v60  ;;  %v509_v23 = vsub.f32 0.0, %v487_v51  ;;  %5665 = vmatprep.subr.msk.mxu1 %vm50_vm0, %v10475_v41 }
 0x1f4   :  { %v508_v17 = vsub.f32 0.0, %v485_v48  ;;  %v522_v54 = vadd.f32 %v521_v7, %v507_v42  ;;  %5572 = vmatprep.mubr.msk.f32.mxu0 %vm50_vm0, %v9736_v20  ;;  %v6278_v55 = vpop.eup %6277  ;;  %5644 = vmatpush3.xpose.msk.msra.mxu0 %vm50_vm0, %v10475_v41  ;;  %6291 = vlog2.f32 %v467_v37  ;;  %v491_v1 = vmul.f32 0.6931472, %v6276_v6 }
 0x1f5   :  { %v1029_v63 = vsub.f32 0.0, %v1004_v49  ;;  %v1043_v40 = vadd.f32 %v1042_v21, %v1028_v62  ;;  %v6280_v11 = vpop.eup %6279  ;;  %v489_v19 = vmul.f32 0.6931472, %v6278_v55  ;;  %5645 = vmatprep.subr.msk.mxu0 %vm50_vm0, %v4304_v15  ;;  %5626 = vmatmul.mubr.msk.f32.gmra.mxu1 %vm50_vm0, %v9843_v8  ;;  %v466_v20 = vadd.f32 1e-09, %v450_v34 }
 0x1f6   :  { %v523_v28 = vadd.f32 %v522_v54, %v508_v17  ;;  %v1008_v18 = vmul.f32 0.6931472, %v6280_v11  ;;  %v988_v35 = vadd.f32 1e-09, %v972_v32  ;;  %5628 = vmatprep.mubr.msk.f32.mxu1 %vm50_vm0, %v9778_v61  ;;  %v6282_v12 = vpop.eup %6281  ;;  %5673 = vmatpush3.xpose.msk.msra.mxu1 %vm50_vm0, %v10475_v41  ;;  %v1030_v30 = vsub.f32 0.0, %v1006_v33 }
 0x1f7   :  { %v1044_v50 = vadd.f32 %v1043_v40, %v1029_v63  ;;  %5573 = vmatmul.mubr.msk.f32.gmra.mxu0 %vm50_vm0, %v9686_v56  ;;  %v510_v0 = vsub.f32 0.0, %v489_v19  ;;  %6293 = vlog2.f32 %v466_v20  ;;  %v6284_v8 = vpop.eup %6283  ;;  %v971_v56 = vmul.f32 %v10497_v3, %v10497_v3  ;;  %5666 = vmatprep.subr.msk.mxu1 %vm50_vm0, %v4304_v15 }
 0x1f8   :  { %v524_v31 = vadd.f32 %v523_v28, %v509_v23  ;;  %5647 = vmatprep.mubr.msk.f32.mxu0 %vm50_vm0, %v4304_v15  ;;  %5646 = vmatpush3.xpose.msk.msra.mxu0 %vm50_vm0, %v4304_v15  ;;  %v511_v61 = vsub.f32 0.0, %v491_v1  ;;  %v974_v10 = vmul.f32 %v5294_v25, %v5294_v25  ;;  %v973_v2 = vmul.f32 %v950_v43, %v950_v43 }
 0x1f9   :  { %5629 = vmatmul.mubr.msk.f32.gmra.mxu1 %vm50_vm0, %v9723_v47  ;;  %v1031_v4 = vsub.f32 0.0, %v1008_v18  ;;  %v1045_v5 = vadd.f32 %v1044_v50, %v1030_v30  ;;  %6295 = vlog2.f32 %v988_v35  ;;  %v987_v44 = vadd.f32 1e-09, %v971_v56 }
 0x1fa   :  { %v525_v36 = vadd.f32 %v524_v31, %v510_v0  ;;  %v6286_v57 = vpop.eup %6285  ;;  %5653 = vmatprep.mubr.msk.f32.mxu1 %vm50_vm0, %v10427_v59  ;;  %v990_v13 = vadd.f32 1e-09, %v974_v10  ;;  %5674 = vmatpush3.xpose.msk.msra.mxu1 %vm50_vm0, %v4304_v15  ;;  %v989_v9 = vadd.f32 1e-09, %v973_v2  ;;  %v1010_v52 = vmul.f32 0.6931472, %v6282_v12 }
 0x1fb   :  { %v493_v58 = vmul.f32 0.6931472, %v6286_v57  ;;  %5648 = vmatmul.mubr.msk.f32.vlgmr.msra.gmra.mxu0 %vm50_vm0, %v10475_v41  ;;  %v6288_v3 = vpop.eup %6287  ;;  %6297 = vlog2.f32 %v987_v44  ;;  %v1046_v51 = vadd.f32 %v1045_v5, %v1031_v4  ;;  %v495_v41 = vmul.f32 0.6931472, %v6284_v8 }
 0x1fc   :  { %5650 = vmatprep.mubr.msk.f32.mxu0 %vm50_vm0, %v10465_v26  ;;  %v526_v27 = vadd.f32 %v525_v36, %v511_v61  ;;  %6299 = vlog2.f32 %v990_v13  ;;  %v1032_v38 = vsub.f32 0.0, %v1010_v52  ;;  %v1014_v42 = vmul.f32 0.6931472, %v6288_v3 }
 0x1fd   :  { %v6290_v47 = vpop.eup %6289  ;;  %v512_v46 = vsub.f32 0.0, %v493_v58  ;;  %6301 = vlog2.f32 %v989_v9  ;;  %5654 = vmatmul.mubr.msk.f32.vlgmr.msra.gmra.mxu1 %vm50_vm0, %v10401_v39  ;;  %v513_v60 = vsub.f32 0.0, %v495_v41 }
 0x1fe   :  { %v1012_v59 = vmul.f32 0.6931472, %v6290_v47  ;;  %5656 = vmatprep.mubr.msk.f32.mxu1 %vm50_vm0, %v10380_v14  ;;  %v1047_v37 = vadd.f32 %v1046_v51, %v1032_v38  ;;  %v1034_v6 = vsub.f32 0.0, %v1014_v42 }
 0x1ff   :  { %5651 = vmatmul.mubr.msk.f32.gmra.mxu0 %vm50_vm0, %v10432_v53  ;;  %v527_v26 = vadd.f32 %v526_v27, %v512_v46 }
 0x200   :  { %v1033_v29 = vsub.f32 0.0, %v1012_v59 }
 0x201   :  { %v6292_v45 = vpop.eup %6291  ;;  %5657 = vmatmul.mubr.msk.f32.gmra.mxu1 %vm50_vm0, %v10364_v16  ;;  %v528_v48 = vadd.f32 %v527_v26, %v513_v60  ;;  %vm4472_vm0 = vcmask 523264  }
 0x202   :  { %v499_v7 = vmul.f32 0.6931472, %v6292_v45  ;;  %v1048_v24 = vadd.f32 %v1047_v37, %v1033_v29 }
 0x204   :  { %v6294_v22 = vpop.eup %6293  ;;  %v515_v14 = vsub.f32 0.0, %v499_v7  ;;  %v1049_v33 = vadd.f32 %v1048_v24, %v1034_v6 }
 0x205   :  { %v497_v39 = vmul.f32 0.6931472, %v6294_v22 }
 0x206   :  { %v6296_v15 = vpop.eup %6295 }
 0x207   :  { %v514_v53 = vsub.f32 0.0, %v497_v39  ;;  %v1018_v32 = vmul.f32 0.6931472, %v6296_v15 }
 0x208   :  { %v6298_v62 = vpop.eup %6297 }
 0x209   :  { %v529_v21 = vadd.f32 %v528_v48, %v514_v53  ;;  %v6300_v49 = vpop.eup %6299  ;;  %v1016_v25 = vmul.f32 0.6931472, %v6298_v62  ;;  %v1036_v63 = vsub.f32 0.0, %v1018_v32 }
 0x20a   :  { %v6302_v17 = vpop.eup %6301  ;;  %v1022_v55 = vmul.f32 0.6931472, %v6300_v49 }
 0x20b   :  { %v530_v54 = vadd.f32 %v529_v21, %v515_v14  ;;  %v1035_v16 = vsub.f32 0.0, %v1016_v25  ;;  %v1020_v34 = vmul.f32 0.6931472, %v6302_v17  ;;  %v5329_v23 = vpop.f32.mrf.mxu0 }
 0x20c   :  { %v1483_v28 = vmul.f32 %v5329_v23, %v5329_v23  ;;  %v1038_v18 = vsub.f32 0.0, %v1022_v55 }
 0x20d   :  { %531 = vadd.xlane.f32.xlu0 %v530_v54  ;;  %v1050_v40 = vadd.f32 %v1049_v33, %v1035_v16  ;;  %v1037_v11 = vsub.f32 0.0, %v1020_v34  ;;  %v1403_v1 = vpop.f32.mrf.mxu0 }
 0x20e   :  { %v1499_v20 = vadd.f32 1e-09, %v1483_v28  ;;  %v1482_v50 = vmul.f32 %v1403_v1, %v1403_v1 }
 0x20f   :  { %v1051_v19 = vadd.f32 %v1050_v40, %v1036_v63  ;;  %v5332_v35 = vpop.f32.mrf.mxu0  ;;  %v5385_v31 = vpop.f32.mrf.mxu1 }
 0x210   :  { %6303 = vlog2.f32 %v1499_v20  ;;  %v1498_v12 = vadd.f32 1e-09, %v1482_v50  ;;  %v1485_v0 = vmul.f32 %v5332_v35, %v5332_v35  ;;  %v2006_v8 = vmul.f32 %v5385_v31, %v5385_v31 }
 0x211   :  { %v1052_v43 = vadd.f32 %v1051_v19, %v1037_v11  ;;  %v1413_v30 = vpop.f32.mrf.mxu0  ;;  %v1926_v10 = vpop.f32.mrf.mxu1 }
 0x212   :  { %6305 = vlog2.f32 %v1498_v12  ;;  %v1501_v61 = vadd.f32 1e-09, %v1485_v0  ;;  %v1484_v36 = vmul.f32 %v1413_v30, %v1413_v30  ;;  %v2022_v2 = vadd.f32 1e-09, %v2006_v8 }
 0x213   :  { %v1053_v56 = vadd.f32 %v1052_v43, %v1038_v18  ;;  %v2005_v57 = vmul.f32 %v1926_v10, %v1926_v10  ;;  %v5335_v4 = vpop.f32.mrf.mxu0 }
 0x214   :  { %6307 = vlog2.f32 %v1501_v61  ;;  %v1500_v5 = vadd.f32 1e-09, %v1484_v36  ;;  %v1487_v44 = vmul.f32 %v5335_v4, %v5335_v4  ;;  %v5388_v58 = vpop.f32.mrf.mxu1 }
 0x215   :  { %1054 = vadd.xlane.f32.xlu1 %v1053_v56  ;;  %6309 = vlog2.f32 %v2022_v2  ;;  %v2021_v13 = vadd.f32 1e-09, %v2005_v57  ;;  %v2008_v9 = vmul.f32 %v5388_v58, %v5388_v58  ;;  %v1423_v3 = vpop.f32.mrf.mxu0 }
 0x216   :  { %6311 = vlog2.f32 %v1500_v5  ;;  %v1503_v52 = vadd.f32 1e-09, %v1487_v44  ;;  %v1486_v47 = vmul.f32 %v1423_v3, %v1423_v3  ;;  %v1936_v46 = vpop.f32.mrf.mxu1 }
 0x217   :  { %6313 = vlog2.f32 %v2021_v13  ;;  %v2024_v27 = vadd.f32 1e-09, %v2008_v9  ;;  %v2007_v51 = vmul.f32 %v1936_v46, %v1936_v46  ;;  %v5338_v59 = vpop.f32.mrf.mxu0 }
 0x218   :  { %6315 = vlog2.f32 %v1503_v52  ;;  %v1502_v41 = vadd.f32 1e-09, %v1486_v47  ;;  %v1489_v38 = vmul.f32 %v5338_v59, %v5338_v59  ;;  %v5391_v45 = vpop.f32.mrf.mxu1 }
 0x219   :  { %6317 = vlog2.f32 %v2024_v27  ;;  %v2023_v26 = vadd.f32 1e-09, %v2007_v51  ;;  %v2010_v29 = vmul.f32 %v5391_v45, %v5391_v45  ;;  %v1433_v37 = vpop.f32.mrf.mxu0 }
 0x21a   :  { %6319 = vlog2.f32 %v1502_v41  ;;  %v1505_v60 = vadd.f32 1e-09, %v1489_v38  ;;  %v1488_v22 = vmul.f32 %v1433_v37, %v1433_v37  ;;  %v1946_v42 = vpop.f32.mrf.mxu1 }
 0x21b   :  { %6321 = vlog2.f32 %v2023_v26  ;;  %v2026_v7 = vadd.f32 1e-09, %v2010_v29  ;;  %v2009_v39 = vmul.f32 %v1946_v42, %v1946_v42 }
 0x21c   :  { %v5341_v48 = vpop.f32.mrf.mxu0  ;;  %6323 = vlog2.f32 %v1505_v60  ;;  %v1504_v24 = vadd.f32 1e-09, %v1488_v22  ;;  %v5394_v53 = vpop.f32.mrf.mxu1 }
 0x21d   :  { %v1491_v15 = vmul.f32 %v5341_v48, %v5341_v48  ;;  %v6304_v6 = vpop.eup %6303  ;;  %6325 = vlog2.f32 %v2026_v7  ;;  %v2025_v62 = vadd.f32 1e-09, %v2009_v39  ;;  %v2012_v14 = vmul.f32 %v5394_v53, %v5394_v53 }
 0x21e   :  { %v1443_v21 = vpop.f32.mrf.mxu0  ;;  %6327 = vlog2.f32 %v1504_v24  ;;  %v1956_v25 = vpop.f32.mrf.mxu1  ;;  %v1517_v17 = vmul.f32 0.6931472, %v6304_v6 }
 0x21f   :  { %v1507_v49 = vadd.f32 1e-09, %v1491_v15  ;;  %v1490_v32 = vmul.f32 %v1443_v21, %v1443_v21  ;;  %v6306_v33 = vpop.eup %6305  ;;  %6329 = vlog2.f32 %v2025_v62  ;;  %v2011_v54 = vmul.f32 %v1956_v25, %v1956_v25 }
 0x220   :  { %v1515_v16 = vmul.f32 0.6931472, %v6306_v33  ;;  %v2028_v34 = vadd.f32 1e-09, %v2012_v14  ;;  %v5344_v23 = vpop.f32.mrf.mxu0  ;;  %v5397_v63 = vpop.f32.mrf.mxu1  ;;  %v1547_v43 = vsub.f32 0.0, %v1517_v17 }
 0x221   :  { %v1506_v55 = vadd.f32 1e-09, %v1490_v32  ;;  %v6308_v40 = vpop.eup %6307  ;;  %6331 = vlog2.f32 %v1507_v49  ;;  %v2027_v11 = vadd.f32 1e-09, %v2011_v54  ;;  %v1493_v28 = vmul.f32 %v5344_v23, %v5344_v23 }
 0x222   :  { %v6310_v1 = vpop.eup %6309  ;;  %v1546_v19 = vsub.f32 0.0, %v1515_v16  ;;  %v1521_v20 = vmul.f32 0.6931472, %v6308_v40  ;;  %v1453_v50 = vpop.f32.mrf.mxu0  ;;  %v2014_v57 = vmul.f32 %v5397_v63, %v5397_v63 }
 0x223   :  { %6333 = vlog2.f32 %v1506_v55  ;;  %v1966_v18 = vpop.f32.mrf.mxu1  ;;  %v6312_v35 = vpop.eup %6311  ;;  %v2040_v12 = vmul.f32 0.6931472, %v6310_v1  ;;  %v1509_v0 = vadd.f32 1e-09, %v1493_v28  ;;  %v1492_v30 = vmul.f32 %v1453_v50, %v1453_v50 }
 0x224   :  { %6335 = vlog2.f32 %v2027_v11  ;;  %v6314_v31 = vpop.eup %6313  ;;  %v1519_v8 = vmul.f32 0.6931472, %v6312_v35  ;;  %v5347_v56 = vpop.f32.mrf.mxu0  ;;  %v1562_v10 = vadd.f32 %v1547_v43, %v1546_v19  ;;  %v2013_v4 = vmul.f32 %v1966_v18, %v1966_v18 }
 0x225   :  { %6337 = vlog2.f32 %v2028_v34  ;;  %v5400_v61 = vpop.f32.mrf.mxu1  ;;  %v6316_v36 = vpop.eup %6315  ;;  %v2038_v2 = vmul.f32 0.6931472, %v6314_v31  ;;  %v1549_v44 = vsub.f32 0.0, %v1521_v20  ;;  %v2070_v58 = vsub.f32 0.0, %v2040_v12 }
 0x226   :  { %v6318_v5 = vpop.eup %6317  ;;  %v1548_v13 = vsub.f32 0.0, %v1519_v8  ;;  %v1508_v9 = vadd.f32 1e-09, %v1492_v30  ;;  %6339 = vlog2.f32 %v1509_v0  ;;  %v2029_v46 = vadd.f32 1e-09, %v2013_v4  ;;  %v1463_v45 = vpop.f32.mrf.mxu0 }
 0x227   :  { %v1976_v3 = vpop.f32.mrf.mxu1  ;;  %v6320_v52 = vpop.eup %6319  ;;  %v2069_v47 = vsub.f32 0.0, %v2038_v2  ;;  %v1495_v27 = vmul.f32 %v5347_v56, %v5347_v56  ;;  %v1525_v41 = vmul.f32 0.6931472, %v6316_v36  ;;  %v2044_v29 = vmul.f32 0.6931472, %v6318_v5 }
 0x228   :  { %v6322_v51 = vpop.eup %6321  ;;  %v1563_v59 = vadd.f32 %v1562_v10, %v1548_v13  ;;  %v1523_v38 = vmul.f32 0.6931472, %v6320_v52  ;;  %6341 = vlog2.f32 %v1508_v9  ;;  %v2030_v60 = vadd.f32 1e-09, %v2014_v57  ;;  %v5350_v28 = vpop.f32.mrf.mxu0 }
 0x229   :  { %v6324_v26 = vpop.eup %6323  ;;  %v2042_v37 = vmul.f32 0.6931472, %v6322_v51  ;;  %6343 = vlog2.f32 %v2029_v46  ;;  %v5403_v22 = vpop.f32.mrf.mxu1  ;;  %v2085_v7 = vadd.f32 %v2070_v58, %v2069_v47  ;;  %v1511_v62 = vadd.f32 1e-09, %v1495_v27 }
 0x22a   :  { %v6326_v42 = vpop.eup %6325  ;;  %v1550_v39 = vsub.f32 0.0, %v1523_v38  ;;  %v1564_v48 = vadd.f32 %v1563_v59, %v1549_v44  ;;  %v1529_v24 = vmul.f32 0.6931472, %v6324_v26  ;;  %v1494_v14 = vmul.f32 %v1463_v45, %v1463_v45  ;;  %v1473_v4 = vpop.f32.mrf.mxu0 }
 0x22b   :  { %v6328_v15 = vpop.eup %6327  ;;  %v2071_v53 = vsub.f32 0.0, %v2042_v37  ;;  %v2048_v6 = vmul.f32 0.6931472, %v6326_v42  ;;  %v1551_v49 = vsub.f32 0.0, %v1525_v41  ;;  %v2016_v33 = vmul.f32 %v5400_v61, %v5400_v61  ;;  %v1986_v34 = vpop.f32.mrf.mxu1 }
 0x22c   :  { %v6330_v21 = vpop.eup %6329  ;;  %v1565_v32 = vadd.f32 %v1564_v48, %v1550_v39  ;;  %v1527_v25 = vmul.f32 0.6931472, %v6328_v15  ;;  %v2072_v17 = vsub.f32 0.0, %v2044_v29  ;;  %6345 = vlog2.f32 %v2030_v60 }
 0x22d   :  { %v2086_v54 = vadd.f32 %v2085_v7, %v2071_v53  ;;  %v2046_v16 = vmul.f32 0.6931472, %v6330_v21  ;;  %v1553_v23 = vsub.f32 0.0, %v1529_v24  ;;  %v1510_v11 = vadd.f32 1e-09, %v1494_v14  ;;  %v5406_v61 = vpop.f32.mrf.mxu1 }
 0x22e   :  { %v6332_v55 = vpop.eup %6331  ;;  %v1552_v63 = vsub.f32 0.0, %v1527_v25  ;;  %v1566_v40 = vadd.f32 %v1565_v32, %v1551_v49  ;;  %v2074_v19 = vsub.f32 0.0, %v2048_v6  ;;  %6347 = vlog2.f32 %v1511_v62 }
 0x22f   :  { %v2073_v20 = vsub.f32 0.0, %v2046_v16  ;;  %v2087_v50 = vadd.f32 %v2086_v54, %v2072_v17  ;;  %v2032_v12 = vadd.f32 1e-09, %v2016_v33  ;;  %6349 = vlog2.f32 %v1510_v11  ;;  %v1996_v59 = vpop.f32.mrf.mxu1 }
 0x230   :  { %v6334_v1 = vpop.eup %6333  ;;  %v1567_v35 = vadd.f32 %v1566_v40, %v1552_v63  ;;  %v1533_v8 = vmul.f32 0.6931472, %v6332_v55  ;;  %v2015_v56 = vmul.f32 %v1976_v3, %v1976_v3  ;;  %v1497_v2 = vmul.f32 %v5350_v28, %v5350_v28 }
 0x231   :  { %v6336_v18 = vpop.eup %6335  ;;  %v1531_v43 = vmul.f32 0.6931472, %v6334_v1  ;;  %v2088_v31 = vadd.f32 %v2087_v50, %v2073_v20  ;;  %v2018_v57 = vmul.f32 %v5403_v22, %v5403_v22  ;;  %6351 = vlog2.f32 %v2032_v12 }
 0x232   :  { %v6338_v0 = vpop.eup %6337  ;;  %v2050_v30 = vmul.f32 0.6931472, %v6336_v18  ;;  %v1568_v10 = vadd.f32 %v1567_v35, %v1553_v23  ;;  %v2031_v58 = vadd.f32 1e-09, %v2015_v56  ;;  %v1513_v52 = vadd.f32 1e-09, %v1497_v2 }
 0x233   :  { %v1554_v36 = vsub.f32 0.0, %v1531_v43  ;;  %v2089_v44 = vadd.f32 %v2088_v31, %v2074_v19  ;;  %v6340_v13 = vpop.eup %6339  ;;  %v1555_v46 = vsub.f32 0.0, %v1533_v8  ;;  %v2052_v27 = vmul.f32 0.6931472, %v6338_v0 }
 0x234   :  { %v2075_v5 = vsub.f32 0.0, %v2050_v30  ;;  %6353 = vlog2.f32 %v2031_v58  ;;  %v1496_v51 = vmul.f32 %v1473_v4, %v1473_v4  ;;  %v2034_v45 = vadd.f32 1e-09, %v2018_v57 }
 0x235   :  { %v1569_v9 = vadd.f32 %v1568_v10, %v1554_v36  ;;  %v6342_v47 = vpop.eup %6341  ;;  %6355 = vlog2.f32 %v1513_v52  ;;  %v2017_v22 = vmul.f32 %v1986_v34, %v1986_v34  ;;  %v2020_v42 = vmul.f32 %v5406_v61, %v5406_v61 }
 0x236   :  { %v6344_v3 = vpop.eup %6343  ;;  %v2090_v41 = vadd.f32 %v2089_v44, %v2075_v5  ;;  %v1535_v38 = vmul.f32 0.6931472, %v6342_v47  ;;  %v1512_v37 = vadd.f32 1e-09, %v1496_v51  ;;  %v2019_v7 = vmul.f32 %v1996_v59, %v1996_v59 }
 0x237   :  { %v1570_v26 = vadd.f32 %v1569_v9, %v1555_v46  ;;  %v2054_v29 = vmul.f32 0.6931472, %v6344_v3  ;;  %v2076_v39 = vsub.f32 0.0, %v2052_v27  ;;  %v1537_v48 = vmul.f32 0.6931472, %v6340_v13 }
 0x238   :  { %v1556_v60 = vsub.f32 0.0, %v1535_v38  ;;  %6357 = vlog2.f32 %v1512_v37  ;;  %v2033_v15 = vadd.f32 1e-09, %v2017_v22  ;;  %v2036_v53 = vadd.f32 1e-09, %v2020_v42 }
 0x239   :  { %v6346_v24 = vpop.eup %6345  ;;  %6359 = vlog2.f32 %v2034_v45  ;;  %v2077_v62 = vsub.f32 0.0, %v2054_v29  ;;  %v2091_v14 = vadd.f32 %v2090_v41, %v2076_v39  ;;  %v2035_v21 = vadd.f32 1e-09, %v2019_v7 }
 0x23a   :  { %v1571_v6 = vadd.f32 %v1570_v26, %v1556_v60  ;;  %6361 = vlog2.f32 %v2033_v15  ;;  %v1557_v25 = vsub.f32 0.0, %v1537_v48  ;;  %v2056_v33 = vmul.f32 0.6931472, %v6346_v24 }
 0x23b   :  { %v6348_v49 = vpop.eup %6347  ;;  %6363 = vlog2.f32 %v2036_v53  ;;  %v2092_v54 = vadd.f32 %v2091_v14, %v2077_v62 }
 0x23c   :  { %v6350_v32 = vpop.eup %6349  ;;  %6365 = vlog2.f32 %v2035_v21  ;;  %v1572_v16 = vadd.f32 %v1571_v6, %v1557_v25  ;;  %v2078_v23 = vsub.f32 0.0, %v2056_v33  ;;  %v1541_v63 = vmul.f32 0.6931472, %v6348_v49 }
 0x23d   :  { %v1539_v17 = vmul.f32 0.6931472, %v6350_v32 }
 0x23e   :  { %v6352_v55 = vpop.eup %6351  ;;  %v2093_v1 = vadd.f32 %v2092_v54, %v2078_v23  ;;  %v1559_v50 = vsub.f32 0.0, %v1541_v63 }
 0x23f   :  { %v1558_v34 = vsub.f32 0.0, %v1539_v17  ;;  %v2060_v20 = vmul.f32 0.6931472, %v6352_v55 }
 0x241   :  { %v6354_v40 = vpop.eup %6353  ;;  %v1573_v11 = vadd.f32 %v1572_v16, %v1558_v34  ;;  %v2080_v30 = vsub.f32 0.0, %v2060_v20 }
 0x242   :  { %v2058_v28 = vmul.f32 0.6931472, %v6354_v40  ;;  %v6356_v19 = vpop.eup %6355 }
 0x243   :  { %v1545_v0 = vmul.f32 0.6931472, %v6356_v19  ;;  %v1574_v8 = vadd.f32 %v1573_v11, %v1559_v50 }
 0x244   :  { %v2079_v18 = vsub.f32 0.0, %v2058_v28 }
 0x245   :  { %v6358_v35 = vpop.eup %6357  ;;  %v1561_v5 = vsub.f32 0.0, %v1545_v0 }
 0x246   :  { %v6360_v43 = vpop.eup %6359  ;;  %v2094_v12 = vadd.f32 %v2093_v1, %v2079_v18  ;;  %v1543_v31 = vmul.f32 0.6931472, %v6358_v35 }
 0x247   :  { %v6362_v56 = vpop.eup %6361  ;;  %v2064_v10 = vmul.f32 0.6931472, %v6360_v43 }
 0x248   :  { %v1560_v61 = vsub.f32 0.0, %v1543_v31  ;;  %v6364_v36 = vpop.eup %6363  ;;  %v2062_v2 = vmul.f32 0.6931472, %v6362_v56  ;;  %v2095_v57 = vadd.f32 %v2094_v12, %v2080_v30 }
 0x249   :  { %v6366_v4 = vpop.eup %6365  ;;  %v2082_v52 = vsub.f32 0.0, %v2064_v10  ;;  %v2068_v46 = vmul.f32 0.6931472, %v6364_v36 }
 0x24a   :  { %v1575_v44 = vadd.f32 %v1574_v8, %v1560_v61  ;;  %v2081_v58 = vsub.f32 0.0, %v2062_v2  ;;  %v2066_v13 = vmul.f32 0.6931472, %v6366_v4 }
 0x24b   :  { %v2084_v59 = vsub.f32 0.0, %v2068_v46 }
 0x24c   :  { %v1576_v9 = vadd.f32 %v1575_v44, %v1561_v5  ;;  %v2096_v47 = vadd.f32 %v2095_v57, %v2081_v58  ;;  %v2083_v27 = vsub.f32 0.0, %v2066_v13 }
 0x24e   :  { %1577 = vadd.xlane.f32.xlu0 %v1576_v9  ;;  %v2097_v51 = vadd.f32 %v2096_v47, %v2082_v52 }
 0x250   :  { %v2098_v3 = vadd.f32 %v2097_v51, %v2083_v27 }
 0x252   :  { %v2099_v45 = vadd.f32 %v2098_v3, %v2084_v59 }
 0x254   :  { %v5441_v41 = vpop.f32.mrf.mxu0  ;;  %2100 = vadd.xlane.f32.xlu1 %v2099_v45 }
 0x255   :  { %v2529_v38 = vmul.f32 %v5441_v41, %v5441_v41 }
 0x256   :  { %v2449_v26 = vpop.f32.mrf.mxu0 }
 0x257   :  { %v2545_v29 = vadd.f32 1e-09, %v2529_v38  ;;  %v2528_v37 = vmul.f32 %v2449_v26, %v2449_v26 }
 0x258   :  { %v5444_v60 = vpop.f32.mrf.mxu0 }
 0x259   :  { %6367 = vlog2.f32 %v2545_v29  ;;  %v2544_v22 = vadd.f32 1e-09, %v2528_v37  ;;  %v2531_v42 = vmul.f32 %v5444_v60, %v5444_v60  ;;  %v5497_v7 = vpop.f32.mrf.mxu1 }
 0x25a   :  { %v3052_v39 = vmul.f32 %v5497_v7, %v5497_v7  ;;  %v2459_v48 = vpop.f32.mrf.mxu0 }
 0x25b   :  { %6369 = vlog2.f32 %v2544_v22  ;;  %v2547_v24 = vadd.f32 1e-09, %v2531_v42  ;;  %v2530_v15 = vmul.f32 %v2459_v48, %v2459_v48  ;;  %v2972_v53 = vpop.f32.mrf.mxu1 }
 0x25c   :  { %v3068_v6 = vadd.f32 1e-09, %v3052_v39  ;;  %v3051_v62 = vmul.f32 %v2972_v53, %v2972_v53  ;;  %v5447_v14 = vpop.f32.mrf.mxu0 }
 0x25d   :  { %6371 = vlog2.f32 %v2547_v24  ;;  %v2546_v21 = vadd.f32 1e-09, %v2530_v15  ;;  %v2533_v49 = vmul.f32 %v5447_v14, %v5447_v14  ;;  %v5500_v32 = vpop.f32.mrf.mxu1 }
 0x25e   :  { %6373 = vlog2.f32 %v3068_v6  ;;  %v3067_v25 = vadd.f32 1e-09, %v3051_v62  ;;  %v3054_v33 = vmul.f32 %v5500_v32, %v5500_v32  ;;  %v2469_v17 = vpop.f32.mrf.mxu0 }
 0x25f   :  { %6375 = vlog2.f32 %v2546_v21  ;;  %v2549_v54 = vadd.f32 1e-09, %v2533_v49  ;;  %v2532_v16 = vmul.f32 %v2469_v17, %v2469_v17  ;;  %v2982_v34 = vpop.f32.mrf.mxu1 }
 0x260   :  { %6377 = vlog2.f32 %v3067_v25  ;;  %v3070_v55 = vadd.f32 1e-09, %v3054_v33  ;;  %v3053_v23 = vmul.f32 %v2982_v34, %v2982_v34 }
 0x261   :  { %6379 = vlog2.f32 %v2549_v54  ;;  %v2548_v63 = vadd.f32 1e-09, %v2532_v16  ;;  %v5450_v40 = vpop.f32.mrf.mxu0  ;;  %v5503_v11 = vpop.f32.mrf.mxu1 }
 0x262   :  { %6381 = vlog2.f32 %v3070_v55  ;;  %v3069_v28 = vadd.f32 1e-09, %v3053_v23  ;;  %v2535_v1 = vmul.f32 %v5450_v40, %v5450_v40  ;;  %v3056_v19 = vmul.f32 %v5503_v11, %v5503_v11 }
 0x263   :  { %6383 = vlog2.f32 %v2548_v63  ;;  %v2479_v20 = vpop.f32.mrf.mxu0  ;;  %v2992_v50 = vpop.f32.mrf.mxu1 }
 0x264   :  { %6385 = vlog2.f32 %v3069_v28  ;;  %v2551_v18 = vadd.f32 1e-09, %v2535_v1  ;;  %v3072_v35 = vadd.f32 1e-09, %v3056_v19  ;;  %v2534_v43 = vmul.f32 %v2479_v20, %v2479_v20 }
 0x265   :  { %v3055_v12 = vmul.f32 %v2992_v50, %v2992_v50 }
 0x266   :  { %v5453_v0 = vpop.f32.mrf.mxu0  ;;  %v5506_v31 = vpop.f32.mrf.mxu1  ;;  %6387 = vlog2.f32 %v2551_v18  ;;  %v2550_v30 = vadd.f32 1e-09, %v2534_v43 }
 0x267   :  { %v6368_v8 = vpop.eup %6367  ;;  %v2537_v56 = vmul.f32 %v5453_v0, %v5453_v0  ;;  %v3058_v61 = vmul.f32 %v5506_v31, %v5506_v31  ;;  %6389 = vlog2.f32 %v3072_v35  ;;  %v3071_v10 = vadd.f32 1e-09, %v3055_v12 }
 0x268   :  { %v2563_v36 = vmul.f32 0.6931472, %v6368_v8  ;;  %v2489_v2 = vpop.f32.mrf.mxu0  ;;  %v3002_v57 = vpop.f32.mrf.mxu1  ;;  %6391 = vlog2.f32 %v2550_v30 }
 0x269   :  { %v6370_v4 = vpop.eup %6369  ;;  %v2553_v5 = vadd.f32 1e-09, %v2537_v56  ;;  %v3074_v44 = vadd.f32 1e-09, %v3058_v61  ;;  %v2536_v58 = vmul.f32 %v2489_v2, %v2489_v2  ;;  %6393 = vlog2.f32 %v3071_v10 }
 0x26a   :  { %v2593_v13 = vsub.f32 0.0, %v2563_v36  ;;  %v2561_v9 = vmul.f32 0.6931472, %v6370_v4  ;;  %v3057_v52 = vmul.f32 %v3002_v57, %v3002_v57  ;;  %v5456_v47 = vpop.f32.mrf.mxu0  ;;  %v5509_v46 = vpop.f32.mrf.mxu1 }
 0x26b   :  { %v6372_v27 = vpop.eup %6371  ;;  %6395 = vlog2.f32 %v2553_v5  ;;  %v2552_v51 = vadd.f32 1e-09, %v2536_v58  ;;  %v2539_v59 = vmul.f32 %v5456_v47, %v5456_v47  ;;  %v3060_v3 = vmul.f32 %v5509_v46, %v5509_v46 }
 0x26c   :  { %v6374_v41 = vpop.eup %6373  ;;  %v2592_v38 = vsub.f32 0.0, %v2561_v9  ;;  %v2567_v45 = vmul.f32 0.6931472, %v6372_v27  ;;  %6397 = vlog2.f32 %v3074_v44  ;;  %v3073_v26 = vadd.f32 1e-09, %v3057_v52  ;;  %v2499_v29 = vpop.f32.mrf.mxu0 }
 0x26d   :  { %v3012_v37 = vpop.f32.mrf.mxu1  ;;  %v6376_v60 = vpop.eup %6375  ;;  %v3086_v22 = vmul.f32 0.6931472, %v6374_v41  ;;  %6399 = vlog2.f32 %v2552_v51  ;;  %v2555_v42 = vadd.f32 1e-09, %v2539_v59  ;;  %v3076_v7 = vadd.f32 1e-09, %v3060_v3 }
 0x26e   :  { %v6378_v39 = vpop.eup %6377  ;;  %v2608_v48 = vadd.f32 %v2593_v13, %v2592_v38  ;;  %v2565_v24 = vmul.f32 0.6931472, %v6376_v60  ;;  %6401 = vlog2.f32 %v3073_v26  ;;  %v5459_v15 = vpop.f32.mrf.mxu0  ;;  %v2595_v62 = vsub.f32 0.0, %v2567_v45 }
 0x26f   :  { %v5512_v53 = vpop.f32.mrf.mxu1  ;;  %v6380_v6 = vpop.eup %6379  ;;  %v3084_v14 = vmul.f32 0.6931472, %v6378_v39  ;;  %6403 = vlog2.f32 %v2555_v42  ;;  %v2538_v21 = vmul.f32 %v2499_v29, %v2499_v29  ;;  %v3116_v32 = vsub.f32 0.0, %v3086_v22 }
 0x270   :  { %v6382_v49 = vpop.eup %6381  ;;  %v2594_v25 = vsub.f32 0.0, %v2565_v24  ;;  %v2571_v33 = vmul.f32 0.6931472, %v6380_v6  ;;  %v3059_v17 = vmul.f32 %v3012_v37, %v3012_v37  ;;  %6405 = vlog2.f32 %v3076_v7  ;;  %v2509_v19 = vpop.f32.mrf.mxu0 }
 0x271   :  { %v3022_v54 = vpop.f32.mrf.mxu1  ;;  %v6384_v16 = vpop.eup %6383  ;;  %v3115_v34 = vsub.f32 0.0, %v3084_v14  ;;  %v2554_v55 = vadd.f32 1e-09, %v2538_v21  ;;  %v2541_v23 = vmul.f32 %v5459_v15, %v5459_v15  ;;  %v3090_v11 = vmul.f32 0.6931472, %v6382_v49 }
 0x272   :  { %v6386_v63 = vpop.eup %6385  ;;  %v2609_v40 = vadd.f32 %v2608_v48, %v2594_v25  ;;  %v2569_v28 = vmul.f32 0.6931472, %v6384_v16  ;;  %v3075_v1 = vadd.f32 1e-09, %v3059_v17  ;;  %v3062_v56 = vmul.f32 %v5512_v53, %v5512_v53  ;;  %v5462_v51 = vpop.f32.mrf.mxu0 }
 0x273   :  { %v3131_v20 = vadd.f32 %v3116_v32, %v3115_v34  ;;  %v3088_v50 = vmul.f32 0.6931472, %v6386_v63  ;;  %6407 = vlog2.f32 %v2554_v55  ;;  %v6388_v18 = vpop.eup %6387  ;;  %v2557_v12 = vadd.f32 1e-09, %v2541_v23  ;;  %v5515_v0 = vpop.f32.mrf.mxu1 }
 0x274   :  { %v2596_v35 = vsub.f32 0.0, %v2569_v28  ;;  %v2610_v43 = vadd.f32 %v2609_v40, %v2595_v62  ;;  %6409 = vlog2.f32 %v3075_v1  ;;  %v6390_v31 = vpop.eup %6389  ;;  %v2575_v30 = vmul.f32 0.6931472, %v6388_v18  ;;  %v2519_v62 = vpop.f32.mrf.mxu0 }
 0x275   :  { %v3117_v8 = vsub.f32 0.0, %v3088_v50  ;;  %v2540_v61 = vmul.f32 %v2509_v19, %v2509_v19  ;;  %v6392_v36 = vpop.eup %6391  ;;  %v2597_v10 = vsub.f32 0.0, %v2571_v33  ;;  %v3118_v2 = vsub.f32 0.0, %v3090_v11  ;;  %v3032_v59 = vpop.f32.mrf.mxu1 }
 0x276   :  { %v2611_v57 = vadd.f32 %v2610_v43, %v2596_v35  ;;  %v3061_v4 = vmul.f32 %v3022_v54, %v3022_v54  ;;  %v6394_v5 = vpop.eup %6393  ;;  %v3094_v58 = vmul.f32 0.6931472, %v6390_v31  ;;  %v2573_v13 = vmul.f32 0.6931472, %v6392_v36 }
 0x277   :  { %v3132_v44 = vadd.f32 %v3131_v20, %v3117_v8  ;;  %v3078_v9 = vadd.f32 1e-09, %v3062_v56  ;;  %v3092_v46 = vmul.f32 0.6931472, %v6394_v5  ;;  %6411 = vlog2.f32 %v2557_v12  ;;  %v5518_v14 = vpop.f32.mrf.mxu1 }
 0x278   :  { %v6396_v52 = vpop.eup %6395  ;;  %v2612_v47 = vadd.f32 %v2611_v57, %v2597_v10  ;;  %v2556_v27 = vadd.f32 1e-09, %v2540_v61  ;;  %v2599_v41 = vsub.f32 0.0, %v2575_v30  ;;  %v2598_v38 = vsub.f32 0.0, %v2573_v13 }
 0x279   :  { %v6398_v3 = vpop.eup %6397  ;;  %v3133_v45 = vadd.f32 %v3132_v44, %v3118_v2  ;;  %6413 = vlog2.f32 %v3078_v9  ;;  %v3119_v29 = vsub.f32 0.0, %v3092_v46  ;;  %v2579_v37 = vmul.f32 0.6931472, %v6396_v52  ;;  %v3042_v19 = vpop.f32.mrf.mxu1 }
 0x27a   :  { %v6400_v26 = vpop.eup %6399  ;;  %6415 = vlog2.f32 %v2556_v27  ;;  %v3077_v60 = vadd.f32 1e-09, %v3061_v4  ;;  %v2613_v42 = vadd.f32 %v2612_v47, %v2598_v38  ;;  %v3098_v7 = vmul.f32 0.6931472, %v6398_v3 }
 0x27b   :  { %v6402_v22 = vpop.eup %6401  ;;  %v2577_v39 = vmul.f32 0.6931472, %v6400_v26  ;;  %v2543_v48 = vmul.f32 %v5462_v51, %v5462_v51  ;;  %v3120_v15 = vsub.f32 0.0, %v3094_v58  ;;  %v3134_v53 = vadd.f32 %v3133_v45, %v3119_v29 }
 0x27c   :  { %v6404_v24 = vpop.eup %6403  ;;  %v3096_v6 = vmul.f32 0.6931472, %v6402_v22  ;;  %6417 = vlog2.f32 %v3077_v60  ;;  %v2614_v49 = vadd.f32 %v2613_v42, %v2599_v41  ;;  %v2601_v33 = vsub.f32 0.0, %v2579_v37 }
 0x27d   :  { %v2600_v21 = vsub.f32 0.0, %v2577_v39  ;;  %v2559_v32 = vadd.f32 1e-09, %v2543_v48  ;;  %v6406_v25 = vpop.eup %6405  ;;  %v3135_v54 = vadd.f32 %v3134_v53, %v3120_v15  ;;  %v3064_v16 = vmul.f32 %v5515_v0, %v5515_v0 }
 0x27e   :  { %v3121_v17 = vsub.f32 0.0, %v3096_v6  ;;  %v3122_v34 = vsub.f32 0.0, %v3098_v7  ;;  %v2583_v23 = vmul.f32 0.6931472, %v6404_v24  ;;  %v2542_v63 = vmul.f32 %v2519_v62, %v2519_v62 }
 0x27f   :  { %v2615_v55 = vadd.f32 %v2614_v49, %v2600_v21  ;;  %6419 = vlog2.f32 %v2559_v32  ;;  %v3080_v28 = vadd.f32 1e-09, %v3064_v16  ;;  %v3063_v1 = vmul.f32 %v3032_v59, %v3032_v59 }
 0x280   :  { %v6408_v40 = vpop.eup %6407  ;;  %v3136_v11 = vadd.f32 %v3135_v54, %v3121_v17  ;;  %v2558_v35 = vadd.f32 1e-09, %v2542_v63  ;;  %v3066_v43 = vmul.f32 %v5518_v14, %v5518_v14  ;;  %v3065_v56 = vmul.f32 %v3042_v19, %v3042_v19 }
 0x281   :  { %v6410_v20 = vpop.eup %6409  ;;  %v2581_v50 = vmul.f32 0.6931472, %v6408_v40  ;;  %v2616_v18 = vadd.f32 %v2615_v55, %v2601_v33  ;;  %6421 = vlog2.f32 %v3080_v28  ;;  %v3079_v8 = vadd.f32 1e-09, %v3063_v1 }
 0x282   :  { %v3100_v12 = vmul.f32 0.6931472, %v6410_v20  ;;  %v3137_v31 = vadd.f32 %v3136_v11, %v3122_v34  ;;  %6423 = vlog2.f32 %v2558_v35  ;;  %v3082_v30 = vadd.f32 1e-09, %v3066_v43 }
 0x283   :  { %v2602_v0 = vsub.f32 0.0, %v2581_v50  ;;  %v3102_v61 = vmul.f32 0.6931472, %v6406_v25  ;;  %6425 = vlog2.f32 %v3079_v8  ;;  %v3081_v57 = vadd.f32 1e-09, %v3065_v56 }
 0x284   :  { %v3123_v36 = vsub.f32 0.0, %v3100_v12  ;;  %v6412_v10 = vpop.eup %6411  ;;  %6427 = vlog2.f32 %v3082_v30  ;;  %v2603_v58 = vsub.f32 0.0, %v2583_v23 }
 0x285   :  { %v2617_v2 = vadd.f32 %v2616_v18, %v2602_v0  ;;  %6429 = vlog2.f32 %v3081_v57  ;;  %v3124_v13 = vsub.f32 0.0, %v3102_v61  ;;  %v2587_v59 = vmul.f32 0.6931472, %v6412_v10 }
 0x286   :  { %v6414_v4 = vpop.eup %6413  ;;  %v3138_v5 = vadd.f32 %v3137_v31, %v3123_v36 }
 0x287   :  { %v6416_v44 = vpop.eup %6415  ;;  %v2618_v47 = vadd.f32 %v2617_v2, %v2603_v58  ;;  %v3106_v3 = vmul.f32 0.6931472, %v6414_v4  ;;  %v2605_v37 = vsub.f32 0.0, %v2587_v59 }
 0x288   :  { %v2585_v9 = vmul.f32 0.6931472, %v6416_v44  ;;  %v3139_v51 = vadd.f32 %v3138_v5, %v3124_v13 }
 0x289   :  { %v6418_v52 = vpop.eup %6417  ;;  %v3126_v22 = vsub.f32 0.0, %v3106_v3 }
 0x28a   :  { %v2604_v46 = vsub.f32 0.0, %v2585_v9  ;;  %v3104_v27 = vmul.f32 0.6931472, %v6418_v52 }
 0x28c   :  { %v3125_v41 = vsub.f32 0.0, %v3104_v27  ;;  %v6420_v38 = vpop.eup %6419  ;;  %v2619_v45 = vadd.f32 %v2618_v47, %v2604_v46 }
 0x28d   :  { %v2591_v7 = vmul.f32 0.6931472, %v6420_v38 }
 0x28e   :  { %v3140_v26 = vadd.f32 %v3139_v51, %v3125_v41  ;;  %v6422_v29 = vpop.eup %6421  ;;  %v2620_v48 = vadd.f32 %v2619_v45, %v2605_v37 }
 0x28f   :  { %v6424_v60 = vpop.eup %6423  ;;  %v3110_v24 = vmul.f32 0.6931472, %v6422_v29  ;;  %v2607_v49 = vsub.f32 0.0, %v2591_v7 }
 0x290   :  { %v6426_v42 = vpop.eup %6425  ;;  %v2589_v39 = vmul.f32 0.6931472, %v6424_v60  ;;  %v3141_v53 = vadd.f32 %v3140_v26, %v3126_v22 }
 0x291   :  { %v3108_v15 = vmul.f32 0.6931472, %v6426_v42  ;;  %v6428_v6 = vpop.eup %6427  ;;  %v3128_v33 = vsub.f32 0.0, %v3110_v24 }
 0x292   :  { %v2606_v62 = vsub.f32 0.0, %v2589_v39  ;;  %v6430_v14 = vpop.eup %6429  ;;  %v3114_v54 = vmul.f32 0.6931472, %v6428_v6 }
 0x293   :  { %v3127_v21 = vsub.f32 0.0, %v3108_v15  ;;  %v3112_v32 = vmul.f32 0.6931472, %v6430_v14 }
 0x294   :  { %v2621_v25 = vadd.f32 %v2620_v48, %v2606_v62  ;;  %v3130_v40 = vsub.f32 0.0, %v3114_v54 }
 0x295   :  { %v3142_v17 = vadd.f32 %v3141_v53, %v3127_v21  ;;  %v3129_v16 = vsub.f32 0.0, %v3112_v32 }
 0x296   :  { %v2622_v34 = vadd.f32 %v2621_v25, %v2607_v49  ;;  %v532_v55 = vpop.xlane.xlu0 %531 }
 0x297   :  { %v3143_v23 = vadd.f32 %v3142_v17, %v3128_v33  ;;  %v533_v63 = vrot.slane %v532_v55, 4 }
 0x298   :  { %2623 = vadd.xlane.f32.xlu0 %v2622_v34 }
 0x299   :  { %v3144_v11 = vadd.f32 %v3143_v23, %v3129_v16  ;;  %v534_v28 = vadd.f32 %v533_v63, %v532_v55 }
 0x29b   :  { %v5553_v1 = vpop.f32.mrf.mxu0  ;;  %v3145_v19 = vadd.f32 %v3144_v11, %v3130_v40  ;;  %v535_v50 = vrot.slane %v534_v28, 2 }
 0x29c   :  { %v3575_v20 = vmul.f32 %v5553_v1, %v5553_v1 }
 0x29d   :  { %v3495_v18 = vpop.f32.mrf.mxu0  ;;  %3146 = vadd.xlane.f32.xlu1 %v3145_v19  ;;  %v5609_v12 = vpop.f32.mrf.mxu1  ;;  %v536_v31 = vadd.f32 %v535_v50, %v534_v28 }
 0x29e   :  { %v3591_v35 = vadd.f32 1e-09, %v3575_v20  ;;  %v3574_v43 = vmul.f32 %v3495_v18, %v3495_v18  ;;  %v4098_v0 = vmul.f32 %v5609_v12, %v5609_v12  ;;  %v1055_v36 = vpop.xlane.xlu1 %1054 }
 0x29f   :  { %v5556_v8 = vpop.f32.mrf.mxu0  ;;  %v4018_v61 = vpop.f32.mrf.mxu1  ;;  %v537_v10 = vrot.slane %v536_v31, 1  ;;  %v1056_v4 = vrot.slane %v1055_v36, 4 }
 0x2a0   :  { %6431 = vlog2.f32 %v3591_v35  ;;  %v3590_v30 = vadd.f32 1e-09, %v3574_v43  ;;  %v3577_v56 = vmul.f32 %v5556_v8, %v5556_v8  ;;  %v4114_v2 = vadd.f32 1e-09, %v4098_v0 }
 0x2a1   :  { %v4097_v57 = vmul.f32 %v4018_v61, %v4018_v61  ;;  %v3505_v5 = vpop.f32.mrf.mxu0  ;;  %v5612_v13 = vpop.f32.mrf.mxu1  ;;  %v538_v9 = vadd.f32 %v537_v10, %v536_v31  ;;  %v1057_v47 = vadd.f32 %v1056_v4, %v1055_v36 }
 0x2a2   :  { %6433 = vlog2.f32 %v3590_v30  ;;  %v3593_v44 = vadd.f32 1e-09, %v3577_v56  ;;  %v3576_v58 = vmul.f32 %v3505_v5, %v3505_v5  ;;  %v4100_v27 = vmul.f32 %v5612_v13, %v5612_v13 }
 0x2a3   :  { %6435 = vlog2.f32 %v4114_v2  ;;  %v4113_v52 = vadd.f32 1e-09, %v4097_v57  ;;  %v5559_v46 = vpop.f32.mrf.mxu0  ;;  %v4028_v3 = vpop.f32.mrf.mxu1  ;;  %5675 = vpush %v538_v9  ;;  %v1058_v41 = vrot.slane %v1057_v47, 2 }
 0x2a4   :  { %6437 = vlog2.f32 %v3593_v44  ;;  %v3592_v51 = vadd.f32 1e-09, %v3576_v58  ;;  %v3579_v59 = vmul.f32 %v5559_v46, %v5559_v46  ;;  %v4116_v38 = vadd.f32 1e-09, %v4100_v27 }
 0x2a5   :  { %6439 = vlog2.f32 %v4113_v52  ;;  %v3515_v45 = vpop.f32.mrf.mxu0  ;;  %v4099_v26 = vmul.f32 %v4028_v3, %v4028_v3  ;;  %v5615_v60 = vpop.f32.mrf.mxu1  ;;  %v1059_v39 = vadd.f32 %v1058_v41, %v1057_v47 }
 0x2a6   :  { %6441 = vlog2.f32 %v3592_v51  ;;  %v3595_v29 = vadd.f32 1e-09, %v3579_v59  ;;  %v3578_v37 = vmul.f32 %v3515_v45, %v3515_v45  ;;  %v4102_v7 = vmul.f32 %v5615_v60, %v5615_v60 }
 0x2a7   :  { %6443 = vlog2.f32 %v4116_v38  ;;  %v4115_v22 = vadd.f32 1e-09, %v4099_v26  ;;  %v5562_v42 = vpop.f32.mrf.mxu0  ;;  %v4038_v15 = vpop.f32.mrf.mxu1  ;;  %v1060_v14 = vrot.slane %v1059_v39, 1 }
 0x2a8   :  { %6445 = vlog2.f32 %v3595_v29  ;;  %v3594_v48 = vadd.f32 1e-09, %v3578_v37  ;;  %v3581_v24 = vmul.f32 %v5562_v42, %v5562_v42  ;;  %v4118_v53 = vadd.f32 1e-09, %v4102_v7 }
 0x2a9   :  { %6447 = vlog2.f32 %v4115_v22  ;;  %v3525_v6 = vpop.f32.mrf.mxu0  ;;  %v4101_v62 = vmul.f32 %v4038_v15, %v4038_v15  ;;  %v5618_v32 = vpop.f32.mrf.mxu1  ;;  %v1061_v54 = vadd.f32 %v1060_v14, %v1059_v39 }
 0x2aa   :  { %6449 = vlog2.f32 %v3594_v48  ;;  %v3597_v21 = vadd.f32 1e-09, %v3581_v24  ;;  %v3580_v49 = vmul.f32 %v3525_v6, %v3525_v6  ;;  %v4104_v17 = vmul.f32 %v5618_v32, %v5618_v32 }
 0x2ab   :  { %6451 = vlog2.f32 %v4118_v53  ;;  %v4117_v25 = vadd.f32 1e-09, %v4101_v62  ;;  %v5565_v33 = vpop.f32.mrf.mxu0  ;;  %v4048_v55 = vpop.f32.mrf.mxu1  ;;  %5677 = vpush %v1061_v54 }
 0x2ac   :  { %6453 = vlog2.f32 %v3597_v21  ;;  %v3596_v16 = vadd.f32 1e-09, %v3580_v49  ;;  %v3583_v34 = vmul.f32 %v5565_v33, %v5565_v33  ;;  %v4120_v63 = vadd.f32 1e-09, %v4104_v17 }
 0x2ad   :  { %v6432_v23 = vpop.eup %6431  ;;  %6455 = vlog2.f32 %v4117_v25  ;;  %v3535_v40 = vpop.f32.mrf.mxu0  ;;  %v4103_v11 = vmul.f32 %v4048_v55, %v4048_v55 }
 0x2ae   :  { %v3609_v28 = vmul.f32 0.6931472, %v6432_v23  ;;  %6457 = vlog2.f32 %v3596_v16  ;;  %v3599_v1 = vadd.f32 1e-09, %v3583_v34  ;;  %v3582_v19 = vmul.f32 %v3535_v40, %v3535_v40  ;;  %v5621_v20 = vpop.f32.mrf.mxu1 }
 0x2af   :  { %v6434_v50 = vpop.eup %6433  ;;  %6459 = vlog2.f32 %v4120_v63  ;;  %v4119_v18 = vadd.f32 1e-09, %v4103_v11  ;;  %v5568_v35 = vpop.f32.mrf.mxu0  ;;  %v4106_v43 = vmul.f32 %v5621_v20, %v5621_v20 }
 0x2b0   :  { %v6436_v12 = vpop.eup %6435  ;;  %v3607_v31 = vmul.f32 0.6931472, %v6434_v50  ;;  %6461 = vlog2.f32 %v3599_v1  ;;  %v3598_v8 = vadd.f32 1e-09, %v3582_v19  ;;  %v4058_v0 = vpop.f32.mrf.mxu1  ;;  %v3639_v56 = vsub.f32 0.0, %v3609_v28 }
 0x2b1   :  { %v6438_v30 = vpop.eup %6437  ;;  %v4132_v61 = vmul.f32 0.6931472, %v6436_v12  ;;  %6463 = vlog2.f32 %v4119_v18  ;;  %v3585_v36 = vmul.f32 %v5568_v35, %v5568_v35  ;;  %v3545_v10 = vpop.f32.mrf.mxu0  ;;  %v4122_v52 = vadd.f32 1e-09, %v4106_v43 }
 0x2b2   :  { %v6440_v2 = vpop.eup %6439  ;;  %v3638_v57 = vsub.f32 0.0, %v3607_v31  ;;  %v3613_v4 = vmul.f32 0.6931472, %v6438_v30  ;;  %6465 = vlog2.f32 %v3598_v8  ;;  %v3584_v5 = vmul.f32 %v3545_v10, %v3545_v10  ;;  %v5624_v44 = vpop.f32.mrf.mxu1 }
 0x2b3   :  { %v6442_v58 = vpop.eup %6441  ;;  %v4130_v13 = vmul.f32 0.6931472, %v6440_v2  ;;  %v3601_v9 = vadd.f32 1e-09, %v3585_v36  ;;  %v5571_v47 = vpop.f32.mrf.mxu0  ;;  %v4162_v51 = vsub.f32 0.0, %v4132_v61  ;;  %v4105_v29 = vmul.f32 %v4058_v0, %v4058_v0 }
 0x2b4   :  { %v6444_v46 = vpop.eup %6443  ;;  %v3654_v27 = vadd.f32 %v3639_v56, %v3638_v57  ;;  %v3611_v59 = vmul.f32 0.6931472, %v6442_v58  ;;  %v3600_v3 = vadd.f32 1e-09, %v3584_v5  ;;  %v4068_v41 = vpop.f32.mrf.mxu1  ;;  %v3641_v45 = vsub.f32 0.0, %v3613_v4 }
 0x2b5   :  { %v6446_v38 = vpop.eup %6445  ;;  %v4161_v26 = vsub.f32 0.0, %v4130_v13  ;;  %6467 = vlog2.f32 %v3601_v9  ;;  %v3555_v37 = vpop.f32.mrf.mxu0  ;;  %v4136_v42 = vmul.f32 0.6931472, %v6444_v46  ;;  %v3587_v7 = vmul.f32 %v5571_v47, %v5571_v47 }
 0x2b6   :  { %v6448_v60 = vpop.eup %6447  ;;  %v3640_v22 = vsub.f32 0.0, %v3611_v59  ;;  %6469 = vlog2.f32 %v3600_v3  ;;  %v10558_v39 = vpop.f32.mrf.mxu1  ;;  %v3617_v24 = vmul.f32 0.6931472, %v6446_v38  ;;  %v4121_v53 = vadd.f32 1e-09, %v4105_v29 }
 0x2b7   :  { %v6450_v48 = vpop.eup %6449  ;;  %v4134_v15 = vmul.f32 0.6931472, %v6448_v60  ;;  %v5574_v6 = vpop.f32.mrf.mxu0  ;;  %v4177_v14 = vadd.f32 %v4162_v51, %v4161_v26  ;;  %v3603_v32 = vadd.f32 1e-09, %v3587_v7  ;;  %v4108_v16 = vmul.f32 %v5624_v44, %v5624_v44 }
 0x2b8   :  { %v6452_v62 = vpop.eup %6451  ;;  %v3655_v21 = vadd.f32 %v3654_v27, %v3640_v22  ;;  %v3615_v49 = vmul.f32 0.6931472, %v6450_v48  ;;  %v10560_v25 = vpop.f32.mrf.mxu1  ;;  %6471 = vlog2.f32 %v4121_v53  ;;  %v3643_v28 = vsub.f32 0.0, %v3617_v24 }
 0x2b9   :  { %v6454_v33 = vpop.eup %6453  ;;  %v4163_v17 = vsub.f32 0.0, %v4134_v15  ;;  %v4140_v54 = vmul.f32 0.6931472, %v6452_v62  ;;  %6473 = vlog2.f32 %v4122_v52  ;;  %v3565_v40 = vpop.f32.mrf.mxu0  ;;  %v4164_v1 = vsub.f32 0.0, %v4136_v42 }
 0x2ba   :  { %v6456_v34 = vpop.eup %6455  ;;  %v3642_v55 = vsub.f32 0.0, %v3615_v49  ;;  %v3656_v23 = vadd.f32 %v3655_v21, %v3641_v45  ;;  %v3621_v63 = vmul.f32 0.6931472, %v6454_v33  ;;  %6475 = vlog2.f32 %v3603_v32  ;;  %v5630_v12 = vpop.f32.mrf.mxu1 }
 0x2bb   :  { %v6458_v11 = vpop.eup %6457  ;;  %v4178_v19 = vadd.f32 %v4177_v14, %v4163_v17  ;;  %v4138_v20 = vmul.f32 0.6931472, %v6456_v34  ;;  %v3586_v43 = vmul.f32 %v3555_v37, %v3555_v37  ;;  %v4166_v8 = vsub.f32 0.0, %v4140_v54  ;;  %v5649_v4 = vpop.f32.mrf.mxu0 }
 0x2bc   :  { %v6460_v50 = vpop.eup %6459  ;;  %v3657_v18 = vadd.f32 %v3656_v23, %v3642_v55  ;;  %v3619_v35 = vmul.f32 0.6931472, %v6458_v11  ;;  %v4124_v56 = vadd.f32 1e-09, %v4108_v16  ;;  %v3645_v36 = vsub.f32 0.0, %v3621_v63  ;;  %v4088_v27 = vpop.f32.mrf.mxu1 }
 0x2bd   :  { %v6462_v31 = vpop.eup %6461  ;;  %v4165_v0 = vsub.f32 0.0, %v4138_v20  ;;  %v4179_v30 = vadd.f32 %v4178_v19, %v4164_v1  ;;  %v3602_v57 = vadd.f32 1e-09, %v3586_v43  ;;  %v4107_v9 = vmul.f32 %v4068_v41, %v4068_v41  ;;  %v4409_v60 = vpop.f32.mrf.mxu0 }
 0x2be   :  { %v6464_v61 = vpop.eup %6463  ;;  %v3644_v10 = vsub.f32 0.0, %v3619_v35  ;;  %v3658_v2 = vadd.f32 %v3657_v18, %v3643_v28  ;;  %v3625_v58 = vmul.f32 0.6931472, %v6462_v31  ;;  %v4144_v47 = vmul.f32 0.6931472, %v6460_v50  ;;  %v5655_v53 = vpop.f32.mrf.mxu1  ;;  %v4456_v50 = vld [vmem:[%s10606_s2] sm:$0xff] }
 0x2bf   :  { %v6466_v5 = vpop.eup %6465  ;;  %v4180_v44 = vadd.f32 %v4179_v30, %v4165_v0  ;;  %v4142_v13 = vmul.f32 0.6931472, %v6464_v61  ;;  %6477 = vlog2.f32 %v3602_v57  ;;  %v4123_v3 = vadd.f32 1e-09, %v4107_v9  ;;  %v5652_v17 = vpop.f32.mrf.mxu0  ;;  %v4458_v61 = vld [vmem:[%s10606_s2 + $0x10] sm:$0xff]  ;;  %v4460_v9 = vld [vmem:[%s10606_s2 + $0x20] sm:$0xff] }
 0x2c0   :  { %v3659_v52 = vadd.f32 %v3658_v2, %v3644_v10  ;;  %v3623_v46 = vmul.f32 0.6931472, %v6466_v5  ;;  %6479 = vlog2.f32 %v4124_v56  ;;  %v3589_v29 = vmul.f32 %v5574_v6, %v5574_v6  ;;  %v4459_v56 = vld [vmem:[%s10606_s2 + $0x18] sm:$0xff] }
 0x2c1   :  { %v4167_v51 = vsub.f32 0.0, %v4142_v13  ;;  %v4181_v59 = vadd.f32 %v4180_v44, %v4166_v8  ;;  %v4110_v37 = vmul.f32 %v10558_v39, %v10558_v39  ;;  %v3647_v42 = vsub.f32 0.0, %v3625_v58  ;;  %v4419_v43 = vpop.f32.mrf.mxu0 }
 0x2c2   :  { %v6468_v38 = vpop.eup %6467  ;;  %v3646_v45 = vsub.f32 0.0, %v3623_v46  ;;  %v3660_v26 = vadd.f32 %v3659_v52, %v3645_v36  ;;  %6481 = vlog2.f32 %v4123_v3  ;;  %v3605_v24 = vadd.f32 1e-09, %v3589_v29 }
 0x2c3   :  { %v6470_v22 = vpop.eup %6469  ;;  %v4182_v41 = vadd.f32 %v4181_v59, %v4167_v51  ;;  %v4126_v15 = vadd.f32 1e-09, %v4110_v37  ;;  %v4168_v62 = vsub.f32 0.0, %v4144_v47  ;;  %v3588_v14 = vmul.f32 %v3565_v40, %v3565_v40  ;;  %v4457_v40 = vld [vmem:[%s10606_s2 + $0x8] sm:$0xff] }
 0x2c4   :  { %v3661_v7 = vadd.f32 %v3660_v26, %v3646_v45  ;;  %v3627_v48 = vmul.f32 0.6931472, %v6470_v22  ;;  %v4109_v21 = vmul.f32 %v10560_v25, %v10560_v25  ;;  %v3629_v6 = vmul.f32 0.6931472, %v6468_v38  ;;  %v4429_v25 = vpop.f32.mrf.mxu1 }
 0x2c5   :  { %v6472_v49 = vpop.eup %6471  ;;  %v4112_v39 = vmul.f32 %v5630_v12, %v5630_v12  ;;  %6483 = vlog2.f32 %v3605_v24  ;;  %v3604_v34 = vadd.f32 1e-09, %v3588_v14  ;;  %v4183_v23 = vadd.f32 %v4182_v41, %v4168_v62 }
 0x2c6   :  { %v3648_v32 = vsub.f32 0.0, %v3627_v48  ;;  %v3662_v33 = vadd.f32 %v3661_v7, %v3647_v42  ;;  %v6474_v54 = vpop.eup %6473  ;;  %v4146_v16 = vmul.f32 0.6931472, %v6472_v49  ;;  %v4125_v55 = vadd.f32 1e-09, %v4109_v21  ;;  %v5658_v36 = vpop.f32.mrf.mxu1  ;;  %v4462_v49 = vld [vmem:[%s10606_s2 + $0x30] sm:$0xff] }
 0x2c7   :  { %6485 = vlog2.f32 %v4126_v15  ;;  %v4128_v63 = vadd.f32 1e-09, %v4112_v39  ;;  %v4449_v11 = vmul.f32 %v5649_v4, %v5649_v4  ;;  %v6476_v28 = vpop.eup %6475  ;;  %v4111_v19 = vmul.f32 %v4088_v27, %v4088_v27 }
 0x2c8   :  { %v4169_v1 = vsub.f32 0.0, %v4146_v16  ;;  %6487 = vlog2.f32 %v3604_v34  ;;  %v4448_v20 = vmul.f32 %v4409_v60, %v4409_v60  ;;  %v4148_v18 = vmul.f32 0.6931472, %v6474_v54  ;;  %v4439_v26 = vpop.f32.mrf.mxu1  ;;  %v4461_v60 = vld [vmem:[%s10606_s2 + $0x28] sm:$0xff] }
 0x2c9   :  { %v3663_v35 = vadd.f32 %v3662_v33, %v3648_v32  ;;  %6489 = vlog2.f32 %v4125_v55  ;;  %v4465_v12 = vmul.f32 %v4457_v40, %v4449_v11  ;;  %v4127_v31 = vadd.f32 1e-09, %v4111_v19  ;;  %v4463_v11 = vld [vmem:[%s10606_s2 + $0x38] sm:$0xff] }
 0x2ca   :  { %v3649_v8 = vsub.f32 0.0, %v3629_v6  ;;  %6491 = vlog2.f32 %v4128_v63  ;;  %v4464_v0 = vmul.f32 %v4456_v50, %v4448_v20  ;;  %v4451_v30 = vmul.f32 %v5652_v17, %v5652_v17 }
 0x2cb   :  { %v4184_v2 = vadd.f32 %v4183_v23, %v4169_v1  ;;  %6493 = vlog2.f32 %v4127_v31  ;;  %v4450_v57 = vmul.f32 %v4419_v43, %v4419_v43  ;;  %v4170_v5 = vsub.f32 0.0, %v4148_v18 }
 0x2cc   :  { %v6478_v10 = vpop.eup %6477  ;;  %v3664_v58 = vadd.f32 %v3663_v35, %v3649_v8  ;;  %v4473_v13 = vsel %vm4472_vm0, %v4464_v0, 0.0  ;;  %v4474_v52 = vsel %vm4472_vm0, %v4465_v12, 0.0  ;;  %v4467_v47 = vmul.f32 %v4459_v56, %v4451_v30 }
 0x2cd   :  { %v6480_v4 = vpop.eup %6479  ;;  %v3631_v44 = vmul.f32 0.6931472, %v6478_v10  ;;  %v4466_v46 = vmul.f32 %v4458_v61, %v4450_v57  ;;  %v4452_v27 = vmul.f32 %v4429_v25, %v4429_v25  ;;  %v3633_v59 = vmul.f32 0.6931472, %v6476_v28 }
 0x2ce   :  { %v4475_v38 = vadd.f32 %v4474_v52, %v4473_v13  ;;  %v4453_v45 = vmul.f32 %v5655_v53, %v5655_v53  ;;  %v4185_v37 = vadd.f32 %v4184_v2, %v4170_v5  ;;  %v4152_v41 = vmul.f32 0.6931472, %v6480_v4 }
 0x2cf   :  { %v6482_v51 = vpop.eup %6481  ;;  %v3650_v3 = vsub.f32 0.0, %v3631_v44  ;;  %v4476_v22 = vsel %vm4472_vm0, %v4466_v46, 0.0  ;;  %v4468_v42 = vmul.f32 %v4460_v9, %v4452_v27  ;;  %v4478_v15 = vsel %vm4472_vm0, %v4467_v47, 0.0 }
 0x2d0   :  { %v4150_v29 = vmul.f32 0.6931472, %v6482_v51  ;;  %v4477_v7 = vadd.f32 %v4476_v22, %v4475_v38  ;;  %v4454_v62 = vmul.f32 %v4439_v26, %v4439_v26  ;;  %v4469_v21 = vmul.f32 %v4461_v60, %v4453_v45 }
 0x2d1   :  { %v3665_v48 = vadd.f32 %v3664_v58, %v3650_v3  ;;  %v3651_v32 = vsub.f32 0.0, %v3633_v59  ;;  %v4480_v39 = vsel %vm4472_vm0, %v4468_v42, 0.0  ;;  %v4172_v54 = vsub.f32 0.0, %v4152_v41 }
 0x2d2   :  { %v4171_v24 = vsub.f32 0.0, %v4150_v29  ;;  %v6484_v14 = vpop.eup %6483  ;;  %v4479_v53 = vadd.f32 %v4478_v15, %v4477_v7  ;;  %v4455_v34 = vmul.f32 %v5658_v36, %v5658_v36  ;;  %v4470_v40 = vmul.f32 %v4462_v49, %v4454_v62 }
 0x2d3   :  { %v3637_v23 = vmul.f32 0.6931472, %v6484_v14  ;;  %v3666_v25 = vadd.f32 %v3665_v48, %v3651_v32  ;;  %v4482_v20 = vsel %vm4472_vm0, %v4469_v21, 0.0 }
 0x2d4   :  { %v6486_v6 = vpop.eup %6485  ;;  %v4186_v33 = vadd.f32 %v4185_v37, %v4171_v24  ;;  %v4481_v16 = vadd.f32 %v4480_v39, %v4479_v53  ;;  %v4471_v31 = vmul.f32 %v4463_v11, %v4455_v34  ;;  %v4484_v30 = vsel %vm4472_vm0, %v4470_v40, 0.0  ;;  %s5676_s2 = spop %5675 }
 0x2d5   :  { %v6488_v17 = vpop.eup %6487  ;;  %v4156_v28 = vmul.f32 0.6931472, %v6486_v6  ;;  %v3653_v8 = vsub.f32 0.0, %v3637_v23 }
 0x2d6   :  { %v6490_v55 = vpop.eup %6489  ;;  %v3635_v63 = vmul.f32 0.6931472, %v6488_v17  ;;  %v4187_v19 = vadd.f32 %v4186_v33, %v4172_v54  ;;  %v4483_v35 = vadd.f32 %v4482_v20, %v4481_v16  ;;  %v4486_v52 = vsel %vm4472_vm0, %v4471_v31, 0.0 }
 0x2d7   :  { %v4154_v1 = vmul.f32 0.6931472, %v6490_v55  ;;  %v6492_v50 = vpop.eup %6491  ;;  %v1578_v61 = vpop.xlane.xlu0 %1577  ;;  %v4174_v36 = vsub.f32 0.0, %v4156_v28 }
 0x2d8   :  { %v3652_v18 = vsub.f32 0.0, %v3635_v63  ;;  %v6494_v43 = vpop.eup %6493  ;;  %v4160_v2 = vmul.f32 0.6931472, %v6492_v50  ;;  %v1579_v57 = vrot.slane %v1578_v61, 4  ;;  %v4485_v5 = vadd.f32 %v4484_v30, %v4483_v35 }
 0x2d9   :  { %v4173_v12 = vsub.f32 0.0, %v4154_v1  ;;  %v4158_v0 = vmul.f32 0.6931472, %v6494_v43 }
 0x2da   :  { %v3667_v56 = vadd.f32 %v3666_v25, %v3652_v18  ;;  %v1580_v13 = vadd.f32 %v1579_v57, %v1578_v61  ;;  %v4176_v9 = vsub.f32 0.0, %v4160_v2  ;;  %v4487_v27 = vadd.f32 %v4486_v52, %v4485_v5 }
 0x2db   :  { %v4188_v10 = vadd.f32 %v4187_v19, %v4173_v12  ;;  %v4175_v4 = vsub.f32 0.0, %v4158_v0 }
 0x2dc   :  { %v3668_v44 = vadd.f32 %v3667_v56, %v3653_v8  ;;  %v1581_v46 = vrot.slane %v1580_v13, 2  ;;  %s5678_s26 = spop %5677 }
 0x2dd   :  { %v4189_v58 = vadd.f32 %v4188_v10, %v4174_v36  ;;  %v2101_v59 = vpop.xlane.xlu1 %2100  ;;  %s1063_s28 = sadd.f32 %s5678_s26, %s5676_s2 }
 0x2de   :  { %3669 = vadd.xlane.f32.xlu0 %v3668_v44  ;;  %v1582_v3 = vadd.f32 %v1581_v46, %v1580_v13  ;;  %v2102_v38 = vrot.slane %v2101_v59, 4 }
 0x2df   :  { %v4190_v47 = vadd.f32 %v4189_v58, %v4175_v4 }
 0x2e0   :  { %v1583_v45 = vrot.slane %v1582_v3, 1  ;;  %v2103_v26 = vadd.f32 %v2102_v38, %v2101_v59 }
 0x2e1   :  { %v4191_v51 = vadd.f32 %v4190_v47, %v4176_v9 }
 0x2e2   :  { %4488 = vadd.xlane.f32.xlu0 %v4487_v27  ;;  %v1584_v29 = vadd.f32 %v1583_v45, %v1582_v3  ;;  %v2104_v37 = vrot.slane %v2103_v26, 2 }
 0x2e3   :  { %4192 = vadd.xlane.f32.xlu1 %v4191_v51 }
 0x2e4   :  { %5679 = vpush %v1584_v29  ;;  %v2105_v60 = vadd.f32 %v2104_v37, %v2103_v26 }
 0x2e6   :  { %v2106_v22 = vrot.slane %v2105_v60, 1 }
 0x2e8   :  { %v2107_v42 = vadd.f32 %v2106_v22, %v2105_v60 }
 0x2ea   :  { %5681 = vpush %v2107_v42 }
 0x315   :  { %s5680_s27 = spop %5679 }
 0x316   :  { %s1586_s30 = sadd.f32 %s5680_s27, %s1063_s28 }
 0x31b   :  { %s5682_s29 = spop %5681 }
 0x31c   :  { %s2109_s6 = sadd.f32 %s5682_s29, %s1586_s30 }
 0x321   :  { %v2624_v41 = vpop.xlane.xlu0 %2623 }
 0x322   :  { %v2625_v7 = vrot.slane %v2624_v41, 4 }
 0x324   :  { %v2626_v48 = vadd.f32 %v2625_v7, %v2624_v41 }
 0x326   :  { %v2627_v24 = vrot.slane %v2626_v48, 2  ;;  %v3147_v15 = vpop.xlane.xlu1 %3146 }
 0x327   :  { %v3148_v62 = vrot.slane %v3147_v15, 4 }
 0x328   :  { %v2628_v14 = vadd.f32 %v2627_v24, %v2626_v48 }
 0x329   :  { %v3149_v21 = vadd.f32 %v3148_v62, %v3147_v15 }
 0x32a   :  { %v2629_v53 = vrot.slane %v2628_v14, 1 }
 0x32b   :  { %v3150_v49 = vrot.slane %v3149_v21, 2 }
 0x32c   :  { %v2630_v6 = vadd.f32 %v2629_v53, %v2628_v14 }
 0x32d   :  { %v3151_v32 = vadd.f32 %v3150_v49, %v3149_v21 }
 0x32e   :  { %5683 = vpush %v2630_v6 }
 0x32f   :  { %v3152_v33 = vrot.slane %v3151_v32, 1 }
 0x331   :  { %v3153_v39 = vadd.f32 %v3152_v33, %v3151_v32 }
 0x333   :  { %5685 = vpush %v3153_v39 }
 0x35f   :  { %s5684_s5 = spop %5683 }
 0x360   :  { %s2632_s8 = sadd.f32 %s5684_s5, %s2109_s6 }
 0x364   :  { %s5686_s7 = spop %5685 }
 0x365   :  { %s3155_s10 = sadd.f32 %s5686_s7, %s2632_s8 }
 0x367   :  { %v3670_v17 = vpop.xlane.xlu0 %3669 }
 0x368   :  { %v3671_v54 = vrot.slane %v3670_v17, 4 }
 0x36a   :  { %v3672_v16 = vadd.f32 %v3671_v54, %v3670_v17 }
 0x36b   :  { %v4489_v34 = vpop.xlane.xlu0 %4488 }
 0x36c   :  { %v3673_v55 = vrot.slane %v3672_v16, 2  ;;  %v4193_v23 = vpop.xlane.xlu1 %4192  ;;  %v4490_v63 = vrot.slane %v4489_v34, 4 }
 0x36d   :  { %v4194_v11 = vrot.slane %v4193_v23, 4 }
 0x36e   :  { %v4491_v40 = vadd.f32 %v4490_v63, %v4489_v34  ;;  %v3674_v25 = vadd.f32 %v3673_v55, %v3672_v16 }
 0x36f   :  { %v4195_v28 = vadd.f32 %v4194_v11, %v4193_v23 }
 0x370   :  { %v4492_v1 = vrot.slane %v4491_v40, 2  ;;  %v3675_v19 = vrot.slane %v3674_v25, 1 }
 0x371   :  { %v4196_v20 = vrot.slane %v4195_v28, 2 }
 0x372   :  { %v4493_v50 = vadd.f32 %v4492_v1, %v4491_v40  ;;  %v3676_v18 = vadd.f32 %v3675_v19, %v3674_v25 }
 0x373   :  { %v4197_v35 = vadd.f32 %v4196_v20, %v4195_v28 }
 0x374   :  { %5687 = vpush %v3676_v18  ;;  %v4494_v43 = vrot.slane %v4493_v50, 1 }
 0x375   :  { %v4198_v12 = vrot.slane %v4197_v35, 1 }
 0x376   :  { %v4495_v31 = vadd.f32 %v4494_v43, %v4493_v50 }
 0x377   :  { %v4199_v8 = vadd.f32 %v4198_v12, %v4197_v35 }
 0x379   :  { %5689 = vpush %v4199_v8 }
 0x37a   :  { %5691 = vpush %v4495_v31 }
 0x3a5   :  { %s5688_s9 = spop %5687 }
 0x3a6   :  { %s3678_s11 = sadd.f32 %s5688_s9, %s3155_s10 }
 0x3aa   :  { %s5690_s1 = spop %5689 }
 0x3ab   :  { %s4201_s12 = sadd.f32 %s5690_s1, %s3678_s11  ;;  %s5692_s13 = spop %5691 }
 0x3ac   :  { %s4499_s14 = smul.f32 0.00024414063, %s5692_s13 }
 0x3ad   :  { %s4204_s15 = smul.f32 7.6293945e-06, %s4201_s12 }
 0x3ae   :  { %4501 = sst [smem:[#allocation4]] %s4499_s14 }
 0x3af   :  { %4206 = sst [smem:[#allocation2]] %s4204_s15 }
 0x3b0   :  { %4509 = dma.smem_to_hbm %s6651_s16, 16, %s10607_s3, [#allocation3]  }
 0x3b1   :  { %4517 = dma.smem_to_hbm %s6652_s19, 16, %s10608_s4, [#allocation5]  }
 0x3b2   :  { %6647 = dma.done.wait [#allocation3], 16  }
 0x3b3   :  { %6648 = vsyncadd [#allocation3], 4294967280 }
 0x3b4   :  { %6649 = dma.done.wait [#allocation5], 16  }
 0x3b5   :  { %6650 = vsyncadd [#allocation5], 4294967280 }
 0x3b6   :  { %4524 = sfence }
 0x3b7   :  { %4525 = vsyncpa [#allocation3], 1 }
 0x3b8   :  { %4526 = vsyncpa [#allocation5], 1 }

// kernel: group_elements_forward.5
= control target key start
LH: loop header
LB: loop body
LE: loop exit
PB: predicated region body
PF: predicated region fallthrough
CT: control target
= control target key end

     0   :  { %v876_v1 = vmov 0.0   ;;  %vm877_vm0 = vmmov 0   ;;  %s878_s16 = smov 112   ;;  %s879_s17 = smov 80   ;;  %vm102_vm1 = vcmask 130048   ;;  %vm100_vm2 = vcmask 519168   ;;  %s1086_s0 = inlined_call_operand.vmem [shape: f32[4,128], index: 0, kind: input, shape index: {}]   ;;  %s1087_s1 = inlined_call_operand.vmem [shape: f32[128,64], index: 1, kind: input, shape index: {}]   ;;  %s1088_s3 = inlined_call_operand.vmem [shape: f32[4,512], index: 3, kind: output, shape index: {1}]   ;;  %s1089_s2 = inlined_call_operand.vmem [shape: f32[4,64], index: 2, kind: output, shape index: {0}]  }
   0x1   :  { %v908_v0 = vld [vmem:[%s1086_s0] sm:$0xf]  ;;  %811 = vmatprep.subr.mxu1 %v876_v1  ;;  %v914_v2 = vld [vmem:[%s1087_s1 + $0x8] sm:$0xff]  ;;  %815 = vmatprep.mubr.msk.f32.mxu1 %vm877_vm0, %v876_v1  ;;  %v17_v4 = vld [vmem:[%s1087_s1 + $0x18] sm:$0xff]  ;;  %s880_s21 = smov 96   ;;  %s881_s22 = smov 64  }
   0x2   :  { %177 = vrot.lane.b32.xlu0 %v908_v0, %s878_s16  ;;  %332 = vrot.lane.b32.xlu1 %v908_v0, %s879_s17  ;;  %v923_v3 = vld [vmem:[%s1087_s1] sm:$0xff]  ;;  %v16_v5 = vld [vmem:[%s1087_s1 + $0x10] sm:$0xff]  ;;  %s882_s25 = smov 48   ;;  %s883_s26 = smov 32   ;;  %vm255_vm3 = vcmask 1043968  }
   0x3   :  { %812 = vmatpush3.msra.mxu1 %v914_v2  ;;  %776 = vmatprep.subr.mxu0 %v876_v1  ;;  %v951_v6 = vld [vmem:[%s1087_s1 + $0x78] sm:$0xff]  ;;  %v958_v7 = vld [vmem:[%s1087_s1 + $0x70] sm:$0xff]  ;;  %s884_s4 = smov 16   ;;  %v966_v8 = vld [vmem:[%s1087_s1 + $0x68] sm:$0xff] }
   0x4   :  { %813 = vmatprep.subr.mxu1 %v876_v1  ;;  %808 = vmatprep.mubr.msk.f32.mxu0 %vm877_vm0, %v876_v1  ;;  %v973_v9 = vld [vmem:[%s1087_s1 + $0x60] sm:$0xff]  ;;  %v25_v10 = vld [vmem:[%s1087_s1 + $0x58] sm:$0xff]  ;;  %v24_v11 = vld [vmem:[%s1087_s1 + $0x50] sm:$0xff] }
   0x5   :  { %814 = vmatpush3.msra.mxu1 %v923_v3  ;;  %777 = vmatpush3.msra.mxu0 %v951_v6  ;;  %v23_v12 = vld [vmem:[%s1087_s1 + $0x48] sm:$0xff]  ;;  %v22_v13 = vld [vmem:[%s1087_s1 + $0x40] sm:$0xff]  ;;  %v21_v14 = vld [vmem:[%s1087_s1 + $0x38] sm:$0xff] }
   0x6   :  { %257 = vrot.lane.b32.xlu0 %v908_v0, %s880_s21  ;;  %411 = vrot.lane.b32.xlu1 %v908_v0, %s881_s22  ;;  %v20_v15 = vld [vmem:[%s1087_s1 + $0x30] sm:$0xff]  ;;  %v19_v16 = vld [vmem:[%s1087_s1 + $0x28] sm:$0xff] }
   0x7   :  { %816 = vmatmul.mubr.msk.f32.vlgmr.msra.gmra.mxu1 %vm102_vm1, %v908_v0  ;;  %818 = vmatprep.subr.mxu1 %v876_v1  ;;  %v18_v17 = vld [vmem:[%s1087_s1 + $0x20] sm:$0xff] }
   0x8   :  { %819 = vmatpush3.msra.mxu1 %v17_v4  ;;  %822 = vmatprep.mubr.msk.f32.mxu1 %vm877_vm0, %v876_v1 }
   0x9   :  { %820 = vmatprep.subr.mxu1 %v876_v1  ;;  %778 = vmatprep.subr.mxu0 %v876_v1 }
   0xa   :  { %486 = vrot.lane.b32.xlu0 %v908_v0, %s882_s25  ;;  %565 = vrot.lane.b32.xlu1 %v908_v0, %s883_s26 }
   0xb   :  { %821 = vmatpush3.msra.mxu1 %v16_v5  ;;  %779 = vmatpush3.msra.mxu0 %v958_v7 }
   0xc   :  { %825 = vmatprep.subr.mxu1 %v876_v1  ;;  %780 = vmatprep.subr.mxu0 %v876_v1 }
   0xd   :  { %781 = vmatpush3.msra.mxu0 %v966_v8 }
   0xe   :  { %640 = vrot.lane.b32.xlu0 %v908_v0, %s884_s4  ;;  %782 = vmatprep.subr.mxu0 %v876_v1 }
   0xf   :  { %783 = vmatpush3.msra.mxu0 %v973_v9 }
  0x10   :  { %784 = vmatprep.subr.mxu0 %v876_v1 }
  0x11   :  { %785 = vmatpush3.msra.mxu0 %v25_v10 }
  0x12   :  { %786 = vmatprep.subr.mxu0 %v876_v1 }
  0x13   :  { %787 = vmatpush3.msra.mxu0 %v24_v11 }
  0x14   :  { %788 = vmatprep.subr.mxu0 %v876_v1 }
  0x15   :  { %789 = vmatpush3.msra.mxu0 %v23_v12 }
  0x16   :  { %790 = vmatprep.subr.mxu0 %v876_v1 }
  0x17   :  { %791 = vmatpush3.msra.mxu0 %v22_v13 }
  0x18   :  { %792 = vmatprep.subr.mxu0 %v876_v1 }
  0x19   :  { %793 = vmatpush3.msra.mxu0 %v21_v14 }
  0x1a   :  { %794 = vmatprep.subr.mxu0 %v876_v1 }
  0x1b   :  { %795 = vmatpush3.msra.mxu0 %v20_v15 }
  0x1c   :  { %796 = vmatprep.subr.mxu0 %v876_v1 }
  0x1d   :  { %797 = vmatpush3.msra.mxu0 %v19_v16 }
  0x1e   :  { %798 = vmatprep.subr.mxu0 %v876_v1 }
  0x1f   :  { %799 = vmatpush3.msra.mxu0 %v18_v17 }
  0x20   :  { %800 = vmatprep.subr.mxu0 %v876_v1 }
  0x21   :  { %801 = vmatpush3.msra.mxu0 %v17_v4 }
  0x22   :  { %802 = vmatprep.subr.mxu0 %v876_v1 }
  0x23   :  { %803 = vmatpush3.msra.mxu0 %v16_v5 }
  0x24   :  { %804 = vmatprep.subr.mxu0 %v876_v1 }
  0x25   :  { %805 = vmatpush3.msra.mxu0 %v914_v2 }
  0x26   :  { %806 = vmatprep.subr.mxu0 %v876_v1 }
  0x27   :  { %807 = vmatpush3.msra.mxu0 %v923_v3 }
  0x28   :  { %809 = vmatmul.mubr.f32.vlgmr.msra.gmra.mxu0 %v908_v0 }
  0x74   :  { %v178_v18 = vpop.permute.xlu0 %177  ;;  %v333_v20 = vpop.permute.xlu1 %332 }
  0x75   :  { %823 = vmatmul.mubr.msk.f32.vlgmr.msra.gmra.mxu1 %vm102_vm1, %v178_v18 }
  0x76   :  { %826 = vmatpush3.msra.mxu1 %v19_v16  ;;  %829 = vmatprep.mubr.msk.f32.mxu1 %vm877_vm0, %v876_v1 }
  0x77   :  { %827 = vmatprep.subr.mxu1 %v876_v1 }
  0x78   :  { %828 = vmatpush3.msra.mxu1 %v18_v17  ;;  %v258_v19 = vpop.permute.xlu0 %257  ;;  %v412_v21 = vpop.permute.xlu1 %411 }
  0x79   :  { %832 = vmatprep.subr.mxu1 %v876_v1  ;;  %830 = vmatmul.mubr.msk.f32.vlgmr.msra.gmra.mxu1 %vm102_vm1, %v258_v19 }
  0x7a   :  { %833 = vmatpush3.msra.mxu1 %v21_v14  ;;  %836 = vmatprep.mubr.msk.f32.mxu1 %vm877_vm0, %v876_v1 }
  0x7b   :  { %834 = vmatprep.subr.mxu1 %v876_v1 }
  0x7c   :  { %835 = vmatpush3.msra.mxu1 %v20_v15  ;;  %v487_v22 = vpop.permute.xlu0 %486  ;;  %v566_v23 = vpop.permute.xlu1 %565 }
  0x7d   :  { %839 = vmatprep.subr.mxu1 %v876_v1  ;;  %837 = vmatmul.mubr.msk.f32.vlgmr.msra.gmra.mxu1 %vm102_vm1, %v333_v20 }
  0x7e   :  { %840 = vmatpush3.msra.mxu1 %v23_v12  ;;  %843 = vmatprep.mubr.msk.f32.mxu1 %vm877_vm0, %v876_v1 }
  0x7f   :  { %841 = vmatprep.subr.mxu1 %v876_v1 }
  0x80   :  { %842 = vmatpush3.msra.mxu1 %v22_v13  ;;  %v641_v24 = vpop.permute.xlu0 %640 }
  0x81   :  { %846 = vmatprep.subr.mxu1 %v876_v1  ;;  %844 = vmatmul.mubr.msk.f32.vlgmr.msra.gmra.mxu1 %vm102_vm1, %v412_v21 }
  0x82   :  { %847 = vmatpush3.msra.mxu1 %v25_v10  ;;  %850 = vmatprep.mubr.msk.f32.mxu1 %vm877_vm0, %v876_v1 }
  0x83   :  { %848 = vmatprep.subr.mxu1 %v876_v1 }
  0x84   :  { %849 = vmatpush3.msra.mxu1 %v24_v11 }
  0x85   :  { %853 = vmatprep.subr.mxu1 %v876_v1  ;;  %851 = vmatmul.mubr.msk.f32.vlgmr.msra.gmra.mxu1 %vm102_vm1, %v487_v22 }
  0x86   :  { %854 = vmatpush3.msra.mxu1 %v966_v8  ;;  %857 = vmatprep.mubr.msk.f32.mxu1 %vm877_vm0, %v876_v1 }
  0x87   :  { %855 = vmatprep.subr.mxu1 %v876_v1 }
  0x88   :  { %856 = vmatpush3.msra.mxu1 %v973_v9 }
  0x89   :  { %860 = vmatprep.subr.mxu1 %v876_v1  ;;  %858 = vmatmul.mubr.msk.f32.vlgmr.msra.gmra.mxu1 %vm102_vm1, %v566_v23 }
  0x8a   :  { %861 = vmatpush3.msra.mxu1 %v951_v6  ;;  %864 = vmatprep.mubr.msk.f32.mxu1 %vm877_vm0, %v876_v1 }
  0x8b   :  { %862 = vmatprep.subr.mxu1 %v876_v1 }
  0x8c   :  { %863 = vmatpush3.msra.mxu1 %v958_v7 }
  0x8d   :  { %865 = vmatmul.mubr.msk.f32.vlgmr.msra.gmra.mxu1 %vm102_vm1, %v641_v24 }
  0xc7   :  { %v172_v25 = vpop.f32.mrf.mxu1 }
  0xc8   :  { %176 = vst.msk [vmem:[%s1088_s3] sm:$0xf] %vm100_vm2, %v172_v25 }
  0xc9   :  { %v817_v26 = vpop.f32.mrf.mxu1 }
  0xe8   :  { %v96_v30 = vpop.f32.mrf.mxu0 }
  0xe9   :  { %101 = vst.msk [vmem:[%s1089_s2] sm:$0xf] %vm100_vm2, %v96_v30 }
  0xea   :  { %v810_v32 = vpop.f32.mrf.mxu0 }
 0x135   :  { %v247_v27 = vpop.f32.mrf.mxu1 }
 0x136   :  { %252 = vrot.lane.b32.xlu1 %v247_v27, %s881_s22 }
 0x137   :  { %v824_v28 = vpop.f32.mrf.mxu1 }
 0x139   :  { %v327_v29 = vpop.f32.mrf.mxu1 }
 0x13a   :  { %331 = vst.msk [vmem:[%s1088_s3 + $0x4] sm:$0xf] %vm100_vm2, %v327_v29 }
 0x13b   :  { %v831_v31 = vpop.f32.mrf.mxu1 }
 0x13d   :  { %v402_v33 = vpop.f32.mrf.mxu1 }
 0x13e   :  { %407 = vrot.lane.b32.xlu0 %v402_v33, %s881_s22 }
 0x13f   :  { %v838_v34 = vpop.f32.mrf.mxu1 }
 0x141   :  { %v481_v35 = vpop.f32.mrf.mxu1 }
 0x142   :  { %485 = vst.msk [vmem:[%s1088_s3 + $0x8] sm:$0xf] %vm100_vm2, %v481_v35 }
 0x143   :  { %v845_v36 = vpop.f32.mrf.mxu1 }
 0x145   :  { %v556_v37 = vpop.f32.mrf.mxu1 }
 0x146   :  { %561 = vrot.lane.b32.xlu1 %v556_v37, %s881_s22 }
 0x147   :  { %v852_v38 = vpop.f32.mrf.mxu1 }
 0x149   :  { %v635_v39 = vpop.f32.mrf.mxu1 }
 0x14a   :  { %639 = vst.msk [vmem:[%s1088_s3 + $0xc] sm:$0xf] %vm100_vm2, %v635_v39 }
 0x14b   :  { %v859_v40 = vpop.f32.mrf.mxu1 }
 0x14d   :  { %v710_v41 = vpop.f32.mrf.mxu1 }
 0x14e   :  { %715 = vrot.lane.b32.xlu0 %v710_v41, %s881_s22 }
 0x14f   :  { %v866_v42 = vpop.f32.mrf.mxu1 }
 0x1a8   :  { %v253_v43 = vpop.permute.xlu1 %252 }
 0x1a9   :  { %256 = vst.msk [vmem:[%s1088_s3] sm:$0xf] %vm255_vm3, %v253_v43 }
 0x1b0   :  { %v408_v44 = vpop.permute.xlu0 %407 }
 0x1b1   :  { %410 = vst.msk [vmem:[%s1088_s3 + $0x4] sm:$0xf] %vm255_vm3, %v408_v44 }
 0x1b8   :  { %v562_v45 = vpop.permute.xlu1 %561 }
 0x1b9   :  { %564 = vst.msk [vmem:[%s1088_s3 + $0x8] sm:$0xf] %vm255_vm3, %v562_v45 }
 0x1c0   :  { %v716_v46 = vpop.permute.xlu0 %715 }
 0x1c1   :  { %718 = vst.msk [vmem:[%s1088_s3 + $0xc] sm:$0xf] %vm255_vm3, %v716_v46 }

// kernel: custom-call.38
= control target key start
LH: loop header
LB: loop body
LE: loop exit
PB: predicated region body
PF: predicated region fallthrough
CT: control target
= control target key end

     0   :  { %s6_s0 = inlined_call_operand.vmem [shape: u32[4], index: 0, kind: output, shape index: {}]  }

// kernel: custom-call.33
= control target key start
LH: loop header
LB: loop body
LE: loop exit
PB: predicated region body
PF: predicated region fallthrough
CT: control target
= control target key end

     0   :  { %5 = vsyncpa [#allocation4], 0  ;;  %s884_s0 = inlined_call_operand.vmem [shape: f32[4,8,8], index: 0, kind: input, shape index: {}]   ;;  %s885_s1 = inlined_call_operand.vmem [shape: f32[4,8,8], index: 1, kind: output, shape index: {0}]   ;;  %s886_s2 = inlined_call_operand.hbm [shape: s32[4,8], index: 2, kind: output, shape index: {1}]   ;;  %s887_s3 = inlined_call_operand.vmem [shape: s32[4,8], index: 3, kind: output, shape index: {2}]  }
   0x1   :  { %7 = vsyncpa [#allocation4 + $0x1], 0  ;;  %s713_s12 = smov 0   ;;  %s715_s13 = smov 0  }
   0x2   :  { %s717_s14 = smov 0   ;;  %s719_s15 = smov 0  }
   0x3 LB: > { %s734_s16 = sadd.s32 4294967295, %s685_s15   ;;  %s550_s17 = sadd.s32 4294967294, %s685_s15   ;;  %s685_s15 = sphi %s719_s15, %s897_s15   ;;  %s681_s14 = sphi %s717_s14, %s896_s14   ;;  %s677_s13 = sphi %s715_s13, %s895_s13   ;;  %s673_s12 = sphi %s713_s12, %s894_s12  }
   0x4   : > { %s738_s18 = sadd.s32 1, %s685_s15   ;;  %s17_s19 = sshrl.u32 %s685_s15, 3 }
   0x5   : > { %s18_s20 = sshrl.u32 %s738_s18, 3  ;;  %s22_s21 = sadd.s32 1, %s681_s14 }
   0x6   : > { %s19_s22 = ssub.s32 %s17_s19, %s18_s20  ;;  %p32_p0 = scmp.ne.s32.totalorder %s681_s14, %s677_s13 }
   0x7   : > { %p20_p1 = scmp.eq.s32.totalorder %s19_s22, 0  ;;  %p33_p2 = scmp.eq.s32.totalorder %s734_s16, 3 }
   0x8   : > { %p38_p3 = scmp.ne.s32.totalorder %s677_s13, %s673_s12  ;;  %p39_p4 = scmp.eq.s32.totalorder %s550_s17, 3 }
   0x9   : > { %s749_s23 = scalar_select %p20_p1, %s681_s14, %s22_s21  }
   0xa   : > { %p751_p5 = por %p33_p2, %p32_p0  ;;  %p755_p6 = por %p39_p4, %p38_p3 }
   0xb   : > { %p552_p7 = scmp.ge.s32.totalorder %s685_s15, 4 }
   0xc   : > { %s85_s26 = sand.u32 (!%p552_p7), 1, %s685_s15   ;;  %s554_s27 = sshll.u32 (!%p552_p7), %s685_s15, 3 }
   0xd   : > { %83 = sbr.rel (%p552_p7) target bundleno = 20 (0x14), region = 16  ;;  %s553_s28 = sshll.u32 (!%p552_p7), %s85_s26, 3 }
   0xe   : > { %s89_s4 = scalar_lea.vmem (!%p552_p7), %s884_s0, %s554_s27  ;;  %s87_s5 = scalar_lea.vmem (!%p552_p7), [#allocation0], %s553_s28 }
  0x12   : > { %v118_v0 = vld [vmem:[%s89_s4] sm:$0xff] }
  0x13   : > { %119 = vst [vmem:[%s87_s5] sm:$0xff] %v118_v0 }
  0x14 PF: > { %p555_p8 = scmp.ge.s32.totalorder %s685_s15, 1  ;;  %p124_p9 = scmp.lt.s32.totalorder %s685_s15, 5 }
  0x16   : > { %p125_p10 = pnand %p555_p8, %p124_p9 }
  0x18   : > { %128 = sbr.rel (%p125_p10) target bundleno = 438 (0x1b6), region = 54 }
  0x1d   : > { %s131_s6 = sand.u32 1, %s734_s16   ;;  %s146_s7 = sand.u32 1, %s677_s13   ;;  %v164_v1 = vlaneseq  ;;  %v691_v4 = vmov 0  }
  0x1e   : > { %s556_s8 = sshll.u32 %s131_s6, 3  ;;  %s771_s9 = sshll.u32 %s146_s7, 2 }
  0x1f   : > { %v774_v2 = vshrl.u32 %v164_v1, 7  ;;  %s133_s10 = scalar_lea.vmem [#allocation0], %s556_s8  ;;  %s776_s11 = scalar_lea.vmem [#allocation1], %s556_s8 }
  0x20   : > { %v157_v3 = vld [vmem:[%s133_s10] sm:$0xff]  ;;  %s159_s17 = sand.u32 7, %s734_s16   ;;  %s148_s20 = scalar_lea.vmem [#allocation3], %s771_s9 }
  0x21   : > { %158 = vst [vmem:[%s776_s11] sm:$0xff] %v157_v3  ;;  %168 = vst [vmem:[#allocation7] sm:$0xff] %v774_v2  ;;  %s781_s19 = scalar_lea.vmem [#allocation2], %s159_s17  ;;  %s786_s22 = scalar_lea.vmem [#allocation5], %s159_s17 }
  0x22   : > { %163 = vst [vmem:[%s781_s19] sm:$0x1] %v691_v4  ;;  %s788_s26 = smov 0  }
  0x23 LB: >> { %v795_v7 = vstv %s689_s26  ;;  %s225_s27 = ssub.s32 128, %s689_s26  ;;  %v231_v37 = vand.u32 127, %v164_v1  ;;  %s237_s28 = scalar_lea.vmem %s776_s11, %s689_s26 [#allocation1]  ;;  %s689_s26 = sphi %s788_s26, %s174_s26  }
  0x24   : >> { %vm183_vm0 = vcmp.ge.s32.totalorder %v774_v2, %v795_v7  ;;  %s243_s30 = scalar_lea.vmem [#allocation7], %s689_s26  ;;  %vm263_vm13 = vcmp.gt.s32.totalorder %v774_v2, %v795_v7  ;;  %s174_s26 = sadd.s32 1, %s689_s26  }
  0x25   : >> { %vm255_vm10 = vcmp.gt.s32.totalorder %v231_v37, %v795_v7  ;;  %vm232_vm11 = vcmp.eq.s32.totalorder %v231_v37, %v795_v7  ;;  %p171_p11 = scmp.ge.s32.totalorder %s174_s26, 8  }
  0x26   : >> { %vm267_vm15 = vmand %vm263_vm13, %vm232_vm11  ;;  %s888_s6 = sshrl.u32 (%p171_p11), %s734_s16, 3  ;;  %s564_s8 = sshll.u32 (%p171_p11), %s734_s16, 3 }
  0x27   : > { %s565_s10 = sshll.u32 (%p171_p11), %s888_s6, 6  ;;  %s692_s6 = smov (%p171_p11), [#allocation3]  }
  0x28   : >> { %v179_v5 = vld [vmem:[%s776_s11] sm:$0xff]  ;;  %v239_v40 = vld [vmem:[%s237_s28] ss:$0 sm:$0xff]  ;;  %s625_s21 = sshll.u32 (%p171_p11), %s692_s6, 4  ;;  %s626_s21 = int_to_ptr.vmem [resolvable:$false] %s625_s21 }
  0x29   : >> { %v180_v6 = vand.u32 2147483647, %v179_v5  ;;  %v234_v39 = vld [vmem:[%s781_s19] ss:$0 sm:$0xff] }
  0x2a   : >> { %v245_v41 = vld [vmem:[%s243_s30] ss:$0 sm:$0xff] }
  0x2b   : >> { %vm560_vm1 = vcmp.gt.f32.partialorder %v180_v6, -inf }
  0x2c   : >> { %vm187_vm2 = vmand %vm183_vm0, %vm560_vm1 }
  0x2d   : >> { %v188_v8 = vsel %vm187_vm2, %v774_v2, %v795_v7  ;;  %v189_v9 = vsel %vm187_vm2, %v180_v6, -inf }
  0x2e   : >> { %v190_v10 = vrot.slane %v189_v9, 1  ;;  %v191_v11 = vrot.slane %v188_v8, 1 }
  0x30   : >> { %vm192_vm3 = vcmp.ge.f32.partialorder %v190_v10, %v189_v9  ;;  %v195_v12 = vrot.slane %v190_v10, 1  ;;  %v196_v13 = vrot.slane %v191_v11, 1 }
  0x31   : >> { %v193_v14 = vsel %vm192_vm3, %v190_v10, %v189_v9  ;;  %v194_v15 = vsel %vm192_vm3, %v191_v11, %v188_v8 }
  0x32   : >> { %vm197_vm4 = vcmp.ge.f32.partialorder %v195_v12, %v193_v14  ;;  %v200_v16 = vrot.slane %v195_v12, 1  ;;  %v201_v17 = vrot.slane %v196_v13, 1 }
  0x33   : >> { %v198_v18 = vsel %vm197_vm4, %v195_v12, %v193_v14  ;;  %v199_v19 = vsel %vm197_vm4, %v196_v13, %v194_v15 }
  0x34   : >> { %vm202_vm5 = vcmp.ge.f32.partialorder %v200_v16, %v198_v18  ;;  %v205_v20 = vrot.slane %v200_v16, 1  ;;  %v206_v21 = vrot.slane %v201_v17, 1 }
  0x35   : >> { %v203_v22 = vsel %vm202_vm5, %v200_v16, %v198_v18  ;;  %v204_v23 = vsel %vm202_vm5, %v201_v17, %v199_v19 }
  0x36   : >> { %vm207_vm6 = vcmp.ge.f32.partialorder %v205_v20, %v203_v22  ;;  %v210_v24 = vrot.slane %v205_v20, 1  ;;  %v211_v25 = vrot.slane %v206_v21, 1 }
  0x37   : >> { %v208_v26 = vsel %vm207_vm6, %v205_v20, %v203_v22  ;;  %v209_v27 = vsel %vm207_vm6, %v206_v21, %v204_v23 }
  0x38   : >> { %vm212_vm7 = vcmp.ge.f32.partialorder %v210_v24, %v208_v26  ;;  %v215_v28 = vrot.slane %v210_v24, 1  ;;  %v216_v29 = vrot.slane %v211_v25, 1 }
  0x39   : >> { %v213_v30 = vsel %vm212_vm7, %v210_v24, %v208_v26  ;;  %v214_v31 = vsel %vm212_vm7, %v211_v25, %v209_v27 }
  0x3a   : >> { %vm217_vm8 = vcmp.ge.f32.partialorder %v215_v28, %v213_v30  ;;  %v220_v32 = vrot.slane %v215_v28, 1  ;;  %v221_v33 = vrot.slane %v216_v29, 1 }
  0x3b   : >> { %v218_v34 = vsel %vm217_vm8, %v215_v28, %v213_v30  ;;  %v219_v35 = vsel %vm217_vm8, %v216_v29, %v214_v31 }
  0x3c   : >> { %vm222_vm9 = vcmp.ge.f32.partialorder %v220_v32, %v218_v34 }
  0x3d   : >> { %v224_v36 = vsel %vm222_vm9, %v221_v33, %v219_v35 }
  0x3e   : >> { %226 = vrot.lane.b32.xlu0 %v224_v36, %s225_s27 }
  0xb0   : >> { %v227_v38 = vpop.permute.xlu0 %226 }
  0xb1   : >> { %569 = vpush %v227_v38 }
  0xe2   : >> { %s570_s29 = spop %569 }
  0xe3   : >> { %v233_v42 = vstv %s570_s29  ;;  %s238_s4 = scalar_lea.vmem %s776_s11, %s570_s29 [#allocation1]  ;;  %s244_s5 = scalar_lea.vmem [#allocation7], %s570_s29 }
  0xe4   : >> { %v240_v43 = vld [vmem:[%s238_s4] ss:$0 sm:$0xff]  ;;  %v235_v45 = vsel %vm232_vm11, %v233_v42, %v234_v39  ;;  %s395_s29 = scalar_lea.hbm (%p171_p11), %s886_s2, %s565_s10 }
  0xe5   : >> { %v246_v44 = vld [vmem:[%s244_s5] ss:$0 sm:$0xff]  ;;  %241 = vst [vmem:[%s238_s4] sm:$0x1] %v239_v40  ;;  %vm249_vm12 = vcmp.ne.f32.partialorder %v240_v43, 0.0  ;;  %236 = vst [vmem:[%s781_s19] sm:$0x1] %v235_v45  ;;  %v256_v52 = vsel %vm255_vm10, %v240_v43, 0.0  ;;  %s353_s19 = scalar_lea.vmem (%p171_p11), %s885_s1, %s564_s8 }
  0xe6   : >> { %247 = vst [vmem:[%s244_s5] sm:$0x1] %v245_v41  ;;  %242 = vst [vmem:[%s237_s28] sm:$0x1] %v240_v43  ;;  %s344_s4 = scalar_lea.sflag (%p171_p11), [#allocation4], %s146_s7  ;;  %s627_s8 = scalar_lea.vmem (%p171_p11), %s626_s21, 128 }
  0xe7   : >> { %248 = vst [vmem:[%s243_s30] sm:$0x1] %v246_v44  ;;  %vm250_vm14 = vmand %vm232_vm11, %vm249_vm12  ;;  %s397_s30 = sshll.u32 (%p171_p11), %s148_s20, 4  ;;  %s398_s30 = int_to_ptr.vmem [resolvable:$true] %s397_s30 }
  0xe8   : >> { %v251_v46 = vsel %vm250_vm14, %v240_v43, 1.0  ;;  %s621_s5 = scalar_lea.vmem (%p171_p11), %s398_s30, 64  ;;  %p628_p1 = scmp.lt.s32.totalorder (%p171_p11), %s398_s30, %s626_s21 }
  0xe9   : >> { %v264_v47 = vsel %vm263_vm13, %v251_v46, 1.0  ;;  %p622_p12 = scmp.ne.s32.totalorder (%p171_p11), %s398_s30, %s621_s5  ;;  %p629_p2 = scmp.lt.s32.totalorder (%p171_p11), %s627_s8, %s621_s5 }
  0xea   : >> { %619 = vrcp.f32 %v264_v47 }
  0xeb   : > { %p623_p13 = pnand (%p171_p11), %p622_p12, %p751_p5  ;;  %p630_p3 = por (%p171_p11), %p629_p2, %p628_p1 }
  0xec   : > { %v327_v57 = vld [vmem:[#allocation2] sm:$0xf] (%p171_p11) }
  0xed   : >> { %v260_v49 = vld [vmem:[%s776_s11] sm:$0xff]  ;;  %330 = vst [vmem:[%s148_s20] sm:$0xf] (%p171_p11), %v327_v57  ;;  %p624_p0 = pneg (%p171_p11), %p623_p13 }
  0xee   : > { %v274_v56 = vld [vmem:[#allocation7] sm:$0xff] (%p171_p11) }
  0xef   : > { %p631_p4 = pnand (%p171_p11), %p630_p3, %p624_p0 }
  0xf7   : >> { %v620_v48 = vpop.eup %619 }
  0xf8   : >> { %v266_v50 = vmul.f32 %v620_v48, %v260_v49 }
  0xfa   : >> { %v268_v51 = vsel %vm267_vm15, %v266_v50, 0.0 }
  0xfb   : >> { %269 = vadd.xlane.f32.xlu0 %v268_v51 }
 0x128   : > { %290 = vxpose.xlu0.b32.start.end [1/1] (short) (narrow) (%p171_p11), %v274_v56, 8 }
 0x184   : >> { %v270_v53 = vpop.xlane.xlu0 %269 }
 0x185   : >> { %v271_v54 = vmul.f32 %v270_v53, %v256_v52  ;;  %173 = sbr.rel (!%p171_p11) target bundleno = 35 (0x23), region = 210 }
 0x187   : >> { %v272_v55 = vsub.f32 %v266_v50, %v271_v54 }
 0x189   : >> { %273 = vst [vmem:[%s776_s11] sm:$0xff] %v272_v55 }
 0x190   : > { %v382_v58 = vld [vmem:[%s776_s11] sm:$0xff] }
 0x191   : > { %383 = vst [vmem:[%s353_s19] sm:$0xff] %v382_v58 }
 0x192   : > { %634 = shalt.err (!%p631_p4)
}
 0x193   : > { %s635_s11 = scalar_lea.hbm %s395_s29, 64  ;;  %s639_s10 = scalar_lea.hbm %s886_s2, 64 }
 0x194   : > { %p636_p7 = scmp.ne.s32.totalorder %s395_s29, %s635_s11  ;;  %p640_p10 = scmp.lt.s32.totalorder %s395_s29, %s886_s2 }
 0x195   : > { %p641_p11 = scmp.lt.s32.totalorder %s639_s10, %s635_s11 }
 0x196   : > { %p637_p8 = pnand %p636_p7, %p751_p5 }
 0x197   : > { %p642_p12 = por %p641_p11, %p640_p10 }
 0x198   : > { %p638_p9 = pneg %p637_p8 }
 0x19a   : > { %p643_p13 = pnand %p642_p12, %p638_p9 }
 0x19c   : > { %646 = shalt.err (!%p643_p13)
}
 0x19d   : > { %571 = dma.vmem_to_hbm [thread:$0]  (%p751_p5), %s398_s30, 64, %s395_s29, %s344_s4  }
 0x19e   : > { %s891_s21 = scalar_lea.vmem [#allocation6], %s771_s9  ;;  %s892_s6 = sshrl.u32 (%p751_p5), %s734_s16, 3 }
 0x19f   : > { %s566_s19 = sshll.u32 (%p751_p5), %s892_s6, 2  ;;  %s893_s27 = scalar_lea.vmem (%p751_p5), [#allocation6], %s771_s9 }
 0x1a0   : > { %s406_s8 = scalar_lea.vmem (%p751_p5), %s887_s3, %s566_s19 }
 0x1a4   : > { %v306_v59 = vpop.trf.xlu0 }
 0x1a5   : > { %322 = vst [vmem:[%s786_s22] sm:$0x1] %v306_v59 }
 0x1a9   : > { %403 = sbr.rel (!%p751_p5) target bundleno = 438 (0x1b6), region = 104 }
 0x1ac   : > { %v335_v60 = vld [vmem:[#allocation5] sm:$0xf] }
 0x1ad   : > { %338 = vst [vmem:[%s891_s21] sm:$0xf] %v335_v60 }
 0x1b4   : > { %v423_v61 = vld [vmem:[%s893_s27] sm:$0xf] }
 0x1b5   : > { %424 = vst [vmem:[%s406_s8] sm:$0xf] %v423_v61 }
 0x1b6 PF: > { %p577_p0 = scmp.ge.s32.totalorder %s685_s15, 2  ;;  %s452_s22 = sand.u32 1, %s673_s12  }
 0x1b7   : > { %s453_s16 = scalar_lea.sflag [#allocation4], %s452_s22 }
 0x1b8   : > { %p574_p5 = pnand %p577_p0, %p755_p6 }
 0x1ba   : > { %p575_p1 = pneg %p574_p5 }
 0x1bc   : > { %668 = dma.done.wait (%p575_p1), %s453_s16, 64  }
 0x1bd   : > { %670 = vsyncadd (%p575_p1), %s453_s16, 4294967232  ;;  %p10_p2 = scmp.ge.s32.totalorder %s738_s18, 6   ;;  %s894_s12 = smov %s677_s13 }
 0x1be   : > { %s895_s13 = smov %s681_s14  ;;  %s896_s14 = smov %s749_s23 }
 0x1bf   : > { %s897_s15 = smov %s738_s18  ;;  %12 = sbr.rel (!%p10_p2) target bundleno = 3 (0x3), region = 221 }
 0x1c4   :  { %465 = vsyncpa [#allocation4], 1 }
 0x1c5   :  { %467 = vsyncpa [#allocation4 + $0x1], 1 }

// kernel: custom-call.35
= control target key start
LH: loop header
LB: loop body
LE: loop exit
PB: predicated region body
PF: predicated region fallthrough
CT: control target
= control target key end

     0   :  { %s387_s6 = smov 0   ;;  %s389_s7 = smov 0   ;;  %s445_s0 = inlined_call_operand.vmem [shape: f32[4,1,8,8], index: 0, kind: input, shape index: {}]   ;;  %s446_s1 = inlined_call_operand.vmem [shape: f32[4,1,8,8], index: 1, kind: output, shape index: {}]  }
   0x1   :  { %s391_s8 = smov 0  }
   0x2 LB: > { %s313_s9 = sadd.s32 4294967295, %s374_s8   ;;  %s33_s10 = sadd.s32 1, %s370_s7  ;;  %s374_s8 = sphi %s391_s8, %s7_s8   ;;  %s370_s7 = sphi %s389_s7, %s448_s7   ;;  %s366_s6 = sphi %s387_s6, %s447_s6  }
   0x3   : > { %p35_p0 = scmp.ge.s32.totalorder %s33_s10, 4  ;;  %p315_p1 = scmp.ge.s32.totalorder %s374_s8, 4 }
   0x4   : > { %s49_s11 = sand.u32 (!%p315_p1), 1, %s374_s8   ;;  %s317_s12 = sshll.u32 (!%p315_p1), %s370_s7, 3 }
   0x5   : > { %s450_s10 = smov (%p35_p0, %s33_s10), 0  ;;  %47 = sbr.rel (%p315_p1) target bundleno = 12 (0xc), region = 16 }
   0x6   : > { %s316_s13 = sshll.u32 (!%p315_p1), %s49_s11, 3  ;;  %s56_s16 = scalar_lea.vmem (!%p315_p1), %s445_s0, %s317_s12 }
   0x7   : > { %s51_s17 = scalar_lea.vmem (!%p315_p1), [#allocation0], %s316_s13 }
   0xa   : > { %v85_v0 = vld [vmem:[%s56_s16] sm:$0xff] }
   0xb   : > { %86 = vst [vmem:[%s51_s17] sm:$0xff] %v85_v0 }
   0xc PF: > { %p318_p2 = scmp.ge.s32.totalorder %s374_s8, 1  ;;  %p91_p3 = scmp.lt.s32.totalorder %s374_s8, 5 }
   0xe   : > { %p92_p4 = pnand %p318_p2, %p91_p3 }
  0x10   : > { %95 = sbr.rel (%p92_p4) target bundleno = 1182 (0x49e), region = 54 }
  0x15   : > { %s98_s18 = sand.u32 1, %s313_s9   ;;  %v109_v1 = vlaneseq  ;;  %v376_v10 = vmov -1.0   ;;  %s322_s21 = sshll.u32 %s366_s6, 3 }
  0x16   : > { %s319_s19 = sshll.u32 %s98_s18, 3  ;;  %s220_s24 = scalar_lea.vmem %s446_s1, %s322_s21 }
  0x17   : > { %v414_v2 = vand.u32 127, %v109_v1  ;;  %v113_v3 = vshrl.u32 %v109_v1, 7  ;;  %s100_s20 = scalar_lea.vmem [#allocation0], %s319_s19 }
  0x18   : > { %v116_v4 = vld [vmem:[%s100_s20] sm:$0xff] }
  0x19   : > { %vm111_vm0 = vcmp.lt.s32.totalorder %v414_v2, 8  ;;  %vm115_vm1 = vcmp.eq.s32.totalorder %v113_v3, %v414_v2  ;;  %vm120_vm2 = vcmp.ge.s32.totalorder %v113_v3, %v414_v2  ;;  %vm134_vm4 = vcmp.eq.s32.totalorder %v414_v2, 0 }
  0x1a   : > { %v117_v5 = vsel %vm115_vm1, %v116_v4, 0.0  ;;  %vm121_vm3 = vmand %vm120_vm2, %vm111_vm0  ;;  %vm131_vm5 = vcmp.eq.s32.totalorder %v414_v2, %v113_v3  ;;  %v135_v11 = vsel %vm134_vm4, 1.0, %v376_v10  ;;  %vm142_vm6 = vcmp.eq.s32.totalorder %v414_v2, 1 }
  0x1b   : > { %v122_v6 = vsel %vm121_vm3, %v116_v4, 0.0  ;;  %118 = vadd.xlane.f32.xlu0 %v117_v5  ;;  %v136_v12 = vsel %vm131_vm5, %v135_v11, 0.0  ;;  %vm152_vm7 = vcmp.eq.s32.totalorder %v414_v2, 2  ;;  %vm162_vm8 = vcmp.eq.s32.totalorder %v414_v2, 3 }
  0x1c   : > { %vm172_vm9 = vcmp.eq.s32.totalorder %v414_v2, 4  ;;  %vm182_vm10 = vcmp.eq.s32.totalorder %v414_v2, 5  ;;  %vm192_vm11 = vcmp.eq.s32.totalorder %v414_v2, 6  ;;  %vm202_vm12 = vcmp.eq.s32.totalorder %v414_v2, 7 }
  0xa4   : > { %v419_v7 = vpop.xlane.xlu0 %118 }
  0xa5   : > { %350 = vrcp.f32 %v419_v7  ;;  %vm209_vm13 = vweird.f32 %v419_v7 }
  0xb2   : > { %v351_v8 = vpop.eup %350 }
  0xb3   : > { %v124_v9 = vmul.f32 %v351_v8, %v122_v6 }
  0xb5   : > { %125 = vst [vmem:[#allocation2] sm:$0xff] %v124_v9 }
  0xbc   : > { %v138_v13 = vld [vmem:[#allocation2 + $0x1] ss:$0 sm:$0xff]  ;;  %v148_v16 = vld [vmem:[#allocation2 + $0x2] ss:$0 sm:$0xff]  ;;  %v158_v21 = vld [vmem:[#allocation2 + $0x3] ss:$0 sm:$0xff] }
  0xbd   : > { %v139_v14 = vxor.u32 2147483648, %v138_v13  ;;  %v149_v18 = vxor.u32 2147483648, %v148_v16  ;;  %v159_v23 = vxor.u32 2147483648, %v158_v21  ;;  %v168_v26 = vld [vmem:[#allocation2 + $0x4] ss:$0 sm:$0xff] }
  0xbe   : > { %v169_v28 = vxor.u32 2147483648, %v168_v26  ;;  %v178_v31 = vld [vmem:[#allocation2 + $0x5] ss:$0 sm:$0xff]  ;;  %v188_v36 = vld [vmem:[#allocation2 + $0x6] ss:$0 sm:$0xff] }
  0xbf   : > { %v143_v15 = vmul.f32 %v139_v14, %v136_v12  ;;  %v179_v33 = vxor.u32 2147483648, %v178_v31  ;;  %v189_v38 = vxor.u32 2147483648, %v188_v36  ;;  %v198_v41 = vld [vmem:[#allocation2 + $0x7] ss:$0 sm:$0xff] }
  0xc0   : > { %v199_v43 = vxor.u32 2147483648, %v198_v41 }
  0xc1   : > { %144 = vadd.xlane.f32.xlu0 %v143_v15 }
 0x14a   : > { %v145_v17 = vpop.xlane.xlu0 %144 }
 0x14b   : > { %v146_v19 = vsel %vm142_vm6, %v145_v17, %v136_v12 }
 0x14c   : > { %v153_v20 = vmul.f32 %v149_v18, %v146_v19 }
 0x14e   : > { %154 = vadd.xlane.f32.xlu1 %v153_v20 }
 0x1d7   : > { %v155_v22 = vpop.xlane.xlu1 %154 }
 0x1d8   : > { %v156_v24 = vsel %vm152_vm7, %v155_v22, %v146_v19 }
 0x1d9   : > { %v163_v25 = vmul.f32 %v159_v23, %v156_v24 }
 0x1db   : > { %164 = vadd.xlane.f32.xlu1 %v163_v25 }
 0x264   : > { %v165_v27 = vpop.xlane.xlu1 %164 }
 0x265   : > { %v166_v29 = vsel %vm162_vm8, %v165_v27, %v156_v24 }
 0x266   : > { %v173_v30 = vmul.f32 %v169_v28, %v166_v29 }
 0x268   : > { %174 = vadd.xlane.f32.xlu0 %v173_v30 }
 0x2f1   : > { %v175_v32 = vpop.xlane.xlu0 %174 }
 0x2f2   : > { %v176_v34 = vsel %vm172_vm9, %v175_v32, %v166_v29 }
 0x2f3   : > { %v183_v35 = vmul.f32 %v179_v33, %v176_v34 }
 0x2f5   : > { %184 = vadd.xlane.f32.xlu1 %v183_v35 }
 0x37e   : > { %v185_v37 = vpop.xlane.xlu1 %184 }
 0x37f   : > { %v186_v39 = vsel %vm182_vm10, %v185_v37, %v176_v34 }
 0x380   : > { %v193_v40 = vmul.f32 %v189_v38, %v186_v39 }
 0x382   : > { %194 = vadd.xlane.f32.xlu0 %v193_v40 }
 0x40b   : > { %v195_v42 = vpop.xlane.xlu0 %194 }
 0x40c   : > { %v196_v44 = vsel %vm192_vm11, %v195_v42, %v186_v39 }
 0x40d   : > { %v203_v45 = vmul.f32 %v199_v43, %v196_v44 }
 0x40f   : > { %204 = vadd.xlane.f32.xlu1 %v203_v45 }
 0x498   : > { %v205_v46 = vpop.xlane.xlu1 %204 }
 0x499   : > { %v206_v47 = vsel %vm202_vm12, %v205_v46, %v196_v44 }
 0x49a   : > { %v208_v48 = vmul.f32 %v351_v8, %v206_v47 }
 0x49c   : > { %v210_v49 = vsel %vm209_vm13, %v206_v47, %v208_v48 }
 0x49d   : > { %250 = vst [vmem:[%s220_s24] sm:$0xff] %v210_v49 }
 0x49e PF: > { %s7_s8 = sadd.s32 1, %s374_s8   ;;  %s447_s6 = smov %s370_s7 }
 0x49f   : > { %p4_p5 = scmp.ge.s32.totalorder %s7_s8, 6   ;;  %s448_s7 = smov %s450_s10 }
 0x4a1   :  { %6 = sbr.rel (!%p4_p5) target bundleno = 2 (0x2), region = 125 }

// kernel: custom-call.34
= control target key start
LH: loop header
LB: loop body
LE: loop exit
PB: predicated region body
PF: predicated region fallthrough
CT: control target
= control target key end

     0   :  { %s386_s6 = smov 0   ;;  %s388_s7 = smov 0   ;;  %s444_s0 = inlined_call_operand.vmem [shape: f32[4,1,8,8], index: 0, kind: input, shape index: {}]   ;;  %s445_s1 = inlined_call_operand.vmem [shape: f32[4,1,8,8], index: 1, kind: output, shape index: {}]  }
   0x1   :  { %s390_s8 = smov 0  }
   0x2 LB: > { %s312_s9 = sadd.s32 4294967295, %s373_s8   ;;  %s33_s10 = sadd.s32 1, %s369_s7  ;;  %s373_s8 = sphi %s390_s8, %s7_s8   ;;  %s369_s7 = sphi %s388_s7, %s447_s7   ;;  %s365_s6 = sphi %s386_s6, %s446_s6  }
   0x3   : > { %p35_p0 = scmp.ge.s32.totalorder %s33_s10, 4  ;;  %p314_p1 = scmp.ge.s32.totalorder %s373_s8, 4 }
   0x4   : > { %s49_s11 = sand.u32 (!%p314_p1), 1, %s373_s8   ;;  %s316_s12 = sshll.u32 (!%p314_p1), %s369_s7, 3 }
   0x5   : > { %s449_s10 = smov (%p35_p0, %s33_s10), 0  ;;  %47 = sbr.rel (%p314_p1) target bundleno = 12 (0xc), region = 16 }
   0x6   : > { %s315_s13 = sshll.u32 (!%p314_p1), %s49_s11, 3  ;;  %s56_s16 = scalar_lea.vmem (!%p314_p1), %s444_s0, %s316_s12 }
   0x7   : > { %s51_s17 = scalar_lea.vmem (!%p314_p1), [#allocation0], %s315_s13 }
   0xa   : > { %v85_v0 = vld [vmem:[%s56_s16] sm:$0xff] }
   0xb   : > { %86 = vst [vmem:[%s51_s17] sm:$0xff] %v85_v0 }
   0xc PF: > { %p317_p2 = scmp.ge.s32.totalorder %s373_s8, 1  ;;  %p91_p3 = scmp.lt.s32.totalorder %s373_s8, 5 }
   0xe   : > { %p92_p4 = pnand %p317_p2, %p91_p3 }
  0x10   : > { %95 = sbr.rel (%p92_p4) target bundleno = 1182 (0x49e), region = 54 }
  0x15   : > { %s98_s18 = sand.u32 1, %s312_s9   ;;  %v109_v1 = vlaneseq  ;;  %v375_v10 = vmov -1.0   ;;  %s321_s21 = sshll.u32 %s365_s6, 3 }
  0x16   : > { %s318_s19 = sshll.u32 %s98_s18, 3  ;;  %s219_s24 = scalar_lea.vmem %s445_s1, %s321_s21 }
  0x17   : > { %v413_v2 = vand.u32 127, %v109_v1  ;;  %v113_v3 = vshrl.u32 %v109_v1, 7  ;;  %s100_s20 = scalar_lea.vmem [#allocation0], %s318_s19 }
  0x18   : > { %v116_v4 = vld [vmem:[%s100_s20] sm:$0xff] }
  0x19   : > { %vm111_vm0 = vcmp.lt.s32.totalorder %v413_v2, 8  ;;  %vm115_vm1 = vcmp.eq.s32.totalorder %v113_v3, %v413_v2  ;;  %vm120_vm2 = vcmp.le.s32.totalorder %v113_v3, %v413_v2  ;;  %vm134_vm4 = vcmp.eq.s32.totalorder %v413_v2, 7 }
  0x1a   : > { %v117_v5 = vsel %vm115_vm1, %v116_v4, 0.0  ;;  %vm121_vm3 = vmand %vm120_vm2, %vm111_vm0  ;;  %vm131_vm5 = vcmp.eq.s32.totalorder %v413_v2, %v113_v3  ;;  %v135_v11 = vsel %vm134_vm4, 1.0, %v375_v10  ;;  %vm142_vm6 = vcmp.eq.s32.totalorder %v413_v2, 6 }
  0x1b   : > { %v122_v6 = vsel %vm121_vm3, %v116_v4, 0.0  ;;  %118 = vadd.xlane.f32.xlu0 %v117_v5  ;;  %v136_v12 = vsel %vm131_vm5, %v135_v11, 0.0  ;;  %vm152_vm7 = vcmp.eq.s32.totalorder %v413_v2, 5  ;;  %vm162_vm8 = vcmp.eq.s32.totalorder %v413_v2, 4 }
  0x1c   : > { %vm172_vm9 = vcmp.eq.s32.totalorder %v413_v2, 3  ;;  %vm182_vm10 = vcmp.eq.s32.totalorder %v413_v2, 2  ;;  %vm192_vm11 = vcmp.eq.s32.totalorder %v413_v2, 1  ;;  %vm201_vm12 = vcmp.eq.s32.totalorder %v413_v2, 0 }
  0xa4   : > { %v418_v7 = vpop.xlane.xlu0 %118 }
  0xa5   : > { %349 = vrcp.f32 %v418_v7  ;;  %vm208_vm13 = vweird.f32 %v418_v7 }
  0xb2   : > { %v350_v8 = vpop.eup %349 }
  0xb3   : > { %v124_v9 = vmul.f32 %v350_v8, %v122_v6 }
  0xb5   : > { %125 = vst [vmem:[#allocation2] sm:$0xff] %v124_v9 }
  0xbc   : > { %v138_v13 = vld [vmem:[#allocation2 + $0x6] ss:$0 sm:$0xff]  ;;  %v148_v16 = vld [vmem:[#allocation2 + $0x5] ss:$0 sm:$0xff]  ;;  %v158_v21 = vld [vmem:[#allocation2 + $0x4] ss:$0 sm:$0xff] }
  0xbd   : > { %v139_v14 = vxor.u32 2147483648, %v138_v13  ;;  %v149_v18 = vxor.u32 2147483648, %v148_v16  ;;  %v159_v23 = vxor.u32 2147483648, %v158_v21  ;;  %v168_v26 = vld [vmem:[#allocation2 + $0x3] ss:$0 sm:$0xff] }
  0xbe   : > { %v169_v28 = vxor.u32 2147483648, %v168_v26  ;;  %v178_v31 = vld [vmem:[#allocation2 + $0x2] ss:$0 sm:$0xff]  ;;  %v188_v36 = vld [vmem:[#allocation2 + $0x1] ss:$0 sm:$0xff] }
  0xbf   : > { %v143_v15 = vmul.f32 %v139_v14, %v136_v12  ;;  %v179_v33 = vxor.u32 2147483648, %v178_v31  ;;  %v189_v38 = vxor.u32 2147483648, %v188_v36  ;;  %v197_v41 = vld [vmem:[#allocation2] ss:$0 sm:$0xff] }
  0xc0   : > { %v198_v43 = vxor.u32 2147483648, %v197_v41 }
  0xc1   : > { %144 = vadd.xlane.f32.xlu0 %v143_v15 }
 0x14a   : > { %v145_v17 = vpop.xlane.xlu0 %144 }
 0x14b   : > { %v146_v19 = vsel %vm142_vm6, %v145_v17, %v136_v12 }
 0x14c   : > { %v153_v20 = vmul.f32 %v149_v18, %v146_v19 }
 0x14e   : > { %154 = vadd.xlane.f32.xlu1 %v153_v20 }
 0x1d7   : > { %v155_v22 = vpop.xlane.xlu1 %154 }
 0x1d8   : > { %v156_v24 = vsel %vm152_vm7, %v155_v22, %v146_v19 }
 0x1d9   : > { %v163_v25 = vmul.f32 %v159_v23, %v156_v24 }
 0x1db   : > { %164 = vadd.xlane.f32.xlu1 %v163_v25 }
 0x264   : > { %v165_v27 = vpop.xlane.xlu1 %164 }
 0x265   : > { %v166_v29 = vsel %vm162_vm8, %v165_v27, %v156_v24 }
 0x266   : > { %v173_v30 = vmul.f32 %v169_v28, %v166_v29 }
 0x268   : > { %174 = vadd.xlane.f32.xlu0 %v173_v30 }
 0x2f1   : > { %v175_v32 = vpop.xlane.xlu0 %174 }
 0x2f2   : > { %v176_v34 = vsel %vm172_vm9, %v175_v32, %v166_v29 }
 0x2f3   : > { %v183_v35 = vmul.f32 %v179_v33, %v176_v34 }
 0x2f5   : > { %184 = vadd.xlane.f32.xlu1 %v183_v35 }
 0x37e   : > { %v185_v37 = vpop.xlane.xlu1 %184 }
 0x37f   : > { %v186_v39 = vsel %vm182_vm10, %v185_v37, %v176_v34 }
 0x380   : > { %v193_v40 = vmul.f32 %v189_v38, %v186_v39 }
 0x382   : > { %194 = vadd.xlane.f32.xlu0 %v193_v40 }
 0x40b   : > { %v195_v42 = vpop.xlane.xlu0 %194 }
 0x40c   : > { %v196_v44 = vsel %vm192_vm11, %v195_v42, %v186_v39 }
 0x40d   : > { %v202_v45 = vmul.f32 %v198_v43, %v196_v44 }
 0x40f   : > { %203 = vadd.xlane.f32.xlu1 %v202_v45 }
 0x498   : > { %v204_v46 = vpop.xlane.xlu1 %203 }
 0x499   : > { %v205_v47 = vsel %vm201_vm12, %v204_v46, %v196_v44 }
 0x49a   : > { %v207_v48 = vmul.f32 %v350_v8, %v205_v47 }
 0x49c   : > { %v209_v49 = vsel %vm208_vm13, %v205_v47, %v207_v48 }
 0x49d   : > { %249 = vst [vmem:[%s219_s24] sm:$0xff] %v209_v49 }
 0x49e PF: > { %s7_s8 = sadd.s32 1, %s373_s8   ;;  %s446_s6 = smov %s369_s7 }
 0x49f   : > { %p4_p5 = scmp.ge.s32.totalorder %s7_s8, 6   ;;  %s447_s7 = smov %s449_s10 }
 0x4a1   :  { %6 = sbr.rel (!%p4_p5) target bundleno = 2 (0x2), region = 124 }

// kernel: group_elements_forward.6
= control target key start
LH: loop header
LB: loop body
LE: loop exit
PB: predicated region body
PF: predicated region fallthrough
CT: control target
= control target key end

     0   :  { %v20_v0 = vlaneseq  ;;  %vm84_vm0 = vcmask 64512   ;;  %vm149_vm1 = vcmask 1041409   ;;  %vm151_vm2 = vcmask 1042434   ;;  %s223_s0 = inlined_call_operand.vmem [shape: f32[8,8], index: 0, kind: input, shape index: {}]   ;;  %s224_s1 = inlined_call_operand.vmem [shape: f32[8,8,8], index: 1, kind: input, shape index: {}]   ;;  %s225_s2 = inlined_call_operand.vmem [shape: f32[8,8], index: 2, kind: output, shape index: {}]  }
   0x1   :  { %v11_v2 = vld [vmem:[%s223_s0] sm:$0xff]  ;;  %v14_v19 = vld [vmem:[%s224_s1 + $0x10] sm:$0xff]  ;;  %v15_v25 = vld [vmem:[%s224_s1 + $0x18] sm:$0xff]  ;;  %vm153_vm3 = vcmask 1043459   ;;  %vm155_vm4 = vcmask 1044484   ;;  %vm157_vm5 = vcmask 1045509  }
   0x2   :  { %v21_v1 = vshrl.u32 %v20_v0, 7  ;;  %v12_v20 = vld [vmem:[%s224_s1] sm:$0xff]  ;;  %v13_v26 = vld [vmem:[%s224_s1 + $0x8] sm:$0xff]  ;;  %v19_v53 = vld [vmem:[%s224_s1 + $0x38] sm:$0xff]  ;;  %vm159_vm6 = vcmask 1046534   ;;  %vm161_vm7 = vcmask 1047559  }
   0x3   :  { %v17_v37 = vld [vmem:[%s224_s1 + $0x28] sm:$0xff]  ;;  %v16_v38 = vld [vmem:[%s224_s1 + $0x20] sm:$0xff]  ;;  %v18_v54 = vld [vmem:[%s224_s1 + $0x30] sm:$0xff] }
   0x4   :  { %v36_v3 = vsub.s32 2, %v21_v1  ;;  %v22_v4 = vsub.s32 0, %v21_v1  ;;  %v43_v5 = vsub.s32 3, %v21_v1  ;;  %v29_v6 = vsub.s32 1, %v21_v1 }
   0x5   :  { %v57_v11 = vsub.s32 5, %v21_v1  ;;  %v50_v12 = vsub.s32 4, %v21_v1  ;;  %v71_v15 = vsub.s32 7, %v21_v1  ;;  %v64_v16 = vsub.s32 6, %v21_v1 }
   0x6   :  { %v37_v7 = vrot.slane %v11_v2, %v36_v3  ;;  %v23_v8 = vrot.slane %v11_v2, %v22_v4  ;;  %v44_v9 = vrot.slane %v11_v2, %v43_v5  ;;  %v30_v10 = vrot.slane %v11_v2, %v29_v6 }
   0x7   :  { %v58_v13 = vrot.slane %v11_v2, %v57_v11  ;;  %v51_v14 = vrot.slane %v11_v2, %v50_v12  ;;  %v72_v17 = vrot.slane %v11_v2, %v71_v15  ;;  %v65_v18 = vrot.slane %v11_v2, %v64_v16 }
   0x8   :  { %39 = vbcast.lane.b32.xlu1 %v37_v7, 256  ;;  %25 = vbcast.lane.b32.xlu0 %v23_v8, 256 }
   0xc   :  { %46 = vbcast.lane.b32.xlu1 %v44_v9, 256  ;;  %32 = vbcast.lane.b32.xlu0 %v30_v10, 256 }
  0x10   :  { %60 = vbcast.lane.b32.xlu1 %v58_v13, 256  ;;  %53 = vbcast.lane.b32.xlu0 %v51_v14, 256 }
  0x14   :  { %74 = vbcast.lane.b32.xlu1 %v72_v17, 256  ;;  %67 = vbcast.lane.b32.xlu0 %v65_v18, 256 }
  0x7a   :  { %v40_v21 = vpop.permute.xlu1 %39  ;;  %v26_v22 = vpop.permute.xlu0 %25 }
  0x7b   :  { %v78_v23 = vmul.f32 %v40_v21, %v14_v19  ;;  %v76_v24 = vmul.f32 %v26_v22, %v12_v20 }
  0x7d   :  { %v99_v27 = vsel %vm84_vm0, %v78_v23, 0.0  ;;  %v85_v28 = vsel %vm84_vm0, %v76_v24, 0.0 }
  0x7e   :  { %v100_v29 = vrot.slane %v99_v27, 4  ;;  %v86_v30 = vrot.slane %v85_v28, 4  ;;  %v47_v31 = vpop.permute.xlu1 %46  ;;  %v33_v32 = vpop.permute.xlu0 %32 }
  0x7f   :  { %v79_v33 = vmul.f32 %v47_v31, %v15_v25  ;;  %v77_v34 = vmul.f32 %v33_v32, %v13_v26 }
  0x80   :  { %v101_v35 = vadd.f32 %v100_v29, %v99_v27  ;;  %v87_v36 = vadd.f32 %v86_v30, %v85_v28 }
  0x81   :  { %v106_v39 = vsel %vm84_vm0, %v79_v33, 0.0  ;;  %v92_v40 = vsel %vm84_vm0, %v77_v34, 0.0 }
  0x82   :  { %v102_v41 = vrot.slane %v101_v35, 2  ;;  %v88_v42 = vrot.slane %v87_v36, 2  ;;  %v107_v43 = vrot.slane %v106_v39, 4  ;;  %v93_v44 = vrot.slane %v92_v40, 4  ;;  %v61_v45 = vpop.permute.xlu1 %60  ;;  %v54_v46 = vpop.permute.xlu0 %53 }
  0x83   :  { %v81_v47 = vmul.f32 %v61_v45, %v17_v37  ;;  %v80_v48 = vmul.f32 %v54_v46, %v16_v38 }
  0x84   :  { %v103_v49 = vadd.f32 %v102_v41, %v101_v35  ;;  %v89_v50 = vadd.f32 %v88_v42, %v87_v36  ;;  %v108_v51 = vadd.f32 %v107_v43, %v106_v39  ;;  %v94_v52 = vadd.f32 %v93_v44, %v92_v40 }
  0x85   :  { %v120_v55 = vsel %vm84_vm0, %v81_v47, 0.0  ;;  %v113_v56 = vsel %vm84_vm0, %v80_v48, 0.0 }
  0x86   :  { %v109_v57 = vrot.slane %v108_v51, 2  ;;  %v95_v58 = vrot.slane %v94_v52, 2  ;;  %v75_v59 = vpop.permute.xlu1 %74  ;;  %v68_v60 = vpop.permute.xlu0 %67  ;;  %v121_v61 = vrot.slane %v120_v55, 4  ;;  %v114_v62 = vrot.slane %v113_v56, 4 }
  0x87   :  { %v83_v63 = vmul.f32 %v75_v59, %v19_v53  ;;  %v82_v0 = vmul.f32 %v68_v60, %v18_v54  ;;  %v104_v1 = vrot.slane %v103_v49, 1  ;;  %v90_v2 = vrot.slane %v89_v50, 1 }
  0x88   :  { %v110_v3 = vadd.f32 %v109_v57, %v108_v51  ;;  %v96_v4 = vadd.f32 %v95_v58, %v94_v52  ;;  %v122_v5 = vadd.f32 %v121_v61, %v120_v55  ;;  %v115_v6 = vadd.f32 %v114_v62, %v113_v56 }
  0x89   :  { %v134_v7 = vsel %vm84_vm0, %v83_v63, 0.0  ;;  %v127_v8 = vsel %vm84_vm0, %v82_v0, 0.0  ;;  %v91_v15 = vadd.f32 %v90_v2, %v89_v50  ;;  %v105_v19 = vadd.f32 %v104_v1, %v103_v49 }
  0x8a   :  { %v111_v9 = vrot.slane %v110_v3, 1  ;;  %v97_v10 = vrot.slane %v96_v4, 1  ;;  %v135_v11 = vrot.slane %v134_v7, 4  ;;  %v128_v12 = vrot.slane %v127_v8, 4 }
  0x8b   :  { %v123_v13 = vrot.slane %v122_v5, 2  ;;  %v116_v14 = vrot.slane %v115_v6, 2 }
  0x8c   :  { %v98_v16 = vadd.f32 %v97_v10, %v96_v4  ;;  %v136_v17 = vadd.f32 %v135_v11, %v134_v7  ;;  %v129_v18 = vadd.f32 %v128_v12, %v127_v8  ;;  %v112_v22 = vadd.f32 %v111_v9, %v110_v3 }
  0x8d   :  { %v124_v20 = vadd.f32 %v123_v13, %v122_v5  ;;  %v117_v21 = vadd.f32 %v116_v14, %v115_v6 }
  0x8e   :  { %v150_v23 = vsel %vm149_vm1, %v98_v16, %v91_v15  ;;  %v137_v24 = vrot.slane %v136_v17, 2  ;;  %v130_v25 = vrot.slane %v129_v18, 2 }
  0x8f   :  { %v152_v26 = vsel %vm151_vm2, %v105_v19, %v150_v23  ;;  %v125_v27 = vrot.slane %v124_v20, 1  ;;  %v118_v28 = vrot.slane %v117_v21, 1 }
  0x90   :  { %v154_v29 = vsel %vm153_vm3, %v112_v22, %v152_v26  ;;  %v138_v30 = vadd.f32 %v137_v24, %v136_v17  ;;  %v131_v31 = vadd.f32 %v130_v25, %v129_v18 }
  0x91   :  { %v126_v32 = vadd.f32 %v125_v27, %v124_v20  ;;  %v119_v33 = vadd.f32 %v118_v28, %v117_v21 }
  0x92   :  { %v139_v34 = vrot.slane %v138_v30, 1  ;;  %v132_v35 = vrot.slane %v131_v31, 1 }
  0x93   :  { %v156_v36 = vsel %vm155_vm4, %v119_v33, %v154_v29 }
  0x94   :  { %v140_v37 = vadd.f32 %v139_v34, %v138_v30  ;;  %v133_v38 = vadd.f32 %v132_v35, %v131_v31  ;;  %v158_v39 = vsel %vm157_vm5, %v126_v32, %v156_v36 }
  0x96   :  { %v160_v40 = vsel %vm159_vm6, %v133_v38, %v158_v39 }
  0x97   :  { %v162_v41 = vsel %vm161_vm7, %v140_v37, %v160_v40 }
  0x98   :  { %164 = vst.msk [vmem:[%s225_s2] sm:$0xff] %vm84_vm0, %v162_v41 }

</bundles_post_ra>
